<compile_context>
chip_gen: v6e
topology: v6e:2x2x1
jax: 0.10.0
libtpu: 0.0.40
codegen_flags: <defaults>
</compile_context>

<pallas_src>
from functools import partial

import jax
import jax.numpy as jnp
import numpy as np
from jax.experimental import pallas as pl
from jax.experimental.pallas import tpu as pltpu

H0 = 8            # spatial size of the (synthetic) input: 8x8, 3 max-pools -> 1x1
PIX = H0 * H0     # rows per image in the flattened activation slab
CP = 128          # lane-padded channel width of the internal activation slab


# ----------------------------------------------------------------------------
# The fused kernel: conv1 -> pool -> conv2 -> pool -> conv3 -> pool -> conv4
#                   -> flatten -> Linear, all resident in VMEM, with later-layer
#                   weight DMA overlapped with earlier-layer compute.
# ----------------------------------------------------------------------------
def vgg_fused_kernel(x_ref, sel_ref, w1_ref, s1_ref,
                     w2_hbm, s2_hbm, w3_hbm, s3_hbm,
                     w4_hbm, s4_hbm, wc_hbm, bc_hbm,
                     o_ref,
                     w2_v, s2_v, w3_v, s3_v, w4_v, s4_v, wc_v, bc_v, sems):
    m = x_ref.shape[0]                              # N * 64 (batch folded into M)

    # --- prefetch all later-layer weights; the DMAs stream behind conv1/conv2
    cps = [pltpu.make_async_copy(src, dst, sems.at[i])
           for i, (src, dst) in enumerate((
               (w2_hbm, w2_v), (s2_hbm, s2_v),
               (w3_hbm, w3_v), (s3_hbm, s3_v),
               (w4_hbm, w4_v), (s4_hbm, s4_v),
               (wc_hbm, wc_v), (bc_hbm, bc_v)))]
    for cp in cps:
        cp.start()

    # per-row (h, w) coordinates of the flattened NHWC slab (static shapes)
    row = jax.lax.broadcasted_iota(jnp.int32, (m, 1), 0)
    hh = (row >> 3) & (H0 - 1)                      # (row % 64) // 8
    ww = row & (H0 - 1)                             # row % 8

    def shift_rows(x, delta):
        # out[i] = x[(i + delta) mod m]; wrapped rows are masked by the caller
        # or land on don't-care rows never read as valid downstream.
        if delta % m == 0:
            return x
        return pltpu.roll(x, shift=(-delta) % m, axis=0)

    def conv3x3_bn_relu(act, wmat, shift, log2_stride):
        # act: (m, CP) fp32.  Live pixels sit on the 2**log2_stride row grid.
        stride = 1 << log2_stride
        hs = H0 >> log2_stride                      # logical spatial extent
        h = hh >> log2_stride
        w = ww >> log2_stride
        blocks = []
        for dh in (-1, 0, 1):                       # 3x3 taps, SAME padding
            for dw in (-1, 0, 1):
                tap = shift_rows(act, stride * (H0 * dh + dw))
                ok = ((h + dh >= 0) & (h + dh < hs) &
                      (w + dw >= 0) & (w + dw < hs)).astype(jnp.float32)
                # mask in fp32, cast per-tap to bf16 (halves slab traffic)
                blocks.append((tap * ok).astype(jnp.bfloat16))
        slab = jnp.concatenate(blocks, axis=-1)     # (m, 9*CP) bf16
        acc = jnp.dot(slab, wmat, preferred_element_type=jnp.float32)
        return jnp.maximum(acc + shift, 0.0)        # BN shift + ReLU (fp32)

    def maxpool2x2(act, log2_stride):
        # separable 2x2/stride-2 max pool: horizontal pair, then vertical pair.
        # Result lands on the window's top-left anchor row (the 2*stride grid).
        stride = 1 << log2_stride
        m1 = jnp.maximum(act, shift_rows(act, stride))          # (h, w)+(h, w+1)
        return jnp.maximum(m1, shift_rows(m1, stride * H0))     # + row h+1 pair

    a = conv3x3_bn_relu(x_ref[...], w1_ref[...], s1_ref[...], 0)   # 32ch @ 8x8
    a = maxpool2x2(a, 0)                                           #   -> 4x4 grid

    cps[0].wait(); cps[1].wait()
    a = conv3x3_bn_relu(a, w2_v[...], s2_v[...], 1)                # 64ch @ 4x4
    a = maxpool2x2(a, 1)                                           #   -> 2x2 grid

    cps[2].wait(); cps[3].wait()
    a = conv3x3_bn_relu(a, w3_v[...], s3_v[...], 2)                # 128ch @ 2x2
    a = maxpool2x2(a, 2)                                           #   -> 1x1 grid

    # compact the N live rows (row n*64) into (N, 128) with a bf16 0/1 selection
    # matmul (exact selection; values are bf16 anyway for conv4's MXU pass)
    a16 = a.astype(jnp.bfloat16)
    feats = jnp.dot(sel_ref[...], a16,
                    preferred_element_type=jnp.float32).astype(jnp.bfloat16)

    # last conv (3x3, 128->512) on a 1x1 input: only the centre tap is live
    cps[4].wait(); cps[5].wait()
    x4 = jnp.maximum(
        jnp.dot(feats, w4_v[...], preferred_element_type=jnp.float32)
        + s4_v[...], 0.0)

    # classifier: Linear(512, num_class), zero-padded to 128 lane-dense outputs
    cps[6].wait(); cps[7].wait()
    o_ref[...] = (jnp.dot(x4.astype(jnp.bfloat16), wc_v[...],
                          preferred_element_type=jnp.float32)
                  + bc_v[...]).astype(o_ref.dtype)


# ----------------------------------------------------------------------------
# Parameter packing (one-time, outside the kernel):
#   * fold BN scale into the conv weights
#   * reorder to im2col layout (9 taps x CP in-lanes, CP out-lanes, zero padded)
#   * cast MXU operands to bf16
#   * zero-pad the classifier to 128 lane-dense outputs
# ----------------------------------------------------------------------------
def pack_params(feat_params, cls_params):
    convs = [p for kind, p in feat_params if kind == 'C']
    assert len(convs) == 4, "expected config [32,'M',64,'M',128,'M',512]"
    packed = []
    for li, (w, scale, shift) in enumerate(convs):
        cin, cout = int(w.shape[2]), int(w.shape[3])
        wf = w * scale[None, None, None, :]            # fold BN scale into weights
        sh = shift.astype(jnp.float32)
        if li < 3:
            wp = jnp.pad(wf.reshape(9, cin, cout),
                         ((0, 0), (0, CP - cin), (0, CP - cout)))
            packed.append((wp.reshape(9 * CP, CP).astype(jnp.bfloat16),
                           jnp.pad(sh, (0, CP - cout)).reshape(1, CP)))
        else:                                          # 1x1 input: centre tap only
            packed.append((wf[1, 1].astype(jnp.bfloat16),      # (128, 512)
                           sh.reshape(1, cout)))
    lw, lb = cls_params
    nc = int(lw.shape[0])
    assert nc <= CP, "classifier padding assumes num_class <= 128"
    wc = jnp.pad(lw.T, ((0, 0), (0, CP - nc))).astype(jnp.bfloat16)   # (512, 128)
    bc = jnp.pad(lb, (0, CP - nc)).astype(jnp.float32).reshape(1, CP)
    return packed, (wc, bc)


@partial(jax.jit, static_argnames=("num_class",))
def vgg_forward_fused(x_nchw, packed_convs, packed_cls, *, num_class):
    n, cin, h, w = x_nchw.shape
    assert (h, w) == (H0, H0) and cin <= CP
    m = n * PIX
    # NCHW -> NHWC -> (N*64, CP) lane-padded slab (rows = (n,h,w), lanes = chan)
    x2d = jnp.transpose(x_nchw, (0, 2, 3, 1)).reshape(m, cin)
    x_slab = jnp.pad(x2d, ((0, 0), (0, CP - cin))).astype(jnp.float32)
    # bf16 0/1 selector that picks row n*64 (the 1x1x128 feature of image n)
    sel = (jnp.arange(m)[None, :] == (jnp.arange(n) * PIX)[:, None]
           ).astype(jnp.bfloat16)
    (w1, s1), (w2, s2), (w3, s3), (w4, s4) = packed_convs
    wc, bc = packed_cls

    vm = pltpu.MemorySpace.VMEM
    out_pad = pl.pallas_call(
        vgg_fused_kernel,
        out_shape=jax.ShapeDtypeStruct((n, CP), jnp.float32),
        in_specs=(
            [pl.BlockSpec(memory_space=vm)] * 4        # x, sel, w1, s1 -> VMEM
            + [pl.BlockSpec(memory_space=pl.ANY)] * 8  # later weights stay in HBM
        ),
        out_specs=pl.BlockSpec(memory_space=vm),
        scratch_shapes=[
            pltpu.VMEM((9 * CP, CP), jnp.bfloat16),    # w2
            pltpu.VMEM((1, CP), jnp.float32),          # s2
            pltpu.VMEM((9 * CP, CP), jnp.bfloat16),    # w3
            pltpu.VMEM((1, CP), jnp.float32),          # s3
            pltpu.VMEM((CP, 512), jnp.bfloat16),       # w4
            pltpu.VMEM((1, 512), jnp.float32),         # s4
            pltpu.VMEM((512, CP), jnp.bfloat16),       # wc (lane-padded)
            pltpu.VMEM((1, CP), jnp.float32),          # bc (lane-padded)
            pltpu.SemaphoreType.DMA((8,)),
        ],
    )(x_slab, sel, w1, s1, w2, s2, w3, s3, w4, s4, wc, bc)
    return out_pad[:, :num_class]


# ----------------------------------------------------------------------------
# Deterministic synthetic parameters + pure-JAX reference (fp32, unfused)
# ----------------------------------------------------------------------------
def init_params(key, cfg, in_ch, num_class):
    feat_params = []
    c = in_ch
    eps = 1e-5
    for v in cfg:
        if v == 'M':
            feat_params.append(('M', None))
            continue
        key, k1, k2, k3, k4, k5, k6 = jax.random.split(key, 7)
        w = jax.random.normal(k1, (3, 3, c, v), jnp.float32) / np.sqrt(9.0 * c)
        conv_b = 0.05 * jax.random.normal(k2, (v,), jnp.float32)
        gamma = 1.0 + 0.1 * jax.random.normal(k3, (v,), jnp.float32)
        beta = 0.1 * jax.random.normal(k4, (v,), jnp.float32)
        mean = 0.1 * jax.random.normal(k5, (v,), jnp.float32)
        var = 1.0 + 0.1 * jnp.abs(jax.random.normal(k6, (v,), jnp.float32))
        scale = gamma / jnp.sqrt(var + eps)          # BN (inference) folded
        shift = (conv_b - mean) * scale + beta
        feat_params.append(('C', (w, scale, shift)))
        c = v
    key, k1, k2 = jax.random.split(key, 3)
    lw = jax.random.normal(k1, (num_class, 512), jnp.float32) / np.sqrt(512.0)
    lb = 0.05 * jax.random.normal(k2, (num_class,), jnp.float32)
    return feat_params, (lw, lb)


def ref_forward(x_nchw, feat_params, cls_params):
    x = jnp.transpose(x_nchw, (0, 2, 3, 1))
    for kind, p in feat_params:
        if kind == 'M':
            x = jax.lax.reduce_window(x, -jnp.inf, jax.lax.max,
                                      (1, 2, 2, 1), (1, 2, 2, 1), 'VALID')
        else:
            w, scale, shift = p
            y = jax.lax.conv_general_dilated(
                x, w, (1, 1), 'SAME',
                dimension_numbers=('NHWC', 'HWIO', 'NHWC'))
            x = jnp.maximum(y * scale + shift, 0.0)
    n = x.shape[0]
    x = jnp.transpose(x, (0, 3, 1, 2)).reshape(n, -1)   # PyTorch .view(N, -1)
    lw, lb = cls_params
    return x @ lw.T + lb


if __name__ == "__main__":
    key = jax.random.PRNGKey(0)
    k_x, k_p = jax.random.split(key)

    # Small VGG config whose flattened feature size is exactly 512 (as the
    # classifier Linear(512, num_class) requires): 8x8 input, 3 max-pools.
    cfg = [32, 'M', 64, 'M', 128, 'M', 512]
    num_class = 100

    x = jax.random.normal(k_x, (2, 3, 8, 8), jnp.float32)     # NCHW like PyTorch
    feat_params, cls_params = init_params(k_p, cfg, in_ch=3, num_class=num_class)
    packed_convs, packed_cls = pack_params(feat_params, cls_params)

    out = jax.block_until_ready(
        vgg_forward_fused(x, packed_convs, packed_cls, num_class=num_class))
    assert out.shape == (2, num_class), out.shape

    ref = jax.block_until_ready(ref_forward(x, feat_params, cls_params))
    err = float(np.max(np.abs(np.asarray(out) - np.asarray(ref))))
    # bf16 MXU operands (fp32 accumulation) -> tighter than before, still bf16-safe
    if not np.allclose(np.asarray(out), np.asarray(ref), atol=3e-2, rtol=3e-2):
        raise SystemExit("mismatch: max abs diff %e" % err)
    print("KERNEL_OK")
</pallas_src>

<mosaic_0001>
module attributes {stable_mosaic.version = 11 : i64} {
  func.func @vgg_fused_kernel(%arg0: memref<128x128xf32, #tpu.memory_space<vmem>>, %arg1: memref<2x128xbf16, #tpu.memory_space<vmem>>, %arg2: memref<1152x128xbf16, #tpu.memory_space<vmem>>, %arg3: memref<1x128xf32, #tpu.memory_space<vmem>>, %arg4: memref<1152x128xbf16, #tpu.memory_space<any>>, %arg5: memref<1x128xf32, #tpu.memory_space<any>>, %arg6: memref<1152x128xbf16, #tpu.memory_space<any>>, %arg7: memref<1x128xf32, #tpu.memory_space<any>>, %arg8: memref<128x512xbf16, #tpu.memory_space<any>>, %arg9: memref<1x512xf32, #tpu.memory_space<any>>, %arg10: memref<512x128xbf16, #tpu.memory_space<any>>, %arg11: memref<1x128xf32, #tpu.memory_space<any>>, %arg12: memref<2x128xf32, #tpu.memory_space<vmem>>, %arg13: memref<1152x128xbf16, #tpu.memory_space<vmem>>, %arg14: memref<1x128xf32, #tpu.memory_space<vmem>>, %arg15: memref<1152x128xbf16, #tpu.memory_space<vmem>>, %arg16: memref<1x128xf32, #tpu.memory_space<vmem>>, %arg17: memref<128x512xbf16, #tpu.memory_space<vmem>>, %arg18: memref<1x512xf32, #tpu.memory_space<vmem>>, %arg19: memref<512x128xbf16, #tpu.memory_space<vmem>>, %arg20: memref<1x128xf32, #tpu.memory_space<vmem>>, %arg21: memref<8x!tpu.dma_semaphore, #tpu.memory_space<semaphore_mem>>) attributes {dimension_semantics = [], scalar_prefetch = 0 : i64, scratch_operands = 9 : i64, tpu.core_type = #tpu.core_type<tc>} {
    %c0_i32 = arith.constant 0 : i32
    %0 = tpu.memref_slice %arg21[%c0_i32] : memref<8x!tpu.dma_semaphore, #tpu.memory_space<semaphore_mem>> -> memref<1x!tpu.dma_semaphore, #tpu.memory_space<semaphore_mem>>
    %1 = tpu.memref_squeeze %0 : memref<1x!tpu.dma_semaphore, #tpu.memory_space<semaphore_mem>> -> memref<!tpu.dma_semaphore, #tpu.memory_space<semaphore_mem>>
    tpu.enqueue_dma source(%arg4 : memref<1152x128xbf16, #tpu.memory_space<any>>) target(%arg13 : memref<1152x128xbf16, #tpu.memory_space<vmem>>) target_semaphore(%1 : memref<!tpu.dma_semaphore, #tpu.memory_space<semaphore_mem>>)
    %c1_i32 = arith.constant 1 : i32
    %2 = tpu.memref_slice %arg21[%c1_i32] : memref<8x!tpu.dma_semaphore, #tpu.memory_space<semaphore_mem>> -> memref<1x!tpu.dma_semaphore, #tpu.memory_space<semaphore_mem>>
    %3 = tpu.memref_squeeze %2 : memref<1x!tpu.dma_semaphore, #tpu.memory_space<semaphore_mem>> -> memref<!tpu.dma_semaphore, #tpu.memory_space<semaphore_mem>>
    tpu.enqueue_dma source(%arg5 : memref<1x128xf32, #tpu.memory_space<any>>) target(%arg14 : memref<1x128xf32, #tpu.memory_space<vmem>>) target_semaphore(%3 : memref<!tpu.dma_semaphore, #tpu.memory_space<semaphore_mem>>)
    %c2_i32 = arith.constant 2 : i32
    %4 = tpu.memref_slice %arg21[%c2_i32] : memref<8x!tpu.dma_semaphore, #tpu.memory_space<semaphore_mem>> -> memref<1x!tpu.dma_semaphore, #tpu.memory_space<semaphore_mem>>
    %5 = tpu.memref_squeeze %4 : memref<1x!tpu.dma_semaphore, #tpu.memory_space<semaphore_mem>> -> memref<!tpu.dma_semaphore, #tpu.memory_space<semaphore_mem>>
    tpu.enqueue_dma source(%arg6 : memref<1152x128xbf16, #tpu.memory_space<any>>) target(%arg15 : memref<1152x128xbf16, #tpu.memory_space<vmem>>) target_semaphore(%5 : memref<!tpu.dma_semaphore, #tpu.memory_space<semaphore_mem>>)
    %c3_i32 = arith.constant 3 : i32
    %6 = tpu.memref_slice %arg21[%c3_i32] : memref<8x!tpu.dma_semaphore, #tpu.memory_space<semaphore_mem>> -> memref<1x!tpu.dma_semaphore, #tpu.memory_space<semaphore_mem>>
    %7 = tpu.memref_squeeze %6 : memref<1x!tpu.dma_semaphore, #tpu.memory_space<semaphore_mem>> -> memref<!tpu.dma_semaphore, #tpu.memory_space<semaphore_mem>>
    tpu.enqueue_dma source(%arg7 : memref<1x128xf32, #tpu.memory_space<any>>) target(%arg16 : memref<1x128xf32, #tpu.memory_space<vmem>>) target_semaphore(%7 : memref<!tpu.dma_semaphore, #tpu.memory_space<semaphore_mem>>)
    %c4_i32 = arith.constant 4 : i32
    %8 = tpu.memref_slice %arg21[%c4_i32] : memref<8x!tpu.dma_semaphore, #tpu.memory_space<semaphore_mem>> -> memref<1x!tpu.dma_semaphore, #tpu.memory_space<semaphore_mem>>
    %9 = tpu.memref_squeeze %8 : memref<1x!tpu.dma_semaphore, #tpu.memory_space<semaphore_mem>> -> memref<!tpu.dma_semaphore, #tpu.memory_space<semaphore_mem>>
    tpu.enqueue_dma source(%arg8 : memref<128x512xbf16, #tpu.memory_space<any>>) target(%arg17 : memref<128x512xbf16, #tpu.memory_space<vmem>>) target_semaphore(%9 : memref<!tpu.dma_semaphore, #tpu.memory_space<semaphore_mem>>)
    %c5_i32 = arith.constant 5 : i32
    %10 = tpu.memref_slice %arg21[%c5_i32] : memref<8x!tpu.dma_semaphore, #tpu.memory_space<semaphore_mem>> -> memref<1x!tpu.dma_semaphore, #tpu.memory_space<semaphore_mem>>
    %11 = tpu.memref_squeeze %10 : memref<1x!tpu.dma_semaphore, #tpu.memory_space<semaphore_mem>> -> memref<!tpu.dma_semaphore, #tpu.memory_space<semaphore_mem>>
    tpu.enqueue_dma source(%arg9 : memref<1x512xf32, #tpu.memory_space<any>>) target(%arg18 : memref<1x512xf32, #tpu.memory_space<vmem>>) target_semaphore(%11 : memref<!tpu.dma_semaphore, #tpu.memory_space<semaphore_mem>>)
    %c6_i32 = arith.constant 6 : i32
    %12 = tpu.memref_slice %arg21[%c6_i32] : memref<8x!tpu.dma_semaphore, #tpu.memory_space<semaphore_mem>> -> memref<1x!tpu.dma_semaphore, #tpu.memory_space<semaphore_mem>>
    %13 = tpu.memref_squeeze %12 : memref<1x!tpu.dma_semaphore, #tpu.memory_space<semaphore_mem>> -> memref<!tpu.dma_semaphore, #tpu.memory_space<semaphore_mem>>
    tpu.enqueue_dma source(%arg10 : memref<512x128xbf16, #tpu.memory_space<any>>) target(%arg19 : memref<512x128xbf16, #tpu.memory_space<vmem>>) target_semaphore(%13 : memref<!tpu.dma_semaphore, #tpu.memory_space<semaphore_mem>>)
    %c7_i32 = arith.constant 7 : i32
    %14 = tpu.memref_slice %arg21[%c7_i32] : memref<8x!tpu.dma_semaphore, #tpu.memory_space<semaphore_mem>> -> memref<1x!tpu.dma_semaphore, #tpu.memory_space<semaphore_mem>>
    %15 = tpu.memref_squeeze %14 : memref<1x!tpu.dma_semaphore, #tpu.memory_space<semaphore_mem>> -> memref<!tpu.dma_semaphore, #tpu.memory_space<semaphore_mem>>
    tpu.enqueue_dma source(%arg11 : memref<1x128xf32, #tpu.memory_space<any>>) target(%arg20 : memref<1x128xf32, #tpu.memory_space<vmem>>) target_semaphore(%15 : memref<!tpu.dma_semaphore, #tpu.memory_space<semaphore_mem>>)
    %16 = tpu.iota {dimensions = array<i32: 0>} : vector<128x1xi32>
    %c3_i32_0 = arith.constant 3 : i32
    %17 = vector.broadcast %c3_i32_0 : i32 to vector<128x1xi32>
    %18 = arith.shrsi %16, %17 : vector<128x1xi32>
    %c7_i32_1 = arith.constant 7 : i32
    %19 = vector.broadcast %c7_i32_1 : i32 to vector<128x1xi32>
    %20 = arith.andi %18, %19 : vector<128x1xi32>
    %c7_i32_2 = arith.constant 7 : i32
    %21 = vector.broadcast %c7_i32_2 : i32 to vector<128x1xi32>
    %22 = arith.andi %16, %21 : vector<128x1xi32>
    %c0 = arith.constant 0 : index
    %c0_3 = arith.constant 0 : index
    %23 = vector.load %arg0[%c0, %c0_3] : memref<128x128xf32, #tpu.memory_space<vmem>>, vector<128x128xf32>
    %c0_4 = arith.constant 0 : index
    %c0_5 = arith.constant 0 : index
    %24 = vector.load %arg2[%c0_4, %c0_5] : memref<1152x128xbf16, #tpu.memory_space<vmem>>, vector<1152x128xbf16>
    %c0_6 = arith.constant 0 : index
    %c0_7 = arith.constant 0 : index
    %25 = vector.load %arg3[%c0_6, %c0_7] : memref<1x128xf32, #tpu.memory_space<vmem>>, vector<1x128xf32>
    %c0_i32_8 = arith.constant 0 : i32
    %26 = vector.broadcast %c0_i32_8 : i32 to vector<128x1xi32>
    %27 = arith.shrsi %20, %26 : vector<128x1xi32>
    %c0_i32_9 = arith.constant 0 : i32
    %28 = vector.broadcast %c0_i32_9 : i32 to vector<128x1xi32>
    %29 = arith.shrsi %22, %28 : vector<128x1xi32>
    %c9_i32 = arith.constant 9 : i32
    %30 = tpu.dynamic_rotate %23 by %c9_i32 dim 0 : vector<128x128xf32>, i32 -> vector<128x128xf32>
    %c-1_i32 = arith.constant -1 : i32
    %31 = vector.broadcast %c-1_i32 : i32 to vector<128x1xi32>
    %32 = arith.addi %27, %31 : vector<128x1xi32>
    %c0_i32_10 = arith.constant 0 : i32
    %33 = vector.broadcast %c0_i32_10 : i32 to vector<128x1xi32>
    %34 = arith.cmpi sge, %32, %33 : vector<128x1xi32>
    %c-1_i32_11 = arith.constant -1 : i32
    %35 = vector.broadcast %c-1_i32_11 : i32 to vector<128x1xi32>
    %36 = arith.addi %27, %35 : vector<128x1xi32>
    %c8_i32 = arith.constant 8 : i32
    %37 = vector.broadcast %c8_i32 : i32 to vector<128x1xi32>
    %38 = arith.cmpi slt, %36, %37 : vector<128x1xi32>
    %39 = arith.andi %34, %38 : vector<128x1xi1>
    %c-1_i32_12 = arith.constant -1 : i32
    %40 = vector.broadcast %c-1_i32_12 : i32 to vector<128x1xi32>
    %41 = arith.addi %29, %40 : vector<128x1xi32>
    %c0_i32_13 = arith.constant 0 : i32
    %42 = vector.broadcast %c0_i32_13 : i32 to vector<128x1xi32>
    %43 = arith.cmpi sge, %41, %42 : vector<128x1xi32>
    %44 = arith.andi %39, %43 : vector<128x1xi1>
    %c-1_i32_14 = arith.constant -1 : i32
    %45 = vector.broadcast %c-1_i32_14 : i32 to vector<128x1xi32>
    %46 = arith.addi %29, %45 : vector<128x1xi32>
    %c8_i32_15 = arith.constant 8 : i32
    %47 = vector.broadcast %c8_i32_15 : i32 to vector<128x1xi32>
    %48 = arith.cmpi slt, %46, %47 : vector<128x1xi32>
    %49 = arith.andi %44, %48 : vector<128x1xi1>
    %50 = arith.extui %49 : vector<128x1xi1> to vector<128x1xi32>
    %51 = arith.sitofp %50 : vector<128x1xi32> to vector<128x1xf32>
    %52 = vector.broadcast %51 : vector<128x1xf32> to vector<128x128xf32>
    %53 = arith.mulf %30, %52 : vector<128x128xf32>
    %54 = arith.truncf %53 : vector<128x128xf32> to vector<128x128xbf16>
    %c8_i32_16 = arith.constant 8 : i32
    %55 = tpu.dynamic_rotate %23 by %c8_i32_16 dim 0 : vector<128x128xf32>, i32 -> vector<128x128xf32>
    %c-1_i32_17 = arith.constant -1 : i32
    %56 = vector.broadcast %c-1_i32_17 : i32 to vector<128x1xi32>
    %57 = arith.addi %27, %56 : vector<128x1xi32>
    %c0_i32_18 = arith.constant 0 : i32
    %58 = vector.broadcast %c0_i32_18 : i32 to vector<128x1xi32>
    %59 = arith.cmpi sge, %57, %58 : vector<128x1xi32>
    %c-1_i32_19 = arith.constant -1 : i32
    %60 = vector.broadcast %c-1_i32_19 : i32 to vector<128x1xi32>
    %61 = arith.addi %27, %60 : vector<128x1xi32>
    %c8_i32_20 = arith.constant 8 : i32
    %62 = vector.broadcast %c8_i32_20 : i32 to vector<128x1xi32>
    %63 = arith.cmpi slt, %61, %62 : vector<128x1xi32>
    %64 = arith.andi %59, %63 : vector<128x1xi1>
    %c0_i32_21 = arith.constant 0 : i32
    %65 = vector.broadcast %c0_i32_21 : i32 to vector<128x1xi32>
    %66 = arith.addi %29, %65 : vector<128x1xi32>
    %c0_i32_22 = arith.constant 0 : i32
    %67 = vector.broadcast %c0_i32_22 : i32 to vector<128x1xi32>
    %68 = arith.cmpi sge, %66, %67 : vector<128x1xi32>
    %69 = arith.andi %64, %68 : vector<128x1xi1>
    %c0_i32_23 = arith.constant 0 : i32
    %70 = vector.broadcast %c0_i32_23 : i32 to vector<128x1xi32>
    %71 = arith.addi %29, %70 : vector<128x1xi32>
    %c8_i32_24 = arith.constant 8 : i32
    %72 = vector.broadcast %c8_i32_24 : i32 to vector<128x1xi32>
    %73 = arith.cmpi slt, %71, %72 : vector<128x1xi32>
    %74 = arith.andi %69, %73 : vector<128x1xi1>
    %75 = arith.extui %74 : vector<128x1xi1> to vector<128x1xi32>
    %76 = arith.sitofp %75 : vector<128x1xi32> to vector<128x1xf32>
    %77 = vector.broadcast %76 : vector<128x1xf32> to vector<128x128xf32>
    %78 = arith.mulf %55, %77 : vector<128x128xf32>
    %79 = arith.truncf %78 : vector<128x128xf32> to vector<128x128xbf16>
    %c7_i32_25 = arith.constant 7 : i32
    %80 = tpu.dynamic_rotate %23 by %c7_i32_25 dim 0 : vector<128x128xf32>, i32 -> vector<128x128xf32>
    %c-1_i32_26 = arith.constant -1 : i32
    %81 = vector.broadcast %c-1_i32_26 : i32 to vector<128x1xi32>
    %82 = arith.addi %27, %81 : vector<128x1xi32>
    %c0_i32_27 = arith.constant 0 : i32
    %83 = vector.broadcast %c0_i32_27 : i32 to vector<128x1xi32>
    %84 = arith.cmpi sge, %82, %83 : vector<128x1xi32>
    %c-1_i32_28 = arith.constant -1 : i32
    %85 = vector.broadcast %c-1_i32_28 : i32 to vector<128x1xi32>
    %86 = arith.addi %27, %85 : vector<128x1xi32>
    %c8_i32_29 = arith.constant 8 : i32
    %87 = vector.broadcast %c8_i32_29 : i32 to vector<128x1xi32>
    %88 = arith.cmpi slt, %86, %87 : vector<128x1xi32>
    %89 = arith.andi %84, %88 : vector<128x1xi1>
    %c1_i32_30 = arith.constant 1 : i32
    %90 = vector.broadcast %c1_i32_30 : i32 to vector<128x1xi32>
    %91 = arith.addi %29, %90 : vector<128x1xi32>
    %c0_i32_31 = arith.constant 0 : i32
    %92 = vector.broadcast %c0_i32_31 : i32 to vector<128x1xi32>
    %93 = arith.cmpi sge, %91, %92 : vector<128x1xi32>
    %94 = arith.andi %89, %93 : vector<128x1xi1>
    %c1_i32_32 = arith.constant 1 : i32
    %95 = vector.broadcast %c1_i32_32 : i32 to vector<128x1xi32>
    %96 = arith.addi %29, %95 : vector<128x1xi32>
    %c8_i32_33 = arith.constant 8 : i32
    %97 = vector.broadcast %c8_i32_33 : i32 to vector<128x1xi32>
    %98 = arith.cmpi slt, %96, %97 : vector<128x1xi32>
    %99 = arith.andi %94, %98 : vector<128x1xi1>
    %100 = arith.extui %99 : vector<128x1xi1> to vector<128x1xi32>
    %101 = arith.sitofp %100 : vector<128x1xi32> to vector<128x1xf32>
    %102 = vector.broadcast %101 : vector<128x1xf32> to vector<128x128xf32>
    %103 = arith.mulf %80, %102 : vector<128x128xf32>
    %104 = arith.truncf %103 : vector<128x128xf32> to vector<128x128xbf16>
    %c1_i32_34 = arith.constant 1 : i32
    %105 = tpu.dynamic_rotate %23 by %c1_i32_34 dim 0 : vector<128x128xf32>, i32 -> vector<128x128xf32>
    %c0_i32_35 = arith.constant 0 : i32
    %106 = vector.broadcast %c0_i32_35 : i32 to vector<128x1xi32>
    %107 = arith.addi %27, %106 : vector<128x1xi32>
    %c0_i32_36 = arith.constant 0 : i32
    %108 = vector.broadcast %c0_i32_36 : i32 to vector<128x1xi32>
    %109 = arith.cmpi sge, %107, %108 : vector<128x1xi32>
    %c0_i32_37 = arith.constant 0 : i32
    %110 = vector.broadcast %c0_i32_37 : i32 to vector<128x1xi32>
    %111 = arith.addi %27, %110 : vector<128x1xi32>
    %c8_i32_38 = arith.constant 8 : i32
    %112 = vector.broadcast %c8_i32_38 : i32 to vector<128x1xi32>
    %113 = arith.cmpi slt, %111, %112 : vector<128x1xi32>
    %114 = arith.andi %109, %113 : vector<128x1xi1>
    %c-1_i32_39 = arith.constant -1 : i32
    %115 = vector.broadcast %c-1_i32_39 : i32 to vector<128x1xi32>
    %116 = arith.addi %29, %115 : vector<128x1xi32>
    %c0_i32_40 = arith.constant 0 : i32
    %117 = vector.broadcast %c0_i32_40 : i32 to vector<128x1xi32>
    %118 = arith.cmpi sge, %116, %117 : vector<128x1xi32>
    %119 = arith.andi %114, %118 : vector<128x1xi1>
    %c-1_i32_41 = arith.constant -1 : i32
    %120 = vector.broadcast %c-1_i32_41 : i32 to vector<128x1xi32>
    %121 = arith.addi %29, %120 : vector<128x1xi32>
    %c8_i32_42 = arith.constant 8 : i32
    %122 = vector.broadcast %c8_i32_42 : i32 to vector<128x1xi32>
    %123 = arith.cmpi slt, %121, %122 : vector<128x1xi32>
    %124 = arith.andi %119, %123 : vector<128x1xi1>
    %125 = arith.extui %124 : vector<128x1xi1> to vector<128x1xi32>
    %126 = arith.sitofp %125 : vector<128x1xi32> to vector<128x1xf32>
    %127 = vector.broadcast %126 : vector<128x1xf32> to vector<128x128xf32>
    %128 = arith.mulf %105, %127 : vector<128x128xf32>
    %129 = arith.truncf %128 : vector<128x128xf32> to vector<128x128xbf16>
    %c0_i32_43 = arith.constant 0 : i32
    %130 = vector.broadcast %c0_i32_43 : i32 to vector<128x1xi32>
    %131 = arith.addi %27, %130 : vector<128x1xi32>
    %c0_i32_44 = arith.constant 0 : i32
    %132 = vector.broadcast %c0_i32_44 : i32 to vector<128x1xi32>
    %133 = arith.cmpi sge, %131, %132 : vector<128x1xi32>
    %c0_i32_45 = arith.constant 0 : i32
    %134 = vector.broadcast %c0_i32_45 : i32 to vector<128x1xi32>
    %135 = arith.addi %27, %134 : vector<128x1xi32>
    %c8_i32_46 = arith.constant 8 : i32
    %136 = vector.broadcast %c8_i32_46 : i32 to vector<128x1xi32>
    %137 = arith.cmpi slt, %135, %136 : vector<128x1xi32>
    %138 = arith.andi %133, %137 : vector<128x1xi1>
    %c0_i32_47 = arith.constant 0 : i32
    %139 = vector.broadcast %c0_i32_47 : i32 to vector<128x1xi32>
    %140 = arith.addi %29, %139 : vector<128x1xi32>
    %c0_i32_48 = arith.constant 0 : i32
    %141 = vector.broadcast %c0_i32_48 : i32 to vector<128x1xi32>
    %142 = arith.cmpi sge, %140, %141 : vector<128x1xi32>
    %143 = arith.andi %138, %142 : vector<128x1xi1>
    %c0_i32_49 = arith.constant 0 : i32
    %144 = vector.broadcast %c0_i32_49 : i32 to vector<128x1xi32>
    %145 = arith.addi %29, %144 : vector<128x1xi32>
    %c8_i32_50 = arith.constant 8 : i32
    %146 = vector.broadcast %c8_i32_50 : i32 to vector<128x1xi32>
    %147 = arith.cmpi slt, %145, %146 : vector<128x1xi32>
    %148 = arith.andi %143, %147 : vector<128x1xi1>
    %149 = arith.extui %148 : vector<128x1xi1> to vector<128x1xi32>
    %150 = arith.sitofp %149 : vector<128x1xi32> to vector<128x1xf32>
    %151 = vector.broadcast %150 : vector<128x1xf32> to vector<128x128xf32>
    %152 = arith.mulf %23, %151 : vector<128x128xf32>
    %153 = arith.truncf %152 : vector<128x128xf32> to vector<128x128xbf16>
    %c127_i32 = arith.constant 127 : i32
    %154 = tpu.dynamic_rotate %23 by %c127_i32 dim 0 : vector<128x128xf32>, i32 -> vector<128x128xf32>
    %c0_i32_51 = arith.constant 0 : i32
    %155 = vector.broadcast %c0_i32_51 : i32 to vector<128x1xi32>
    %156 = arith.addi %27, %155 : vector<128x1xi32>
    %c0_i32_52 = arith.constant 0 : i32
    %157 = vector.broadcast %c0_i32_52 : i32 to vector<128x1xi32>
    %158 = arith.cmpi sge, %156, %157 : vector<128x1xi32>
    %c0_i32_53 = arith.constant 0 : i32
    %159 = vector.broadcast %c0_i32_53 : i32 to vector<128x1xi32>
    %160 = arith.addi %27, %159 : vector<128x1xi32>
    %c8_i32_54 = arith.constant 8 : i32
    %161 = vector.broadcast %c8_i32_54 : i32 to vector<128x1xi32>
    %162 = arith.cmpi slt, %160, %161 : vector<128x1xi32>
    %163 = arith.andi %158, %162 : vector<128x1xi1>
    %c1_i32_55 = arith.constant 1 : i32
    %164 = vector.broadcast %c1_i32_55 : i32 to vector<128x1xi32>
    %165 = arith.addi %29, %164 : vector<128x1xi32>
    %c0_i32_56 = arith.constant 0 : i32
    %166 = vector.broadcast %c0_i32_56 : i32 to vector<128x1xi32>
    %167 = arith.cmpi sge, %165, %166 : vector<128x1xi32>
    %168 = arith.andi %163, %167 : vector<128x1xi1>
    %c1_i32_57 = arith.constant 1 : i32
    %169 = vector.broadcast %c1_i32_57 : i32 to vector<128x1xi32>
    %170 = arith.addi %29, %169 : vector<128x1xi32>
    %c8_i32_58 = arith.constant 8 : i32
    %171 = vector.broadcast %c8_i32_58 : i32 to vector<128x1xi32>
    %172 = arith.cmpi slt, %170, %171 : vector<128x1xi32>
    %173 = arith.andi %168, %172 : vector<128x1xi1>
    %174 = arith.extui %173 : vector<128x1xi1> to vector<128x1xi32>
    %175 = arith.sitofp %174 : vector<128x1xi32> to vector<128x1xf32>
    %176 = vector.broadcast %175 : vector<128x1xf32> to vector<128x128xf32>
    %177 = arith.mulf %154, %176 : vector<128x128xf32>
    %178 = arith.truncf %177 : vector<128x128xf32> to vector<128x128xbf16>
    %c121_i32 = arith.constant 121 : i32
    %179 = tpu.dynamic_rotate %23 by %c121_i32 dim 0 : vector<128x128xf32>, i32 -> vector<128x128xf32>
    %c1_i32_59 = arith.constant 1 : i32
    %180 = vector.broadcast %c1_i32_59 : i32 to vector<128x1xi32>
    %181 = arith.addi %27, %180 : vector<128x1xi32>
    %c0_i32_60 = arith.constant 0 : i32
    %182 = vector.broadcast %c0_i32_60 : i32 to vector<128x1xi32>
    %183 = arith.cmpi sge, %181, %182 : vector<128x1xi32>
    %c1_i32_61 = arith.constant 1 : i32
    %184 = vector.broadcast %c1_i32_61 : i32 to vector<128x1xi32>
    %185 = arith.addi %27, %184 : vector<128x1xi32>
    %c8_i32_62 = arith.constant 8 : i32
    %186 = vector.broadcast %c8_i32_62 : i32 to vector<128x1xi32>
    %187 = arith.cmpi slt, %185, %186 : vector<128x1xi32>
    %188 = arith.andi %183, %187 : vector<128x1xi1>
    %c-1_i32_63 = arith.constant -1 : i32
    %189 = vector.broadcast %c-1_i32_63 : i32 to vector<128x1xi32>
    %190 = arith.addi %29, %189 : vector<128x1xi32>
    %c0_i32_64 = arith.constant 0 : i32
    %191 = vector.broadcast %c0_i32_64 : i32 to vector<128x1xi32>
    %192 = arith.cmpi sge, %190, %191 : vector<128x1xi32>
    %193 = arith.andi %188, %192 : vector<128x1xi1>
    %c-1_i32_65 = arith.constant -1 : i32
    %194 = vector.broadcast %c-1_i32_65 : i32 to vector<128x1xi32>
    %195 = arith.addi %29, %194 : vector<128x1xi32>
    %c8_i32_66 = arith.constant 8 : i32
    %196 = vector.broadcast %c8_i32_66 : i32 to vector<128x1xi32>
    %197 = arith.cmpi slt, %195, %196 : vector<128x1xi32>
    %198 = arith.andi %193, %197 : vector<128x1xi1>
    %199 = arith.extui %198 : vector<128x1xi1> to vector<128x1xi32>
    %200 = arith.sitofp %199 : vector<128x1xi32> to vector<128x1xf32>
    %201 = vector.broadcast %200 : vector<128x1xf32> to vector<128x128xf32>
    %202 = arith.mulf %179, %201 : vector<128x128xf32>
    %203 = arith.truncf %202 : vector<128x128xf32> to vector<128x128xbf16>
    %c120_i32 = arith.constant 120 : i32
    %204 = tpu.dynamic_rotate %23 by %c120_i32 dim 0 : vector<128x128xf32>, i32 -> vector<128x128xf32>
    %c1_i32_67 = arith.constant 1 : i32
    %205 = vector.broadcast %c1_i32_67 : i32 to vector<128x1xi32>
    %206 = arith.addi %27, %205 : vector<128x1xi32>
    %c0_i32_68 = arith.constant 0 : i32
    %207 = vector.broadcast %c0_i32_68 : i32 to vector<128x1xi32>
    %208 = arith.cmpi sge, %206, %207 : vector<128x1xi32>
    %c1_i32_69 = arith.constant 1 : i32
    %209 = vector.broadcast %c1_i32_69 : i32 to vector<128x1xi32>
    %210 = arith.addi %27, %209 : vector<128x1xi32>
    %c8_i32_70 = arith.constant 8 : i32
    %211 = vector.broadcast %c8_i32_70 : i32 to vector<128x1xi32>
    %212 = arith.cmpi slt, %210, %211 : vector<128x1xi32>
    %213 = arith.andi %208, %212 : vector<128x1xi1>
    %c0_i32_71 = arith.constant 0 : i32
    %214 = vector.broadcast %c0_i32_71 : i32 to vector<128x1xi32>
    %215 = arith.addi %29, %214 : vector<128x1xi32>
    %c0_i32_72 = arith.constant 0 : i32
    %216 = vector.broadcast %c0_i32_72 : i32 to vector<128x1xi32>
    %217 = arith.cmpi sge, %215, %216 : vector<128x1xi32>
    %218 = arith.andi %213, %217 : vector<128x1xi1>
    %c0_i32_73 = arith.constant 0 : i32
    %219 = vector.broadcast %c0_i32_73 : i32 to vector<128x1xi32>
    %220 = arith.addi %29, %219 : vector<128x1xi32>
    %c8_i32_74 = arith.constant 8 : i32
    %221 = vector.broadcast %c8_i32_74 : i32 to vector<128x1xi32>
    %222 = arith.cmpi slt, %220, %221 : vector<128x1xi32>
    %223 = arith.andi %218, %222 : vector<128x1xi1>
    %224 = arith.extui %223 : vector<128x1xi1> to vector<128x1xi32>
    %225 = arith.sitofp %224 : vector<128x1xi32> to vector<128x1xf32>
    %226 = vector.broadcast %225 : vector<128x1xf32> to vector<128x128xf32>
    %227 = arith.mulf %204, %226 : vector<128x128xf32>
    %228 = arith.truncf %227 : vector<128x128xf32> to vector<128x128xbf16>
    %c119_i32 = arith.constant 119 : i32
    %229 = tpu.dynamic_rotate %23 by %c119_i32 dim 0 : vector<128x128xf32>, i32 -> vector<128x128xf32>
    %c1_i32_75 = arith.constant 1 : i32
    %230 = vector.broadcast %c1_i32_75 : i32 to vector<128x1xi32>
    %231 = arith.addi %27, %230 : vector<128x1xi32>
    %c0_i32_76 = arith.constant 0 : i32
    %232 = vector.broadcast %c0_i32_76 : i32 to vector<128x1xi32>
    %233 = arith.cmpi sge, %231, %232 : vector<128x1xi32>
    %c1_i32_77 = arith.constant 1 : i32
    %234 = vector.broadcast %c1_i32_77 : i32 to vector<128x1xi32>
    %235 = arith.addi %27, %234 : vector<128x1xi32>
    %c8_i32_78 = arith.constant 8 : i32
    %236 = vector.broadcast %c8_i32_78 : i32 to vector<128x1xi32>
    %237 = arith.cmpi slt, %235, %236 : vector<128x1xi32>
    %238 = arith.andi %233, %237 : vector<128x1xi1>
    %c1_i32_79 = arith.constant 1 : i32
    %239 = vector.broadcast %c1_i32_79 : i32 to vector<128x1xi32>
    %240 = arith.addi %29, %239 : vector<128x1xi32>
    %c0_i32_80 = arith.constant 0 : i32
    %241 = vector.broadcast %c0_i32_80 : i32 to vector<128x1xi32>
    %242 = arith.cmpi sge, %240, %241 : vector<128x1xi32>
    %243 = arith.andi %238, %242 : vector<128x1xi1>
    %c1_i32_81 = arith.constant 1 : i32
    %244 = vector.broadcast %c1_i32_81 : i32 to vector<128x1xi32>
    %245 = arith.addi %29, %244 : vector<128x1xi32>
    %c8_i32_82 = arith.constant 8 : i32
    %246 = vector.broadcast %c8_i32_82 : i32 to vector<128x1xi32>
    %247 = arith.cmpi slt, %245, %246 : vector<128x1xi32>
    %248 = arith.andi %243, %247 : vector<128x1xi1>
    %249 = arith.extui %248 : vector<128x1xi1> to vector<128x1xi32>
    %250 = arith.sitofp %249 : vector<128x1xi32> to vector<128x1xf32>
    %251 = vector.broadcast %250 : vector<128x1xf32> to vector<128x128xf32>
    %252 = arith.mulf %229, %251 : vector<128x128xf32>
    %253 = arith.truncf %252 : vector<128x128xf32> to vector<128x128xbf16>
    %254 = tpu.concatenate %54, %79, %104, %129, %153, %178, %203, %228, %253 in 1 : vector<128x128xbf16>, vector<128x128xbf16>, vector<128x128xbf16>, vector<128x128xbf16>, vector<128x128xbf16>, vector<128x128xbf16>, vector<128x128xbf16>, vector<128x128xbf16>, vector<128x128xbf16> -> vector<128x1152xbf16>
    %cst = arith.constant dense<0.000000e+00> : vector<128x128xf32>
    %255 = tpu.matmul %254, %24, %cst {dimension_numbers = #tpu.dot_dimension_numbers<[1], [0], [0], [1], [0, 0, 1, 1], [], []>} : vector<128x1152xbf16>, vector<1152x128xbf16>, vector<128x128xf32> -> vector<128x128xf32>
    %256 = vector.broadcast %25 : vector<1x128xf32> to vector<128x128xf32>
    %257 = arith.addf %255, %256 : vector<128x128xf32>
    %cst_83 = arith.constant 0.000000e+00 : f32
    %258 = vector.broadcast %cst_83 : f32 to vector<128x128xf32>
    %259 = arith.maximumf %257, %258 : vector<128x128xf32>
    %c127_i32_84 = arith.constant 127 : i32
    %260 = tpu.dynamic_rotate %259 by %c127_i32_84 dim 0 : vector<128x128xf32>, i32 -> vector<128x128xf32>
    %261 = arith.maximumf %259, %260 : vector<128x128xf32>
    %c120_i32_85 = arith.constant 120 : i32
    %262 = tpu.dynamic_rotate %261 by %c120_i32_85 dim 0 : vector<128x128xf32>, i32 -> vector<128x128xf32>
    %263 = arith.maximumf %261, %262 : vector<128x128xf32>
    %c0_i32_86 = arith.constant 0 : i32
    %264 = tpu.memref_slice %arg21[%c0_i32_86] : memref<8x!tpu.dma_semaphore, #tpu.memory_space<semaphore_mem>> -> memref<1x!tpu.dma_semaphore, #tpu.memory_space<semaphore_mem>>
    %265 = tpu.memref_squeeze %264 : memref<1x!tpu.dma_semaphore, #tpu.memory_space<semaphore_mem>> -> memref<!tpu.dma_semaphore, #tpu.memory_space<semaphore_mem>>
    tpu.wait_dma2 semaphore(%265 : memref<!tpu.dma_semaphore, #tpu.memory_space<semaphore_mem>>) src(%arg4 : memref<1152x128xbf16, #tpu.memory_space<any>>) dst(%arg13 : memref<1152x128xbf16, #tpu.memory_space<vmem>>)
    %c1_i32_87 = arith.constant 1 : i32
    %266 = tpu.memref_slice %arg21[%c1_i32_87] : memref<8x!tpu.dma_semaphore, #tpu.memory_space<semaphore_mem>> -> memref<1x!tpu.dma_semaphore, #tpu.memory_space<semaphore_mem>>
    %267 = tpu.memref_squeeze %266 : memref<1x!tpu.dma_semaphore, #tpu.memory_space<semaphore_mem>> -> memref<!tpu.dma_semaphore, #tpu.memory_space<semaphore_mem>>
    tpu.wait_dma2 semaphore(%267 : memref<!tpu.dma_semaphore, #tpu.memory_space<semaphore_mem>>) src(%arg5 : memref<1x128xf32, #tpu.memory_space<any>>) dst(%arg14 : memref<1x128xf32, #tpu.memory_space<vmem>>)
    %c0_88 = arith.constant 0 : index
    %c0_89 = arith.constant 0 : index
    %268 = vector.load %arg13[%c0_88, %c0_89] : memref<1152x128xbf16, #tpu.memory_space<vmem>>, vector<1152x128xbf16>
    %c0_90 = arith.constant 0 : index
    %c0_91 = arith.constant 0 : index
    %269 = vector.load %arg14[%c0_90, %c0_91] : memref<1x128xf32, #tpu.memory_space<vmem>>, vector<1x128xf32>
    %c1_i32_92 = arith.constant 1 : i32
    %270 = vector.broadcast %c1_i32_92 : i32 to vector<128x1xi32>
    %271 = arith.shrsi %20, %270 : vector<128x1xi32>
    %c1_i32_93 = arith.constant 1 : i32
    %272 = vector.broadcast %c1_i32_93 : i32 to vector<128x1xi32>
    %273 = arith.shrsi %22, %272 : vector<128x1xi32>
    %c18_i32 = arith.constant 18 : i32
    %274 = tpu.dynamic_rotate %263 by %c18_i32 dim 0 : vector<128x128xf32>, i32 -> vector<128x128xf32>
    %c-1_i32_94 = arith.constant -1 : i32
    %275 = vector.broadcast %c-1_i32_94 : i32 to vector<128x1xi32>
    %276 = arith.addi %271, %275 : vector<128x1xi32>
    %c0_i32_95 = arith.constant 0 : i32
    %277 = vector.broadcast %c0_i32_95 : i32 to vector<128x1xi32>
    %278 = arith.cmpi sge, %276, %277 : vector<128x1xi32>
    %c-1_i32_96 = arith.constant -1 : i32
    %279 = vector.broadcast %c-1_i32_96 : i32 to vector<128x1xi32>
    %280 = arith.addi %271, %279 : vector<128x1xi32>
    %c4_i32_97 = arith.constant 4 : i32
    %281 = vector.broadcast %c4_i32_97 : i32 to vector<128x1xi32>
    %282 = arith.cmpi slt, %280, %281 : vector<128x1xi32>
    %283 = arith.andi %278, %282 : vector<128x1xi1>
    %c-1_i32_98 = arith.constant -1 : i32
    %284 = vector.broadcast %c-1_i32_98 : i32 to vector<128x1xi32>
    %285 = arith.addi %273, %284 : vector<128x1xi32>
    %c0_i32_99 = arith.constant 0 : i32
    %286 = vector.broadcast %c0_i32_99 : i32 to vector<128x1xi32>
    %287 = arith.cmpi sge, %285, %286 : vector<128x1xi32>
    %288 = arith.andi %283, %287 : vector<128x1xi1>
    %c-1_i32_100 = arith.constant -1 : i32
    %289 = vector.broadcast %c-1_i32_100 : i32 to vector<128x1xi32>
    %290 = arith.addi %273, %289 : vector<128x1xi32>
    %c4_i32_101 = arith.constant 4 : i32
    %291 = vector.broadcast %c4_i32_101 : i32 to vector<128x1xi32>
    %292 = arith.cmpi slt, %290, %291 : vector<128x1xi32>
    %293 = arith.andi %288, %292 : vector<128x1xi1>
    %294 = arith.extui %293 : vector<128x1xi1> to vector<128x1xi32>
    %295 = arith.sitofp %294 : vector<128x1xi32> to vector<128x1xf32>
    %296 = vector.broadcast %295 : vector<128x1xf32> to vector<128x128xf32>
    %297 = arith.mulf %274, %296 : vector<128x128xf32>
    %298 = arith.truncf %297 : vector<128x128xf32> to vector<128x128xbf16>
    %c16_i32 = arith.constant 16 : i32
    %299 = tpu.dynamic_rotate %263 by %c16_i32 dim 0 : vector<128x128xf32>, i32 -> vector<128x128xf32>
    %c-1_i32_102 = arith.constant -1 : i32
    %300 = vector.broadcast %c-1_i32_102 : i32 to vector<128x1xi32>
    %301 = arith.addi %271, %300 : vector<128x1xi32>
    %c0_i32_103 = arith.constant 0 : i32
    %302 = vector.broadcast %c0_i32_103 : i32 to vector<128x1xi32>
    %303 = arith.cmpi sge, %301, %302 : vector<128x1xi32>
    %c-1_i32_104 = arith.constant -1 : i32
    %304 = vector.broadcast %c-1_i32_104 : i32 to vector<128x1xi32>
    %305 = arith.addi %271, %304 : vector<128x1xi32>
    %c4_i32_105 = arith.constant 4 : i32
    %306 = vector.broadcast %c4_i32_105 : i32 to vector<128x1xi32>
    %307 = arith.cmpi slt, %305, %306 : vector<128x1xi32>
    %308 = arith.andi %303, %307 : vector<128x1xi1>
    %c0_i32_106 = arith.constant 0 : i32
    %309 = vector.broadcast %c0_i32_106 : i32 to vector<128x1xi32>
    %310 = arith.addi %273, %309 : vector<128x1xi32>
    %c0_i32_107 = arith.constant 0 : i32
    %311 = vector.broadcast %c0_i32_107 : i32 to vector<128x1xi32>
    %312 = arith.cmpi sge, %310, %311 : vector<128x1xi32>
    %313 = arith.andi %308, %312 : vector<128x1xi1>
    %c0_i32_108 = arith.constant 0 : i32
    %314 = vector.broadcast %c0_i32_108 : i32 to vector<128x1xi32>
    %315 = arith.addi %273, %314 : vector<128x1xi32>
    %c4_i32_109 = arith.constant 4 : i32
    %316 = vector.broadcast %c4_i32_109 : i32 to vector<128x1xi32>
    %317 = arith.cmpi slt, %315, %316 : vector<128x1xi32>
    %318 = arith.andi %313, %317 : vector<128x1xi1>
    %319 = arith.extui %318 : vector<128x1xi1> to vector<128x1xi32>
    %320 = arith.sitofp %319 : vector<128x1xi32> to vector<128x1xf32>
    %321 = vector.broadcast %320 : vector<128x1xf32> to vector<128x128xf32>
    %322 = arith.mulf %299, %321 : vector<128x128xf32>
    %323 = arith.truncf %322 : vector<128x128xf32> to vector<128x128xbf16>
    %c14_i32 = arith.constant 14 : i32
    %324 = tpu.dynamic_rotate %263 by %c14_i32 dim 0 : vector<128x128xf32>, i32 -> vector<128x128xf32>
    %c-1_i32_110 = arith.constant -1 : i32
    %325 = vector.broadcast %c-1_i32_110 : i32 to vector<128x1xi32>
    %326 = arith.addi %271, %325 : vector<128x1xi32>
    %c0_i32_111 = arith.constant 0 : i32
    %327 = vector.broadcast %c0_i32_111 : i32 to vector<128x1xi32>
    %328 = arith.cmpi sge, %326, %327 : vector<128x1xi32>
    %c-1_i32_112 = arith.constant -1 : i32
    %329 = vector.broadcast %c-1_i32_112 : i32 to vector<128x1xi32>
    %330 = arith.addi %271, %329 : vector<128x1xi32>
    %c4_i32_113 = arith.constant 4 : i32
    %331 = vector.broadcast %c4_i32_113 : i32 to vector<128x1xi32>
    %332 = arith.cmpi slt, %330, %331 : vector<128x1xi32>
    %333 = arith.andi %328, %332 : vector<128x1xi1>
    %c1_i32_114 = arith.constant 1 : i32
    %334 = vector.broadcast %c1_i32_114 : i32 to vector<128x1xi32>
    %335 = arith.addi %273, %334 : vector<128x1xi32>
    %c0_i32_115 = arith.constant 0 : i32
    %336 = vector.broadcast %c0_i32_115 : i32 to vector<128x1xi32>
    %337 = arith.cmpi sge, %335, %336 : vector<128x1xi32>
    %338 = arith.andi %333, %337 : vector<128x1xi1>
    %c1_i32_116 = arith.constant 1 : i32
    %339 = vector.broadcast %c1_i32_116 : i32 to vector<128x1xi32>
    %340 = arith.addi %273, %339 : vector<128x1xi32>
    %c4_i32_117 = arith.constant 4 : i32
    %341 = vector.broadcast %c4_i32_117 : i32 to vector<128x1xi32>
    %342 = arith.cmpi slt, %340, %341 : vector<128x1xi32>
    %343 = arith.andi %338, %342 : vector<128x1xi1>
    %344 = arith.extui %343 : vector<128x1xi1> to vector<128x1xi32>
    %345 = arith.sitofp %344 : vector<128x1xi32> to vector<128x1xf32>
    %346 = vector.broadcast %345 : vector<128x1xf32> to vector<128x128xf32>
    %347 = arith.mulf %324, %346 : vector<128x128xf32>
    %348 = arith.truncf %347 : vector<128x128xf32> to vector<128x128xbf16>
    %c2_i32_118 = arith.constant 2 : i32
    %349 = tpu.dynamic_rotate %263 by %c2_i32_118 dim 0 : vector<128x128xf32>, i32 -> vector<128x128xf32>
    %c0_i32_119 = arith.constant 0 : i32
    %350 = vector.broadcast %c0_i32_119 : i32 to vector<128x1xi32>
    %351 = arith.addi %271, %350 : vector<128x1xi32>
    %c0_i32_120 = arith.constant 0 : i32
    %352 = vector.broadcast %c0_i32_120 : i32 to vector<128x1xi32>
    %353 = arith.cmpi sge, %351, %352 : vector<128x1xi32>
    %c0_i32_121 = arith.constant 0 : i32
    %354 = vector.broadcast %c0_i32_121 : i32 to vector<128x1xi32>
    %355 = arith.addi %271, %354 : vector<128x1xi32>
    %c4_i32_122 = arith.constant 4 : i32
    %356 = vector.broadcast %c4_i32_122 : i32 to vector<128x1xi32>
    %357 = arith.cmpi slt, %355, %356 : vector<128x1xi32>
    %358 = arith.andi %353, %357 : vector<128x1xi1>
    %c-1_i32_123 = arith.constant -1 : i32
    %359 = vector.broadcast %c-1_i32_123 : i32 to vector<128x1xi32>
    %360 = arith.addi %273, %359 : vector<128x1xi32>
    %c0_i32_124 = arith.constant 0 : i32
    %361 = vector.broadcast %c0_i32_124 : i32 to vector<128x1xi32>
    %362 = arith.cmpi sge, %360, %361 : vector<128x1xi32>
    %363 = arith.andi %358, %362 : vector<128x1xi1>
    %c-1_i32_125 = arith.constant -1 : i32
    %364 = vector.broadcast %c-1_i32_125 : i32 to vector<128x1xi32>
    %365 = arith.addi %273, %364 : vector<128x1xi32>
    %c4_i32_126 = arith.constant 4 : i32
    %366 = vector.broadcast %c4_i32_126 : i32 to vector<128x1xi32>
    %367 = arith.cmpi slt, %365, %366 : vector<128x1xi32>
    %368 = arith.andi %363, %367 : vector<128x1xi1>
    %369 = arith.extui %368 : vector<128x1xi1> to vector<128x1xi32>
    %370 = arith.sitofp %369 : vector<128x1xi32> to vector<128x1xf32>
    %371 = vector.broadcast %370 : vector<128x1xf32> to vector<128x128xf32>
    %372 = arith.mulf %349, %371 : vector<128x128xf32>
    %373 = arith.truncf %372 : vector<128x128xf32> to vector<128x128xbf16>
    %c0_i32_127 = arith.constant 0 : i32
    %374 = vector.broadcast %c0_i32_127 : i32 to vector<128x1xi32>
    %375 = arith.addi %271, %374 : vector<128x1xi32>
    %c0_i32_128 = arith.constant 0 : i32
    %376 = vector.broadcast %c0_i32_128 : i32 to vector<128x1xi32>
    %377 = arith.cmpi sge, %375, %376 : vector<128x1xi32>
    %c0_i32_129 = arith.constant 0 : i32
    %378 = vector.broadcast %c0_i32_129 : i32 to vector<128x1xi32>
    %379 = arith.addi %271, %378 : vector<128x1xi32>
    %c4_i32_130 = arith.constant 4 : i32
    %380 = vector.broadcast %c4_i32_130 : i32 to vector<128x1xi32>
    %381 = arith.cmpi slt, %379, %380 : vector<128x1xi32>
    %382 = arith.andi %377, %381 : vector<128x1xi1>
    %c0_i32_131 = arith.constant 0 : i32
    %383 = vector.broadcast %c0_i32_131 : i32 to vector<128x1xi32>
    %384 = arith.addi %273, %383 : vector<128x1xi32>
    %c0_i32_132 = arith.constant 0 : i32
    %385 = vector.broadcast %c0_i32_132 : i32 to vector<128x1xi32>
    %386 = arith.cmpi sge, %384, %385 : vector<128x1xi32>
    %387 = arith.andi %382, %386 : vector<128x1xi1>
    %c0_i32_133 = arith.constant 0 : i32
    %388 = vector.broadcast %c0_i32_133 : i32 to vector<128x1xi32>
    %389 = arith.addi %273, %388 : vector<128x1xi32>
    %c4_i32_134 = arith.constant 4 : i32
    %390 = vector.broadcast %c4_i32_134 : i32 to vector<128x1xi32>
    %391 = arith.cmpi slt, %389, %390 : vector<128x1xi32>
    %392 = arith.andi %387, %391 : vector<128x1xi1>
    %393 = arith.extui %392 : vector<128x1xi1> to vector<128x1xi32>
    %394 = arith.sitofp %393 : vector<128x1xi32> to vector<128x1xf32>
    %395 = vector.broadcast %394 : vector<128x1xf32> to vector<128x128xf32>
    %396 = arith.mulf %263, %395 : vector<128x128xf32>
    %397 = arith.truncf %396 : vector<128x128xf32> to vector<128x128xbf16>
    %c126_i32 = arith.constant 126 : i32
    %398 = tpu.dynamic_rotate %263 by %c126_i32 dim 0 : vector<128x128xf32>, i32 -> vector<128x128xf32>
    %c0_i32_135 = arith.constant 0 : i32
    %399 = vector.broadcast %c0_i32_135 : i32 to vector<128x1xi32>
    %400 = arith.addi %271, %399 : vector<128x1xi32>
    %c0_i32_136 = arith.constant 0 : i32
    %401 = vector.broadcast %c0_i32_136 : i32 to vector<128x1xi32>
    %402 = arith.cmpi sge, %400, %401 : vector<128x1xi32>
    %c0_i32_137 = arith.constant 0 : i32
    %403 = vector.broadcast %c0_i32_137 : i32 to vector<128x1xi32>
    %404 = arith.addi %271, %403 : vector<128x1xi32>
    %c4_i32_138 = arith.constant 4 : i32
    %405 = vector.broadcast %c4_i32_138 : i32 to vector<128x1xi32>
    %406 = arith.cmpi slt, %404, %405 : vector<128x1xi32>
    %407 = arith.andi %402, %406 : vector<128x1xi1>
    %c1_i32_139 = arith.constant 1 : i32
    %408 = vector.broadcast %c1_i32_139 : i32 to vector<128x1xi32>
    %409 = arith.addi %273, %408 : vector<128x1xi32>
    %c0_i32_140 = arith.constant 0 : i32
    %410 = vector.broadcast %c0_i32_140 : i32 to vector<128x1xi32>
    %411 = arith.cmpi sge, %409, %410 : vector<128x1xi32>
    %412 = arith.andi %407, %411 : vector<128x1xi1>
    %c1_i32_141 = arith.constant 1 : i32
    %413 = vector.broadcast %c1_i32_141 : i32 to vector<128x1xi32>
    %414 = arith.addi %273, %413 : vector<128x1xi32>
    %c4_i32_142 = arith.constant 4 : i32
    %415 = vector.broadcast %c4_i32_142 : i32 to vector<128x1xi32>
    %416 = arith.cmpi slt, %414, %415 : vector<128x1xi32>
    %417 = arith.andi %412, %416 : vector<128x1xi1>
    %418 = arith.extui %417 : vector<128x1xi1> to vector<128x1xi32>
    %419 = arith.sitofp %418 : vector<128x1xi32> to vector<128x1xf32>
    %420 = vector.broadcast %419 : vector<128x1xf32> to vector<128x128xf32>
    %421 = arith.mulf %398, %420 : vector<128x128xf32>
    %422 = arith.truncf %421 : vector<128x128xf32> to vector<128x128xbf16>
    %c114_i32 = arith.constant 114 : i32
    %423 = tpu.dynamic_rotate %263 by %c114_i32 dim 0 : vector<128x128xf32>, i32 -> vector<128x128xf32>
    %c1_i32_143 = arith.constant 1 : i32
    %424 = vector.broadcast %c1_i32_143 : i32 to vector<128x1xi32>
    %425 = arith.addi %271, %424 : vector<128x1xi32>
    %c0_i32_144 = arith.constant 0 : i32
    %426 = vector.broadcast %c0_i32_144 : i32 to vector<128x1xi32>
    %427 = arith.cmpi sge, %425, %426 : vector<128x1xi32>
    %c1_i32_145 = arith.constant 1 : i32
    %428 = vector.broadcast %c1_i32_145 : i32 to vector<128x1xi32>
    %429 = arith.addi %271, %428 : vector<128x1xi32>
    %c4_i32_146 = arith.constant 4 : i32
    %430 = vector.broadcast %c4_i32_146 : i32 to vector<128x1xi32>
    %431 = arith.cmpi slt, %429, %430 : vector<128x1xi32>
    %432 = arith.andi %427, %431 : vector<128x1xi1>
    %c-1_i32_147 = arith.constant -1 : i32
    %433 = vector.broadcast %c-1_i32_147 : i32 to vector<128x1xi32>
    %434 = arith.addi %273, %433 : vector<128x1xi32>
    %c0_i32_148 = arith.constant 0 : i32
    %435 = vector.broadcast %c0_i32_148 : i32 to vector<128x1xi32>
    %436 = arith.cmpi sge, %434, %435 : vector<128x1xi32>
    %437 = arith.andi %432, %436 : vector<128x1xi1>
    %c-1_i32_149 = arith.constant -1 : i32
    %438 = vector.broadcast %c-1_i32_149 : i32 to vector<128x1xi32>
    %439 = arith.addi %273, %438 : vector<128x1xi32>
    %c4_i32_150 = arith.constant 4 : i32
    %440 = vector.broadcast %c4_i32_150 : i32 to vector<128x1xi32>
    %441 = arith.cmpi slt, %439, %440 : vector<128x1xi32>
    %442 = arith.andi %437, %441 : vector<128x1xi1>
    %443 = arith.extui %442 : vector<128x1xi1> to vector<128x1xi32>
    %444 = arith.sitofp %443 : vector<128x1xi32> to vector<128x1xf32>
    %445 = vector.broadcast %444 : vector<128x1xf32> to vector<128x128xf32>
    %446 = arith.mulf %423, %445 : vector<128x128xf32>
    %447 = arith.truncf %446 : vector<128x128xf32> to vector<128x128xbf16>
    %c112_i32 = arith.constant 112 : i32
    %448 = tpu.dynamic_rotate %263 by %c112_i32 dim 0 : vector<128x128xf32>, i32 -> vector<128x128xf32>
    %c1_i32_151 = arith.constant 1 : i32
    %449 = vector.broadcast %c1_i32_151 : i32 to vector<128x1xi32>
    %450 = arith.addi %271, %449 : vector<128x1xi32>
    %c0_i32_152 = arith.constant 0 : i32
    %451 = vector.broadcast %c0_i32_152 : i32 to vector<128x1xi32>
    %452 = arith.cmpi sge, %450, %451 : vector<128x1xi32>
    %c1_i32_153 = arith.constant 1 : i32
    %453 = vector.broadcast %c1_i32_153 : i32 to vector<128x1xi32>
    %454 = arith.addi %271, %453 : vector<128x1xi32>
    %c4_i32_154 = arith.constant 4 : i32
    %455 = vector.broadcast %c4_i32_154 : i32 to vector<128x1xi32>
    %456 = arith.cmpi slt, %454, %455 : vector<128x1xi32>
    %457 = arith.andi %452, %456 : vector<128x1xi1>
    %c0_i32_155 = arith.constant 0 : i32
    %458 = vector.broadcast %c0_i32_155 : i32 to vector<128x1xi32>
    %459 = arith.addi %273, %458 : vector<128x1xi32>
    %c0_i32_156 = arith.constant 0 : i32
    %460 = vector.broadcast %c0_i32_156 : i32 to vector<128x1xi32>
    %461 = arith.cmpi sge, %459, %460 : vector<128x1xi32>
    %462 = arith.andi %457, %461 : vector<128x1xi1>
    %c0_i32_157 = arith.constant 0 : i32
    %463 = vector.broadcast %c0_i32_157 : i32 to vector<128x1xi32>
    %464 = arith.addi %273, %463 : vector<128x1xi32>
    %c4_i32_158 = arith.constant 4 : i32
    %465 = vector.broadcast %c4_i32_158 : i32 to vector<128x1xi32>
    %466 = arith.cmpi slt, %464, %465 : vector<128x1xi32>
    %467 = arith.andi %462, %466 : vector<128x1xi1>
    %468 = arith.extui %467 : vector<128x1xi1> to vector<128x1xi32>
    %469 = arith.sitofp %468 : vector<128x1xi32> to vector<128x1xf32>
    %470 = vector.broadcast %469 : vector<128x1xf32> to vector<128x128xf32>
    %471 = arith.mulf %448, %470 : vector<128x128xf32>
    %472 = arith.truncf %471 : vector<128x128xf32> to vector<128x128xbf16>
    %c110_i32 = arith.constant 110 : i32
    %473 = tpu.dynamic_rotate %263 by %c110_i32 dim 0 : vector<128x128xf32>, i32 -> vector<128x128xf32>
    %c1_i32_159 = arith.constant 1 : i32
    %474 = vector.broadcast %c1_i32_159 : i32 to vector<128x1xi32>
    %475 = arith.addi %271, %474 : vector<128x1xi32>
    %c0_i32_160 = arith.constant 0 : i32
    %476 = vector.broadcast %c0_i32_160 : i32 to vector<128x1xi32>
    %477 = arith.cmpi sge, %475, %476 : vector<128x1xi32>
    %c1_i32_161 = arith.constant 1 : i32
    %478 = vector.broadcast %c1_i32_161 : i32 to vector<128x1xi32>
    %479 = arith.addi %271, %478 : vector<128x1xi32>
    %c4_i32_162 = arith.constant 4 : i32
    %480 = vector.broadcast %c4_i32_162 : i32 to vector<128x1xi32>
    %481 = arith.cmpi slt, %479, %480 : vector<128x1xi32>
    %482 = arith.andi %477, %481 : vector<128x1xi1>
    %c1_i32_163 = arith.constant 1 : i32
    %483 = vector.broadcast %c1_i32_163 : i32 to vector<128x1xi32>
    %484 = arith.addi %273, %483 : vector<128x1xi32>
    %c0_i32_164 = arith.constant 0 : i32
    %485 = vector.broadcast %c0_i32_164 : i32 to vector<128x1xi32>
    %486 = arith.cmpi sge, %484, %485 : vector<128x1xi32>
    %487 = arith.andi %482, %486 : vector<128x1xi1>
    %c1_i32_165 = arith.constant 1 : i32
    %488 = vector.broadcast %c1_i32_165 : i32 to vector<128x1xi32>
    %489 = arith.addi %273, %488 : vector<128x1xi32>
    %c4_i32_166 = arith.constant 4 : i32
    %490 = vector.broadcast %c4_i32_166 : i32 to vector<128x1xi32>
    %491 = arith.cmpi slt, %489, %490 : vector<128x1xi32>
    %492 = arith.andi %487, %491 : vector<128x1xi1>
    %493 = arith.extui %492 : vector<128x1xi1> to vector<128x1xi32>
    %494 = arith.sitofp %493 : vector<128x1xi32> to vector<128x1xf32>
    %495 = vector.broadcast %494 : vector<128x1xf32> to vector<128x128xf32>
    %496 = arith.mulf %473, %495 : vector<128x128xf32>
    %497 = arith.truncf %496 : vector<128x128xf32> to vector<128x128xbf16>
    %498 = tpu.concatenate %298, %323, %348, %373, %397, %422, %447, %472, %497 in 1 : vector<128x128xbf16>, vector<128x128xbf16>, vector<128x128xbf16>, vector<128x128xbf16>, vector<128x128xbf16>, vector<128x128xbf16>, vector<128x128xbf16>, vector<128x128xbf16>, vector<128x128xbf16> -> vector<128x1152xbf16>
    %cst_167 = arith.constant dense<0.000000e+00> : vector<128x128xf32>
    %499 = tpu.matmul %498, %268, %cst_167 {dimension_numbers = #tpu.dot_dimension_numbers<[1], [0], [0], [1], [0, 0, 1, 1], [], []>} : vector<128x1152xbf16>, vector<1152x128xbf16>, vector<128x128xf32> -> vector<128x128xf32>
    %500 = vector.broadcast %269 : vector<1x128xf32> to vector<128x128xf32>
    %501 = arith.addf %499, %500 : vector<128x128xf32>
    %cst_168 = arith.constant 0.000000e+00 : f32
    %502 = vector.broadcast %cst_168 : f32 to vector<128x128xf32>
    %503 = arith.maximumf %501, %502 : vector<128x128xf32>
    %c126_i32_169 = arith.constant 126 : i32
    %504 = tpu.dynamic_rotate %503 by %c126_i32_169 dim 0 : vector<128x128xf32>, i32 -> vector<128x128xf32>
    %505 = arith.maximumf %503, %504 : vector<128x128xf32>
    %c112_i32_170 = arith.constant 112 : i32
    %506 = tpu.dynamic_rotate %505 by %c112_i32_170 dim 0 : vector<128x128xf32>, i32 -> vector<128x128xf32>
    %507 = arith.maximumf %505, %506 : vector<128x128xf32>
    %c2_i32_171 = arith.constant 2 : i32
    %508 = tpu.memref_slice %arg21[%c2_i32_171] : memref<8x!tpu.dma_semaphore, #tpu.memory_space<semaphore_mem>> -> memref<1x!tpu.dma_semaphore, #tpu.memory_space<semaphore_mem>>
    %509 = tpu.memref_squeeze %508 : memref<1x!tpu.dma_semaphore, #tpu.memory_space<semaphore_mem>> -> memref<!tpu.dma_semaphore, #tpu.memory_space<semaphore_mem>>
    tpu.wait_dma2 semaphore(%509 : memref<!tpu.dma_semaphore, #tpu.memory_space<semaphore_mem>>) src(%arg6 : memref<1152x128xbf16, #tpu.memory_space<any>>) dst(%arg15 : memref<1152x128xbf16, #tpu.memory_space<vmem>>)
    %c3_i32_172 = arith.constant 3 : i32
    %510 = tpu.memref_slice %arg21[%c3_i32_172] : memref<8x!tpu.dma_semaphore, #tpu.memory_space<semaphore_mem>> -> memref<1x!tpu.dma_semaphore, #tpu.memory_space<semaphore_mem>>
    %511 = tpu.memref_squeeze %510 : memref<1x!tpu.dma_semaphore, #tpu.memory_space<semaphore_mem>> -> memref<!tpu.dma_semaphore, #tpu.memory_space<semaphore_mem>>
    tpu.wait_dma2 semaphore(%511 : memref<!tpu.dma_semaphore, #tpu.memory_space<semaphore_mem>>) src(%arg7 : memref<1x128xf32, #tpu.memory_space<any>>) dst(%arg16 : memref<1x128xf32, #tpu.memory_space<vmem>>)
    %c0_173 = arith.constant 0 : index
    %c0_174 = arith.constant 0 : index
    %512 = vector.load %arg15[%c0_173, %c0_174] : memref<1152x128xbf16, #tpu.memory_space<vmem>>, vector<1152x128xbf16>
    %c0_175 = arith.constant 0 : index
    %c0_176 = arith.constant 0 : index
    %513 = vector.load %arg16[%c0_175, %c0_176] : memref<1x128xf32, #tpu.memory_space<vmem>>, vector<1x128xf32>
    %c2_i32_177 = arith.constant 2 : i32
    %514 = vector.broadcast %c2_i32_177 : i32 to vector<128x1xi32>
    %515 = arith.shrsi %20, %514 : vector<128x1xi32>
    %c2_i32_178 = arith.constant 2 : i32
    %516 = vector.broadcast %c2_i32_178 : i32 to vector<128x1xi32>
    %517 = arith.shrsi %22, %516 : vector<128x1xi32>
    %c36_i32 = arith.constant 36 : i32
    %518 = tpu.dynamic_rotate %507 by %c36_i32 dim 0 : vector<128x128xf32>, i32 -> vector<128x128xf32>
    %c-1_i32_179 = arith.constant -1 : i32
    %519 = vector.broadcast %c-1_i32_179 : i32 to vector<128x1xi32>
    %520 = arith.addi %515, %519 : vector<128x1xi32>
    %c0_i32_180 = arith.constant 0 : i32
    %521 = vector.broadcast %c0_i32_180 : i32 to vector<128x1xi32>
    %522 = arith.cmpi sge, %520, %521 : vector<128x1xi32>
    %c-1_i32_181 = arith.constant -1 : i32
    %523 = vector.broadcast %c-1_i32_181 : i32 to vector<128x1xi32>
    %524 = arith.addi %515, %523 : vector<128x1xi32>
    %c2_i32_182 = arith.constant 2 : i32
    %525 = vector.broadcast %c2_i32_182 : i32 to vector<128x1xi32>
    %526 = arith.cmpi slt, %524, %525 : vector<128x1xi32>
    %527 = arith.andi %522, %526 : vector<128x1xi1>
    %c-1_i32_183 = arith.constant -1 : i32
    %528 = vector.broadcast %c-1_i32_183 : i32 to vector<128x1xi32>
    %529 = arith.addi %517, %528 : vector<128x1xi32>
    %c0_i32_184 = arith.constant 0 : i32
    %530 = vector.broadcast %c0_i32_184 : i32 to vector<128x1xi32>
    %531 = arith.cmpi sge, %529, %530 : vector<128x1xi32>
    %532 = arith.andi %527, %531 : vector<128x1xi1>
    %c-1_i32_185 = arith.constant -1 : i32
    %533 = vector.broadcast %c-1_i32_185 : i32 to vector<128x1xi32>
    %534 = arith.addi %517, %533 : vector<128x1xi32>
    %c2_i32_186 = arith.constant 2 : i32
    %535 = vector.broadcast %c2_i32_186 : i32 to vector<128x1xi32>
    %536 = arith.cmpi slt, %534, %535 : vector<128x1xi32>
    %537 = arith.andi %532, %536 : vector<128x1xi1>
    %538 = arith.extui %537 : vector<128x1xi1> to vector<128x1xi32>
    %539 = arith.sitofp %538 : vector<128x1xi32> to vector<128x1xf32>
    %540 = vector.broadcast %539 : vector<128x1xf32> to vector<128x128xf32>
    %541 = arith.mulf %518, %540 : vector<128x128xf32>
    %542 = arith.truncf %541 : vector<128x128xf32> to vector<128x128xbf16>
    %c32_i32 = arith.constant 32 : i32
    %543 = tpu.dynamic_rotate %507 by %c32_i32 dim 0 : vector<128x128xf32>, i32 -> vector<128x128xf32>
    %c-1_i32_187 = arith.constant -1 : i32
    %544 = vector.broadcast %c-1_i32_187 : i32 to vector<128x1xi32>
    %545 = arith.addi %515, %544 : vector<128x1xi32>
    %c0_i32_188 = arith.constant 0 : i32
    %546 = vector.broadcast %c0_i32_188 : i32 to vector<128x1xi32>
    %547 = arith.cmpi sge, %545, %546 : vector<128x1xi32>
    %c-1_i32_189 = arith.constant -1 : i32
    %548 = vector.broadcast %c-1_i32_189 : i32 to vector<128x1xi32>
    %549 = arith.addi %515, %548 : vector<128x1xi32>
    %c2_i32_190 = arith.constant 2 : i32
    %550 = vector.broadcast %c2_i32_190 : i32 to vector<128x1xi32>
    %551 = arith.cmpi slt, %549, %550 : vector<128x1xi32>
    %552 = arith.andi %547, %551 : vector<128x1xi1>
    %c0_i32_191 = arith.constant 0 : i32
    %553 = vector.broadcast %c0_i32_191 : i32 to vector<128x1xi32>
    %554 = arith.addi %517, %553 : vector<128x1xi32>
    %c0_i32_192 = arith.constant 0 : i32
    %555 = vector.broadcast %c0_i32_192 : i32 to vector<128x1xi32>
    %556 = arith.cmpi sge, %554, %555 : vector<128x1xi32>
    %557 = arith.andi %552, %556 : vector<128x1xi1>
    %c0_i32_193 = arith.constant 0 : i32
    %558 = vector.broadcast %c0_i32_193 : i32 to vector<128x1xi32>
    %559 = arith.addi %517, %558 : vector<128x1xi32>
    %c2_i32_194 = arith.constant 2 : i32
    %560 = vector.broadcast %c2_i32_194 : i32 to vector<128x1xi32>
    %561 = arith.cmpi slt, %559, %560 : vector<128x1xi32>
    %562 = arith.andi %557, %561 : vector<128x1xi1>
    %563 = arith.extui %562 : vector<128x1xi1> to vector<128x1xi32>
    %564 = arith.sitofp %563 : vector<128x1xi32> to vector<128x1xf32>
    %565 = vector.broadcast %564 : vector<128x1xf32> to vector<128x128xf32>
    %566 = arith.mulf %543, %565 : vector<128x128xf32>
    %567 = arith.truncf %566 : vector<128x128xf32> to vector<128x128xbf16>
    %c28_i32 = arith.constant 28 : i32
    %568 = tpu.dynamic_rotate %507 by %c28_i32 dim 0 : vector<128x128xf32>, i32 -> vector<128x128xf32>
    %c-1_i32_195 = arith.constant -1 : i32
    %569 = vector.broadcast %c-1_i32_195 : i32 to vector<128x1xi32>
    %570 = arith.addi %515, %569 : vector<128x1xi32>
    %c0_i32_196 = arith.constant 0 : i32
    %571 = vector.broadcast %c0_i32_196 : i32 to vector<128x1xi32>
    %572 = arith.cmpi sge, %570, %571 : vector<128x1xi32>
    %c-1_i32_197 = arith.constant -1 : i32
    %573 = vector.broadcast %c-1_i32_197 : i32 to vector<128x1xi32>
    %574 = arith.addi %515, %573 : vector<128x1xi32>
    %c2_i32_198 = arith.constant 2 : i32
    %575 = vector.broadcast %c2_i32_198 : i32 to vector<128x1xi32>
    %576 = arith.cmpi slt, %574, %575 : vector<128x1xi32>
    %577 = arith.andi %572, %576 : vector<128x1xi1>
    %c1_i32_199 = arith.constant 1 : i32
    %578 = vector.broadcast %c1_i32_199 : i32 to vector<128x1xi32>
    %579 = arith.addi %517, %578 : vector<128x1xi32>
    %c0_i32_200 = arith.constant 0 : i32
    %580 = vector.broadcast %c0_i32_200 : i32 to vector<128x1xi32>
    %581 = arith.cmpi sge, %579, %580 : vector<128x1xi32>
    %582 = arith.andi %577, %581 : vector<128x1xi1>
    %c1_i32_201 = arith.constant 1 : i32
    %583 = vector.broadcast %c1_i32_201 : i32 to vector<128x1xi32>
    %584 = arith.addi %517, %583 : vector<128x1xi32>
    %c2_i32_202 = arith.constant 2 : i32
    %585 = vector.broadcast %c2_i32_202 : i32 to vector<128x1xi32>
    %586 = arith.cmpi slt, %584, %585 : vector<128x1xi32>
    %587 = arith.andi %582, %586 : vector<128x1xi1>
    %588 = arith.extui %587 : vector<128x1xi1> to vector<128x1xi32>
    %589 = arith.sitofp %588 : vector<128x1xi32> to vector<128x1xf32>
    %590 = vector.broadcast %589 : vector<128x1xf32> to vector<128x128xf32>
    %591 = arith.mulf %568, %590 : vector<128x128xf32>
    %592 = arith.truncf %591 : vector<128x128xf32> to vector<128x128xbf16>
    %c4_i32_203 = arith.constant 4 : i32
    %593 = tpu.dynamic_rotate %507 by %c4_i32_203 dim 0 : vector<128x128xf32>, i32 -> vector<128x128xf32>
    %c0_i32_204 = arith.constant 0 : i32
    %594 = vector.broadcast %c0_i32_204 : i32 to vector<128x1xi32>
    %595 = arith.addi %515, %594 : vector<128x1xi32>
    %c0_i32_205 = arith.constant 0 : i32
    %596 = vector.broadcast %c0_i32_205 : i32 to vector<128x1xi32>
    %597 = arith.cmpi sge, %595, %596 : vector<128x1xi32>
    %c0_i32_206 = arith.constant 0 : i32
    %598 = vector.broadcast %c0_i32_206 : i32 to vector<128x1xi32>
    %599 = arith.addi %515, %598 : vector<128x1xi32>
    %c2_i32_207 = arith.constant 2 : i32
    %600 = vector.broadcast %c2_i32_207 : i32 to vector<128x1xi32>
    %601 = arith.cmpi slt, %599, %600 : vector<128x1xi32>
    %602 = arith.andi %597, %601 : vector<128x1xi1>
    %c-1_i32_208 = arith.constant -1 : i32
    %603 = vector.broadcast %c-1_i32_208 : i32 to vector<128x1xi32>
    %604 = arith.addi %517, %603 : vector<128x1xi32>
    %c0_i32_209 = arith.constant 0 : i32
    %605 = vector.broadcast %c0_i32_209 : i32 to vector<128x1xi32>
    %606 = arith.cmpi sge, %604, %605 : vector<128x1xi32>
    %607 = arith.andi %602, %606 : vector<128x1xi1>
    %c-1_i32_210 = arith.constant -1 : i32
    %608 = vector.broadcast %c-1_i32_210 : i32 to vector<128x1xi32>
    %609 = arith.addi %517, %608 : vector<128x1xi32>
    %c2_i32_211 = arith.constant 2 : i32
    %610 = vector.broadcast %c2_i32_211 : i32 to vector<128x1xi32>
    %611 = arith.cmpi slt, %609, %610 : vector<128x1xi32>
    %612 = arith.andi %607, %611 : vector<128x1xi1>
    %613 = arith.extui %612 : vector<128x1xi1> to vector<128x1xi32>
    %614 = arith.sitofp %613 : vector<128x1xi32> to vector<128x1xf32>
    %615 = vector.broadcast %614 : vector<128x1xf32> to vector<128x128xf32>
    %616 = arith.mulf %593, %615 : vector<128x128xf32>
    %617 = arith.truncf %616 : vector<128x128xf32> to vector<128x128xbf16>
    %c0_i32_212 = arith.constant 0 : i32
    %618 = vector.broadcast %c0_i32_212 : i32 to vector<128x1xi32>
    %619 = arith.addi %515, %618 : vector<128x1xi32>
    %c0_i32_213 = arith.constant 0 : i32
    %620 = vector.broadcast %c0_i32_213 : i32 to vector<128x1xi32>
    %621 = arith.cmpi sge, %619, %620 : vector<128x1xi32>
    %c0_i32_214 = arith.constant 0 : i32
    %622 = vector.broadcast %c0_i32_214 : i32 to vector<128x1xi32>
    %623 = arith.addi %515, %622 : vector<128x1xi32>
    %c2_i32_215 = arith.constant 2 : i32
    %624 = vector.broadcast %c2_i32_215 : i32 to vector<128x1xi32>
    %625 = arith.cmpi slt, %623, %624 : vector<128x1xi32>
    %626 = arith.andi %621, %625 : vector<128x1xi1>
    %c0_i32_216 = arith.constant 0 : i32
    %627 = vector.broadcast %c0_i32_216 : i32 to vector<128x1xi32>
    %628 = arith.addi %517, %627 : vector<128x1xi32>
    %c0_i32_217 = arith.constant 0 : i32
    %629 = vector.broadcast %c0_i32_217 : i32 to vector<128x1xi32>
    %630 = arith.cmpi sge, %628, %629 : vector<128x1xi32>
    %631 = arith.andi %626, %630 : vector<128x1xi1>
    %c0_i32_218 = arith.constant 0 : i32
    %632 = vector.broadcast %c0_i32_218 : i32 to vector<128x1xi32>
    %633 = arith.addi %517, %632 : vector<128x1xi32>
    %c2_i32_219 = arith.constant 2 : i32
    %634 = vector.broadcast %c2_i32_219 : i32 to vector<128x1xi32>
    %635 = arith.cmpi slt, %633, %634 : vector<128x1xi32>
    %636 = arith.andi %631, %635 : vector<128x1xi1>
    %637 = arith.extui %636 : vector<128x1xi1> to vector<128x1xi32>
    %638 = arith.sitofp %637 : vector<128x1xi32> to vector<128x1xf32>
    %639 = vector.broadcast %638 : vector<128x1xf32> to vector<128x128xf32>
    %640 = arith.mulf %507, %639 : vector<128x128xf32>
    %641 = arith.truncf %640 : vector<128x128xf32> to vector<128x128xbf16>
    %c124_i32 = arith.constant 124 : i32
    %642 = tpu.dynamic_rotate %507 by %c124_i32 dim 0 : vector<128x128xf32>, i32 -> vector<128x128xf32>
    %c0_i32_220 = arith.constant 0 : i32
    %643 = vector.broadcast %c0_i32_220 : i32 to vector<128x1xi32>
    %644 = arith.addi %515, %643 : vector<128x1xi32>
    %c0_i32_221 = arith.constant 0 : i32
    %645 = vector.broadcast %c0_i32_221 : i32 to vector<128x1xi32>
    %646 = arith.cmpi sge, %644, %645 : vector<128x1xi32>
    %c0_i32_222 = arith.constant 0 : i32
    %647 = vector.broadcast %c0_i32_222 : i32 to vector<128x1xi32>
    %648 = arith.addi %515, %647 : vector<128x1xi32>
    %c2_i32_223 = arith.constant 2 : i32
    %649 = vector.broadcast %c2_i32_223 : i32 to vector<128x1xi32>
    %650 = arith.cmpi slt, %648, %649 : vector<128x1xi32>
    %651 = arith.andi %646, %650 : vector<128x1xi1>
    %c1_i32_224 = arith.constant 1 : i32
    %652 = vector.broadcast %c1_i32_224 : i32 to vector<128x1xi32>
    %653 = arith.addi %517, %652 : vector<128x1xi32>
    %c0_i32_225 = arith.constant 0 : i32
    %654 = vector.broadcast %c0_i32_225 : i32 to vector<128x1xi32>
    %655 = arith.cmpi sge, %653, %654 : vector<128x1xi32>
    %656 = arith.andi %651, %655 : vector<128x1xi1>
    %c1_i32_226 = arith.constant 1 : i32
    %657 = vector.broadcast %c1_i32_226 : i32 to vector<128x1xi32>
    %658 = arith.addi %517, %657 : vector<128x1xi32>
    %c2_i32_227 = arith.constant 2 : i32
    %659 = vector.broadcast %c2_i32_227 : i32 to vector<128x1xi32>
    %660 = arith.cmpi slt, %658, %659 : vector<128x1xi32>
    %661 = arith.andi %656, %660 : vector<128x1xi1>
    %662 = arith.extui %661 : vector<128x1xi1> to vector<128x1xi32>
    %663 = arith.sitofp %662 : vector<128x1xi32> to vector<128x1xf32>
    %664 = vector.broadcast %663 : vector<128x1xf32> to vector<128x128xf32>
    %665 = arith.mulf %642, %664 : vector<128x128xf32>
    %666 = arith.truncf %665 : vector<128x128xf32> to vector<128x128xbf16>
    %c100_i32 = arith.constant 100 : i32
    %667 = tpu.dynamic_rotate %507 by %c100_i32 dim 0 : vector<128x128xf32>, i32 -> vector<128x128xf32>
    %c1_i32_228 = arith.constant 1 : i32
    %668 = vector.broadcast %c1_i32_228 : i32 to vector<128x1xi32>
    %669 = arith.addi %515, %668 : vector<128x1xi32>
    %c0_i32_229 = arith.constant 0 : i32
    %670 = vector.broadcast %c0_i32_229 : i32 to vector<128x1xi32>
    %671 = arith.cmpi sge, %669, %670 : vector<128x1xi32>
    %c1_i32_230 = arith.constant 1 : i32
    %672 = vector.broadcast %c1_i32_230 : i32 to vector<128x1xi32>
    %673 = arith.addi %515, %672 : vector<128x1xi32>
    %c2_i32_231 = arith.constant 2 : i32
    %674 = vector.broadcast %c2_i32_231 : i32 to vector<128x1xi32>
    %675 = arith.cmpi slt, %673, %674 : vector<128x1xi32>
    %676 = arith.andi %671, %675 : vector<128x1xi1>
    %c-1_i32_232 = arith.constant -1 : i32
    %677 = vector.broadcast %c-1_i32_232 : i32 to vector<128x1xi32>
    %678 = arith.addi %517, %677 : vector<128x1xi32>
    %c0_i32_233 = arith.constant 0 : i32
    %679 = vector.broadcast %c0_i32_233 : i32 to vector<128x1xi32>
    %680 = arith.cmpi sge, %678, %679 : vector<128x1xi32>
    %681 = arith.andi %676, %680 : vector<128x1xi1>
    %c-1_i32_234 = arith.constant -1 : i32
    %682 = vector.broadcast %c-1_i32_234 : i32 to vector<128x1xi32>
    %683 = arith.addi %517, %682 : vector<128x1xi32>
    %c2_i32_235 = arith.constant 2 : i32
    %684 = vector.broadcast %c2_i32_235 : i32 to vector<128x1xi32>
    %685 = arith.cmpi slt, %683, %684 : vector<128x1xi32>
    %686 = arith.andi %681, %685 : vector<128x1xi1>
    %687 = arith.extui %686 : vector<128x1xi1> to vector<128x1xi32>
    %688 = arith.sitofp %687 : vector<128x1xi32> to vector<128x1xf32>
    %689 = vector.broadcast %688 : vector<128x1xf32> to vector<128x128xf32>
    %690 = arith.mulf %667, %689 : vector<128x128xf32>
    %691 = arith.truncf %690 : vector<128x128xf32> to vector<128x128xbf16>
    %c96_i32 = arith.constant 96 : i32
    %692 = tpu.dynamic_rotate %507 by %c96_i32 dim 0 : vector<128x128xf32>, i32 -> vector<128x128xf32>
    %c1_i32_236 = arith.constant 1 : i32
    %693 = vector.broadcast %c1_i32_236 : i32 to vector<128x1xi32>
    %694 = arith.addi %515, %693 : vector<128x1xi32>
    %c0_i32_237 = arith.constant 0 : i32
    %695 = vector.broadcast %c0_i32_237 : i32 to vector<128x1xi32>
    %696 = arith.cmpi sge, %694, %695 : vector<128x1xi32>
    %c1_i32_238 = arith.constant 1 : i32
    %697 = vector.broadcast %c1_i32_238 : i32 to vector<128x1xi32>
    %698 = arith.addi %515, %697 : vector<128x1xi32>
    %c2_i32_239 = arith.constant 2 : i32
    %699 = vector.broadcast %c2_i32_239 : i32 to vector<128x1xi32>
    %700 = arith.cmpi slt, %698, %699 : vector<128x1xi32>
    %701 = arith.andi %696, %700 : vector<128x1xi1>
    %c0_i32_240 = arith.constant 0 : i32
    %702 = vector.broadcast %c0_i32_240 : i32 to vector<128x1xi32>
    %703 = arith.addi %517, %702 : vector<128x1xi32>
    %c0_i32_241 = arith.constant 0 : i32
    %704 = vector.broadcast %c0_i32_241 : i32 to vector<128x1xi32>
    %705 = arith.cmpi sge, %703, %704 : vector<128x1xi32>
    %706 = arith.andi %701, %705 : vector<128x1xi1>
    %c0_i32_242 = arith.constant 0 : i32
    %707 = vector.broadcast %c0_i32_242 : i32 to vector<128x1xi32>
    %708 = arith.addi %517, %707 : vector<128x1xi32>
    %c2_i32_243 = arith.constant 2 : i32
    %709 = vector.broadcast %c2_i32_243 : i32 to vector<128x1xi32>
    %710 = arith.cmpi slt, %708, %709 : vector<128x1xi32>
    %711 = arith.andi %706, %710 : vector<128x1xi1>
    %712 = arith.extui %711 : vector<128x1xi1> to vector<128x1xi32>
    %713 = arith.sitofp %712 : vector<128x1xi32> to vector<128x1xf32>
    %714 = vector.broadcast %713 : vector<128x1xf32> to vector<128x128xf32>
    %715 = arith.mulf %692, %714 : vector<128x128xf32>
    %716 = arith.truncf %715 : vector<128x128xf32> to vector<128x128xbf16>
    %c92_i32 = arith.constant 92 : i32
    %717 = tpu.dynamic_rotate %507 by %c92_i32 dim 0 : vector<128x128xf32>, i32 -> vector<128x128xf32>
    %c1_i32_244 = arith.constant 1 : i32
    %718 = vector.broadcast %c1_i32_244 : i32 to vector<128x1xi32>
    %719 = arith.addi %515, %718 : vector<128x1xi32>
    %c0_i32_245 = arith.constant 0 : i32
    %720 = vector.broadcast %c0_i32_245 : i32 to vector<128x1xi32>
    %721 = arith.cmpi sge, %719, %720 : vector<128x1xi32>
    %c1_i32_246 = arith.constant 1 : i32
    %722 = vector.broadcast %c1_i32_246 : i32 to vector<128x1xi32>
    %723 = arith.addi %515, %722 : vector<128x1xi32>
    %c2_i32_247 = arith.constant 2 : i32
    %724 = vector.broadcast %c2_i32_247 : i32 to vector<128x1xi32>
    %725 = arith.cmpi slt, %723, %724 : vector<128x1xi32>
    %726 = arith.andi %721, %725 : vector<128x1xi1>
    %c1_i32_248 = arith.constant 1 : i32
    %727 = vector.broadcast %c1_i32_248 : i32 to vector<128x1xi32>
    %728 = arith.addi %517, %727 : vector<128x1xi32>
    %c0_i32_249 = arith.constant 0 : i32
    %729 = vector.broadcast %c0_i32_249 : i32 to vector<128x1xi32>
    %730 = arith.cmpi sge, %728, %729 : vector<128x1xi32>
    %731 = arith.andi %726, %730 : vector<128x1xi1>
    %c1_i32_250 = arith.constant 1 : i32
    %732 = vector.broadcast %c1_i32_250 : i32 to vector<128x1xi32>
    %733 = arith.addi %517, %732 : vector<128x1xi32>
    %c2_i32_251 = arith.constant 2 : i32
    %734 = vector.broadcast %c2_i32_251 : i32 to vector<128x1xi32>
    %735 = arith.cmpi slt, %733, %734 : vector<128x1xi32>
    %736 = arith.andi %731, %735 : vector<128x1xi1>
    %737 = arith.extui %736 : vector<128x1xi1> to vector<128x1xi32>
    %738 = arith.sitofp %737 : vector<128x1xi32> to vector<128x1xf32>
    %739 = vector.broadcast %738 : vector<128x1xf32> to vector<128x128xf32>
    %740 = arith.mulf %717, %739 : vector<128x128xf32>
    %741 = arith.truncf %740 : vector<128x128xf32> to vector<128x128xbf16>
    %742 = tpu.concatenate %542, %567, %592, %617, %641, %666, %691, %716, %741 in 1 : vector<128x128xbf16>, vector<128x128xbf16>, vector<128x128xbf16>, vector<128x128xbf16>, vector<128x128xbf16>, vector<128x128xbf16>, vector<128x128xbf16>, vector<128x128xbf16>, vector<128x128xbf16> -> vector<128x1152xbf16>
    %cst_252 = arith.constant dense<0.000000e+00> : vector<128x128xf32>
    %743 = tpu.matmul %742, %512, %cst_252 {dimension_numbers = #tpu.dot_dimension_numbers<[1], [0], [0], [1], [0, 0, 1, 1], [], []>} : vector<128x1152xbf16>, vector<1152x128xbf16>, vector<128x128xf32> -> vector<128x128xf32>
    %744 = vector.broadcast %513 : vector<1x128xf32> to vector<128x128xf32>
    %745 = arith.addf %743, %744 : vector<128x128xf32>
    %cst_253 = arith.constant 0.000000e+00 : f32
    %746 = vector.broadcast %cst_253 : f32 to vector<128x128xf32>
    %747 = arith.maximumf %745, %746 : vector<128x128xf32>
    %c124_i32_254 = arith.constant 124 : i32
    %748 = tpu.dynamic_rotate %747 by %c124_i32_254 dim 0 : vector<128x128xf32>, i32 -> vector<128x128xf32>
    %749 = arith.maximumf %747, %748 : vector<128x128xf32>
    %c96_i32_255 = arith.constant 96 : i32
    %750 = tpu.dynamic_rotate %749 by %c96_i32_255 dim 0 : vector<128x128xf32>, i32 -> vector<128x128xf32>
    %751 = arith.maximumf %749, %750 : vector<128x128xf32>
    %752 = arith.truncf %751 : vector<128x128xf32> to vector<128x128xbf16>
    %c0_256 = arith.constant 0 : index
    %c0_257 = arith.constant 0 : index
    %753 = vector.load %arg1[%c0_256, %c0_257] : memref<2x128xbf16, #tpu.memory_space<vmem>>, vector<2x128xbf16>
    %cst_258 = arith.constant dense<0.000000e+00> : vector<2x128xf32>
    %754 = tpu.matmul %753, %752, %cst_258 {dimension_numbers = #tpu.dot_dimension_numbers<[1], [0], [0], [1], [0, 0, 1, 1], [], []>} : vector<2x128xbf16>, vector<128x128xbf16>, vector<2x128xf32> -> vector<2x128xf32>
    %755 = arith.truncf %754 : vector<2x128xf32> to vector<2x128xbf16>
    %c4_i32_259 = arith.constant 4 : i32
    %756 = tpu.memref_slice %arg21[%c4_i32_259] : memref<8x!tpu.dma_semaphore, #tpu.memory_space<semaphore_mem>> -> memref<1x!tpu.dma_semaphore, #tpu.memory_space<semaphore_mem>>
    %757 = tpu.memref_squeeze %756 : memref<1x!tpu.dma_semaphore, #tpu.memory_space<semaphore_mem>> -> memref<!tpu.dma_semaphore, #tpu.memory_space<semaphore_mem>>
    tpu.wait_dma2 semaphore(%757 : memref<!tpu.dma_semaphore, #tpu.memory_space<semaphore_mem>>) src(%arg8 : memref<128x512xbf16, #tpu.memory_space<any>>) dst(%arg17 : memref<128x512xbf16, #tpu.memory_space<vmem>>)
    %c5_i32_260 = arith.constant 5 : i32
    %758 = tpu.memref_slice %arg21[%c5_i32_260] : memref<8x!tpu.dma_semaphore, #tpu.memory_space<semaphore_mem>> -> memref<1x!tpu.dma_semaphore, #tpu.memory_space<semaphore_mem>>
    %759 = tpu.memref_squeeze %758 : memref<1x!tpu.dma_semaphore, #tpu.memory_space<semaphore_mem>> -> memref<!tpu.dma_semaphore, #tpu.memory_space<semaphore_mem>>
    tpu.wait_dma2 semaphore(%759 : memref<!tpu.dma_semaphore, #tpu.memory_space<semaphore_mem>>) src(%arg9 : memref<1x512xf32, #tpu.memory_space<any>>) dst(%arg18 : memref<1x512xf32, #tpu.memory_space<vmem>>)
    %c0_261 = arith.constant 0 : index
    %c0_262 = arith.constant 0 : index
    %760 = vector.load %arg17[%c0_261, %c0_262] : memref<128x512xbf16, #tpu.memory_space<vmem>>, vector<128x512xbf16>
    %cst_263 = arith.constant dense<0.000000e+00> : vector<2x512xf32>
    %761 = tpu.matmul %755, %760, %cst_263 {dimension_numbers = #tpu.dot_dimension_numbers<[1], [0], [0], [1], [0, 0, 1, 1], [], []>} : vector<2x128xbf16>, vector<128x512xbf16>, vector<2x512xf32> -> vector<2x512xf32>
    %c0_264 = arith.constant 0 : index
    %c0_265 = arith.constant 0 : index
    %762 = vector.load %arg18[%c0_264, %c0_265] : memref<1x512xf32, #tpu.memory_space<vmem>>, vector<1x512xf32>
    %763 = vector.broadcast %762 : vector<1x512xf32> to vector<2x512xf32>
    %764 = arith.addf %761, %763 : vector<2x512xf32>
    %cst_266 = arith.constant 0.000000e+00 : f32
    %765 = vector.broadcast %cst_266 : f32 to vector<2x512xf32>
    %766 = arith.maximumf %764, %765 : vector<2x512xf32>
    %c6_i32_267 = arith.constant 6 : i32
    %767 = tpu.memref_slice %arg21[%c6_i32_267] : memref<8x!tpu.dma_semaphore, #tpu.memory_space<semaphore_mem>> -> memref<1x!tpu.dma_semaphore, #tpu.memory_space<semaphore_mem>>
    %768 = tpu.memref_squeeze %767 : memref<1x!tpu.dma_semaphore, #tpu.memory_space<semaphore_mem>> -> memref<!tpu.dma_semaphore, #tpu.memory_space<semaphore_mem>>
    tpu.wait_dma2 semaphore(%768 : memref<!tpu.dma_semaphore, #tpu.memory_space<semaphore_mem>>) src(%arg10 : memref<512x128xbf16, #tpu.memory_space<any>>) dst(%arg19 : memref<512x128xbf16, #tpu.memory_space<vmem>>)
    %c7_i32_268 = arith.constant 7 : i32
    %769 = tpu.memref_slice %arg21[%c7_i32_268] : memref<8x!tpu.dma_semaphore, #tpu.memory_space<semaphore_mem>> -> memref<1x!tpu.dma_semaphore, #tpu.memory_space<semaphore_mem>>
    %770 = tpu.memref_squeeze %769 : memref<1x!tpu.dma_semaphore, #tpu.memory_space<semaphore_mem>> -> memref<!tpu.dma_semaphore, #tpu.memory_space<semaphore_mem>>
    tpu.wait_dma2 semaphore(%770 : memref<!tpu.dma_semaphore, #tpu.memory_space<semaphore_mem>>) src(%arg11 : memref<1x128xf32, #tpu.memory_space<any>>) dst(%arg20 : memref<1x128xf32, #tpu.memory_space<vmem>>)
    %771 = arith.truncf %766 : vector<2x512xf32> to vector<2x512xbf16>
    %c0_269 = arith.constant 0 : index
    %c0_270 = arith.constant 0 : index
    %772 = vector.load %arg19[%c0_269, %c0_270] : memref<512x128xbf16, #tpu.memory_space<vmem>>, vector<512x128xbf16>
    %cst_271 = arith.constant dense<0.000000e+00> : vector<2x128xf32>
    %773 = tpu.matmul %771, %772, %cst_271 {dimension_numbers = #tpu.dot_dimension_numbers<[1], [0], [0], [1], [0, 0, 1, 1], [], []>} : vector<2x512xbf16>, vector<512x128xbf16>, vector<2x128xf32> -> vector<2x128xf32>
    %c0_272 = arith.constant 0 : index
    %c0_273 = arith.constant 0 : index
    %774 = vector.load %arg20[%c0_272, %c0_273] : memref<1x128xf32, #tpu.memory_space<vmem>>, vector<1x128xf32>
    %775 = vector.broadcast %774 : vector<1x128xf32> to vector<2x128xf32>
    %776 = arith.addf %773, %775 : vector<2x128xf32>
    %c0_274 = arith.constant 0 : index
    %c0_275 = arith.constant 0 : index
    %777 = vector.load %arg12[%c0_274, %c0_275] : memref<2x128xf32, #tpu.memory_space<vmem>>, vector<2x128xf32>
    tpu.vector_store %arg12[%c0_274, %c0_275], %776 {strides = array<i32>} : memref<2x128xf32, #tpu.memory_space<vmem>>, vector<2x128xf32>,
    return
  }
}

</mosaic_0001>

<bundles_post_ra>
// kernel: vgg_forward_fused.1
= control target key start
LH: loop header
LB: loop body
LE: loop exit
PB: predicated region body
PF: predicated region fallthrough
CT: control target
= control target key end

     0   :  { %17 = vsyncpa [#allocation12], 0  ;;  %s17093_s0 = inlined_call_operand.vmem [shape: f32[128,128], index: 0, kind: input, shape index: {}]   ;;  %s17094_s1 = inlined_call_operand.vmem [shape: bf16[2,128], index: 1, kind: input, shape index: {}]   ;;  %s17095_s2 = inlined_call_operand.hbm [shape: bf16[1152,128], index: 2, kind: input, shape index: {}]   ;;  %s17096_s3 = inlined_call_operand.vmem [shape: f32[1,128], index: 3, kind: input, shape index: {}]   ;;  %s17097_s4 = inlined_call_operand.hbm [shape: bf16[1152,128], index: 4, kind: input, shape index: {}]   ;;  %s17098_s5 = inlined_call_operand.vmem [shape: f32[1,128], index: 5, kind: input, shape index: {}]   ;;  %s17099_s6 = inlined_call_operand.hbm [shape: bf16[1152,128], index: 6, kind: input, shape index: {}]   ;;  %s17100_s7 = inlined_call_operand.vmem [shape: f32[1,128], index: 7, kind: input, shape index: {}]   ;;  %s17101_s8 = inlined_call_operand.vmem [shape: bf16[128,512], index: 8, kind: input, shape index: {}]   ;;  %s17102_s9 = inlined_call_operand.vmem [shape: f32[1,512], index: 9, kind: input, shape index: {}]   ;;  %s17103_s10 = inlined_call_operand.hbm [shape: bf16[512,128], index: 10, kind: input, shape index: {}]   ;;  %s17104_s11 = inlined_call_operand.vmem [shape: f32[1,128], index: 11, kind: input, shape index: {}]   ;;  %s17105_s12 = inlined_call_operand.hbm [shape: f32[2,128], index: 12, kind: output, shape index: {}]  }
   0x1   :  { %18 = vsyncpa [#allocation13], 0  ;;  %s10352_s21 = smov [#allocation11]  }
   0x2   :  { %s28_s22 = sshll.u32 %s10352_s21, 4  ;;  %s29_s22 = int_to_ptr.vmem [resolvable:$true] %s28_s22 }
   0x3   :  { %s10240_s23 = scalar_lea.vmem %s29_s22, 9216  ;;  %p10245_p1 = scmp.lt.s32.totalorder %s29_s22, %s29_s22 }
   0x4   :  { %p10241_p0 = scmp.ne.s32.totalorder %s29_s22, %s10240_s23  ;;  %p10246_p2 = scmp.lt.s32.totalorder %s10240_s23, %s10240_s23 }
   0x6   :  { %p10247_p3 = por %p10246_p2, %p10245_p1 }
   0x8   :  { %p10248_p4 = pnand %p10247_p3, %p10241_p0 }
   0xa   :  { %10251 = shalt.err (!%p10248_p4)
}
   0xb   :  { %s10353_s24 = smov 64   ;;  %s10354_s25 = smov 4  }
   0xc   :  { %34 = dma.hbm_to_vmem [thread:$0]  %s17095_s2, 9216, %s29_s22, [#allocation12], %s10353_s24, %s10353_s24, %s10354_s25  }
   0xd   :  { %10332 = dma.done.wait [#allocation12], 9216  }
   0xe   :  { %10333 = vsyncadd [#allocation12], 4294958080  ;;  %s10355_s28 = smov [#allocation2]  }
   0xf   :  { %s48_s29 = sshll.u32 %s10355_s28, 4  ;;  %s49_s29 = int_to_ptr.vmem [resolvable:$true] %s48_s29 }
  0x10   :  { %s10260_s30 = scalar_lea.vmem %s49_s29, 9216  ;;  %p10265_p6 = scmp.lt.s32.totalorder %s49_s29, %s49_s29 }
  0x11   :  { %p10261_p5 = scmp.ne.s32.totalorder %s49_s29, %s10260_s30  ;;  %p10266_p7 = scmp.lt.s32.totalorder %s10260_s30, %s10260_s30 }
  0x13   :  { %p10267_p8 = por %p10266_p7, %p10265_p6 }
  0x15   :  { %p10268_p9 = pnand %p10267_p8, %p10261_p5 }
  0x17   :  { %10271 = shalt.err (!%p10268_p9)  }
  0x18   :  { %51 = dma.hbm_to_vmem [thread:$0]  %s17097_s4, 9216, %s49_s29, [#allocation10]  ;;  %v71_v0 = vld [vmem:[%s17098_s5] sm:$0x1] }
  0x19   :  { %72 = vst [vmem:[#allocation3] sm:$0x1] %v71_v0 }
  0x1a   :  { %98 = vsyncadd [#allocation10 + $0x1], 16  ;;  %v130_v1 = vld [vmem:[%s17100_s7] sm:$0x1]  ;;  %s10356_s18 = smov [#allocation4]  }
  0x1b   :  { %s107_s19 = sshll.u32 %s10356_s18, 4  ;;  %131 = vst [vmem:[#allocation5] sm:$0x1] %v130_v1  ;;  %s108_s19 = int_to_ptr.vmem [resolvable:$true] %s107_s19 }
  0x1c   :  { %s10280_s20 = scalar_lea.vmem %s108_s19, 9216  ;;  %p10285_p11 = scmp.lt.s32.totalorder %s108_s19, %s108_s19 }
  0x1d   :  { %p10281_p10 = scmp.ne.s32.totalorder %s108_s19, %s10280_s20  ;;  %p10286_p12 = scmp.lt.s32.totalorder %s10280_s20, %s10280_s20 }
  0x1f   :  { %p10287_p13 = por %p10286_p12, %p10285_p11 }
  0x21   :  { %p10288_p0 = pnand %p10287_p13, %p10281_p10 }
  0x23   :  { %10291 = shalt.err (!%p10288_p0)  }
  0x24   :  { %110 = dma.hbm_to_vmem [thread:$0]  %s17099_s6, 9216, %s108_s19, [#allocation10 + $0x2] }
  0x25   :  { %157 = vsyncadd [#allocation10 + $0x3], 16  ;;  %v10445_v2 = vld [vmem:[%s17101_s8] sm:$0xff]  ;;  %v10450_v3 = vld [vmem:[%s17101_s8 + $0x8] sm:$0xff] }
  0x26   :  { %17844 = vst [vmem:[#allocation38_spill] sm:$0xff] %v10445_v2  ;;  %17845 = vst [vmem:[#allocation39_spill] sm:$0xff] %v10450_v3  ;;  %v10455_v4 = vld [vmem:[%s17101_s8 + $0x10] sm:$0xff]  ;;  %v10460_v5 = vld [vmem:[%s17101_s8 + $0x18] sm:$0xff] }
  0x27   :  { %17846 = vst [vmem:[#allocation40_spill] sm:$0xff] %v10455_v4  ;;  %17847 = vst [vmem:[#allocation41_spill] sm:$0xff] %v10460_v5  ;;  %v10465_v6 = vld [vmem:[%s17101_s8 + $0x20] sm:$0xff]  ;;  %v10470_v7 = vld [vmem:[%s17101_s8 + $0x28] sm:$0xff] }
  0x28   :  { %17848 = vst [vmem:[#allocation42_spill] sm:$0xff] %v10465_v6  ;;  %17849 = vst [vmem:[#allocation43_spill] sm:$0xff] %v10470_v7  ;;  %v10475_v8 = vld [vmem:[%s17101_s8 + $0x30] sm:$0xff]  ;;  %v10480_v9 = vld [vmem:[%s17101_s8 + $0x38] sm:$0xff] }
  0x29   :  { %17850 = vst [vmem:[#allocation44_spill] sm:$0xff] %v10475_v8  ;;  %17851 = vst [vmem:[#allocation45_spill] sm:$0xff] %v10480_v9  ;;  %v10485_v10 = vld [vmem:[%s17101_s8 + $0x40] sm:$0xff]  ;;  %v10490_v11 = vld [vmem:[%s17101_s8 + $0x48] sm:$0xff] }
  0x2a   :  { %17852 = vst [vmem:[#allocation46_spill] sm:$0xff] %v10485_v10  ;;  %17853 = vst [vmem:[#allocation47_spill] sm:$0xff] %v10490_v11  ;;  %v10495_v12 = vld [vmem:[%s17101_s8 + $0x50] sm:$0xff]  ;;  %v10500_v13 = vld [vmem:[%s17101_s8 + $0x58] sm:$0xff] }
  0x2b   :  { %17854 = vst [vmem:[#allocation48_spill] sm:$0xff] %v10495_v12  ;;  %17855 = vst [vmem:[#allocation49_spill] sm:$0xff] %v10500_v13  ;;  %v10505_v14 = vld [vmem:[%s17101_s8 + $0x60] sm:$0xff]  ;;  %v10510_v15 = vld [vmem:[%s17101_s8 + $0x68] sm:$0xff] }
  0x2c   :  { %17856 = vst [vmem:[#allocation50_spill] sm:$0xff] %v10505_v14  ;;  %17857 = vst [vmem:[#allocation51_spill] sm:$0xff] %v10510_v15  ;;  %v10515_v16 = vld [vmem:[%s17101_s8 + $0x70] sm:$0xff]  ;;  %v10520_v17 = vld [vmem:[%s17101_s8 + $0x78] sm:$0xff] }
  0x2d   :  { %17858 = vst [vmem:[#allocation52_spill] sm:$0xff] %v10515_v16  ;;  %17859 = vst [vmem:[#allocation53_spill] sm:$0xff] %v10520_v17  ;;  %v10525_v18 = vld [vmem:[%s17101_s8 + $0x80] sm:$0xff]  ;;  %v10530_v19 = vld [vmem:[%s17101_s8 + $0x88] sm:$0xff] }
  0x2e   :  { %17860 = vst [vmem:[#allocation54_spill] sm:$0xff] %v10525_v18  ;;  %17861 = vst [vmem:[#allocation55_spill] sm:$0xff] %v10530_v19  ;;  %v10535_v20 = vld [vmem:[%s17101_s8 + $0x90] sm:$0xff]  ;;  %v10540_v21 = vld [vmem:[%s17101_s8 + $0x98] sm:$0xff] }
  0x2f   :  { %17862 = vst [vmem:[#allocation56_spill] sm:$0xff] %v10535_v20  ;;  %17863 = vst [vmem:[#allocation57_spill] sm:$0xff] %v10540_v21  ;;  %v10545_v22 = vld [vmem:[%s17101_s8 + $0xa0] sm:$0xff]  ;;  %v10550_v23 = vld [vmem:[%s17101_s8 + $0xa8] sm:$0xff] }
  0x30   :  { %17864 = vst [vmem:[#allocation58_spill] sm:$0xff] %v10545_v22  ;;  %17865 = vst [vmem:[#allocation59_spill] sm:$0xff] %v10550_v23  ;;  %v10555_v24 = vld [vmem:[%s17101_s8 + $0xb0] sm:$0xff]  ;;  %v10560_v25 = vld [vmem:[%s17101_s8 + $0xb8] sm:$0xff] }
  0x31   :  { %17866 = vst [vmem:[#allocation60_spill] sm:$0xff] %v10555_v24  ;;  %17867 = vst [vmem:[#allocation61_spill] sm:$0xff] %v10560_v25  ;;  %v10565_v26 = vld [vmem:[%s17101_s8 + $0xc0] sm:$0xff]  ;;  %v10570_v27 = vld [vmem:[%s17101_s8 + $0xc8] sm:$0xff] }
  0x32   :  { %17868 = vst [vmem:[#allocation62_spill] sm:$0xff] %v10565_v26  ;;  %17869 = vst [vmem:[#allocation63_spill] sm:$0xff] %v10570_v27  ;;  %v10575_v28 = vld [vmem:[%s17101_s8 + $0xd0] sm:$0xff]  ;;  %v10580_v29 = vld [vmem:[%s17101_s8 + $0xd8] sm:$0xff] }
  0x33   :  { %17870 = vst [vmem:[#allocation64_spill] sm:$0xff] %v10575_v28  ;;  %17871 = vst [vmem:[#allocation65_spill] sm:$0xff] %v10580_v29  ;;  %v10585_v30 = vld [vmem:[%s17101_s8 + $0xe0] sm:$0xff]  ;;  %v10590_v31 = vld [vmem:[%s17101_s8 + $0xe8] sm:$0xff] }
  0x34   :  { %17872 = vst [vmem:[#allocation66_spill] sm:$0xff] %v10585_v30  ;;  %17873 = vst [vmem:[#allocation67_spill] sm:$0xff] %v10590_v31  ;;  %v10595_v32 = vld [vmem:[%s17101_s8 + $0xf0] sm:$0xff]  ;;  %v10600_v33 = vld [vmem:[%s17101_s8 + $0xf8] sm:$0xff] }
  0x35   :  { %17874 = vst [vmem:[#allocation68_spill] sm:$0xff] %v10595_v32  ;;  %17875 = vst [vmem:[#allocation69_spill] sm:$0xff] %v10600_v33 }
  0x36   :  { %263 = vsyncadd [#allocation10 + $0x4], 4096  ;;  %v283_v34 = vld [vmem:[%s17102_s9] sm:$0xf] }
  0x37   :  { %284 = vst [vmem:[#allocation7] sm:$0xf] %v283_v34 }
  0x38   :  { %310 = vsyncadd [#allocation10 + $0x5], 64  ;;  %v342_v35 = vld [vmem:[%s17104_s11] sm:$0x1]  ;;  %s10357_s21 = smov [#allocation8]  }
  0x39   :  { %s319_s5 = sshll.u32 %s10357_s21, 4  ;;  %343 = vst [vmem:[#allocation9] sm:$0x1] %v342_v35  ;;  %s320_s5 = int_to_ptr.vmem [resolvable:$true] %s319_s5 }
  0x3a   :  { %s10300_s22 = scalar_lea.vmem %s320_s5, 4096  ;;  %p10305_p2 = scmp.lt.s32.totalorder %s320_s5, %s320_s5 }
  0x3b   :  { %p10301_p1 = scmp.ne.s32.totalorder %s320_s5, %s10300_s22  ;;  %p10306_p3 = scmp.lt.s32.totalorder %s10300_s22, %s10300_s22 }
  0x3d   :  { %p10307_p4 = por %p10306_p3, %p10305_p2 }
  0x3f   :  { %p10308_p5 = pnand %p10307_p4, %p10301_p1 }
  0x41   :  { %10311 = shalt.err (!%p10308_p5)  }
  0x42   :  { %322 = dma.hbm_to_vmem [thread:$0]  %s17103_s10, 4096, %s320_s5, [#allocation10 + $0x6] }
  0x43   :  { %369 = vsyncadd [#allocation10 + $0x7], 16  ;;  %v370_v36 = vlaneseq  ;;  %v9971_v37 = vld [vmem:[#allocation11 + $0x78] sm:$0xff]   ;;  %v9975_v42 = vld [vmem:[#allocation11 + $0x70] sm:$0xff]   ;;  %v17937_v32 = vmov 0 }
  0x44   :  { %v9972_v38 = vld [vmem:[#allocation11 + $0x38] sm:$0xff]   ;;  %8976 = vmatprep.subr.bf16.mxu0 %v9971_v37  ;;  %v9976_v43 = vld [vmem:[#allocation11 + $0x30] sm:$0xff]   ;;  %v9979_v47 = vld [vmem:[#allocation11 + $0x68] sm:$0xff]  }
  0x45   :  { %v10611_v39 = vshrl.u32 %v370_v36, 7  ;;  %v9973_v40 = vld [vmem:[#allocation11 + $0xf8] sm:$0xff]   ;;  %8977 = vmatpush3.bf16.msra.mxu0 %v9972_v38  ;;  %v9977_v45 = vld [vmem:[#allocation11 + $0xf0] sm:$0xff]   ;;  %v9980_v49 = vld [vmem:[#allocation11 + $0x28] sm:$0xff]  }
  0x46   :  { %v9974_v41 = vld [vmem:[#allocation11 + $0xb8] sm:$0xff]   ;;  %9040 = vmatprep.subr.bf16.mxu1 %v9973_v40  ;;  %8978 = vmatprep.subr.bf16.mxu0 %v9975_v42  ;;  %v9978_v46 = vld [vmem:[#allocation11 + $0xb0] sm:$0xff]   ;;  %v9981_v51 = vld [vmem:[#allocation11 + $0xe8] sm:$0xff]  }
  0x47   :  { %17876 = vst [vmem:[#allocation70_spill] sm:$0xff] %v10611_v39  ;;  %9041 = vmatpush3.bf16.msra.mxu1 %v9974_v41  ;;  %v372_v44 = vadd.s32 8, %v10611_v39  ;;  %v387_v48 = vshra.s32 %v10611_v39, 3  ;;  %v9982_v52 = vld [vmem:[#allocation11 + $0xa8] sm:$0xff]   ;;  %v9983_v53 = vld [vmem:[#allocation11 + $0x60] sm:$0xff]   ;;  %v10620_v58 = vand.u32 7, %v10611_v39 }
  0x48   :  { %9042 = vmatprep.subr.bf16.mxu1 %v9977_v45  ;;  %v9984_v55 = vld [vmem:[#allocation11 + $0x20] sm:$0xff]   ;;  %v9987_v61 = vld [vmem:[#allocation11 + $0x58] sm:$0xff]   ;;  %v9991_v37 = vld [vmem:[#allocation11 + $0x50] sm:$0xff]   ;;  %vm17148_vm8 = vcmp.lt.s32.totalorder %v10611_v39, 1  ;;  %vm17174_vm13 = vcmp.lt.s32.totalorder %v10611_v39, 7 }
  0x49   :  { %8979 = vmatpush3.bf16.msra.mxu0 %v9976_v43  ;;  %v388_v50 = vshra.s32 %v372_v44, 3  ;;  %v10615_v54 = vand.u32 7, %v387_v48  ;;  %v9985_v57 = vld [vmem:[#allocation11 + $0xe0] sm:$0xff]   ;;  %17879 = vst [vmem:[#allocation73_spill] sm:$0xff] %v10620_v58  ;;  %v10622_v60 = vand.u32 7, %v372_v44  ;;  %v9988_v63 = vld [vmem:[#allocation11 + $0x18] sm:$0xff]  }
  0x4a   :  { %8980 = vmatprep.subr.bf16.mxu0 %v9979_v47  ;;  %v9986_v59 = vld [vmem:[#allocation11 + $0xa0] sm:$0xff]   ;;  %v9989_v1 = vld [vmem:[#allocation11 + $0xd8] sm:$0xff]   ;;  %v10627_v34 = vadd.s32 4294967295, %v10620_v58  ;;  %v10633_v38 = vadd.s32 1, %v10620_v58  ;;  %v9992_v40 = vld [vmem:[#allocation11 + $0x10] sm:$0xff]  }
  0x4b   :  { %9043 = vmatpush3.bf16.msra.mxu1 %v9978_v46  ;;  %17877 = vst [vmem:[#allocation71_spill] sm:$0xff] %v10615_v54  ;;  %v10617_v56 = vand.u32 7, %v388_v50  ;;  %17880 = vst [vmem:[#allocation74_spill] sm:$0xff] %v10622_v60  ;;  %v629_v62 = vadd.s32 4294967295, %v10615_v54  ;;  %v9990_v35 = vld [vmem:[#allocation11 + $0x98] sm:$0xff]   ;;  %v10630_v36 = vadd.s32 4294967295, %v10622_v60 }
  0x4c   :  { %9044 = vmatprep.subr.bf16.mxu1 %v9981_v51  ;;  %v10636_v41 = vadd.s32 1, %v10622_v60  ;;  %v9993_v42 = vld [vmem:[#allocation11 + $0xd0] sm:$0xff]   ;;  %vm709_vm4 = vcmp.ge.s32.totalorder %v10627_v34, 0  ;;  %v9995_v44 = vld [vmem:[#allocation11 + $0x48] sm:$0xff]   ;;  %vm17125_vm6 = vcmp.lt.s32.totalorder %v10633_v38, 8  ;;  %vm1118_vm9 = vcmp.ge.s32.totalorder %v10615_v54, 0 }
  0x4d   :  { %8981 = vmatpush3.bf16.msra.mxu0 %v9980_v49  ;;  %17878 = vst [vmem:[#allocation72_spill] sm:$0xff] %v10617_v56  ;;  %v630_v0 = vadd.s32 4294967295, %v10617_v56  ;;  %vm645_vm0 = vcmp.ge.s32.totalorder %v629_v62, 0  ;;  %vm661_vm1 = vcmp.lt.s32.totalorder %v629_v62, 8  ;;  %v9994_v43 = vld [vmem:[#allocation11 + $0x90] sm:$0xff]   ;;  %vm17122_vm5 = vcmp.ge.s32.totalorder %v10630_v36, 0 }
  0x4e   :  { %8982 = vmatprep.subr.bf16.mxu0 %v9983_v53  ;;  %17881 = vst [vmem:[#allocation75_spill] sm:$0xff] %v10636_v41  ;;  %v9996_v45 = vld [vmem:[#allocation11 + $0x8] sm:$0xff]   ;;  %vm17124_vm7 = vcmp.lt.s32.totalorder %v10636_v41, 8  ;;  %vm1119_vm10 = vcmp.ge.s32.totalorder %v10617_v56, 0  ;;  %vm1134_vm11 = vcmp.lt.s32.totalorder %v10615_v54, 8  ;;  %v9999_v48 = vld [vmem:[#allocation11 + $0x40] sm:$0xff]   ;;  %vm10665_vm14 = vmand %vm645_vm0, %vm661_vm1 }
  0x4f   :  { %9045 = vmatpush3.bf16.msra.mxu1 %v9982_v52  ;;  %vm646_vm2 = vcmp.ge.s32.totalorder %v630_v0, 0  ;;  %vm662_vm3 = vcmp.lt.s32.totalorder %v630_v0, 8  ;;  %v9997_v46 = vld [vmem:[#allocation11 + $0xc8] sm:$0xff]   ;;  %vm1135_vm12 = vcmp.lt.s32.totalorder %v10617_v56, 8  ;;  %v10000_v49 = vld [vmem:[#allocation11] sm:$0xff]   ;;  %v10648_v50 = vadd.s32 1, %v10615_v54  ;;  %vm1046_vm0 = vmand %vm10665_vm14, %vm17125_vm6 }
  0x50   :  { %9046 = vmatprep.subr.bf16.mxu1 %v9985_v57  ;;  %v9998_v47 = vld [vmem:[#allocation11 + $0x88] sm:$0xff]   ;;  %v10001_v51 = vld [vmem:[#allocation11 + $0xc0] sm:$0xff]   ;;  %v10656_v53 = vld [vmem:[%s17093_s0 + $0x78] sm:$0xff]  ;;  %v10661_v57 = vadd.s32 24, %v10611_v39 }
  0x51   :  { %8983 = vmatpush3.bf16.msra.mxu0 %v9984_v55  ;;  %v435_v52 = vld [vmem:[%s17093_s0] sm:$0xff]  ;;  %v373_v55 = vadd.s32 16, %v10611_v39  ;;  %vm10672_vm15 = vmand %vm646_vm2, %vm662_vm3  ;;  %vm1462_vm1 = vcmp.lt.s32.totalorder %v10648_v50, 8  ;;  %v10955_v10 = vld [vmem:[%s17093_s0 + $0x28] sm:$0xff] }
  0x52   :  { %8984 = vmatprep.subr.bf16.mxu0 %v9987_v61  ;;  %v596_v61 = vrot.slane %v435_v52, 7  ;;  %v10002_v62 = vld [vmem:[#allocation11 + $0x80] sm:$0xff]   ;;  %v949_v0 = vrot.slane %v435_v52, 1  ;;  %vm725_vm2 = vmand %vm10665_vm14, %vm709_vm4  ;;  %v10004_v2 = vld [vmem:[#allocation11 + $0x138] sm:$0xff]   ;;  %v390_v6 = vshra.s32 %v10661_v57, 3 }
  0x53   :  { %9047 = vmatpush3.bf16.msra.mxu1 %v9986_v59  ;;  %vm726_vm3 = vmand %vm10672_vm15, %vm17122_vm5  ;;  %v10018_v26 = vld [vmem:[#allocation11 + $0x110] sm:$0xff]   ;;  %v10019_v33 = vld [vmem:[#allocation11 + $0x1e8] sm:$0xff]  }
  0x54   :  { %9048 = vmatprep.subr.bf16.mxu1 %v9989_v1  ;;  %v17889_v1 = vrot.slane %v10656_v53, 1  ;;  %v10805_v11 = vand.u32 7, %v390_v6  ;;  %v10007_v6 = vld [vmem:[#allocation11 + $0x168] sm:$0xff]  }
  0x55   :  { %8985 = vmatpush3.bf16.msra.mxu0 %v9988_v63  ;;  %v611_v63 = vrot.slane %v10656_v53, 7 }
  0x56   :  { %8986 = vmatprep.subr.bf16.mxu0 %v9991_v37  ;;  %17899 = vst [vmem:[#allocation81_spill] sm:$0xff] %v10805_v11 }
  0x57   :  { %9049 = vmatpush3.bf16.msra.mxu1 %v9990_v35  ;;  %v17118_v35 = vmov 0.0  }
  0x58   :  { %9050 = vmatprep.subr.bf16.mxu1 %v9993_v42  ;;  %v8268_v37 = vsel %vm10665_vm14, 1.0, %v17118_v35  ;;  %v8269_v42 = vsel %vm10672_vm15, 1.0, %v17118_v35  ;;  %vm10737_vm14 = vmand %vm1118_vm9, %vm1134_vm11 }
  0x59   :  { %8987 = vmatpush3.bf16.msra.mxu0 %v9992_v40  ;;  %v10682_v40 = vld [vmem:[%s17093_s0 + $0x70] sm:$0xff]  ;;  %vm10753_vm9 = vmand %vm1119_vm10, %vm1135_vm12  ;;  %vm17896_vm12 = vcmp.ge.s32.totalorder %v10648_v50, 0 }
  0x5a   :  { %8988 = vmatprep.subr.bf16.mxu0 %v9995_v44  ;;  %v17110_v44 = vrot.slane %v10682_v40, 7  ;;  %vm1166_vm10 = vmand %vm10737_vm14, %vm709_vm4 }
  0x5b   :  { %9051 = vmatpush3.bf16.msra.mxu1 %v9994_v43  ;;  %v925_v43 = vmul.f32 %v8268_v37, %v10656_v53  ;;  %v389_v37 = vshra.s32 %v373_v55, 3  ;;  %vm1167_vm11 = vmand %vm10753_vm9, %vm17122_vm5 }
  0x5c   :  { %9052 = vmatprep.subr.bf16.mxu1 %v9997_v46  ;;  %v926_v46 = vmul.f32 %v8269_v42, %v435_v52  ;;  %v8253_v42 = vsel %vm726_vm3, 1.0, %v17118_v35 }
  0x5d   :  { %8989 = vmatpush3.bf16.msra.mxu0 %v9996_v45  ;;  %v10697_v45 = vsel %vm17148_vm8, %v611_v63, %v596_v61 }
  0x5e   :  { %8990 = vmatprep.subr.bf16.mxu0 %v9999_v48  ;;  %17886 = vst [vmem:[#allocation76_spill] sm:$0xff] %v10697_v45  ;;  %v10003_v48 = vld [vmem:[#allocation11 + $0x178] sm:$0xff]   ;;  %v941_v5 = vpack.c.bf16 %v926_v46, %v925_v43  ;;  %v806_v59 = vmul.f32 %v8253_v42, %v10697_v45  ;;  %v10745_v46 = vsel %vm17174_vm13, %v17889_v1, %v949_v0 }
  0x5f   :  { %9053 = vmatpush3.bf16.msra.mxu1 %v9998_v47  ;;  %v8252_v47 = vsel %vm725_vm2, 1.0, %v17118_v35  ;;  %vm1047_vm2 = vmand %vm10672_vm15, %vm17124_vm7  ;;  %17890 = vst [vmem:[#allocation77_spill] sm:$0xff] %v10745_v46  ;;  %vm1137_vm7 = vcmp.lt.s32.totalorder %v10805_v11, 8 }
  0x60   :  { %9054 = vmatprep.subr.bf16.mxu1 %v10001_v51  ;;  %2228 = vmatprep.mubr.bf16.mxu0 %v941_v5  ;;  %vm10801_vm15 = vmand %vm17896_vm12, %vm1462_vm1 }
  0x61   :  { %8991 = vmatpush3.bf16.msra.mxu0 %v10000_v49  ;;  %v10707_v49 = vld [vmem:[%s17093_s0 + $0x8] sm:$0xff] }
  0x62   :  { %v597_v3 = vrot.slane %v10707_v49, 7  ;;  %9104 = vmatprep.subr.bf16.mxu0 %v10003_v48  ;;  %v17114_v4 = vrot.slane %v10707_v49, 1  ;;  %v8285_v48 = vsel %vm1047_vm2, 1.0, %v17118_v35 }
  0x63   :  { %9055 = vmatpush3.bf16.msra.mxu1 %v10002_v62  ;;  %v10718_v62 = vsel %vm17148_vm8, %v17110_v44, %v611_v63  ;;  %v8316_v44 = vsel %vm10737_vm14, 1.0, %v17118_v35 }
  0x64   :  { %v805_v51 = vmul.f32 %v8252_v47, %v10718_v62  ;;  %v10731_v63 = vsel %vm17148_vm8, %v596_v61, %v597_v3  ;;  %v8284_v47 = vsel %vm1046_vm0, 1.0, %v17118_v35  ;;  %v10764_v1 = vsel %vm17174_vm13, %v949_v0, %v17114_v4  ;;  %vm1494_vm0 = vmand %vm10801_vm15, %vm709_vm4 }
  0x65   :  { %17893 = vst [vmem:[#allocation78_spill] sm:$0xff] %v10764_v1  ;;  %v1094_v5 = vmul.f32 %v8284_v47, %v10745_v46  ;;  %v10774_v7 = vmul.f32 %v8316_v44, %v435_v52  ;;  %v1095_v9 = vmul.f32 %v8285_v48, %v10764_v1  ;;  %v8300_v0 = vsel %vm1166_vm10, 1.0, %v17118_v35  ;;  %v10791_v52 = vld [vmem:[%s17093_s0 + $0x10] sm:$0xff]  ;;  %vm10833_vm4 = vmand %vm10737_vm14, %vm17125_vm6 }
  0x66   :  { %v821_v61 = vpack.c.bf16 %v806_v59, %v805_v51  ;;  %v10005_v51 = vld [vmem:[#allocation11 + $0x170] sm:$0xff]   ;;  %v8317_v59 = vsel %vm10753_vm9, 1.0, %v17118_v35  ;;  %v10786_v4 = vand.u32 7, %v389_v37  ;;  %v10793_v44 = vand.u32 7, %v373_v55 }
  0x67   :  { %v10784_v47 = vmul.f32 %v8317_v59, %v10707_v49  ;;  %v10006_v48 = vld [vmem:[#allocation11 + $0x130] sm:$0xff]   ;;  %v1230_v8 = vmul.f32 %v8300_v0, %v10697_v45  ;;  %v1110_v37 = vpack.c.bf16 %v1095_v9, %v1094_v5  ;;  %v10816_v0 = vand.u32 7, %v10661_v57 }
  0x68   :  { %2229 = vmatmul.mubr.bf16.vlgmr.msra.gmra.mxu0 %v821_v61  ;;  %17894 = vst [vmem:[#allocation79_spill] sm:$0xff] %v10786_v4  ;;  %17895 = vst [vmem:[#allocation80_spill] sm:$0xff] %v10793_v44  ;;  %v8301_v61 = vsel %vm1167_vm11, 1.0, %v17118_v35  ;;  %v631_v50 = vadd.s32 4294967295, %v10786_v4  ;;  %v8348_v9 = vsel %vm1494_vm0, 1.0, %v17118_v35  ;;  %v632_v5 = vadd.s32 4294967295, %v10805_v11 }
  0x69   :  { %9105 = vmatpush3.bf16.msra.mxu0 %v10004_v2  ;;  %v1231_v55 = vmul.f32 %v8301_v61, %v10731_v63  ;;  %17900 = vst [vmem:[#allocation82_spill] sm:$0xff] %v10816_v0  ;;  %v10821_v2 = vld [vmem:[%s17093_s0 + $0x18] sm:$0xff]  ;;  %v598_v34 = vrot.slane %v10791_v52, 7  ;;  %v10827_v61 = vadd.s32 4294967295, %v10793_v44  ;;  %v10838_v13 = vmul.f32 %v8348_v9, %v10731_v63  ;;  %v10008_v35 = vld [vmem:[#allocation11 + $0x128] sm:$0xff]  }
  0x6a   :  { %9106 = vmatprep.subr.bf16.mxu0 %v10005_v51  ;;  %vm647_vm1 = vcmp.ge.s32.totalorder %v631_v50, 0  ;;  %vm663_vm3 = vcmp.lt.s32.totalorder %v631_v50, 8  ;;  %vm648_vm2 = vcmp.ge.s32.totalorder %v632_v5, 0  ;;  %vm664_vm10 = vcmp.lt.s32.totalorder %v632_v5, 8 }
  0x6b   :  { %v1246_v51 = vpack.c.bf16 %v1231_v55, %v1230_v8  ;;  %vm10840_vm11 = vmand %vm647_vm1, %vm663_vm3  ;;  %v10846_v43 = vsel %vm17148_vm8, %v597_v3, %v598_v34  ;;  %v10849_v12 = vadd.s32 4294967295, %v10816_v0  ;;  %v10009_v8 = vld [vmem:[#allocation11 + $0x160] sm:$0xff]   ;;  %v17908_v50 = vmov 0.0   ;;  %v10014_v55 = vld [vmem:[#allocation11 + $0x118] sm:$0xff]  }
  0x6c   :  { %vm10851_vm14 = vmand %vm648_vm2, %vm664_vm10  ;;  %v8270_v9 = vsel %vm10840_vm11, 1.0, %v17908_v50  ;;  %vm17140_vm12 = vcmp.ge.s32.totalorder %v10827_v61, 0  ;;  %v17128_v5 = vrot.slane %v10821_v2, 7  ;;  %vm1120_vm0 = vcmp.ge.s32.totalorder %v10786_v4, 0 }
  0x6d   :  { %17905 = vst [vmem:[#allocation83_spill] sm:$0xff] %v10849_v12  ;;  %9107 = vmatpush3.bf16.msra.mxu0 %v10006_v48  ;;  %2325 = vmatprep.mubr.bf16.mxu1 %v1246_v51  ;;  %v8271_v3 = vsel %vm10851_vm14, 1.0, %v17908_v50  ;;  %v927_v48 = vmul.f32 %v8270_v9, %v10707_v49  ;;  %vm17139_vm1 = vcmp.ge.s32.totalorder %v10849_v12, 0  ;;  %vm727_vm3 = vmand %vm10840_vm11, %vm17140_vm12  ;;  %vm1121_vm2 = vcmp.ge.s32.totalorder %v10805_v11, 0  ;;  %v10010_v9 = vld [vmem:[#allocation11 + $0x120] sm:$0xff]  }
  0x6e   :  { %9108 = vmatprep.subr.bf16.mxu0 %v10007_v6  ;;  %2326 = vmatmul.mubr.bf16.vlgmr.msra.gmra.mxu1 %v1110_v37  ;;  %v928_v51 = vmul.f32 %v8271_v3, %v10791_v52  ;;  %vm728_vm10 = vmand %vm10851_vm14, %vm17139_vm1  ;;  %v8254_v37 = vsel %vm727_vm3, 1.0, %v17908_v50  ;;  %v10881_v6 = vsel %vm17148_vm8, %v598_v34, %v17128_v5  ;;  %vm1136_vm5 = vcmp.lt.s32.totalorder %v10786_v4, 8  ;;  %v10011_v34 = vld [vmem:[#allocation11 + $0x1f8] sm:$0xff]  }
  0x6f   :  { %17909 = vst [vmem:[#allocation84_spill] sm:$0xff] %v10881_v6  ;;  %v8255_v15 = vsel %vm728_vm10, 1.0, %v17908_v50  ;;  %v807_v3 = vmul.f32 %v8254_v37, %v10731_v63  ;;  %vm10889_vm6 = vmand %vm1120_vm0, %vm1136_vm5  ;;  %v951_v14 = vrot.slane %v10791_v52, 1  ;;  %v10903_v37 = vadd.s32 1, %v10793_v44  ;;  %9168 = vmatprep.subr.bf16.mxu1 %v10011_v34  ;;  %v10013_v34 = vld [vmem:[#allocation11 + $0x158] sm:$0xff]  }
  0x70   :  { %v942_v5 = vpack.c.bf16 %v928_v51, %v927_v48  ;;  %v808_v16 = vmul.f32 %v8255_v15, %v10846_v43  ;;  %vm10897_vm3 = vmand %vm1121_vm2, %vm1137_vm7  ;;  %v10916_v52 = vadd.s32 1, %v10816_v0  ;;  %v375_v48 = vadd.s32 32, %v10611_v39 }
  0x71   :  { %9109 = vmatpush3.bf16.msra.mxu0 %v10008_v35  ;;  %17914 = vst [vmem:[#allocation85_spill] sm:$0xff] %v10903_v37  ;;  %vm1168_vm5 = vmand %vm10889_vm6, %vm17140_vm12  ;;  %v17915_v35 = vrot.slane %v10707_v49, 1  ;;  %v376_v51 = vadd.s32 40, %v10611_v39  ;;  %vm17142_vm0 = vcmp.lt.s32.totalorder %v10903_v37, 8  ;;  %v1432_v19 = vadd.s32 1, %v10786_v4 }
  0x72   :  { %9110 = vmatprep.subr.bf16.mxu0 %v10009_v8  ;;  %17916 = vst [vmem:[#allocation86_spill] sm:$0xff] %v10916_v52  ;;  %v10012_v8 = vld [vmem:[#allocation11 + $0x1b8] sm:$0xff]   ;;  %2236 = vmatprep.mubr.bf16.mxu0 %v942_v5  ;;  %v822_v63 = vpack.c.bf16 %v808_v16, %v807_v3  ;;  %vm1169_vm7 = vmand %vm10897_vm3, %vm17139_vm1  ;;  %v8302_v49 = vsel %vm1168_vm5, 1.0, %v17908_v50  ;;  %vm17141_vm2 = vcmp.lt.s32.totalorder %v10916_v52, 8  ;;  %v10950_v20 = vand.u32 7, %v375_v48 }
  0x73   :  { %v10913_v15 = vsel %vm17174_vm13, %v17915_v35, %v951_v14  ;;  %v17917_v35 = vrot.slane %v10821_v2, 1  ;;  %v10935_v5 = vld [vmem:[%s17093_s0 + $0x20] sm:$0xff]  ;;  %v8303_v16 = vsel %vm1169_vm7, 1.0, %v17908_v50  ;;  %v1232_v3 = vmul.f32 %v8302_v49, %v10846_v43  ;;  %vm1048_vm10 = vmand %vm10840_vm11, %vm17142_vm0  ;;  %9169 = vmatpush3.bf16.msra.mxu1 %v10012_v8 }
  0x74   :  { %2237 = vmatmul.mubr.bf16.gmra.mxu0 %v822_v63  ;;  %vm1049_vm5 = vmand %vm10851_vm14, %vm17141_vm2  ;;  %v8286_v49 = vsel %vm1048_vm10, 1.0, %v17908_v50  ;;  %v392_v18 = vshra.s32 %v376_v51, 3  ;;  %17918 = vst [vmem:[#allocation87_spill] sm:$0xff] %v10950_v20  ;;  %v600_v22 = vrot.slane %v10935_v5, 7  ;;  %v10969_v27 = vadd.s32 4294967295, %v10950_v20 }
  0x75   :  { %v10929_v21 = vsel %vm17174_vm13, %v951_v14, %v17917_v35  ;;  %v391_v14 = vshra.s32 %v375_v48, 3  ;;  %9111 = vmatpush3.bf16.msra.mxu0 %v10010_v9  ;;  %v1233_v35 = vmul.f32 %v8303_v16, %v10881_v6  ;;  %v8287_v9 = vsel %vm1049_vm5, 1.0, %v17908_v50 }
  0x76   :  { %v1096_v63 = vmul.f32 %v8286_v49, %v10913_v15  ;;  %v10961_v16 = vand.u32 7, %v376_v51  ;;  %9112 = vmatprep.subr.bf16.mxu0 %v10013_v34  ;;  %v1097_v25 = vmul.f32 %v8287_v9, %v10929_v21  ;;  %v10964_v48 = vand.u32 7, %v392_v18  ;;  %17922 = vst [vmem:[#allocation91_spill] sm:$0xff] %v10969_v27  ;;  %v10016_v34 = vld [vmem:[#allocation11 + $0x1b0] sm:$0xff]  }
  0x77   :  { %v10959_v8 = vand.u32 7, %v391_v14  ;;  %v1247_v23 = vpack.c.bf16 %v1233_v35, %v1232_v3  ;;  %v17143_v51 = vrot.slane %v10955_v10, 7  ;;  %v10015_v14 = vld [vmem:[#allocation11 + $0x1f0] sm:$0xff]   ;;  %v17924_v35 = vrot.slane %v10821_v2, 7 }
  0x78   :  { %17920 = vst [vmem:[#allocation89_spill] sm:$0xff] %v10961_v16  ;;  %17921 = vst [vmem:[#allocation90_spill] sm:$0xff] %v10964_v48  ;;  %v10972_v49 = vadd.s32 4294967295, %v10961_v16  ;;  %v1111_v3 = vpack.c.bf16 %v1097_v25, %v1096_v63  ;;  %v634_v18 = vadd.s32 4294967295, %v10964_v48  ;;  %vm17165_vm10 = vcmp.ge.s32.totalorder %v10969_v27, 0  ;;  %9170 = vmatprep.subr.bf16.mxu1 %v10015_v14 }
  0x79   :  { %17919 = vst [vmem:[#allocation88_spill] sm:$0xff] %v10959_v8  ;;  %v633_v24 = vadd.s32 4294967295, %v10959_v8  ;;  %9113 = vmatpush3.bf16.msra.mxu0 %v10014_v55  ;;  %2333 = vmatprep.mubr.bf16.mxu1 %v1247_v23  ;;  %v10980_v9 = vsel %vm17148_vm8, %v17924_v35, %v600_v22  ;;  %v10017_v55 = vld [vmem:[#allocation11 + $0x150] sm:$0xff]   ;;  %v10993_v25 = vsel %vm17148_vm8, %v600_v22, %v17143_v51  ;;  %vm1123_vm0 = vcmp.ge.s32.totalorder %v10964_v48, 0 }
  0x7a   :  { %17923 = vst [vmem:[#allocation92_spill] sm:$0xff] %v10972_v49  ;;  %17925 = vst [vmem:[#allocation93_spill] sm:$0xff] %v10980_v9  ;;  %vm17149_vm5 = vcmp.ge.s32.totalorder %v10972_v49, 0  ;;  %2334 = vmatmul.mubr.bf16.gmra.mxu1 %v1111_v3  ;;  %vm650_vm1 = vcmp.ge.s32.totalorder %v634_v18, 0  ;;  %vm666_vm12 = vcmp.lt.s32.totalorder %v634_v18, 8  ;;  %v953_v14 = vrot.slane %v10935_v5, 1  ;;  %9114 = vmatprep.subr.bf16.mxu0 %v10017_v55 }
  0x7b   :  { %vm649_vm14 = vcmp.ge.s32.totalorder %v633_v24, 0  ;;  %vm665_vm7 = vcmp.lt.s32.totalorder %v633_v24, 8  ;;  %17928 = vst [vmem:[#allocation94_spill] sm:$0xff] %v10993_v25  ;;  %vm10996_vm11 = vmand %vm650_vm1, %vm666_vm12  ;;  %v11009_v22 = vld [vmem:[%s17093_s0 + $0x30] sm:$0xff]  ;;  %v11014_v3 = vld [vmem:[%s17093_s0 + $0x38] sm:$0xff]  ;;  %9171 = vmatpush3.bf16.msra.mxu1 %v10016_v34  ;;  %v11026_v29 = vadd.s32 1, %v10950_v20 }
  0x7c   :  { %vm10985_vm2 = vmand %vm649_vm14, %vm665_vm7  ;;  %vm1138_vm14 = vcmp.lt.s32.totalorder %v10959_v8, 8  ;;  %vm1139_vm7 = vcmp.lt.s32.totalorder %v10964_v48, 8  ;;  %v8273_v18 = vsel %vm10996_vm11, 1.0, %v17908_v50  ;;  %v11041_v51 = vadd.s32 1, %v10961_v16  ;;  %9172 = vmatprep.subr.bf16.mxu1 %v10019_v33  ;;  %v10021_v16 = vld [vmem:[#allocation11 + $0x1e0] sm:$0xff]  }
  0x7d   :  { %v8272_v63 = vsel %vm10985_vm2, 1.0, %v17908_v50  ;;  %vm729_vm12 = vmand %vm10985_vm2, %vm17165_vm10  ;;  %v930_v34 = vmul.f32 %v8273_v18, %v10935_v5  ;;  %vm17933_vm8 = vcmp.ge.s32.totalorder %v10959_v8, 0  ;;  %v17934_v18 = vmov 0  ;;  %9115 = vmatpush3.bf16.msra.mxu0 %v10018_v26 }
  0x7e   :  { %v929_v35 = vmul.f32 %v8272_v63, %v10821_v2  ;;  %vm730_vm1 = vmand %vm10996_vm11, %vm17149_vm5  ;;  %v8256_v55 = vsel %vm729_vm12, 1.0, %v17908_v50  ;;  %v17931_v63 = vrot.slane %v10821_v2, 1  ;;  %v17936_v2 = vrot.slane %v10955_v10, 1 }
  0x7f   :  { %v8257_v31 = vsel %vm730_vm1, 1.0, %v17908_v50  ;;  %v809_v5 = vmul.f32 %v8256_v55, %v10881_v6  ;;  %vm11049_vm5 = vmand %vm17933_vm8, %vm1138_vm14  ;;  %vm17172_vm12 = vcmp.lt.s32.totalorder %v11026_v29, 8  ;;  %vm17171_vm14 = vcmp.lt.s32.totalorder %v11041_v51, 8  ;;  %v10030_v6 = vld [vmem:[#allocation11 + $0x100] sm:$0xff]  }
  0x80   :  { %v11038_v28 = vsel %vm17174_vm13, %v17931_v63, %v953_v14  ;;  %v17935_v18 = vsel %vm11049_vm5, 4294967295, %v17934_v18  ;;  %v11057_v63 = vsel %vm17174_vm13, %v953_v14, %v17936_v2  ;;  %v943_v30 = vpack.c.bf16 %v930_v34, %v929_v35  ;;  %vm11065_vm8 = vmand %vm1123_vm0, %vm1139_vm7  ;;  %v10020_v2 = vld [vmem:[#allocation11 + $0x1a8] sm:$0xff]  }
  0x81   :  { %17932 = vst [vmem:[#allocation95_spill] sm:$0xff] %v11038_v28  ;;  %v810_v55 = vmul.f32 %v8257_v31, %v10980_v9  ;;  %v17938_v32 = vsel %vm11065_vm8, 4294967295, %v17937_v32  ;;  %v377_v14 = vadd.s32 48, %v10611_v39  ;;  %vm1170_vm1 = vmand %vm11049_vm5, %vm17165_vm10  ;;  %v378_v26 = vadd.s32 56, %v10611_v39  ;;  %9173 = vmatpush3.bf16.msra.mxu1 %v10020_v2  ;;  %v10023_v34 = vld [vmem:[#allocation11 + $0x148] sm:$0xff]  }
  0x82   :  { %v602_v31 = vrot.slane %v11009_v22, 7  ;;  %2244 = vmatprep.mubr.bf16.mxu0 %v943_v30  ;;  %vm17939_vm0 = vcmp.ge.s32.totalorder %v10972_v49, 0  ;;  %v8304_v0 = vsel %vm1170_vm1, 1.0, %v17908_v50  ;;  %vm1050_vm10 = vmand %vm10985_vm2, %vm17172_vm12  ;;  %v17943_v23 = vrot.slane %v10955_v10, 7  ;;  %9174 = vmatprep.subr.bf16.mxu1 %v10021_v16 }
  0x83   :  { %v823_v20 = vpack.c.bf16 %v810_v55, %v809_v5  ;;  %vm1171_vm7 = vmand %vm11065_vm8, %vm17939_vm0  ;;  %v393_v44 = vshra.s32 %v377_v14, 3  ;;  %v11084_v60 = vand.u32 7, %v377_v14  ;;  %v1234_v35 = vmul.f32 %v8304_v0, %v10980_v9  ;;  %v10022_v5 = vld [vmem:[#allocation11 + $0x1a0] sm:$0xff]   ;;  %9116 = vmatprep.subr.bf16.mxu0 %v10023_v34 }
  0x84   :  { %v8305_v58 = vsel %vm1171_vm7, 1.0, %v17908_v50  ;;  %v394_v30 = vshra.s32 %v378_v26, 3  ;;  %v11092_v33 = vand.u32 7, %v378_v26  ;;  %vm1051_vm1 = vmand %vm10996_vm11, %vm17171_vm14  ;;  %v8288_v0 = vsel %vm1050_vm10, 1.0, %v17908_v50 }
  0x85   :  { %17940 = vst [vmem:[#allocation96_spill] sm:$0xff] %v11084_v60  ;;  %2245 = vmatmul.mubr.bf16.gmra.mxu0 %v823_v20  ;;  %v1235_v55 = vmul.f32 %v8305_v58, %v10993_v25  ;;  %v11100_v14 = vand.u32 7, %v393_v44  ;;  %vm17944_vm2 = vcmp.lt.s32.totalorder %v10611_v39, 1  ;;  %v8289_v20 = vsel %vm1051_vm1, 1.0, %v17908_v50  ;;  %9175 = vmatpush3.bf16.msra.mxu1 %v10022_v5 }
  0x86   :  { %17941 = vst [vmem:[#allocation97_spill] sm:$0xff] %v11092_v33  ;;  %v11106_v26 = vsel %vm17944_vm2, %v17943_v23, %v602_v31  ;;  %v1098_v58 = vmul.f32 %v8288_v0, %v11038_v28  ;;  %v11110_v2 = vand.u32 7, %v394_v30  ;;  %v11113_v24 = vadd.s32 4294967295, %v11084_v60  ;;  %v10024_v23 = vld [vmem:[#allocation11 + $0x108] sm:$0xff]   ;;  %vm17950_vm10 = vmmov %vm17944_vm2 }
  0x87   :  { %17942 = vst [vmem:[#allocation98_spill] sm:$0xff] %v11100_v14  ;;  %17945 = vst [vmem:[#allocation99_spill] sm:$0xff] %v11106_v26  ;;  %v1248_v54 = vpack.c.bf16 %v1235_v55, %v1234_v35  ;;  %v1099_v44 = vmul.f32 %v8289_v20, %v11057_v63  ;;  %v635_v45 = vadd.s32 4294967295, %v11100_v14  ;;  %v11118_v46 = vadd.s32 4294967295, %v11092_v33  ;;  %v10025_v35 = vld [vmem:[#allocation11 + $0x1d8] sm:$0xff]   ;;  %9117 = vmatpush3.bf16.msra.mxu0 %v10024_v23  ;;  %v11161_v23 = vld [vmem:[%s17093_s0 + $0x48] sm:$0xff] }
  0x88   :  { %17946 = vst [vmem:[#allocation100_spill] sm:$0xff] %v11110_v2  ;;  %17947 = vst [vmem:[#allocation101_spill] sm:$0xff] %v11113_v24  ;;  %v636_v16 = vadd.s32 4294967295, %v11110_v2  ;;  %v17949_v30 = vrot.slane %v11014_v3, 7  ;;  %v10026_v20 = vld [vmem:[#allocation11 + $0x198] sm:$0xff]   ;;  %vm1140_vm0 = vcmp.lt.s32.totalorder %v11100_v14, 8  ;;  %9176 = vmatprep.subr.bf16.mxu1 %v10025_v35 }
  0x89   :  { %17948 = vst [vmem:[#allocation102_spill] sm:$0xff] %v11118_v46  ;;  %2341 = vmatprep.mubr.bf16.mxu1 %v1248_v54  ;;  %v1112_v55 = vpack.c.bf16 %v1099_v44, %v1098_v58  ;;  %vm651_vm7 = vcmp.ge.s32.totalorder %v635_v45, 0  ;;  %vm667_vm1 = vcmp.lt.s32.totalorder %v635_v45, 8  ;;  %vm1141_vm2 = vcmp.lt.s32.totalorder %v11110_v2, 8  ;;  %v11156_v44 = vld [vmem:[%s17093_s0 + $0x40] sm:$0xff]  ;;  %17961 = vst [vmem:[#allocation106_spill] sm:$0xff] %v11161_v23  ;;  %9177 = vmatpush3.bf16.msra.mxu1 %v10026_v20 }
  0x8a   :  { %v11126_v0 = vsel %vm17950_vm10, %v602_v31, %v17949_v30  ;;  %vm652_vm14 = vcmp.ge.s32.totalorder %v636_v16, 0  ;;  %vm668_vm12 = vcmp.lt.s32.totalorder %v636_v16, 8  ;;  %vm11130_vm11 = vmand %vm651_vm7, %vm667_vm1  ;;  %v17956_v34 = vrot.slane %v11009_v22, 1  ;;  %17960 = vst [vmem:[#allocation105_spill] sm:$0xff] %v11156_v44  ;;  %v10027_v16 = vld [vmem:[#allocation11 + $0x1d0] sm:$0xff]   ;;  %v10032_v54 = vld [vmem:[#allocation11 + $0x188] sm:$0xff]  }
  0x8b   :  { %17951 = vst [vmem:[#allocation103_spill] sm:$0xff] %v11126_v0  ;;  %2342 = vmatmul.mubr.bf16.gmra.mxu1 %v1112_v55  ;;  %vm11136_vm13 = vmand %vm652_vm14, %vm668_vm12  ;;  %v8274_v45 = vsel %vm11130_vm11, 1.0, %v17908_v50  ;;  %v17957_v5 = vrot.slane %v10955_v10, 1  ;;  %vm17958_vm7 = vcmp.lt.s32.totalorder %v10611_v39, 7  ;;  %vm17962_vm12 = vcmp.ge.s32.totalorder %v11113_v24, 0  ;;  %9178 = vmatprep.subr.bf16.mxu1 %v10027_v16 }
  0x8c   :  { %v8275_v30 = vsel %vm11136_vm13, 1.0, %v17908_v50  ;;  %v931_v35 = vmul.f32 %v8274_v45, %v10955_v10  ;;  %vm731_vm14 = vmand %vm11130_vm11, %vm17962_vm12  ;;  %v11172_v55 = vadd.s32 1, %v11084_v60  ;;  %vm17964_vm1 = vcmp.ge.s32.totalorder %v11118_v46, 0 }
  0x8d   :  { %v11151_v58 = vsel %vm17958_vm7, %v17957_v5, %v17956_v34  ;;  %v11175_v34 = vadd.s32 1, %v11092_v33  ;;  %v10028_v5 = vld [vmem:[#allocation11 + $0x190] sm:$0xff]   ;;  %v932_v31 = vmul.f32 %v8275_v30, %v11009_v22  ;;  %vm732_vm7 = vmand %vm11136_vm13, %vm17964_vm1  ;;  %v8258_v10 = vsel %vm731_vm14, 1.0, %v17908_v50 }
  0x8e   :  { %17959 = vst [vmem:[#allocation104_spill] sm:$0xff] %v11151_v58  ;;  %v17965_v45 = vrot.slane %v11014_v3, 1  ;;  %v17966_v27 = vrot.slane %v11009_v22, 1  ;;  %vm17967_vm12 = vcmp.lt.s32.totalorder %v10611_v39, 7  ;;  %v379_v20 = vadd.s32 64, %v10611_v39  ;;  %9179 = vmatpush3.bf16.msra.mxu1 %v10028_v5 }
  0x8f   :  { %17963 = vst [vmem:[#allocation107_spill] sm:$0xff] %v11175_v34  ;;  %v8259_v30 = vsel %vm732_vm7, 1.0, %v17908_v50  ;;  %v811_v33 = vmul.f32 %v8258_v10, %v10993_v25  ;;  %vm17969_vm1 = vcmp.ge.s32.totalorder %v11100_v14, 0  ;;  %v17970_v9 = vmov 0 }
  0x90   :  { %v11189_v60 = vsel %vm17967_vm12, %v17966_v27, %v17965_v45  ;;  %vm11198_vm14 = vmand %vm17969_vm1, %vm1140_vm0  ;;  %vm17197_vm10 = vcmp.lt.s32.totalorder %v11172_v55, 8  ;;  %vm17196_vm12 = vcmp.lt.s32.totalorder %v11175_v34, 8  ;;  %v10029_v27 = vld [vmem:[#allocation11 + $0x140] sm:$0xff]   ;;  %v944_v22 = vpack.c.bf16 %v932_v31, %v931_v35 }
  0x91   :  { %17968 = vst [vmem:[#allocation108_spill] sm:$0xff] %v11189_v60  ;;  %v17971_v9 = vsel %vm11198_vm14, 4294967295, %v17970_v9  ;;  %v812_v16 = vmul.f32 %v8259_v30, %v11106_v26  ;;  %vm17972_vm7 = vcmp.ge.s32.totalorder %v11110_v2, 0  ;;  %v17973_v10 = vmov 0  ;;  %9118 = vmatprep.subr.bf16.mxu0 %v10029_v27 }
  0x92   :  { %vm11209_vm8 = vmand %vm17972_vm7, %vm1141_vm2  ;;  %v380_v45 = vadd.s32 72, %v10611_v39  ;;  %v395_v25 = vshra.s32 %v379_v20, 3  ;;  %vm17975_vm0 = vcmp.ge.s32.totalorder %v11113_v24, 0  ;;  %v11218_v14 = vand.u32 7, %v379_v20  ;;  %2252 = vmatprep.mubr.bf16.mxu0 %v944_v22  ;;  %9119 = vmatpush3.bf16.msra.mxu0 %v10030_v6  ;;  %v10033_v6 = vld [vmem:[#allocation11 + $0x1c0] sm:$0xff]  }
  0x93   :  { %v17974_v10 = vsel %vm11209_vm8, 4294967295, %v17973_v10  ;;  %vm1172_vm1 = vmand %vm11198_vm14, %vm17975_vm0  ;;  %v604_v31 = vrot.slane %v11156_v44, 7  ;;  %v824_v2 = vpack.c.bf16 %v812_v16, %v811_v33  ;;  %vm17977_vm2 = vcmp.ge.s32.totalorder %v11118_v46, 0  ;;  %v10031_v16 = vld [vmem:[#allocation11 + $0x1c8] sm:$0xff]  }
  0x94   :  { %17976 = vst [vmem:[#allocation109_spill] sm:$0xff] %v11218_v14  ;;  %vm1173_vm7 = vmand %vm11209_vm8, %vm17977_vm2  ;;  %v8306_v24 = vsel %vm1172_vm1, 1.0, %v17908_v50  ;;  %v396_v48 = vshra.s32 %v380_v45, 3  ;;  %v11228_v20 = vand.u32 7, %v395_v25  ;;  %v11236_v33 = vand.u32 7, %v380_v45  ;;  %9180 = vmatprep.subr.bf16.mxu1 %v10031_v16 }
  0x95   :  { %v8307_v8 = vsel %vm1173_vm7, 1.0, %v17908_v50  ;;  %v1236_v35 = vmul.f32 %v8306_v24, %v11106_v26  ;;  %vm1052_vm0 = vmand %vm11130_vm11, %vm17197_vm10  ;;  %v17980_v5 = vrot.slane %v11014_v3, 7  ;;  %vm17981_vm2 = vcmp.lt.s32.totalorder %v10611_v39, 1  ;;  %2253 = vmatmul.mubr.bf16.gmra.mxu0 %v824_v2  ;;  %9181 = vmatpush3.bf16.msra.mxu1 %v10032_v54 }
  0x96   :  { %17978 = vst [vmem:[#allocation110_spill] sm:$0xff] %v11228_v20  ;;  %17979 = vst [vmem:[#allocation111_spill] sm:$0xff] %v11236_v33  ;;  %v1237_v25 = vmul.f32 %v8307_v8, %v11126_v0  ;;  %v8290_v24 = vsel %vm1052_vm0, 1.0, %v17908_v50  ;;  %v11250_v49 = vand.u32 7, %v396_v48  ;;  %v637_v22 = vadd.s32 4294967295, %v11228_v20  ;;  %9182 = vmatprep.subr.bf16.mxu1 %v10033_v6  ;;  %v11319_v6 = vld [vmem:[%s17093_s0 + $0x58] sm:$0xff] }
  0x97   :  { %v11242_v27 = vsel %vm17981_vm2, %v17980_v5, %v604_v31  ;;  %vm1053_vm1 = vmand %vm11136_vm13, %vm17196_vm12  ;;  %v1100_v5 = vmul.f32 %v8290_v24, %v11151_v58  ;;  %v11256_v2 = vadd.s32 4294967295, %v11218_v14  ;;  %v11259_v8 = vadd.s32 4294967295, %v11236_v33 }
  0x98   :  { %17982 = vst [vmem:[#allocation112_spill] sm:$0xff] %v11242_v27  ;;  %17983 = vst [vmem:[#allocation113_spill] sm:$0xff] %v11250_v49  ;;  %v8291_v45 = vsel %vm1053_vm1, 1.0, %v17908_v50  ;;  %v1249_v30 = vpack.c.bf16 %v1237_v25, %v1236_v35  ;;  %v638_v48 = vadd.s32 4294967295, %v11250_v49  ;;  %vm653_vm13 = vcmp.ge.s32.totalorder %v637_v22, 0 }
  0x99   :  { %17984 = vst [vmem:[#allocation114_spill] sm:$0xff] %v11256_v2  ;;  %17985 = vst [vmem:[#allocation115_spill] sm:$0xff] %v11259_v8  ;;  %v1101_v46 = vmul.f32 %v8291_v45, %v11189_v60  ;;  %vm669_vm11 = vcmp.lt.s32.totalorder %v637_v22, 8  ;;  %v17986_v24 = vrot.slane %v11161_v23, 7  ;;  %vm17988_vm1 = vcmp.lt.s32.totalorder %v10633_v38, 8 }
  0x9a   :  { %vm11275_vm12 = vmand %vm10801_vm15, %vm17988_vm1  ;;  %v17989_v35 = vmov 0  ;;  %2349 = vmatprep.mubr.bf16.mxu1 %v1249_v30  ;;  %vm654_vm10 = vcmp.ge.s32.totalorder %v638_v48, 0  ;;  %vm670_vm0 = vcmp.lt.s32.totalorder %v638_v48, 8  ;;  %v17998_v54 = vrot.slane %v11156_v44, 1 }
  0x9b   :  { %v11269_v26 = vsel %vm17981_vm2, %v604_v31, %v17986_v24  ;;  %v17990_v35 = vsel %vm11275_vm12, 4294967295, %v17989_v35  ;;  %v1113_v25 = vpack.c.bf16 %v1101_v46, %v1100_v5  ;;  %vm11279_vm7 = vmand %vm653_vm13, %vm669_vm11  ;;  %vm1126_vm2 = vcmp.ge.s32.totalorder %v11228_v20, 0  ;;  %v10034_v31 = vld [vmem:[#allocation11 + $0x180] sm:$0xff]   ;;  %v11297_v46 = vld [vmem:[%s17093_s0 + $0x50] sm:$0xff] }
  0x9c   :  { %17987 = vst [vmem:[#allocation116_spill] sm:$0xff] %v11269_v26  ;;  %17991 = vst [vmem:[#allocation117_spill] sm:$0xff] %v17990_v35  ;;  %v8276_v38 = vsel %vm11279_vm7, 1.0, %v17908_v50  ;;  %vm1142_vm12 = vcmp.lt.s32.totalorder %v11228_v20, 8  ;;  %vm1143_vm13 = vcmp.lt.s32.totalorder %v11250_v49, 8  ;;  %v17999_v48 = vrot.slane %v11014_v3, 1  ;;  %9183 = vmatpush3.bf16.msra.mxu1 %v10034_v31 }
  0x9d   :  { %vm11284_vm8 = vmand %vm654_vm10, %vm670_vm0  ;;  %17996 = vst [vmem:[#allocation118_spill] sm:$0xff] %v11297_v46  ;;  %2350 = vmatmul.mubr.bf16.gmra.mxu1 %v1113_v25  ;;  %v933_v45 = vmul.f32 %v8276_v38, %v11014_v3  ;;  %vm17997_vm10 = vcmp.ge.s32.totalorder %v11256_v2, 0  ;;  %vm18000_vm0 = vcmp.lt.s32.totalorder %v10611_v39, 7  ;;  %vm18002_vm1 = vcmp.ge.s32.totalorder %v11259_v8, 0 }
  0x9e   :  { %v8277_v30 = vsel %vm11284_vm8, 1.0, %v17908_v50  ;;  %vm733_vm11 = vmand %vm11279_vm7, %vm17997_vm10  ;;  %v11314_v24 = vsel %vm18000_vm0, %v17999_v48, %v17998_v54  ;;  %v11328_v3 = vadd.s32 1, %v11218_v14  ;;  %v11331_v54 = vadd.s32 1, %v11236_v33  ;;  %v11333_v48 = vld [vmem:[#allocation11 + $0x238] sm:$0xff]  }
  0x9f   :  { %18001 = vst [vmem:[#allocation119_spill] sm:$0xff] %v11314_v24  ;;  %v934_v25 = vmul.f32 %v8277_v30, %v11156_v44  ;;  %vm734_vm10 = vmand %vm11284_vm8, %vm18002_vm1  ;;  %v8260_v38 = vsel %vm733_vm11, 1.0, %v17908_v50  ;;  %v18005_v35 = vmov 0  ;;  %v18008_v14 = vrot.slane %v11161_v23, 1  ;;  %9845 = vmatprep.subr.bf16.mxu0 %v11333_v48 }
  0xa0   :  { %18003 = vst [vmem:[#allocation120_spill] sm:$0xff] %v11328_v3  ;;  %18004 = vst [vmem:[#allocation121_spill] sm:$0xff] %v11331_v54  ;;  %v8261_v5 = vsel %vm734_vm10, 1.0, %v17908_v50  ;;  %v813_v30 = vmul.f32 %v8260_v38, %v11126_v0  ;;  %v18009_v33 = vrot.slane %v11156_v44, 1  ;;  %v381_v60 = vadd.s32 80, %v10611_v39 }
  0xa1   :  { %vm11341_vm1 = vmand %vm1126_vm2, %vm1142_vm12  ;;  %v945_v12 = vpack.c.bf16 %v934_v25, %v933_v45  ;;  %v814_v38 = vmul.f32 %v8261_v5, %v11242_v27  ;;  %vm18012_vm12 = vcmp.ge.s32.totalorder %v11250_v49, 0  ;;  %v18013_v0 = vmov 0 }
  0xa2   :  { %v18006_v35 = vsel %vm11341_vm1, 4294967295, %v18005_v35  ;;  %vm18010_vm11 = vmmov %vm18000_vm0  ;;  %vm17227_vm0 = vcmp.lt.s32.totalorder %v11328_v3, 8  ;;  %vm17226_vm10 = vcmp.lt.s32.totalorder %v11331_v54, 8  ;;  %v11371_v45 = vand.u32 7, %v381_v60 }
  0xa3   :  { %18007 = vst [vmem:[#allocation122_spill] sm:$0xff] %v18006_v35  ;;  %v11351_v31 = vsel %vm18010_vm11, %v18009_v33, %v18008_v14  ;;  %vm11359_vm2 = vmand %vm18012_vm12, %vm1143_vm13  ;;  %vm18016_vm11 = vcmp.ge.s32.totalorder %v11256_v2, 0  ;;  %v382_v14 = vadd.s32 88, %v10611_v39  ;;  %v397_v33 = vshra.s32 %v381_v60, 3  ;;  %2260 = vmatprep.mubr.bf16.mxu0 %v945_v12 }
  0xa4   :  { %18011 = vst [vmem:[#allocation123_spill] sm:$0xff] %v11351_v31  ;;  %v18014_v0 = vsel %vm11359_vm2, 4294967295, %v18013_v0  ;;  %vm1174_vm14 = vmand %vm11341_vm1, %vm18016_vm11  ;;  %v606_v5 = vrot.slane %v11297_v46, 7  ;;  %v825_v25 = vpack.c.bf16 %v814_v38, %v813_v30  ;;  %vm18018_vm13 = vcmp.ge.s32.totalorder %v11259_v8, 0 }
  0xa5   :  { %18015 = vst [vmem:[#allocation124_spill] sm:$0xff] %v18014_v0  ;;  %18017 = vst [vmem:[#allocation125_spill] sm:$0xff] %v11371_v45  ;;  %v8308_v49 = vsel %vm1174_vm14, 1.0, %v17908_v50  ;;  %v959_v20 = vrot.slane %v11297_v46, 1  ;;  %v398_v12 = vshra.s32 %v382_v14, 3  ;;  %v11387_v30 = vand.u32 7, %v397_v33 }
  0xa6   :  { %vm1175_vm12 = vmand %vm11359_vm2, %vm18018_vm13  ;;  %v1238_v60 = vmul.f32 %v8308_v49, %v11242_v27  ;;  %2261 = vmatmul.mubr.bf16.gmra.mxu0 %v825_v25  ;;  %v11395_v8 = vand.u32 7, %v382_v14  ;;  %v18021_v49 = vrot.slane %v11161_v23, 7  ;;  %vm18022_vm13 = vcmp.lt.s32.totalorder %v10611_v39, 1 }
  0xa7   :  { %v8309_v44 = vsel %vm1175_vm12, 1.0, %v17908_v50  ;;  %vm1054_vm11 = vmand %vm11279_vm7, %vm17227_vm0  ;;  %18019 = vst [vmem:[#allocation126_spill] sm:$0xff] %v11387_v30  ;;  %v639_v27 = vadd.s32 4294967295, %v11387_v30  ;;  %v11410_v14 = vadd.s32 4294967295, %v11371_v45  ;;  %v18027_v35 = vrot.slane %v11319_v6, 7 }
  0xa8   :  { %v1239_v38 = vmul.f32 %v8309_v44, %v11269_v26  ;;  %vm1055_vm14 = vmand %vm11284_vm8, %vm17226_vm10  ;;  %v8292_v2 = vsel %vm1054_vm11, 1.0, %v17908_v50  ;;  %18020 = vst [vmem:[#allocation127_spill] sm:$0xff] %v11395_v8  ;;  %v11401_v22 = vsel %vm18022_vm13, %v18021_v49, %v606_v5  ;;  %v11405_v44 = vand.u32 7, %v398_v12 }
  0xa9   :  { %18023 = vst [vmem:[#allocation128_spill] sm:$0xff] %v11401_v22  ;;  %v8293_v33 = vsel %vm1055_vm14, 1.0, %v17908_v50  ;;  %v1102_v25 = vmul.f32 %v8292_v2, %v11314_v24  ;;  %18025 = vst [vmem:[#allocation130_spill] sm:$0xff] %v11410_v14  ;;  %v11413_v54 = vadd.s32 4294967295, %v11395_v8  ;;  %vm655_vm8 = vcmp.ge.s32.totalorder %v639_v27, 0 }
  0xaa   :  { %18024 = vst [vmem:[#allocation129_spill] sm:$0xff] %v11405_v44  ;;  %v1250_v16 = vpack.c.bf16 %v1239_v38, %v1238_v60  ;;  %v1103_v0 = vmul.f32 %v8293_v33, %v11351_v31  ;;  %v640_v49 = vadd.s32 4294967295, %v11405_v44  ;;  %vm671_vm7 = vcmp.lt.s32.totalorder %v639_v27, 8  ;;  %vm18028_vm12 = vmmov %vm18022_vm13 }
  0xab   :  { %18026 = vst [vmem:[#allocation131_spill] sm:$0xff] %v11413_v54  ;;  %v11420_v2 = vsel %vm18028_vm12, %v606_v5, %v18027_v35  ;;  %vm11422_vm11 = vmand %vm655_vm8, %vm671_vm7  ;;  %vm17230_vm14 = vcmp.ge.s32.totalorder %v11410_v14, 0  ;;  %vm1129_vm7 = vcmp.ge.s32.totalorder %v11405_v44, 0  ;;  %vm1144_vm10 = vcmp.lt.s32.totalorder %v11387_v30, 8 }
  0xac   :  { %18029 = vst [vmem:[#allocation132_spill] sm:$0xff] %v11420_v2  ;;  %2357 = vmatprep.mubr.bf16.mxu1 %v1250_v16  ;;  %v1114_v60 = vpack.c.bf16 %v1103_v0, %v1102_v25  ;;  %vm656_vm0 = vcmp.ge.s32.totalorder %v640_v49, 0  ;;  %vm672_vm2 = vcmp.lt.s32.totalorder %v640_v49, 8  ;;  %v8278_v27 = vsel %vm11422_vm11, 1.0, %v17908_v50  ;;  %vm735_vm8 = vmand %vm11422_vm11, %vm17230_vm14 }
  0xad   :  { %vm11437_vm12 = vmand %vm656_vm0, %vm672_vm2  ;;  %v935_v35 = vmul.f32 %v8278_v27, %v11161_v23  ;;  %v8262_v5 = vsel %vm735_vm8, 1.0, %v17908_v50  ;;  %vm1145_vm13 = vcmp.lt.s32.totalorder %v11405_v44, 8  ;;  %vm18034_vm14 = vcmp.ge.s32.totalorder %v11413_v54, 0 }
  0xae   :  { %2358 = vmatmul.mubr.bf16.gmra.mxu1 %v1114_v60  ;;  %v8279_v38 = vsel %vm11437_vm12, 1.0, %v17908_v50  ;;  %vm736_vm2 = vmand %vm11437_vm12, %vm18034_vm14  ;;  %v815_v33 = vmul.f32 %v8262_v5, %v11269_v26  ;;  %v18035_v16 = vrot.slane %v11161_v23, 1  ;;  %vm18036_vm0 = vcmp.lt.s32.totalorder %v10611_v39, 7  ;;  %v11463_v60 = vld [vmem:[%s17093_s0 + $0x60] sm:$0xff] }
  0xaf   :  { %18038 = vst [vmem:[#allocation134_spill] sm:$0xff] %v11463_v60  ;;  %v936_v27 = vmul.f32 %v8279_v38, %v11297_v46  ;;  %v8263_v31 = vsel %vm736_vm2, 1.0, %v17908_v50  ;;  %vm18039_vm14 = vcmp.ge.s32.totalorder %v11387_v30, 0  ;;  %v18040_v5 = vmov 0 }
  0xb0   :  { %v11458_v49 = vsel %vm18036_vm0, %v18035_v16, %v959_v20  ;;  %vm11469_vm8 = vmand %vm18039_vm14, %vm1144_vm10  ;;  %v11474_v25 = vadd.s32 1, %v11371_v45  ;;  %v11477_v16 = vadd.s32 1, %v11395_v8  ;;  %v816_v26 = vmul.f32 %v8263_v31, %v11401_v22 }
  0xb1   :  { %18037 = vst [vmem:[#allocation133_spill] sm:$0xff] %v11458_v49  ;;  %v18041_v5 = vsel %vm11469_vm8, 4294967295, %v18040_v5  ;;  %vm11482_vm0 = vmand %vm1129_vm7, %vm1145_vm13  ;;  %v18045_v38 = vmov 0  ;;  %v18048_v30 = vrot.slane %v11319_v6, 1  ;;  %vm18049_vm10 = vcmp.lt.s32.totalorder %v10611_v39, 7 }
  0xb2   :  { %18042 = vst [vmem:[#allocation135_spill] sm:$0xff] %v18041_v5  ;;  %18043 = vst [vmem:[#allocation136_spill] sm:$0xff] %v11474_v25  ;;  %v18046_v38 = vsel %vm11482_vm0, 4294967295, %v18045_v38  ;;  %v383_v45 = vadd.s32 96, %v10611_v39  ;;  %v384_v23 = vadd.s32 104, %v10611_v39  ;;  %v946_v8 = vpack.c.bf16 %v936_v27, %v935_v35 }
  0xb3   :  { %18044 = vst [vmem:[#allocation137_spill] sm:$0xff] %v11477_v16  ;;  %18047 = vst [vmem:[#allocation138_spill] sm:$0xff] %v18046_v38  ;;  %v11490_v46 = vsel %vm18049_vm10, %v959_v20, %v18048_v30  ;;  %vm18051_vm2 = vcmp.ge.s32.totalorder %v11410_v14, 0  ;;  %vm17257_vm13 = vcmp.lt.s32.totalorder %v11474_v25, 8  ;;  %vm17256_vm7 = vcmp.lt.s32.totalorder %v11477_v16, 8 }
  0xb4   :  { %18050 = vst [vmem:[#allocation139_spill] sm:$0xff] %v11490_v46  ;;  %vm1176_vm14 = vmand %vm11469_vm8, %vm18051_vm2  ;;  %v608_v31 = vrot.slane %v11463_v60, 7  ;;  %v826_v44 = vpack.c.bf16 %v816_v26, %v815_v33  ;;  %vm18052_vm10 = vcmp.ge.s32.totalorder %v11413_v54, 0  ;;  %v399_v30 = vshra.s32 %v383_v45, 3  ;;  %2268 = vmatprep.mubr.bf16.mxu0 %v946_v8 }
  0xb5   :  { %vm1177_vm1 = vmand %vm11482_vm0, %vm18052_vm10  ;;  %v8310_v20 = vsel %vm1176_vm14, 1.0, %v17908_v50  ;;  %v400_v35 = vshra.s32 %v384_v23, 3  ;;  %v11512_v26 = vand.u32 7, %v383_v45  ;;  %v11514_v33 = vand.u32 7, %v384_v23  ;;  %v11529_v45 = vld [vmem:[%s17093_s0 + $0x68] sm:$0xff] }
  0xb6   :  { %v8311_v27 = vsel %vm1177_vm1, 1.0, %v17908_v50  ;;  %v1240_v14 = vmul.f32 %v8310_v20, %v11401_v22  ;;  %vm1056_vm2 = vmand %vm11422_vm11, %vm17257_vm13  ;;  %2269 = vmatmul.mubr.bf16.gmra.mxu0 %v826_v44  ;;  %v11522_v20 = vand.u32 7, %v399_v30  ;;  %v18058_v38 = vrot.slane %v11319_v6, 7 }
  0xb7   :  { %18053 = vst [vmem:[#allocation140_spill] sm:$0xff] %v11512_v26  ;;  %18054 = vst [vmem:[#allocation141_spill] sm:$0xff] %v11514_v33  ;;  %v1241_v54 = vmul.f32 %v8311_v27, %v11420_v2  ;;  %v8294_v8 = vsel %vm1056_vm2, 1.0, %v17908_v50  ;;  %v11524_v22 = vand.u32 7, %v400_v35  ;;  %v11534_v12 = vadd.s32 4294967295, %v11512_v26 }
  0xb8   :  { %vm1057_vm14 = vmand %vm11437_vm12, %vm17256_vm7  ;;  %18055 = vst [vmem:[#allocation142_spill] sm:$0xff] %v11522_v20  ;;  %v1104_v44 = vmul.f32 %v8294_v8, %v11458_v49  ;;  %v641_v30 = vadd.s32 4294967295, %v11522_v20  ;;  %vm18059_vm1 = vcmp.lt.s32.totalorder %v10611_v39, 1  ;;  %v11546_v5 = vadd.s32 4294967295, %v11514_v33 }
  0xb9   :  { %18056 = vst [vmem:[#allocation143_spill] sm:$0xff] %v11524_v22  ;;  %v8295_v23 = vsel %vm1057_vm14, 1.0, %v17908_v50  ;;  %18057 = vst [vmem:[#allocation144_spill] sm:$0xff] %v11534_v12  ;;  %v1251_v0 = vpack.c.bf16 %v1241_v54, %v1240_v14  ;;  %v642_v35 = vadd.s32 4294967295, %v11524_v22  ;;  %v11543_v16 = vsel %vm18059_vm1, %v18058_v38, %v608_v31  ;;  %v18174_v4 = vld [vmem:[#allocation135_spill] sm:$0xff] }
  0xba   :  { %v1105_v27 = vmul.f32 %v8295_v23, %v11490_v46  ;;  %18060 = vst [vmem:[#allocation145_spill] sm:$0xff] %v11543_v16  ;;  %18061 = vst [vmem:[#allocation146_spill] sm:$0xff] %v11546_v5  ;;  %v609_v8 = vrot.slane %v11529_v45, 7  ;;  %vm657_vm12 = vcmp.ge.s32.totalorder %v641_v30, 0  ;;  %vm673_vm2 = vcmp.lt.s32.totalorder %v641_v30, 8 }
  0xbb   :  { %2365 = vmatprep.mubr.bf16.mxu1 %v1251_v0  ;;  %vm658_vm10 = vcmp.ge.s32.totalorder %v642_v35, 0  ;;  %vm674_vm14 = vcmp.lt.s32.totalorder %v642_v35, 8  ;;  %vm11550_vm7 = vmand %vm657_vm12, %vm673_vm2  ;;  %vm17275_vm1 = vcmp.ge.s32.totalorder %v11546_v5, 0  ;;  %vm1130_vm13 = vcmp.ge.s32.totalorder %v11522_v20, 0 }
  0xbc   :  { %v1115_v54 = vpack.c.bf16 %v1105_v27, %v1104_v44  ;;  %vm11557_vm11 = vmand %vm658_vm10, %vm674_vm14  ;;  %v8280_v23 = vsel %vm11550_vm7, 1.0, %v17908_v50  ;;  %vm1146_vm12 = vcmp.lt.s32.totalorder %v11522_v20, 8  ;;  %v961_v44 = vrot.slane %v11463_v60, 1 }
  0xbd   :  { %v8281_v0 = vsel %vm11557_vm11, 1.0, %v17908_v50  ;;  %v937_v27 = vmul.f32 %v8280_v23, %v11319_v6  ;;  %vm18066_vm10 = vcmp.ge.s32.totalorder %v11534_v12, 0  ;;  %v11577_v35 = vadd.s32 1, %v11512_v26  ;;  %vm738_vm0 = vmand %vm11557_vm11, %vm17275_vm1 }
  0xbe   :  { %2366 = vmatmul.mubr.bf16.gmra.mxu1 %v1115_v54  ;;  %vm737_vm14 = vmand %vm11550_vm7, %vm18066_vm10  ;;  %v938_v54 = vmul.f32 %v8281_v0, %v11463_v60  ;;  %vm18067_vm2 = vcmp.lt.s32.totalorder %v10611_v39, 1  ;;  %v11590_v49 = vadd.s32 1, %v11514_v33  ;;  %v8265_v30 = vsel %vm738_vm0, 1.0, %v17908_v50 }
  0xbf   :  { %v8264_v46 = vsel %vm737_vm14, 1.0, %v17908_v50  ;;  %v11587_v23 = vsel %vm18067_vm2, %v608_v31, %v609_v8  ;;  %vm11598_vm10 = vmand %vm1130_vm13, %vm1146_vm12  ;;  %v18068_v0 = vmov 0  ;;  %v18071_v60 = vrot.slane %v11529_v45, 1 }
  0xc0   :  { %v817_v26 = vmul.f32 %v8264_v46, %v11420_v2  ;;  %v18069_v0 = vsel %vm11598_vm10, 4294967295, %v18068_v0  ;;  %vm18072_vm2 = vcmp.lt.s32.totalorder %v10611_v39, 7  ;;  %v18073_v33 = vrot.slane %v11319_v6, 1 }
  0xc1   :  { %18070 = vst [vmem:[#allocation147_spill] sm:$0xff] %v18069_v0  ;;  %v11606_v31 = vsel %vm18072_vm2, %v961_v44, %v18071_v60  ;;  %vm18074_vm0 = vmmov %vm18072_vm2  ;;  %v947_v46 = vpack.c.bf16 %v938_v54, %v937_v27  ;;  %v818_v2 = vmul.f32 %v8265_v30, %v11543_v16  ;;  %vm18076_vm13 = vcmp.lt.s32.totalorder %v11524_v22, 8  ;;  %v11640_v30 = vld [vmem:[%s17093_s0 + $0x70] sm:$0xff] }
  0xc2   :  { %v11612_v25 = vsel %vm18074_vm0, %v18073_v33, %v961_v44  ;;  %vm18077_vm12 = vcmp.ge.s32.totalorder %v11524_v22, 0  ;;  %v18078_v20 = vmov 0  ;;  %vm17288_vm2 = vcmp.lt.s32.totalorder %v11577_v35, 8 }
  0xc3   :  { %18075 = vst [vmem:[#allocation148_spill] sm:$0xff] %v11612_v25  ;;  %vm11619_vm14 = vmand %vm18077_vm12, %vm18076_vm13  ;;  %v385_v60 = vadd.s32 112, %v10611_v39  ;;  %vm18081_vm1 = vcmp.ge.s32.totalorder %v11534_v12, 0  ;;  %vm17287_vm8 = vcmp.lt.s32.totalorder %v11590_v49, 8  ;;  %v386_v33 = vadd.s32 120, %v10611_v39  ;;  %2276 = vmatprep.mubr.bf16.mxu0 %v947_v46 }
  0xc4   :  { %v18079_v20 = vsel %vm11619_vm14, 4294967295, %v18078_v20  ;;  %vm1178_vm0 = vmand %vm11598_vm10, %vm18081_vm1  ;;  %v18082_v44 = vrot.slane %v10682_v40, 7  ;;  %vm18083_vm13 = vcmp.lt.s32.totalorder %v10611_v39, 1  ;;  %v963_v54 = vrot.slane %v11640_v30, 1 }
  0xc5   :  { %18080 = vst [vmem:[#allocation149_spill] sm:$0xff] %v18079_v20  ;;  %v827_v12 = vpack.c.bf16 %v818_v2, %v817_v26  ;;  %vm18084_vm1 = vcmp.ge.s32.totalorder %v11546_v5, 0  ;;  %v8312_v40 = vsel %vm1178_vm0, 1.0, %v17908_v50  ;;  %v401_v22 = vshra.s32 %v385_v60, 3  ;;  %vm1059_vm0 = vmand %vm11557_vm11, %vm17287_vm8 }
  0xc6   :  { %v11635_v27 = vsel %vm18083_vm13, %v609_v8, %v18082_v44  ;;  %vm1179_vm12 = vmand %vm11619_vm14, %vm18084_vm1  ;;  %v11648_v0 = vand.u32 7, %v385_v60  ;;  %v1242_v44 = vmul.f32 %v8312_v40, %v11543_v16  ;;  %v402_v2 = vshra.s32 %v386_v33, 3 }
  0xc7   :  { %v8313_v8 = vsel %vm1179_vm12, 1.0, %v17908_v50  ;;  %vm1058_vm13 = vmand %vm11550_vm7, %vm17288_vm2  ;;  %v11656_v26 = vand.u32 7, %v386_v33  ;;  %2277 = vmatmul.mubr.bf16.gmra.mxu0 %v827_v12  ;;  %v11664_v5 = vand.u32 7, %v401_v22  ;;  %v8297_v14 = vsel %vm1059_vm0, 1.0, %v17908_v50 }
  0xc8   :  { %18085 = vst [vmem:[#allocation150_spill] sm:$0xff] %v11648_v0  ;;  %v1243_v46 = vmul.f32 %v8313_v8, %v11587_v23  ;;  %v8296_v60 = vsel %vm1058_vm13, 1.0, %v17908_v50  ;;  %v11667_v40 = vadd.s32 4294967295, %v11648_v0  ;;  %v11671_v16 = vand.u32 7, %v402_v2 }
  0xc9   :  { %18086 = vst [vmem:[#allocation151_spill] sm:$0xff] %v11656_v26  ;;  %18087 = vst [vmem:[#allocation152_spill] sm:$0xff] %v11664_v5  ;;  %v1106_v33 = vmul.f32 %v8296_v60, %v11612_v25  ;;  %v11674_v12 = vadd.s32 4294967295, %v11656_v26  ;;  %v1107_v38 = vmul.f32 %v8297_v14, %v11606_v31  ;;  %v643_v20 = vadd.s32 4294967295, %v11664_v5 }
  0xca   :  { %18088 = vst [vmem:[#allocation153_spill] sm:$0xff] %v11671_v16  ;;  %v1252_v8 = vpack.c.bf16 %v1243_v46, %v1242_v44  ;;  %vm18089_vm7 = vcmp.lt.s32.totalorder %v10636_v41, 8  ;;  %v8332_v2 = vsel %vm10833_vm4, 1.0, %v17908_v50  ;;  %v644_v60 = vadd.s32 4294967295, %v11671_v16  ;;  %v10044_v46 = vld [vmem:[%s17093_s0 + $0x8] sm:$0xff] }
  0xcb   :  { %vm11682_vm11 = vmand %vm10753_vm9, %vm18089_vm7  ;;  %vm18092_vm0 = vcmp.lt.s32.totalorder %v10903_v37, 8  ;;  %v1116_v44 = vpack.c.bf16 %v1107_v38, %v1106_v33  ;;  %vm659_vm7 = vcmp.ge.s32.totalorder %v643_v20, 0  ;;  %vm675_vm4 = vcmp.lt.s32.totalorder %v643_v20, 8 }
  0xcc   :  { %vm11697_vm9 = vmand %vm10889_vm6, %vm18092_vm0  ;;  %2373 = vmatprep.mubr.bf16.mxu1 %v1252_v8  ;;  %vm18095_vm2 = vcmp.lt.s32.totalorder %v10916_v52, 8  ;;  %vm660_vm13 = vcmp.ge.s32.totalorder %v644_v60, 0  ;;  %vm676_vm1 = vcmp.lt.s32.totalorder %v644_v60, 8  ;;  %vm1148_vm14 = vcmp.lt.s32.totalorder %v11664_v5, 8 }
  0xcd   :  { %vm11706_vm12 = vmand %vm10897_vm3, %vm18095_vm2  ;;  %2374 = vmatmul.mubr.bf16.gmra.mxu1 %v1116_v44  ;;  %v18102_v33 = vrot.slane %v10656_v53, 1  ;;  %vm18103_vm2 = vcmp.lt.s32.totalorder %v10611_v39, 7  ;;  %v11730_v38 = vadd.s32 1, %v11648_v0  ;;  %v11733_v60 = vadd.s32 1, %v11656_v26 }
  0xce   :  { %vm11710_vm0 = vmand %vm659_vm7, %vm675_vm4  ;;  %v8333_v53 = vsel %vm11682_vm11, 1.0, %v17908_v50  ;;  %vm18105_vm7 = vcmp.ge.s32.totalorder %v11674_v12, 0  ;;  %v18106_v0 = vrot.slane %v11529_v45, 1  ;;  %vm18107_vm11 = vcmp.ge.s32.totalorder %v11664_v5, 0 }
  0xcf   :  { %vm11716_vm8 = vmand %vm660_vm13, %vm676_vm1  ;;  %v8282_v14 = vsel %vm11710_vm0, 1.0, %v17908_v50  ;;  %v11727_v8 = vsel %vm18103_vm2, %v963_v54, %v18102_v33  ;;  %vm18104_vm1 = vcmp.ge.s32.totalorder %v11667_v40, 0  ;;  %v1406_v33 = vmul.f32 %v8332_v2, %v10764_v1 }
  0xd0   :  { %v8283_v44 = vsel %vm11716_vm8, 1.0, %v17908_v50  ;;  %v939_v52 = vmul.f32 %v8282_v14, %v11529_v45  ;;  %vm739_vm13 = vmand %vm11710_vm0, %vm18104_vm1  ;;  %v11757_v37 = vsel %vm18103_vm2, %v18106_v0, %v963_v54  ;;  %v1407_v1 = vmul.f32 %v8333_v53, %v10913_v15 }
  0xd1   :  { %v940_v26 = vmul.f32 %v11640_v30, %v8283_v44  ;;  %vm740_vm4 = vmand %vm11716_vm8, %vm18105_vm7  ;;  %v8266_v14 = vsel %vm739_vm13, 1.0, %v17908_v50  ;;  %v1431_v39 = vadd.s32 1, %v10617_v56  ;;  %vm18110_vm13 = vcmp.lt.s32.totalorder %v11026_v29, 8 }
  0xd2   :  { %v8267_v22 = vsel %vm740_vm4, 1.0, %v17908_v50  ;;  %v819_v2 = vmul.f32 %v8266_v14, %v11587_v23  ;;  %vm11766_vm10 = vmand %vm18107_vm11, %vm1148_vm14  ;;  %v18111_v0 = vmov 0  ;;  %vm18113_vm14 = vcmp.lt.s32.totalorder %v11671_v16, 8 }
  0xd3   :  { %vm11776_vm7 = vmand %vm11049_vm5, %vm18110_vm13  ;;  %v948_v54 = vpack.c.bf16 %v940_v26, %v939_v52  ;;  %v820_v14 = vmul.f32 %v8267_v22, %v11635_v27  ;;  %vm18114_vm4 = vcmp.ge.s32.totalorder %v11671_v16, 0  ;;  %vm17309_vm11 = vcmp.lt.s32.totalorder %v11733_v60, 8 }
  0xd4   :  { %v18112_v0 = vsel %vm11776_vm7, 4294967295, %v18111_v0  ;;  %vm11785_vm2 = vmand %vm18114_vm4, %vm18113_vm14  ;;  %v8334_v53 = vsel %vm11697_vm9, 1.0, %v17908_v50  ;;  %v1422_v52 = vpack.c.bf16 %v1407_v1, %v1406_v33  ;;  %vm1447_vm5 = vcmp.ge.s32.totalorder %v1431_v39, 0 }
  0xd5   :  { %vm18117_vm13 = vmmov %vm18104_vm1  ;;  %vm1463_vm7 = vcmp.lt.s32.totalorder %v1431_v39, 8  ;;  %v8364_v26 = vsel %vm10801_vm15, 1.0, %v17908_v50  ;;  %2284 = vmatprep.mubr.bf16.mxu0 %v948_v54  ;;  %v828_v22 = vpack.c.bf16 %v820_v14, %v819_v2  ;;  %vm18118_vm14 = vcmp.ge.s32.totalorder %v11674_v12, 0 }
  0xd6   :  { %vm1180_vm1 = vmand %vm11766_vm10, %vm18117_vm13  ;;  %v8335_v56 = vsel %vm11706_vm12, 1.0, %v17908_v50  ;;  %v1408_v1 = vmul.f32 %v8334_v53, %v10929_v21  ;;  %vm18119_vm15 = vcmp.lt.s32.totalorder %v11730_v38, 8  ;;  %v8318_v54 = vsel %vm10889_vm6, 1.0, %v17908_v50 }
  0xd7   :  { %vm1181_vm4 = vmand %vm11785_vm2, %vm18118_vm14  ;;  %v8314_v42 = vsel %vm1180_vm1, 1.0, %v17908_v50  ;;  %v1409_v2 = vmul.f32 %v8335_v56, %v11038_v28  ;;  %2285 = vmatmul.mubr.bf16.gmra.mxu0 %v828_v22  ;;  %v1646_v53 = vmul.f32 %v10044_v46, %v8364_v26  ;;  %v18120_v22 = vmov 0 }
  0xd8   :  { %v8315_v33 = vsel %vm1181_vm4, 1.0, %v17908_v50  ;;  %v1244_v59 = vmul.f32 %v8314_v42, %v11635_v27  ;;  %vm1060_vm9 = vmand %vm11710_vm0, %vm18119_vm15  ;;  %2422 = vmatprep.mubr.bf16.mxu0 %v1422_v52  ;;  %v8319_v20 = vsel %vm10897_vm3, 1.0, %v17908_v50  ;;  %v10045_v42 = vld [vmem:[%s17093_s0 + $0x10] sm:$0xff]  ;;  %vm18123_vm3 = vcmp.lt.s32.totalorder %v11041_v51, 8 }
  0xd9   :  { %v1245_v57 = vmul.f32 %v8315_v33, %v10718_v62  ;;  %vm1061_vm12 = vmand %vm11716_vm8, %vm17309_vm11  ;;  %v8298_v14 = vsel %vm1060_vm9, 1.0, %v17908_v50  ;;  %v11842_v26 = vmul.f32 %v10045_v42, %v8318_v54  ;;  %vm18122_vm8 = vcmp.ge.s32.totalorder %v10630_v36, 0 }
  0xda   :  { %v8299_v56 = vsel %vm1061_vm12, 1.0, %v17908_v50  ;;  %v1108_v17 = vmul.f32 %v8298_v14, %v11757_v37  ;;  %vm11832_vm6 = vmand %vm1447_vm5, %vm1463_vm7  ;;  %v1423_v28 = vpack.c.bf16 %v1409_v2, %v1408_v1  ;;  %v1433_v54 = vadd.s32 1, %v10805_v11 }
  0xdb   :  { %v18121_v22 = vsel %vm11832_vm6, 4294967295, %v18120_v22  ;;  %v1253_v33 = vpack.c.bf16 %v1245_v57, %v1244_v59  ;;  %v1109_v14 = vmul.f32 %v8299_v56, %v11727_v8  ;;  %vm1495_vm5 = vmand %vm11832_vm6, %vm18122_vm8  ;;  %v8365_v39 = vsel %vm11832_vm6, 1.0, %v17908_v50  ;;  %v10046_v57 = vld [vmem:[%s17093_s0 + $0x18] sm:$0xff] }
  0xdc   :  { %v8349_v52 = vsel %vm1495_vm5, 1.0, %v17908_v50  ;;  %v1647_v46 = vmul.f32 %v10045_v42, %v8365_v39  ;;  %vm18124_vm0 = vnez %v17938_v32  ;;  %v11866_v56 = vmul.f32 %v10046_v57, %v8319_v20 }
  0xdd   :  { %vm11859_vm1 = vmand %vm18124_vm0, %vm18123_vm3  ;;  %2381 = vmatprep.mubr.bf16.mxu1 %v1253_v33  ;;  %v1117_v59 = vpack.c.bf16 %v1109_v14, %v1108_v17  ;;  %vm1448_vm7 = vcmp.ge.s32.totalorder %v1432_v19, 0  ;;  %vm1464_vm13 = vcmp.lt.s32.totalorder %v1432_v19, 8  ;;  %v1559_v1 = vmul.f32 %v8349_v52, %v10846_v43  ;;  %v10036_v33 = vld [vmem:[#allocation11 + $0x230] sm:$0xff]  }
  0xde   :  { %v1662_v2 = vpack.c.bf16 %v1647_v46, %v1646_v53  ;;  %vm1449_vm14 = vcmp.ge.s32.totalorder %v1433_v54, 0  ;;  %vm1465_vm4 = vcmp.lt.s32.totalorder %v1433_v54, 8  ;;  %vm11869_vm15 = vmand %vm1448_vm7, %vm1464_vm13  ;;  %v18127_v42 = vmov 0 }
  0xdf   :  { %v18128_v42 = vsel %vm11869_vm15, 4294967295, %v18127_v42  ;;  %2382 = vmatmul.mubr.bf16.gmra.mxu1 %v1117_v59  ;;  %vm11873_vm9 = vmand %vm1449_vm14, %vm1465_vm4  ;;  %v18129_v17 = vmov 0  ;;  %v8366_v20 = vsel %vm11869_vm15, 1.0, %v17908_v50  ;;  %vm18131_vm12 = vnez %v18112_v0 }
  0xe0   :  { %v18130_v17 = vsel %vm11873_vm9, 4294967295, %v18129_v17  ;;  %v8336_v43 = vsel %vm18131_vm12, 1.0, %v17908_v50  ;;  %v8337_v53 = vsel %vm11859_vm1, 1.0, %v17908_v50  ;;  %2519 = vmatprep.mubr.bf16.mxu1 %v1662_v2  ;;  %v8367_v14 = vsel %vm11873_vm9, 1.0, %v17908_v50 }
  0xe1   :  { %v1648_v39 = vmul.f32 %v10046_v57, %v8366_v20  ;;  %vm18132_vm8 = vnez %v17935_v18  ;;  %vm18133_vm5 = vcmp.lt.s32.totalorder %v11172_v55, 8  ;;  %vm18134_vm3 = vnez %v17971_v9  ;;  %v10047_v18 = vld [vmem:[%s17093_s0 + $0x20] sm:$0xff] }
  0xe2   :  { %v8320_v19 = vsel %vm18132_vm8, 1.0, %v17908_v50  ;;  %vm11896_vm7 = vmand %vm18134_vm3, %vm18133_vm5  ;;  %v18137_v52 = vpack.c.bf16 %v10784_v47, %v10774_v7  ;;  %v1335_v46 = vpack.c.bf16 %v11866_v56, %v11842_v26  ;;  %v1649_v54 = vmul.f32 %v10047_v18, %v8367_v14  ;;  %v18143_v26 = vld [vmem:[#allocation83_spill] sm:$0xff]  ;;  %v18145_v56 = vld [vmem:[#allocation88_spill] sm:$0xff] }
  0xe3   :  { %v8321_v36 = vsel %vm18124_vm0, 1.0, %v17908_v50  ;;  %vm18138_vm1 = vcmp.lt.s32.totalorder %v11175_v34, 8  ;;  %vm18139_vm13 = vnez %v17974_v10  ;;  %v1574_v7 = vpack.c.bf16 %v1559_v1, %v10838_v13  ;;  %v10048_v13 = vld [vmem:[%s17093_s0 + $0x28] sm:$0xff] }
  0xe4   :  { %2423 = vmatmul.mubr.bf16.vlgmr.msra.gmra.mxu0 %v18137_v52  ;;  %vm11915_vm14 = vmand %vm18139_vm13, %vm18138_vm1  ;;  %vm18142_vm4 = vcmp.ge.s32.totalorder %v10827_v61, 0  ;;  %v1410_v32 = vmul.f32 %v8336_v43, %v11057_v63  ;;  %v1411_v47 = vmul.f32 %v8337_v53, %v11151_v58  ;;  %vm18144_vm0 = vcmp.ge.s32.totalorder %v18143_v26, 0  ;;  %v10037_v61 = vld [vmem:[#allocation11 + $0x228] sm:$0xff]   ;;  %v18146_v43 = vld [vmem:[#allocation84_spill] sm:$0xff] }
  0xe5   :  { %9846 = vmatpush3.bf16.msra.mxu0 %v11333_v48  ;;  %2430 = vmatprep.mubr.bf16.mxu0 %v1423_v28  ;;  %vm1496_vm12 = vmand %vm11869_vm15, %vm18142_vm4  ;;  %v11932_v57 = vmul.f32 %v10047_v18, %v8320_v19  ;;  %v11937_v28 = vmul.f32 %v10048_v13, %v8321_v36  ;;  %v1434_v1 = vadd.s32 1, %v18145_v56  ;;  %v1663_v2 = vpack.c.bf16 %v1649_v54, %v1648_v39  ;;  %v18147_v14 = vld [vmem:[#allocation90_spill] sm:$0xff]  ;;  %v18148_v26 = vld [vmem:[#allocation93_spill] sm:$0xff] }
  0xe6   :  { %9847 = vmatprep.subr.bf16.mxu0 %v10036_v33  ;;  %vm1497_vm8 = vmand %vm11873_vm9, %vm18144_vm0  ;;  %v8350_v48 = vsel %vm1496_vm12, 1.0, %v17908_v50  ;;  %v1435_v52 = vadd.s32 1, %v18147_v14  ;;  %v8338_v19 = vsel %vm11896_vm7, 1.0, %v17908_v50  ;;  %vm18149_vm4 = vcmp.lt.s32.totalorder %v11328_v3, 8  ;;  %v18150_v18 = vld [vmem:[#allocation122_spill] sm:$0xff]  ;;  %v18172_v56 = vld [vmem:[#allocation136_spill] sm:$0xff] }
  0xe7   :  { %v8351_v20 = vsel %vm1497_vm8, 1.0, %v17908_v50  ;;  %v1560_v53 = vmul.f32 %v8350_v48, %v18146_v43  ;;  %vm1450_vm5 = vcmp.ge.s32.totalorder %v1434_v1, 0  ;;  %vm1466_vm1 = vcmp.lt.s32.totalorder %v1434_v1, 8  ;;  %2520 = vmatmul.mubr.bf16.vlgmr.msra.gmra.mxu1 %v1574_v7  ;;  %v18193_v34 = vld [vmem:[#allocation101_spill] sm:$0xff] }
  0xe8   :  { %v1561_v11 = vmul.f32 %v8351_v20, %v18148_v26  ;;  %vm18151_vm12 = vnez %v18150_v18  ;;  %v1424_v54 = vpack.c.bf16 %v1411_v47, %v1410_v32  ;;  %vm1451_vm8 = vcmp.ge.s32.totalorder %v1435_v52, 0  ;;  %vm11955_vm9 = vmand %vm1450_vm5, %vm1466_vm1  ;;  %v18158_v32 = vld [vmem:[#allocation108_spill] sm:$0xff]  ;;  %v10038_v20 = vld [vmem:[#allocation11 + $0x220] sm:$0xff]   ;;  %2527 = vmatprep.mubr.bf16.mxu1 %v1663_v2 }
  0xe9   :  { %vm11951_vm0 = vmand %vm18151_vm12, %vm18149_vm4  ;;  %9848 = vmatpush3.bf16.msra.mxu0 %v10036_v33  ;;  %vm1467_vm11 = vcmp.lt.s32.totalorder %v1435_v52, 8  ;;  %v18154_v36 = vmov 0  ;;  %v8339_v0 = vsel %vm11915_vm14, 1.0, %v17908_v50  ;;  %v18156_v48 = vmov 0  ;;  %v18159_v52 = vld [vmem:[#allocation91_spill] sm:$0xff] }
  0xea   :  { %v18155_v36 = vsel %vm11955_vm9, 4294967295, %v18154_v36  ;;  %9849 = vmatprep.subr.bf16.mxu0 %v10037_v61  ;;  %vm11962_vm7 = vmand %vm1451_vm8, %vm1467_vm11  ;;  %v8368_v33 = vsel %vm11955_vm9, 1.0, %v17908_v50  ;;  %v11970_v47 = vmul.f32 %v8338_v19, %v18158_v32  ;;  %v11973_v1 = vmul.f32 %v8339_v0, %v11314_v24  ;;  %v10049_v19 = vld [vmem:[%s17093_s0 + $0x30] sm:$0xff]  ;;  %v18161_v0 = vld [vmem:[#allocation92_spill] sm:$0xff] }
  0xeb   :  { %v18157_v48 = vsel %vm11962_vm7, 4294967295, %v18156_v48  ;;  %v1336_v59 = vpack.c.bf16 %v11937_v28, %v11932_v57  ;;  %v8369_v7 = vsel %vm11962_vm7, 1.0, %v17908_v50  ;;  %v1650_v43 = vmul.f32 %v10048_v13, %v8368_v33  ;;  %v18163_v28 = vld [vmem:[#allocation98_spill] sm:$0xff]  ;;  %v18164_v33 = vld [vmem:[#allocation100_spill] sm:$0xff] }
  0xec   :  { %vm18160_vm11 = vcmp.ge.s32.totalorder %v18159_v52, 0  ;;  %2431 = vmatmul.mubr.bf16.gmra.mxu0 %v1335_v46  ;;  %v1575_v26 = vpack.c.bf16 %v1561_v11, %v1560_v53  ;;  %v1651_v2 = vmul.f32 %v10049_v19, %v8369_v7  ;;  %vm18162_vm5 = vcmp.ge.s32.totalorder %v18161_v0, 0  ;;  %v18165_v52 = vld [vmem:[#allocation121_spill] sm:$0xff]  ;;  %v18167_v0 = vld [vmem:[#allocation124_spill] sm:$0xff]  ;;  %v18199_v32 = vld [vmem:[#allocation102_spill] sm:$0xff] }
  0xed   :  { %vm1498_vm14 = vmand %vm11955_vm9, %vm18160_vm11  ;;  %v8322_v13 = vsel %vm18134_vm3, 1.0, %v17908_v50  ;;  %2438 = vmatprep.mubr.bf16.mxu0 %v1424_v54  ;;  %9850 = vmatpush3.bf16.msra.mxu0 %v10037_v61  ;;  %v8323_v46 = vsel %vm18139_vm13, 1.0, %v17908_v50  ;;  %v1436_v53 = vadd.s32 1, %v18163_v28  ;;  %v1437_v7 = vadd.s32 1, %v18164_v33  ;;  %v18171_v61 = vld [vmem:[#allocation94_spill] sm:$0xff]  ;;  %v10039_v28 = vld [vmem:[#allocation11 + $0x218] sm:$0xff]  }
  0xee   :  { %vm1499_vm1 = vmand %vm11962_vm7, %vm18162_vm5  ;;  %v8352_v57 = vsel %vm1498_vm14, 1.0, %v17908_v50  ;;  %vm18166_vm4 = vcmp.lt.s32.totalorder %v18165_v52, 8  ;;  %vm18168_vm8 = vnez %v18167_v0  ;;  %v1664_v9 = vpack.c.bf16 %v1651_v2, %v1650_v43  ;;  %9851 = vmatprep.subr.bf16.mxu0 %v10038_v20  ;;  %v18178_v43 = vld [vmem:[#allocation137_spill] sm:$0xff] }
  0xef   :  { %v8353_v11 = vsel %vm1499_vm1, 1.0, %v17908_v50  ;;  %vm12005_vm11 = vmand %vm18168_vm8, %vm18166_vm4  ;;  %v12010_v54 = vmul.f32 %v8352_v57, %v18171_v61  ;;  %v1425_v10 = vpack.c.bf16 %v11973_v1, %v11970_v47  ;;  %v8340_v33 = vsel %vm11951_vm0, 1.0, %v17908_v50  ;;  %v18180_v47 = vld [vmem:[#allocation138_spill] sm:$0xff]  ;;  %v18184_v1 = vld [vmem:[#allocation99_spill] sm:$0xff]  ;;  %2528 = vmatmul.mubr.bf16.gmra.mxu1 %v1575_v26 }
  0xf0   :  { %vm18173_vm3 = vcmp.lt.s32.totalorder %v18172_v56, 8  ;;  %vm18175_vm13 = vnez %v18174_v4  ;;  %vm1452_vm5 = vcmp.ge.s32.totalorder %v1436_v53, 0  ;;  %vm1453_vm1 = vcmp.ge.s32.totalorder %v1437_v7, 0  ;;  %v10040_v26 = vld [vmem:[#allocation11 + $0x210] sm:$0xff]   ;;  %2535 = vmatprep.mubr.bf16.mxu1 %v1664_v9 }
  0xf1   :  { %vm12021_vm14 = vmand %vm18175_vm13, %vm18173_vm3  ;;  %vm1468_vm4 = vcmp.lt.s32.totalorder %v1436_v53, 8  ;;  %vm1469_vm7 = vcmp.lt.s32.totalorder %v1437_v7, 8  ;;  %vm18179_vm9 = vcmp.lt.s32.totalorder %v18178_v43, 8  ;;  %vm18181_vm15 = vnez %v18180_v47  ;;  %v18188_v53 = vld [vmem:[#allocation123_spill] sm:$0xff]  ;;  %9852 = vmatpush3.bf16.msra.mxu0 %v10038_v20 }
  0xf2   :  { %vm12029_vm6 = vmand %vm18181_vm15, %vm18179_vm9  ;;  %v1563_v2 = vmul.f32 %v8353_v11, %v18184_v1  ;;  %v18185_v57 = vmov 0  ;;  %v8341_v61 = vsel %vm12005_vm11, 1.0, %v17908_v50  ;;  %v12042_v7 = vmul.f32 %v8340_v33, %v18188_v53  ;;  %v18191_v1 = vld [vmem:[#allocation133_spill] sm:$0xff]  ;;  %9853 = vmatprep.subr.bf16.mxu0 %v10039_v28 }
  0xf3   :  { %vm12034_vm0 = vmand %vm1452_vm5, %vm1468_vm4  ;;  %v8324_v43 = vsel %vm18151_vm12, 1.0, %v17908_v50  ;;  %v18189_v56 = vmov 0  ;;  %v12055_v52 = vmul.f32 %v8341_v61, %v18191_v1  ;;  %v8325_v14 = vsel %vm18168_vm8, 1.0, %v17908_v50  ;;  %v18192_v33 = vld [vmem:[#allocation105_spill] sm:$0xff]  ;;  %v18197_v61 = vld [vmem:[#allocation106_spill] sm:$0xff] }
  0xf4   :  { %v18186_v57 = vsel %vm12034_vm0, 4294967295, %v18185_v57  ;;  %vm12047_vm9 = vmand %vm1453_vm1, %vm1469_vm7  ;;  %v8370_v11 = vsel %vm12034_vm0, 1.0, %v17908_v50  ;;  %v12061_v53 = vmul.f32 %v8324_v43, %v18192_v33  ;;  %v1324_v18 = vmul.f32 %v10049_v19, %v8322_v13  ;;  %v18198_v43 = vld [vmem:[#allocation110_spill] sm:$0xff]  ;;  %v10050_v19 = vld [vmem:[%s17093_s0 + $0x38] sm:$0xff]  ;;  %2439 = vmatmul.mubr.bf16.gmra.mxu0 %v1336_v59 }
  0xf5   :  { %18187 = vst [vmem:[#allocation83_spill] sm:$0xff] %v18186_v57  ;;  %v18190_v56 = vsel %vm12047_vm9, 4294967295, %v18189_v56  ;;  %v8371_v3 = vsel %vm12047_vm9, 1.0, %v17908_v50  ;;  %vm18194_vm12 = vcmp.ge.s32.totalorder %v18193_v34, 0  ;;  %v12075_v0 = vmul.f32 %v8325_v14, %v18197_v61  ;;  %v18201_v61 = vld [vmem:[#allocation113_spill] sm:$0xff]  ;;  %2446 = vmatprep.mubr.bf16.mxu0 %v1425_v10  ;;  %9854 = vmatpush3.bf16.msra.mxu0 %v10039_v28  ;;  %v10041_v10 = vld [vmem:[#allocation11 + $0x208] sm:$0xff]  }
  0xf6   :  { %vm12070_vm7 = vmand %vm12034_vm0, %vm18194_vm12  ;;  %v1438_v1 = vadd.s32 1, %v18198_v43  ;;  %v1652_v13 = vmul.f32 %v10050_v19, %v8370_v11  ;;  %v1653_v34 = vmul.f32 %v8371_v3, %v18192_v33  ;;  %vm18200_vm8 = vcmp.ge.s32.totalorder %v18199_v32, 0  ;;  %9855 = vmatprep.subr.bf16.mxu0 %v10040_v26  ;;  %v18208_v33 = vld [vmem:[#allocation118_spill] sm:$0xff] }
  0xf7   :  { %vm1501_vm11 = vmand %vm12047_vm9, %vm18200_vm8  ;;  %v1426_v14 = vpack.c.bf16 %v12055_v52, %v12042_v7  ;;  %v1439_v58 = vadd.s32 1, %v18201_v61  ;;  %v1576_v9 = vpack.c.bf16 %v1563_v2, %v12010_v54  ;;  %v1325_v43 = vmul.f32 %v10050_v19, %v8323_v46  ;;  %v18207_v2 = vld [vmem:[#allocation139_spill] sm:$0xff]  ;;  %v18211_v57 = vld [vmem:[#allocation114_spill] sm:$0xff] }
  0xf8   :  { %vm1454_vm3 = vcmp.ge.s32.totalorder %v1438_v1, 0  ;;  %v8354_v3 = vsel %vm12070_vm7, 1.0, %v17908_v50  ;;  %v8355_v32 = vsel %vm1501_vm11, 1.0, %v17908_v50  ;;  %vm1470_vm1 = vcmp.lt.s32.totalorder %v1438_v1, 8  ;;  %v18209_v19 = vld [vmem:[#allocation103_spill] sm:$0xff] }
  0xf9   :  { %vm1455_vm5 = vcmp.ge.s32.totalorder %v1439_v58, 0  ;;  %vm1471_vm4 = vcmp.lt.s32.totalorder %v1439_v58, 8  ;;  %vm12096_vm12 = vmand %vm1454_vm3, %vm1470_vm1  ;;  %v18202_v59 = vmov 0  ;;  %v8342_v46 = vsel %vm12021_vm14, 1.0, %v17908_v50  ;;  %9856 = vmatpush3.bf16.msra.mxu0 %v10040_v26  ;;  %2536 = vmatmul.mubr.bf16.gmra.mxu1 %v1576_v9  ;;  %v10042_v9 = vld [vmem:[#allocation11 + $0x200] sm:$0xff]  }
  0xfa   :  { %v18203_v59 = vsel %vm12096_vm12, 4294967295, %v18202_v59  ;;  %v8343_v52 = vsel %vm12029_vm6, 1.0, %v17908_v50  ;;  %v8326_v54 = vsel %vm18175_vm13, 1.0, %v17908_v50  ;;  %v1665_v28 = vpack.c.bf16 %v1653_v34, %v1652_v13  ;;  %vm12109_vm7 = vmand %vm1455_vm5, %vm1471_vm4  ;;  %v18210_v34 = vld [vmem:[#allocation112_spill] sm:$0xff]  ;;  %9857 = vmatprep.subr.bf16.mxu0 %v10041_v10 }
  0xfb   :  { %v18204_v58 = vmov 0  ;;  %v8372_v24 = vsel %vm12096_vm12, 1.0, %v17908_v50  ;;  %v12117_v7 = vmul.f32 %v8342_v46, %v18207_v2  ;;  %v12120_v39 = vmul.f32 %v8343_v52, %v11612_v25  ;;  %v18215_v52 = vld [vmem:[#allocation115_spill] sm:$0xff] }
  0xfc   :  { %v18205_v58 = vsel %vm12109_vm7, 4294967295, %v18204_v58  ;;  %v1337_v11 = vpack.c.bf16 %v1325_v43, %v1324_v18  ;;  %v8373_v4 = vsel %vm12109_vm7, 1.0, %v17908_v50  ;;  %v8327_v1 = vsel %vm18181_vm15, 1.0, %v17908_v50  ;;  %2543 = vmatprep.mubr.bf16.mxu1 %v1665_v28  ;;  %v18242_v25 = vld [vmem:[#allocation143_spill] sm:$0xff]  ;;  %v18299_v28 = vld [vmem:[#allocation86_spill] sm:$0xff] }
  0xfd   :  { %18206 = vst [vmem:[#allocation84_spill] sm:$0xff] %v18205_v58  ;;  %v12129_v20 = vmul.f32 %v8326_v54, %v18208_v33  ;;  %v1564_v13 = vmul.f32 %v8354_v3, %v18209_v19  ;;  %v1565_v46 = vmul.f32 %v8355_v32, %v18210_v34  ;;  %vm18212_vm6 = vcmp.ge.s32.totalorder %v18211_v57, 0  ;;  %v10051_v3 = vld [vmem:[%s17093_s0 + $0x48] sm:$0xff]  ;;  %9858 = vmatpush3.bf16.msra.mxu0 %v10041_v10 }
  0xfe   :  { %vm12137_vm13 = vmand %vm12096_vm12, %vm18212_vm6  ;;  %v12144_v47 = vmul.f32 %v8327_v1, %v11319_v6  ;;  %v1654_v32 = vmul.f32 %v10051_v3, %v8372_v24  ;;  %v1655_v57 = vmul.f32 %v8373_v4, %v18208_v33  ;;  %vm18216_vm15 = vcmp.ge.s32.totalorder %v18215_v52, 0  ;;  %v18219_v19 = vld [vmem:[#allocation126_spill] sm:$0xff]  ;;  %v18220_v34 = vld [vmem:[#allocation129_spill] sm:$0xff]  ;;  %2447 = vmatmul.mubr.bf16.gmra.mxu0 %v1337_v11  ;;  %9859 = vmatprep.subr.bf16.mxu0 %v10042_v9 }
  0xff   :  { %vm12154_vm14 = vmand %vm12109_vm7, %vm18216_vm15  ;;  %v1440_v1 = vadd.s32 1, %v18219_v19  ;;  %v1441_v26 = vadd.s32 1, %v18220_v34  ;;  %vm18221_vm8 = vcmp.lt.s32.totalorder %v11577_v35, 8  ;;  %v18222_v4 = vld [vmem:[#allocation147_spill] sm:$0xff]  ;;  %vm18226_vm15 = vcmp.lt.s32.totalorder %v11590_v49, 8  ;;  %v18227_v3 = vld [vmem:[#allocation149_spill] sm:$0xff]  ;;  %2454 = vmatprep.mubr.bf16.mxu0 %v1426_v14 }
 0x100   :  { %vm18223_vm11 = vnez %v18222_v4  ;;  %vm18228_vm7 = vnez %v18227_v3  ;;  %v8356_v52 = vsel %vm12137_vm13, 1.0, %v17908_v50  ;;  %v8357_v11 = vsel %vm12154_vm14, 1.0, %v17908_v50  ;;  %v18235_v54 = vld [vmem:[#allocation134_spill] sm:$0xff]  ;;  %v18240_v3 = vld [vmem:[#allocation116_spill] sm:$0xff] }
 0x101   :  { %vm12166_vm3 = vmand %vm18223_vm11, %vm18221_vm8  ;;  %vm1456_vm5 = vcmp.ge.s32.totalorder %v1440_v1, 0  ;;  %vm1457_vm1 = vcmp.ge.s32.totalorder %v1441_v26, 0  ;;  %vm1472_vm4 = vcmp.lt.s32.totalorder %v1440_v1, 8  ;;  %vm1473_vm6 = vcmp.lt.s32.totalorder %v1441_v26, 8  ;;  %v18241_v19 = vld [vmem:[#allocation128_spill] sm:$0xff]  ;;  %9860 = vmatpush3.bf16.msra.mxu0 %v10042_v9  ;;  %v18262_v58 = vld [vmem:[#allocation146_spill] sm:$0xff] }
 0x102   :  { %vm12174_vm12 = vmand %vm18228_vm7, %vm18226_vm15  ;;  %v18231_v1 = vmov 0  ;;  %v8328_v26 = vsel %vm18223_vm11, 1.0, %v17908_v50  ;;  %v1577_v24 = vpack.c.bf16 %v1565_v46, %v1564_v13  ;;  %v1666_v43 = vpack.c.bf16 %v1655_v57, %v1654_v32  ;;  %v18236_v46 = vld [vmem:[#allocation142_spill] sm:$0xff] }
 0x103   :  { %vm12184_vm8 = vmand %vm1456_vm5, %vm1472_vm4  ;;  %v18233_v14 = vmov 0  ;;  %v8329_v18 = vsel %vm18228_vm7, 1.0, %v17908_v50  ;;  %v12199_v34 = vmul.f32 %v8328_v26, %v18235_v54  ;;  %v1442_v32 = vadd.s32 1, %v18236_v46  ;;  %v18246_v46 = vld [vmem:[#allocation130_spill] sm:$0xff] }
 0x104   :  { %v18232_v1 = vsel %vm12184_vm8, 4294967295, %v18231_v1  ;;  %vm12191_vm15 = vmand %vm1457_vm1, %vm1473_vm6  ;;  %v8374_v4 = vsel %vm12184_vm8, 1.0, %v17908_v50  ;;  %v12208_v13 = vmul.f32 %v8329_v18, %v11529_v45  ;;  %vm18237_vm13 = vcmp.lt.s32.totalorder %v11730_v38, 8  ;;  %2544 = vmatmul.mubr.bf16.gmra.mxu1 %v1577_v24 }
 0x105   :  { %v18234_v14 = vsel %vm12191_vm15, 4294967295, %v18233_v14  ;;  %v8375_v10 = vsel %vm12191_vm15, 1.0, %v17908_v50  ;;  %vm12215_vm7 = vmand %vm11766_vm10, %vm18237_vm13  ;;  %v1566_v26 = vmul.f32 %v8356_v52, %v18240_v3  ;;  %v1567_v61 = vmul.f32 %v8357_v11, %v18241_v19  ;;  %2551 = vmatprep.mubr.bf16.mxu1 %v1666_v43 }
 0x106   :  { %v1443_v2 = vadd.s32 1, %v18242_v25  ;;  %vm18243_vm14 = vcmp.lt.s32.totalorder %v11733_v60, 8  ;;  %vm18247_vm5 = vcmp.ge.s32.totalorder %v18246_v46, 0  ;;  %v8344_v19 = vsel %vm12166_vm3, 1.0, %v17908_v50  ;;  %v18250_v25 = vld [vmem:[#allocation131_spill] sm:$0xff] }
 0x107   :  { %vm12226_vm11 = vmand %vm11785_vm2, %vm18243_vm14  ;;  %v8345_v52 = vsel %vm12174_vm12, 1.0, %v17908_v50  ;;  %v1340_v11 = vpack.c.bf16 %v12208_v13, %v12199_v34  ;;  %vm1458_vm4 = vcmp.ge.s32.totalorder %v1442_v32, 0  ;;  %v1656_v46 = vmul.f32 %v8374_v4, %v11319_v6 }
 0x108   :  { %vm12234_vm1 = vmand %vm12184_vm8, %vm18247_vm5  ;;  %v1657_v3 = vmul.f32 %v8375_v10, %v18235_v54  ;;  %vm18251_vm6 = vcmp.ge.s32.totalorder %v18250_v25, 0  ;;  %vm1459_vm3 = vcmp.ge.s32.totalorder %v1443_v2, 0  ;;  %vm1474_vm12 = vcmp.lt.s32.totalorder %v1442_v32, 8  ;;  %v18260_v10 = vld [vmem:[#allocation144_spill] sm:$0xff] }
 0x109   :  { %vm12252_vm13 = vmand %vm12191_vm15, %vm18251_vm6  ;;  %vm1475_vm14 = vcmp.lt.s32.totalorder %v1443_v2, 8  ;;  %v18256_v6 = vpack.c.bf16 %v12075_v0, %v12061_v53  ;;  %v1418_v25 = vmul.f32 %v8344_v19, %v11606_v31  ;;  %v1419_v9 = vmul.f32 %v8345_v52, %v11757_v37 }
 0x10a   :  { %vm12256_vm5 = vmand %vm1458_vm4, %vm1474_vm12  ;;  %v1578_v43 = vpack.c.bf16 %v1567_v61, %v1566_v26  ;;  %v18259_v54 = vpack.c.bf16 %v12120_v39, %v12117_v7  ;;  %v8358_v53 = vsel %vm12234_vm1, 1.0, %v17908_v50  ;;  %vm18261_vm4 = vcmp.ge.s32.totalorder %v18260_v10, 0 }
 0x10b   :  { %2455 = vmatmul.mubr.bf16.gmra.mxu0 %v18256_v6  ;;  %vm12265_vm6 = vmand %vm1459_vm3, %vm1475_vm14  ;;  %v8376_v2 = vsel %vm12256_vm5, 1.0, %v17908_v50  ;;  %v1667_v61 = vpack.c.bf16 %v1657_v3, %v1656_v46  ;;  %v8359_v7 = vsel %vm12252_vm13, 1.0, %v17908_v50  ;;  %vm18263_vm1 = vcmp.ge.s32.totalorder %v18262_v58, 0  ;;  %v18267_v3 = vld [vmem:[#allocation132_spill] sm:$0xff] }
 0x10c   :  { %2462 = vmatprep.mubr.bf16.mxu0 %v18259_v54  ;;  %v8377_v0 = vsel %vm12265_vm6, 1.0, %v17908_v50  ;;  %v1658_v4 = vmul.f32 %v8376_v2, %v11529_v45  ;;  %vm1506_vm3 = vmand %vm12256_vm5, %vm18261_vm4  ;;  %v1444_v19 = vadd.s32 1, %v11664_v5  ;;  %v1445_v52 = vadd.s32 1, %v11671_v16  ;;  %2552 = vmatmul.mubr.bf16.gmra.mxu1 %v1578_v43  ;;  %v18307_v43 = vld [vmem:[#allocation95_spill] sm:$0xff] }
 0x10d   :  { %v1659_v39 = vmul.f32 %v11640_v30, %v8377_v0  ;;  %vm1507_vm12 = vmand %vm12265_vm6, %vm18263_vm1  ;;  %v8360_v32 = vsel %vm1506_vm3, 1.0, %v17908_v50  ;;  %vm18264_vm13 = vcmp.lt.s32.totalorder %v11577_v35, 8  ;;  %v1568_v33 = vmul.f32 %v8358_v53, %v18267_v3  ;;  %v18271_v35 = vld [vmem:[#allocation75_spill] sm:$0xff]  ;;  %2559 = vmatprep.mubr.bf16.mxu1 %v1667_v61  ;;  %v18283_v61 = vld [vmem:[#allocation77_spill] sm:$0xff] }
 0x10e   :  { %v8361_v45 = vsel %vm1507_vm12, 1.0, %v17908_v50  ;;  %v12297_v26 = vmul.f32 %v8360_v32, %v11587_v23  ;;  %vm12305_vm14 = vmand %vm12256_vm5, %vm18264_vm13  ;;  %v1428_v6 = vpack.c.bf16 %v1419_v9, %v1418_v25  ;;  %vm18268_vm4 = vcmp.lt.s32.totalorder %v11590_v49, 8  ;;  %v18276_v49 = vld [vmem:[#allocation145_spill] sm:$0xff]  ;;  %v10052_v0 = vld [vmem:[%s17093_s0 + $0x78] sm:$0xff] }
 0x10f   :  { %v1668_v2 = vpack.c.bf16 %v1659_v39, %v1658_v4  ;;  %v12311_v54 = vmul.f32 %v8361_v45, %v11635_v27  ;;  %vm12317_vm3 = vmand %vm12265_vm6, %vm18268_vm4  ;;  %vm1460_vm1 = vcmp.ge.s32.totalorder %v1444_v19, 0  ;;  %vm1461_vm5 = vcmp.ge.s32.totalorder %v1445_v52, 0  ;;  %v18324_v45 = vld [vmem:[#allocation133_spill] sm:$0xff] }
 0x110   :  { %vm1476_vm12 = vcmp.lt.s32.totalorder %v1444_v19, 8  ;;  %vm1477_vm13 = vcmp.lt.s32.totalorder %v1445_v52, 8  ;;  %vm18272_vm15 = vcmp.lt.s32.totalorder %v18271_v35, 8  ;;  %vm18273_vm8 = vnez %v18121_v22  ;;  %v18326_v52 = vld [vmem:[#allocation136_spill] sm:$0xff] }
 0x111   :  { %vm12325_vm9 = vmand %vm18273_vm8, %vm18272_vm15  ;;  %v1569_v27 = vmul.f32 %v8359_v7, %v18276_v49  ;;  %v1580_v25 = vpack.c.bf16 %v12311_v54, %v12297_v26  ;;  %v8346_v9 = vsel %vm12215_vm7, 1.0, %v17908_v50  ;;  %v8347_v24 = vsel %vm12226_vm11, 1.0, %v17908_v50 }
 0x112   :  { %vm12338_vm6 = vmand %vm1460_vm1, %vm1476_vm12  ;;  %v18281_v57 = vpack.c.bf16 %v12144_v47, %v12129_v20  ;;  %vm18282_vm15 = vcmp.ge.s32.totalorder %v11667_v40, 0  ;;  %v1420_v10 = vmul.f32 %v8346_v9, %v11727_v8  ;;  %v1421_v20 = vmul.f32 %v8347_v24, %v18283_v61  ;;  %v10053_v47 = vld [vmem:[%s17093_s0] sm:$0xff] }
 0x113   :  { %vm12342_vm8 = vmand %vm1461_vm5, %vm1477_vm13  ;;  %v8378_v53 = vsel %vm12338_vm6, 1.0, %v17908_v50  ;;  %vm18284_vm11 = vcmp.ge.s32.totalorder %v11674_v12, 0  ;;  %v1579_v39 = vpack.c.bf16 %v1569_v27, %v1568_v33  ;;  %vm18285_vm1 = vcmp.lt.s32.totalorder %v11730_v38, 8  ;;  %v18288_v12 = vld [vmem:[#allocation76_spill] sm:$0xff]  ;;  %v18294_v9 = vld [vmem:[#allocation85_spill] sm:$0xff] }
 0x114   :  { %2463 = vmatmul.mubr.bf16.gmra.mxu0 %v18281_v57  ;;  %v8379_v18 = vsel %vm12342_vm8, 1.0, %v17908_v50  ;;  %v1660_v4 = vmul.f32 %v10052_v0, %v8378_v53  ;;  %vm1508_vm7 = vmand %vm12338_vm6, %vm18282_vm15  ;;  %vm18289_vm12 = vcmp.lt.s32.totalorder %v11733_v60, 8  ;;  %v8330_v38 = vsel %vm11766_vm10, 1.0, %v17908_v50  ;;  %v18310_v57 = vld [vmem:[#allocation104_spill] sm:$0xff] }
 0x115   :  { %2470 = vmatprep.mubr.bf16.mxu0 %v1428_v6  ;;  %v1661_v7 = vmul.f32 %v10053_v47, %v8379_v18  ;;  %vm1509_vm4 = vmand %vm12342_vm8, %vm18284_vm11  ;;  %v8362_v40 = vsel %vm1508_vm7, 1.0, %v17908_v50  ;;  %v8331_v3 = vsel %vm11785_vm2, 1.0, %v17908_v50  ;;  %2560 = vmatmul.mubr.bf16.gmra.mxu1 %v1579_v39  ;;  %v18292_v6 = vld [vmem:[#allocation117_spill] sm:$0xff]  ;;  %v8381_v54 = vsel %vm12325_vm9, 1.0, %v17908_v50  ;;  %v18322_v39 = vld [vmem:[#allocation119_spill] sm:$0xff] }
 0x116   :  { %v8363_v58 = vsel %vm1509_vm4, 1.0, %v17908_v50  ;;  %v1572_v32 = vmul.f32 %v8362_v40, %v10718_v62  ;;  %vm12378_vm5 = vmand %vm12338_vm6, %vm18285_vm1  ;;  %v1429_v62 = vpack.c.bf16 %v1421_v20, %v1420_v10  ;;  %vm18293_vm6 = vnez %v18292_v6  ;;  %2567 = vmatprep.mubr.bf16.mxu1 %v1668_v2  ;;  %v18315_v10 = vld [vmem:[#allocation120_spill] sm:$0xff] }
 0x117   :  { %v1669_v26 = vpack.c.bf16 %v1661_v7, %v1660_v4  ;;  %v1573_v19 = vmul.f32 %v8363_v58, %v18288_v12  ;;  %vm12387_vm13 = vmand %vm12342_vm8, %vm18289_vm12  ;;  %v8380_v60 = vsel %vm18293_vm6, 1.0, %v17908_v50  ;;  %v8392_v35 = vsel %vm12305_vm14, 1.0, %v17908_v50  ;;  %v18312_v4 = vld [vmem:[#allocation107_spill] sm:$0xff] }
 0x118   :  { %v8393_v44 = vsel %vm12317_vm3, 1.0, %v17908_v50  ;;  %v1746_v41 = vmul.f32 %v8392_v35, %v11757_v37  ;;  %v8394_v27 = vsel %vm12378_vm5, 1.0, %v17908_v50  ;;  %vm18295_vm10 = vcmp.lt.s32.totalorder %v18294_v9, 8  ;;  %v18323_v58 = vld [vmem:[#allocation123_spill] sm:$0xff] }
 0x119   :  { %v1581_v33 = vpack.c.bf16 %v1573_v19, %v1572_v32  ;;  %v1747_v49 = vmul.f32 %v8393_v44, %v11727_v8  ;;  %vm18296_vm2 = vnez %v18128_v42  ;;  %v1332_v37 = vmul.f32 %v11640_v30, %v8330_v38  ;;  %v18325_v12 = vld [vmem:[#allocation139_spill] sm:$0xff] }
 0x11a   :  { %vm12418_vm9 = vmand %vm18296_vm2, %vm18295_vm10  ;;  %v1333_v2 = vmul.f32 %v10052_v0, %v8331_v3  ;;  %v8395_v8 = vsel %vm12387_vm13, 1.0, %v17908_v50  ;;  %v1748_v23 = vmul.f32 %v8394_v27, %v18283_v61  ;;  %vm18300_vm14 = vcmp.lt.s32.totalorder %v18299_v28, 8  ;;  %v18311_v0 = vld [vmem:[#allocation108_spill] sm:$0xff] }
 0x11b   :  { %vm18301_vm3 = vnez %v18130_v17  ;;  %v1734_v42 = vmul.f32 %v8380_v60, %v10913_v15  ;;  %v1735_v34 = vmul.f32 %v8381_v54, %v10929_v21  ;;  %v1756_v13 = vpack.c.bf16 %v1747_v49, %v1746_v41  ;;  %v18332_v60 = vld [vmem:[#allocation148_spill] sm:$0xff] }
 0x11c   :  { %2471 = vmatmul.mubr.bf16.gmra.mxu0 %v1340_v11  ;;  %vm1689_vm8 = vmand %vm18301_vm3, %vm18300_vm14  ;;  %v18302_v11 = vld [vmem:[#allocation78_spill] sm:$0xff]  ;;  %vm18303_vm15 = vcmp.lt.s32.totalorder %v11026_v29, 8  ;;  %vm18304_vm7 = vnez %v18155_v36  ;;  %vm18305_vm4 = vcmp.lt.s32.totalorder %v11041_v51, 8  ;;  %vm18306_vm1 = vnez %v18157_v48  ;;  %v12494_v27 = vld [vmem:[%s17096_s3] ss:$0 sm:$0xff] }
 0x11d   :  { %2478 = vmatprep.mubr.bf16.mxu0 %v1429_v62  ;;  %v1749_v30 = vmul.f32 %v8395_v8, %v18302_v11  ;;  %vm1690_vm11 = vmand %vm18304_vm7, %vm18303_vm15  ;;  %v1341_v24 = vpack.c.bf16 %v1333_v2, %v1332_v37  ;;  %v8382_v15 = vsel %vm12418_vm9, 1.0, %v17908_v50  ;;  %v8383_v21 = vsel %vm1689_vm8, 1.0, %v17908_v50  ;;  %2568 = vmatmul.mubr.bf16.gmra.mxu1 %v1580_v25  ;;  %v18329_v62 = vld [vmem:[#allocation137_spill] sm:$0xff] }
 0x11e   :  { %vm1691_vm5 = vmand %vm18306_vm1, %vm18305_vm4  ;;  %v1750_v22 = vpack.c.bf16 %v1735_v34, %v1734_v42  ;;  %v8384_v29 = vsel %vm1690_vm11, 1.0, %v17908_v50  ;;  %2575 = vmatprep.mubr.bf16.mxu1 %v1669_v26  ;;  %v1736_v51 = vmul.f32 %v8382_v15, %v18307_v43  ;;  %v1737_v48 = vmul.f32 %v8383_v21, %v11057_v63  ;;  %v18318_v63 = vld [vmem:[#allocation121_spill] sm:$0xff] }
 0x11f   :  { %v1757_v17 = vpack.c.bf16 %v1749_v30, %v1748_v23  ;;  %v8385_v36 = vsel %vm1691_vm5, 1.0, %v17908_v50  ;;  %vm18308_vm12 = vcmp.lt.s32.totalorder %v11172_v55, 8  ;;  %v1738_v18 = vmul.f32 %v8384_v29, %v18310_v57  ;;  %v18320_v55 = vld [vmem:[#allocation84_spill] sm:$0xff] }
 0x120   :  { %vm1692_vm13 = vmand %vm12034_vm0, %vm18308_vm12  ;;  %v1739_v25 = vmul.f32 %v8385_v36, %v18311_v0  ;;  %vm18313_vm6 = vcmp.lt.s32.totalorder %v18312_v4, 8  ;;  %vm18314_vm10 = vnez %v18190_v56  ;;  %vm18316_vm9 = vcmp.lt.s32.totalorder %v18315_v10, 8 }
 0x121   :  { %vm1693_vm2 = vmand %vm18314_vm10, %vm18313_vm6  ;;  %vm18317_vm14 = vnez %v18203_v59  ;;  %vm18319_vm8 = vcmp.lt.s32.totalorder %v18318_v63, 8  ;;  %vm18321_vm15 = vnez %v18320_v55  ;;  %v1751_v61 = vpack.c.bf16 %v1737_v48, %v1736_v51 }
 0x122   :  { %vm1694_vm3 = vmand %vm18317_vm14, %vm18316_vm9  ;;  %v1752_v20 = vpack.c.bf16 %v1739_v25, %v1738_v18  ;;  %v8386_v47 = vsel %vm1692_vm13, 1.0, %v17908_v50  ;;  %v8387_v7 = vsel %vm1693_vm2, 1.0, %v17908_v50  ;;  %vm18327_vm7 = vcmp.lt.s32.totalorder %v18326_v52, 8 }
 0x123   :  { %vm1695_vm0 = vmand %vm18321_vm15, %vm18319_vm8  ;;  %v8388_v56 = vsel %vm1694_vm3, 1.0, %v17908_v50  ;;  %v1740_v59 = vmul.f32 %v8386_v47, %v18322_v39  ;;  %v1741_v32 = vmul.f32 %v8387_v7, %v18323_v58  ;;  %vm18328_vm11 = vnez %v18232_v1 }
 0x124   :  { %2479 = vmatmul.mubr.bf16.gmra.mxu0 %v1341_v24  ;;  %v8389_v40 = vsel %vm1695_vm0, 1.0, %v17908_v50  ;;  %v1742_v26 = vmul.f32 %v8388_v56, %v18324_v45  ;;  %vm1696_vm4 = vmand %vm18328_vm11, %vm18327_vm7  ;;  %vm18330_vm1 = vcmp.lt.s32.totalorder %v18329_v62, 8  ;;  %vm18331_vm5 = vnez %v18234_v14 }
 0x125   :  { %9861 = vmatprep.mubr.bf16.mxu0 %v1750_v22  ;;  %2576 = vmatmul.mubr.bf16.gmra.mxu1 %v1581_v33  ;;  %v1743_v19 = vmul.f32 %v8389_v40, %v18325_v12  ;;  %vm1697_vm12 = vmand %vm18331_vm5, %vm18330_vm1  ;;  %v1753_v38 = vpack.c.bf16 %v1741_v32, %v1740_v59  ;;  %v8390_v33 = vsel %vm1696_vm4, 1.0, %v17908_v50 }
 0x126   :  { %v8391_v6 = vsel %vm1697_vm12, 1.0, %v17908_v50  ;;  %v1744_v54 = vmul.f32 %v8390_v33, %v18332_v60 }
 0x127   :  { %v1754_v3 = vpack.c.bf16 %v1743_v19, %v1742_v26  ;;  %v1745_v35 = vmul.f32 %v8391_v6, %v11606_v31 }
 0x128   :  { %v8992_v1 = vpop.f32.mrf.mxu0 }
 0x129   :  { %v1755_v44 = vpack.c.bf16 %v1745_v35, %v1744_v54 }
 0x12a   :  { %v8993_v41 = vpop.f32.mrf.mxu0 }
 0x12b   :  { %v8994_v14 = vadd.f32 %v8993_v41, %v8992_v1 }
 0x12c   :  { %9862 = vmatmul.mubr.bf16.vlgmr.msra.gmra.mxu0 %v1751_v61  ;;  %v8995_v49 = vpop.f32.mrf.mxu0 }
 0x12d   :  { %9865 = vmatprep.mubr.bf16.mxu0 %v1752_v20  ;;  %v2231_v2 = vadd.f32 %v8994_v14, %v12494_v27 }
 0x12e   :  { %v8996_v9 = vpop.f32.mrf.mxu0  ;;  %v9056_v46 = vpop.f32.mrf.mxu1 }
 0x12f   :  { %v8997_v37 = vadd.f32 %v8996_v9, %v8995_v49 }
 0x130   :  { %v9057_v31 = vpop.f32.mrf.mxu1 }
 0x131   :  { %v9058_v8 = vadd.f32 %v9057_v31, %v9056_v46  ;;  %v2234_v42 = vadd.f32 %v8997_v37, %v12494_v27 }
 0x132   :  { %v9059_v23 = vpop.f32.mrf.mxu1 }
 0x133   :  { %v12497_v28 = vadd.f32 %v9058_v8, %v2231_v2 }
 0x134   :  { %9866 = vmatmul.mubr.bf16.gmra.mxu0 %v1753_v38  ;;  %v9060_v34 = vpop.f32.mrf.mxu1 }
 0x135   :  { %9869 = vmatprep.mubr.bf16.mxu0 %v1754_v3  ;;  %v9061_v11 = vadd.f32 %v9060_v34, %v9059_v23 }
 0x137   :  { %v12500_v30 = vadd.f32 %v9061_v11, %v2234_v42 }
 0x13a   :  { %v9062_v21 = vpop.f32.mrf.mxu1 }
 0x13c   :  { %9870 = vmatmul.mubr.bf16.gmra.mxu0 %v1755_v44  ;;  %v9063_v43 = vpop.f32.mrf.mxu1 }
 0x13d   :  { %9873 = vmatprep.mubr.bf16.mxu0 %v1756_v13  ;;  %v8998_v13 = vpop.f32.mrf.mxu0  ;;  %v9064_v51 = vadd.f32 %v9063_v43, %v9062_v21 }
 0x13e   :  { %v9065_v48 = vpop.f32.mrf.mxu1 }
 0x140   :  { %v9066_v18 = vpop.f32.mrf.mxu1 }
 0x141   :  { %v9067_v0 = vadd.f32 %v9066_v18, %v9065_v48 }
 0x144   :  { %9874 = vmatmul.mubr.bf16.gmra.mxu0 %v1757_v17  ;;  %v8999_v17 = vpop.f32.mrf.mxu0 }
 0x145   :  { %v9000_v24 = vadd.f32 %v8999_v17, %v8998_v13 }
 0x146   :  { %v9001_v15 = vpop.f32.mrf.mxu0 }
 0x147   :  { %v2239_v29 = vadd.f32 %v9000_v24, %v12494_v27 }
 0x148   :  { %v9002_v22 = vpop.f32.mrf.mxu0 }
 0x149   :  { %v9003_v36 = vadd.f32 %v9002_v22, %v9001_v15  ;;  %v12503_v53 = vadd.f32 %v9064_v51, %v2239_v29 }
 0x14a   :  { %v9004_v25 = vpop.f32.mrf.mxu0 }
 0x14b   :  { %v2242_v57 = vadd.f32 %v9003_v36, %v12494_v27  ;;  %v9068_v61 = vpop.f32.mrf.mxu1 }
 0x14c   :  { %v9005_v10 = vpop.f32.mrf.mxu0 }
 0x14d   :  { %v12506_v4 = vadd.f32 %v9067_v0, %v2242_v57  ;;  %v9006_v63 = vadd.f32 %v9005_v10, %v9004_v25  ;;  %v9069_v56 = vpop.f32.mrf.mxu1 }
 0x14e   :  { %v9007_v55 = vpop.f32.mrf.mxu0  ;;  %v9070_v40 = vadd.f32 %v9069_v56, %v9068_v61 }
 0x14f   :  { %v2247_v47 = vadd.f32 %v9006_v63, %v12494_v27  ;;  %v9071_v39 = vpop.f32.mrf.mxu1 }
 0x150   :  { %v9008_v20 = vpop.f32.mrf.mxu0 }
 0x151   :  { %v9009_v7 = vadd.f32 %v9008_v20, %v9007_v55  ;;  %v12509_v59 = vadd.f32 %v9070_v40, %v2247_v47  ;;  %v9072_v32 = vpop.f32.mrf.mxu1 }
 0x152   :  { %v9073_v45 = vadd.f32 %v9072_v32, %v9071_v39 }
 0x153   :  { %v2250_v58 = vadd.f32 %v9009_v7, %v12494_v27 }
 0x155   :  { %v9010_v26 = vpop.f32.mrf.mxu0  ;;  %v12512_v12 = vadd.f32 %v9073_v45, %v2250_v58 }
 0x157   :  { %v9011_v19 = vpop.f32.mrf.mxu0 }
 0x158   :  { %v9012_v52 = vadd.f32 %v9011_v19, %v9010_v26 }
 0x159   :  { %v9013_v62 = vpop.f32.mrf.mxu0 }
 0x15a   :  { %v2255_v33 = vadd.f32 %v9012_v52, %v12494_v27 }
 0x15b   :  { %v9014_v3 = vpop.f32.mrf.mxu0 }
 0x15c   :  { %v9015_v6 = vadd.f32 %v9014_v3, %v9013_v62 }
 0x15d   :  { %v9074_v38 = vpop.f32.mrf.mxu1 }
 0x15e   :  { %v2258_v1 = vadd.f32 %v9015_v6, %v12494_v27 }
 0x15f   :  { %v9075_v60 = vpop.f32.mrf.mxu1 }
 0x160   :  { %v9076_v54 = vadd.f32 %v9075_v60, %v9074_v38 }
 0x161   :  { %v9077_v35 = vpop.f32.mrf.mxu1 }
 0x162   :  { %v12515_v44 = vadd.f32 %v9076_v54, %v2255_v33 }
 0x163   :  { %v9078_v41 = vpop.f32.mrf.mxu1 }
 0x164   :  { %v9079_v49 = vadd.f32 %v9078_v41, %v9077_v35 }
 0x166   :  { %v9016_v14 = vpop.f32.mrf.mxu0  ;;  %v12518_v9 = vadd.f32 %v9079_v49, %v2258_v1 }
 0x168   :  { %v9017_v46 = vpop.f32.mrf.mxu0 }
 0x169   :  { %v9018_v37 = vadd.f32 %v9017_v46, %v9016_v14 }
 0x16a   :  { %v9019_v2 = vpop.f32.mrf.mxu0 }
 0x16b   :  { %v2263_v23 = vadd.f32 %v9018_v37, %v12494_v27 }
 0x16c   :  { %v9020_v8 = vpop.f32.mrf.mxu0 }
 0x16d   :  { %v9021_v42 = vadd.f32 %v9020_v8, %v9019_v2 }
 0x16e   :  { %v9080_v31 = vpop.f32.mrf.mxu1 }
 0x16f   :  { %v2266_v24 = vadd.f32 %v9021_v42, %v12494_v27 }
 0x170   :  { %v9081_v34 = vpop.f32.mrf.mxu1 }
 0x171   :  { %v9082_v13 = vadd.f32 %v9081_v34, %v9080_v31 }
 0x172   :  { %v9083_v11 = vpop.f32.mrf.mxu1 }
 0x173   :  { %v12521_v17 = vadd.f32 %v9082_v13, %v2263_v23 }
 0x174   :  { %v9084_v15 = vpop.f32.mrf.mxu1 }
 0x175   :  { %v9085_v22 = vadd.f32 %v9084_v15, %v9083_v11 }
 0x176   :  { %v9022_v21 = vpop.f32.mrf.mxu0 }
 0x177   :  { %v12524_v29 = vadd.f32 %v9085_v22, %v2266_v24 }
 0x178   :  { %v9023_v36 = vpop.f32.mrf.mxu0 }
 0x179   :  { %v9024_v43 = vadd.f32 %v9023_v36, %v9022_v21 }
 0x17a   :  { %v9025_v51 = vpop.f32.mrf.mxu0 }
 0x17b   :  { %v2271_v18 = vadd.f32 %v9024_v43, %v12494_v27 }
 0x17c   :  { %v9026_v57 = vpop.f32.mrf.mxu0 }
 0x17d   :  { %v9027_v0 = vadd.f32 %v9026_v57, %v9025_v51 }
 0x17e   :  { %v9086_v48 = vpop.f32.mrf.mxu1 }
 0x17f   :  { %v2274_v61 = vadd.f32 %v9027_v0, %v12494_v27 }
 0x180   :  { %v9087_v25 = vpop.f32.mrf.mxu1 }
 0x181   :  { %v9088_v10 = vadd.f32 %v9087_v25, %v9086_v48 }
 0x182   :  { %v9089_v63 = vpop.f32.mrf.mxu1 }
 0x183   :  { %v12527_v55 = vadd.f32 %v9088_v10, %v2271_v18 }
 0x184   :  { %v9090_v20 = vpop.f32.mrf.mxu1 }
 0x185   :  { %v9091_v47 = vadd.f32 %v9090_v20, %v9089_v63 }
 0x187   :  { %v9028_v7 = vpop.f32.mrf.mxu0  ;;  %v12530_v56 = vadd.f32 %v9091_v47, %v2274_v61 }
 0x189   :  { %v9029_v40 = vpop.f32.mrf.mxu0 }
 0x18a   :  { %v9030_v39 = vadd.f32 %v9029_v40, %v9028_v7 }
 0x18b   :  { %v9031_v58 = vpop.f32.mrf.mxu0 }
 0x18c   :  { %v2279_v26 = vadd.f32 %v9030_v39, %v12494_v27 }
 0x18d   :  { %v9092_v32 = vpop.f32.mrf.mxu1  ;;  %v9032_v45 = vpop.f32.mrf.mxu0 }
 0x18e   :  { %v9033_v19 = vadd.f32 %v9032_v45, %v9031_v58 }
 0x18f   :  { %v9093_v52 = vpop.f32.mrf.mxu1 }
 0x190   :  { %v9094_v62 = vadd.f32 %v9093_v52, %v9092_v32  ;;  %v2282_v33 = vadd.f32 %v9033_v19, %v12494_v27 }
 0x191   :  { %v9095_v38 = vpop.f32.mrf.mxu1 }
 0x192   :  { %v12533_v3 = vadd.f32 %v9094_v62, %v2279_v26 }
 0x193   :  { %v9096_v6 = vpop.f32.mrf.mxu1 }
 0x194   :  { %v9097_v60 = vadd.f32 %v9096_v6, %v9095_v38 }
 0x196   :  { %v12536_v35 = vadd.f32 %v9097_v60, %v2282_v33 }
 0x197   :  { %v9034_v54 = vpop.f32.mrf.mxu0 }
 0x198   :  { %18333 = vst [vmem:[#allocation93_spill] sm:$0xff] %v12536_v35 }
 0x199   :  { %v9035_v1 = vpop.f32.mrf.mxu0 }
 0x19a   :  { %v9036_v41 = vadd.f32 %v9035_v1, %v9034_v54 }
 0x19b   :  { %v9037_v14 = vpop.f32.mrf.mxu0 }
 0x19c   :  { %v2287_v37 = vadd.f32 %v9036_v41, %v12494_v27 }
 0x19d   :  { %v9038_v46 = vpop.f32.mrf.mxu0 }
 0x19e   :  { %v12539_v2 = vadd.f32 %v9038_v46, %v9037_v14 }
 0x19f   :  { %v9098_v49 = vpop.f32.mrf.mxu1 }
 0x1a1   :  { %v9099_v31 = vpop.f32.mrf.mxu1 }
 0x1a2   :  { %v9100_v23 = vadd.f32 %v9099_v31, %v9098_v49 }
 0x1a3   :  { %v12541_v42 = vpop.f32.mrf.mxu1 }
 0x1a4   :  { %v9120_v8 = vpop.f32.mrf.mxu0  ;;  %v12543_v13 = vadd.f32 %v9100_v23, %v2287_v37 }
 0x1a5   :  { %v12545_v24 = vpop.f32.mrf.mxu1 }
 0x1a6   :  { %v9121_v34 = vpop.f32.mrf.mxu0  ;;  %18334 = vst [vmem:[#allocation122_spill] sm:$0xff] %v12543_v13 }
 0x1a7   :  { %v9122_v11 = vadd.f32 %v9121_v34, %v9120_v8  ;;  %v12550_v22 = vpop.f32.mrf.mxu1 }
 0x1a8   :  { %v9123_v15 = vpop.f32.mrf.mxu0 }
 0x1a9   :  { %v12548_v21 = vadd.f32 %v9122_v11, %v12497_v28  ;;  %v12552_v51 = vpop.f32.mrf.mxu1 }
 0x1aa   :  { %v9124_v36 = vpop.f32.mrf.mxu0  ;;  %v9186_v50 = vadd.f32 %v12552_v51, %v12550_v22 }
 0x1ab   :  { %v9125_v43 = vadd.f32 %v9124_v36, %v9123_v15  ;;  %v12557_v18 = vpop.f32.mrf.mxu1 }
 0x1ac   :  { %v9126_v48 = vpop.f32.mrf.mxu0  ;;  %v2522_v22 = vadd.f32 %v9186_v50, %v12548_v21 }
 0x1ad   :  { %v12555_v57 = vadd.f32 %v9125_v43, %v12500_v30  ;;  %v12559_v10 = vpop.f32.mrf.mxu1 }
 0x1ae   :  { %v9127_v0 = vpop.f32.mrf.mxu0 }
 0x1af   :  { %v9128_v25 = vadd.f32 %v9127_v0, %v9126_v48  ;;  %v9190_v61 = vpop.f32.mrf.mxu1 }
 0x1b0   :  { %v9129_v63 = vpop.f32.mrf.mxu0 }
 0x1b1   :  { %v2433_v28 = vadd.f32 %v9128_v25, %v12503_v53  ;;  %v9191_v7 = vpop.f32.mrf.mxu1 }
 0x1b2   :  { %v9130_v20 = vpop.f32.mrf.mxu0 }
 0x1b3   :  { %v9131_v47 = vadd.f32 %v9130_v20, %v9129_v63  ;;  %v9193_v58 = vpop.f32.mrf.mxu1 }
 0x1b4   :  { %v9132_v40 = vpop.f32.mrf.mxu0 }
 0x1b5   :  { %v12563_v39 = vadd.f32 %v9131_v47, %v12506_v4  ;;  %v9194_v45 = vpop.f32.mrf.mxu1 }
 0x1b6   :  { %v9133_v30 = vpop.f32.mrf.mxu0  ;;  %v9195_v35 = vadd.f32 %v9194_v45, %v9193_v58 }
 0x1b7   :  { %v9134_v32 = vadd.f32 %v9133_v30, %v9132_v40 }
 0x1b8   :  { %v9135_v26 = vpop.f32.mrf.mxu0 }
 0x1b9   :  { %v12566_v19 = vadd.f32 %v9134_v32, %v12509_v59  ;;  %v9196_v52 = vpop.f32.mrf.mxu1 }
 0x1ba   :  { %v9136_v62 = vpop.f32.mrf.mxu0 }
 0x1bb   :  { %v9137_v38 = vadd.f32 %v9136_v62, %v9135_v26  ;;  %v9197_v53 = vpop.f32.mrf.mxu1 }
 0x1bd   :  { %v12569_v6 = vadd.f32 %v9137_v38, %v12512_v12  ;;  %v9199_v60 = vpop.f32.mrf.mxu1 }
 0x1be   :  { %v9138_v33 = vpop.f32.mrf.mxu0 }
 0x1bf   :  { %v9200_v1 = vpop.f32.mrf.mxu1 }
 0x1c0   :  { %v9139_v54 = vpop.f32.mrf.mxu0 }
 0x1c1   :  { %v9140_v4 = vadd.f32 %v9139_v54, %v9138_v33 }
 0x1c2   :  { %v9141_v41 = vpop.f32.mrf.mxu0 }
 0x1c3   :  { %v12572_v14 = vadd.f32 %v9140_v4, %v12515_v44  ;;  %v9192_v4 = vadd.f32 %v9191_v7, %v9190_v61  ;;  %v9189_v61 = vadd.f32 %v12559_v10, %v12557_v18  ;;  %v9198_v7 = vadd.f32 %v9197_v53, %v9196_v52 }
 0x1c4   :  { %v9202_v49 = vpop.f32.mrf.mxu1  ;;  %v9142_v46 = vpop.f32.mrf.mxu0 }
 0x1c5   :  { %v2525_v10 = vadd.f32 %v9189_v61, %v12555_v57  ;;  %v2538_v52 = vadd.f32 %v9198_v7, %v12566_v19 }
 0x1c6   :  { %v9203_v59 = vpop.f32.mrf.mxu1 }
 0x1c7   :  { %v9204_v51 = vadd.f32 %v9203_v59, %v9202_v49 }
 0x1c8   :  { %v9205_v31 = vpop.f32.mrf.mxu1 }
 0x1ca   :  { %v9206_v23 = vpop.f32.mrf.mxu1 }
 0x1cb   :  { %v9144_v37 = vpop.f32.mrf.mxu0 }
 0x1cc   :  { %v9208_v11 = vpop.f32.mrf.mxu1 }
 0x1cd   :  { %v9145_v8 = vpop.f32.mrf.mxu0 }
 0x1ce   :  { %v9209_v12 = vpop.f32.mrf.mxu1  ;;  %v9146_v58 = vadd.f32 %v9145_v8, %v9144_v37 }
 0x1cf   :  { %v9147_v34 = vpop.f32.mrf.mxu0 }
 0x1d0   :  { %v9211_v43 = vpop.f32.mrf.mxu1  ;;  %v2457_v49 = vadd.f32 %v9146_v58, %v12521_v17 }
 0x1d1   :  { %v9148_v15 = vpop.f32.mrf.mxu0 }
 0x1d2   :  { %v9212_v0 = vpop.f32.mrf.mxu1  ;;  %v9149_v45 = vadd.f32 %v9148_v15, %v9147_v34 }
 0x1d3   :  { %v9213_v57 = vadd.f32 %v9212_v0, %v9211_v43 }
 0x1d4   :  { %v9150_v36 = vpop.f32.mrf.mxu0  ;;  %v2460_v59 = vadd.f32 %v9149_v45, %v12524_v29 }
 0x1d5   :  { %v9214_v63 = vpop.f32.mrf.mxu1 }
 0x1d6   :  { %v9151_v48 = vpop.f32.mrf.mxu0 }
 0x1d7   :  { %v9215_v44 = vpop.f32.mrf.mxu1 }
 0x1d8   :  { %v9153_v25 = vpop.f32.mrf.mxu0 }
 0x1d9   :  { %v12574_v40 = vpop.f32.mrf.mxu1 }
 0x1da   :  { %v9154_v20 = vpop.f32.mrf.mxu0 }
 0x1db   :  { %v12576_v32 = vpop.f32.mrf.mxu1 }
 0x1dc   :  { %v9156_v47 = vpop.f32.mrf.mxu0 }
 0x1dd   :  { %v12582_v38 = vpop.f32.mrf.mxu1 }
 0x1de   :  { %v9157_v30 = vpop.f32.mrf.mxu0  ;;  %18337 = vst [vmem:[#allocation124_spill] sm:$0xff] %v12582_v38  ;;  %v9103_v38 = vadd.f32 %v12545_v24, %v12541_v42  ;;  %v9152_v42 = vadd.f32 %v9151_v48, %v9150_v36 }
 0x1df   :  { %v12588_v16 = vpop.f32.mrf.mxu1 }
 0x1e0   :  { %v12578_v26 = vpop.f32.mrf.mxu0  ;;  %18340 = vst [vmem:[#allocation138_spill] sm:$0xff] %v12588_v16  ;;  %v2465_v19 = vadd.f32 %v9152_v42, %v12527_v55 }
 0x1e1   :  { %18335 = vst [vmem:[#allocation91_spill] sm:$0xff] %v12578_v26  ;;  %v2530_v26 = vadd.f32 %v9192_v4, %v2433_v28  ;;  %v12602_v16 = vpop.f32.mrf.mxu1 }
 0x1e2   :  { %v12580_v62 = vpop.f32.mrf.mxu0 }
 0x1e3   :  { %18336 = vst [vmem:[#allocation92_spill] sm:$0xff] %v12580_v62  ;;  %v2290_v62 = vadd.f32 %v12539_v2, %v12494_v27  ;;  %v2533_v27 = vadd.f32 %v9195_v35, %v12563_v39  ;;  %v12608_v24 = vpop.f32.mrf.mxu1  ;;  %v2546_v39 = vadd.f32 %v9204_v51, %v12572_v14 }
 0x1e4   :  { %v12584_v33 = vpop.f32.mrf.mxu0 }
 0x1e5   :  { %18338 = vst [vmem:[#allocation94_spill] sm:$0xff] %v12584_v33  ;;  %v12606_v2 = vadd.f32 %v9103_v38, %v2290_v62  ;;  %v18342_v62 = vld [vmem:[#allocation70_spill] sm:$0xff] }
 0x1e6   :  { %v12586_v54 = vpop.f32.mrf.mxu0  ;;  %vm18343_vm13 = vcmp.lt.s32.totalorder %v18342_v62, 7 }
 0x1e7   :  { %18339 = vst [vmem:[#allocation135_spill] sm:$0xff] %v12586_v54  ;;  %v9143_v54 = vadd.f32 %v9142_v46, %v9141_v41  ;;  %v9207_v41 = vadd.f32 %v9206_v23, %v9205_v31  ;;  %v9210_v46 = vadd.f32 %v9209_v12, %v9208_v11  ;;  %v9158_v11 = vadd.f32 %v9157_v30, %v9156_v47  ;;  %vm18344_vm6 = vmmov %vm18343_vm13 }
 0x1e8   :  { %v12590_v5 = vpop.f32.mrf.mxu0  ;;  %vm18345_vm10 = vmmov %vm18344_vm6 }
 0x1e9   :  { %18341 = vst [vmem:[#allocation99_spill] sm:$0xff] %v12590_v5  ;;  %v2452_v50 = vadd.f32 %v9143_v54, %v12518_v9  ;;  %v9226_v9 = vpop.f32.mrf.mxu1  ;;  %v2554_v29 = vadd.f32 %v9210_v46, %v2457_v49  ;;  %v2473_v58 = vadd.f32 %v9158_v11, %v12533_v3  ;;  %vm18350_vm2 = vmmov %vm18344_vm6  ;;  %v18351_v46 = vld [vmem:[#allocation124_spill] sm:$0xff] }
 0x1ea   :  { %v12594_v13 = vpop.f32.mrf.mxu0  ;;  %v18347_v45 = vld [vmem:[#allocation92_spill] sm:$0xff]  ;;  %vm18356_vm9 = vmmov %vm18350_vm2 }
 0x1eb   :  { %v2549_v48 = vadd.f32 %v9207_v41, %v2452_v50  ;;  %vm18357_vm14 = vmmov %vm18350_vm2 }
 0x1ec   :  { %v9863_v5 = vpop.f32.mrf.mxu0  ;;  %vm18358_vm3 = vmmov %vm18350_vm2 }
 0x1ed   :  { %v2627_v33 = vadd.f32 %v9863_v5, %v2530_v26  ;;  %v9201_v5 = vadd.f32 %v9200_v1, %v9199_v60  ;;  %v9216_v60 = vadd.f32 %v9215_v44, %v9214_v63  ;;  %v9155_v1 = vadd.f32 %v9154_v20, %v9153_v25  ;;  %v9227_v63 = vpop.f32.mrf.mxu1  ;;  %vm18359_vm8 = vmmov %vm18350_vm2 }
 0x1ee   :  { %v2618_v28 = vpop.f32.mrf.mxu0  ;;  %v18349_v42 = vld [vmem:[#allocation135_spill] sm:$0xff]  ;;  %vm18360_vm15 = vmmov %vm18350_vm2 }
 0x1ef   :  { %v2619_v4 = vadd.f32 %v2618_v28, %v2522_v22  ;;  %v2683_v21 = vmax.f32 %v2627_v33, 0.0  ;;  %v2541_v17 = vadd.f32 %v9201_v5, %v12569_v6  ;;  %v2468_v25 = vadd.f32 %v9155_v1, %v12530_v56  ;;  %v18346_v28 = vld [vmem:[#allocation91_spill] sm:$0xff]  ;;  %vm18361_vm0 = vmmov %vm18350_vm2 }
 0x1f0   :  { %v9864_v18 = vpop.f32.mrf.mxu0  ;;  %v2562_v38 = vadd.f32 %v9216_v60, %v2465_v19  ;;  %v2557_v33 = vadd.f32 %v9213_v57, %v2460_v59  ;;  %v9219_v6 = vadd.f32 %v12576_v32, %v12574_v40  ;;  %v18353_v19 = vld [vmem:[#allocation93_spill] sm:$0xff]  ;;  %v18354_v1 = vld [vmem:[#allocation99_spill] sm:$0xff]  ;;  %vm18362_vm7 = vmmov %vm18361_vm0 }
 0x1f1   :  { %v2630_v53 = vadd.f32 %v9864_v18, %v2533_v27  ;;  %v2681_v37 = vmax.f32 %v2619_v4, 0.0  ;;  %v2699_v36 = vrot.slane %v2683_v21, 1  ;;  %v9161_v4 = vadd.f32 %v18347_v45, %v18346_v28  ;;  %v18348_v27 = vld [vmem:[#allocation94_spill] sm:$0xff]  ;;  %vm18363_vm11 = vmmov %vm18361_vm0 }
 0x1f2   :  { %v2621_v35 = vpop.f32.mrf.mxu0  ;;  %v9164_v18 = vadd.f32 %v18349_v42, %v18348_v27  ;;  %v2565_v49 = vadd.f32 %v9219_v6, %v2468_v25  ;;  %vm18364_vm4 = vmmov %vm18361_vm0 }
 0x1f3   :  { %v2684_v8 = vmax.f32 %v2630_v53, 0.0  ;;  %v2622_v34 = vadd.f32 %v2621_v35, %v2525_v10  ;;  %v12618_v26 = vrot.slane %v2681_v37, 1  ;;  %v9229_v10 = vpop.f32.mrf.mxu1  ;;  %v18352_v35 = vld [vmem:[#allocation138_spill] sm:$0xff]  ;;  %v2476_v60 = vadd.f32 %v9161_v4, %v18353_v19  ;;  %vm18365_vm1 = vmmov %vm18361_vm0 }
 0x1f4   :  { %v9867_v15 = vpop.f32.mrf.mxu0  ;;  %vm18366_vm5 = vmmov %vm18361_vm0 }
 0x1f5   :  { %v2700_v31 = vrot.slane %v2684_v8, 1  ;;  %v2682_v23 = vmax.f32 %v2622_v34, 0.0  ;;  %v2643_v12 = vadd.f32 %v9867_v15, %v2546_v39  ;;  %v9222_v39 = vadd.f32 %v18352_v35, %v18351_v46  ;;  %vm18367_vm12 = vmmov %vm18361_vm0 }
 0x1f6   :  { %v2634_v14 = vpop.f32.mrf.mxu0  ;;  %v9167_v15 = vadd.f32 %v12594_v13, %v18354_v1 }
 0x1f7   :  { %v2725_v43 = vsel %vm18343_vm13, %v2699_v36, %v2700_v31  ;;  %v2698_v55 = vrot.slane %v2682_v23, 1  ;;  %v2635_v0 = vadd.f32 %v2634_v14, %v2538_v52  ;;  %v2687_v56 = vmax.f32 %v2643_v12, 0.0  ;;  %v9230_v12 = vpop.f32.mrf.mxu1 }
 0x1f8   :  { %v2731_v20 = vmax.f32 %v2683_v21, %v2725_v43  ;;  %v9868_v44 = vpop.f32.mrf.mxu0  ;;  %v9231_v6 = vadd.f32 %v9230_v12, %v9229_v10 }
 0x1f9   :  { %v2726_v47 = vsel %vm18344_vm6, %v2698_v55, %v2699_v36  ;;  %v2727_v30 = vsel %vm18345_vm10, %v12618_v26, %v2698_v55  ;;  %v2685_v54 = vmax.f32 %v2635_v0, 0.0  ;;  %v2646_v22 = vadd.f32 %v9868_v44, %v2549_v48 }
 0x1fa   :  { %v12630_v61 = vmax.f32 %v2681_v37, %v2727_v30  ;;  %v2730_v7 = vmax.f32 %v2682_v23, %v2726_v47  ;;  %v2637_v51 = vpop.f32.mrf.mxu0  ;;  %v2703_v59 = vrot.slane %v2687_v56, 1 }
 0x1fb   :  { %v2701_v40 = vrot.slane %v2685_v54, 1  ;;  %v2638_v32 = vadd.f32 %v2637_v51, %v2541_v17  ;;  %v2688_v50 = vmax.f32 %v2646_v22, 0.0  ;;  %v18355_v17 = vld [vmem:[#allocation122_spill] sm:$0xff] }
 0x1fc   :  { %v12638_v52 = vmax.f32 %v12630_v61, %v2730_v7  ;;  %v12640_v5 = vmax.f32 %v2730_v7, %v2731_v20  ;;  %v9871_v21 = vpop.f32.mrf.mxu0  ;;  %v2481_v11 = vadd.f32 %v9164_v18, %v18355_v17 }
 0x1fd   :  { %v2724_v53 = vsel %vm18350_vm2, %v2700_v31, %v2701_v40  ;;  %v2686_v3 = vmax.f32 %v2638_v32, 0.0  ;;  %v2659_v41 = vadd.f32 %v9871_v21, %v2562_v38  ;;  %v2704_v34 = vrot.slane %v2688_v50, 1 }
 0x1fe   :  { %v2732_v37 = vmax.f32 %v2684_v8, %v2724_v53  ;;  %v2650_v57 = vpop.f32.mrf.mxu0  ;;  %v9228_v31 = vadd.f32 %v9227_v63, %v9226_v9  ;;  %v9225_v63 = vadd.f32 %v12608_v24, %v12602_v16  ;;  %v2570_v16 = vadd.f32 %v9222_v39, %v2473_v58 }
 0x1ff   :  { %v2702_v36 = vrot.slane %v2686_v3, 1  ;;  %v2651_v23 = vadd.f32 %v2650_v57, %v2554_v29  ;;  %v2721_v48 = vsel %vm18356_vm9, %v2703_v59, %v2704_v34  ;;  %v2691_v13 = vmax.f32 %v2659_v41, 0.0 }
 0x200   :  { %v12650_v14 = vmax.f32 %v2731_v20, %v2732_v37  ;;  %v9872_v43 = vpop.f32.mrf.mxu0  ;;  %v2735_v0 = vmax.f32 %v2687_v56, %v2721_v48  ;;  %v2484_v20 = vadd.f32 %v9167_v15, %v12606_v2  ;;  %v2578_v45 = vadd.f32 %v9228_v31, %v2481_v11 }
 0x201   :  { %v2722_v8 = vsel %vm18357_vm14, %v2702_v36, %v2703_v59  ;;  %v2723_v55 = vsel %vm18358_vm3, %v2701_v40, %v2702_v36  ;;  %v2689_v44 = vmax.f32 %v2651_v23, 0.0  ;;  %v2662_v38 = vadd.f32 %v9872_v43, %v2565_v49 }
 0x202   :  { %v2733_v25 = vmax.f32 %v2685_v54, %v2723_v55  ;;  %v2734_v29 = vmax.f32 %v2686_v3, %v2722_v8  ;;  %v2653_v9 = vpop.f32.mrf.mxu0  ;;  %v2707_v4 = vrot.slane %v2691_v13, 1  ;;  %v2581_v18 = vadd.f32 %v9231_v6, %v2484_v20 }
 0x203   :  { %v2654_v47 = vadd.f32 %v2653_v9, %v2557_v33  ;;  %v2705_v56 = vrot.slane %v2689_v44, 1  ;;  %v2692_v54 = vmax.f32 %v2662_v38, 0.0  ;;  %v2573_v21 = vadd.f32 %v9225_v63, %v2476_v60 }
 0x204   :  { %v12661_v30 = vmax.f32 %v2732_v37, %v2733_v25  ;;  %v12663_v7 = vmax.f32 %v2733_v25, %v2734_v29  ;;  %v12665_v22 = vmax.f32 %v2734_v29, %v2735_v0  ;;  %v9875_v51 = vpop.f32.mrf.mxu0 }
 0x205   :  { %v2690_v28 = vmax.f32 %v2654_v47, 0.0  ;;  %v2720_v40 = vsel %vm18359_vm8, %v2704_v34, %v2705_v56  ;;  %v2708_v32 = vrot.slane %v2692_v54, 1  ;;  %v2675_v27 = vadd.f32 %v9875_v51, %v2578_v45 }
 0x206   :  { %v2666_v24 = vpop.f32.mrf.mxu0  ;;  %v2736_v2 = vmax.f32 %v2688_v50, %v2720_v40 }
 0x207   :  { %v2706_v33 = vrot.slane %v2690_v28, 1  ;;  %v2667_v42 = vadd.f32 %v2666_v24, %v2570_v16  ;;  %v2717_v3 = vsel %vm18360_vm15, %v2707_v4, %v2708_v32  ;;  %v2695_v39 = vmax.f32 %v2675_v27, 0.0 }
 0x208   :  { %v9876_v10 = vpop.f32.mrf.mxu0  ;;  %v12669_v53 = vmax.f32 %v2735_v0, %v2736_v2  ;;  %v2739_v46 = vmax.f32 %v2691_v13, %v2717_v3 }
 0x209   :  { %v2718_v41 = vsel %vm18361_vm0, %v2706_v33, %v2707_v4  ;;  %v2719_v58 = vsel %vm18362_vm7, %v2705_v56, %v2706_v33  ;;  %v2693_v59 = vmax.f32 %v2667_v42, 0.0  ;;  %v2678_v37 = vadd.f32 %v9876_v10, %v2581_v18 }
 0x20a   :  { %v2737_v49 = vmax.f32 %v2689_v44, %v2719_v58  ;;  %v2738_v50 = vmax.f32 %v2690_v28, %v2718_v41  ;;  %v2669_v35 = vpop.f32.mrf.mxu0  ;;  %v2711_v23 = vrot.slane %v2695_v39, 1 }
 0x20b   :  { %v2670_v34 = vadd.f32 %v2669_v35, %v2573_v21  ;;  %v2709_v1 = vrot.slane %v2693_v59, 1  ;;  %v2696_v15 = vmax.f32 %v2678_v37, 0.0 }
 0x20c   :  { %v12677_v57 = vmax.f32 %v2736_v2, %v2737_v49  ;;  %v12679_v19 = vmax.f32 %v2737_v49, %v2738_v50  ;;  %v12681_v60 = vmax.f32 %v2738_v50, %v2739_v46 }
 0x20d   :  { %v2694_v36 = vmax.f32 %v2670_v34, 0.0  ;;  %v2716_v17 = vsel %vm18363_vm11, %v2708_v32, %v2709_v1  ;;  %v2712_v11 = vrot.slane %v2696_v15, 1 }
 0x20e   :  { %v2740_v12 = vmax.f32 %v2692_v54, %v2716_v17 }
 0x20f   :  { %v2710_v31 = vrot.slane %v2694_v36, 1  ;;  %v2713_v48 = vsel %vm18364_vm4, %v2711_v23, %v2712_v11  ;;  %v2728_v43 = vsel %vm18365_vm1, %v2712_v11, %v12618_v26 }
 0x210   :  { %v12694_v0 = vmax.f32 %v2739_v46, %v2740_v12  ;;  %v2743_v13 = vmax.f32 %v2695_v39, %v2713_v48  ;;  %v2744_v25 = vmax.f32 %v2696_v15, %v2728_v43 }
 0x211   :  { %v2714_v8 = vsel %vm18366_vm5, %v2710_v31, %v2711_v23  ;;  %v2715_v55 = vsel %vm18367_vm12, %v2709_v1, %v2710_v31 }
 0x212   :  { %v2741_v29 = vmax.f32 %v2693_v59, %v2715_v55  ;;  %v2742_v44 = vmax.f32 %v2694_v36, %v2714_v8  ;;  %v12696_v38 = vmax.f32 %v2743_v13, %v2744_v25  ;;  %v12699_v9 = vmax.f32 %v2744_v25, %v12630_v61 }
 0x214   :  { %18368 = vst [vmem:[#allocation105_spill] sm:$0xff] %v12699_v9  ;;  %v12701_v63 = vmax.f32 %v2740_v12, %v2741_v29  ;;  %v12703_v26 = vmax.f32 %v2741_v29, %v2742_v44  ;;  %v12705_v20 = vmax.f32 %v2742_v44, %v2743_v13 }
 0x215   :  { %10334 = dma.done.wait [#allocation10], 9216 }
 0x216   :  { %10335 = vsyncadd [#allocation10], 4294958080 }
 0x217   :  { %10336 = dma.done.wait [#allocation10 + $0x1], 16 }
 0x218   :  { %10337 = vsyncadd [#allocation10 + $0x1], 4294967280  ;;  %v10054_v6 = vld [vmem:[#allocation2 + $0x78] sm:$0xff]   ;;  %v10058_v54 = vld [vmem:[#allocation2 + $0x70] sm:$0xff]  }
 0x219   :  { %v10055_v47 = vld [vmem:[#allocation2 + $0x38] sm:$0xff]   ;;  %9248 = vmatprep.subr.bf16.mxu1 %v10054_v6  ;;  %v10059_v61 = vld [vmem:[#allocation2 + $0x30] sm:$0xff]   ;;  %v10062_v4 = vld [vmem:[#allocation2 + $0x68] sm:$0xff]   ;;  %v17349_v6 = vrot.slane %v12705_v20, 6 }
 0x21a   :  { %v10056_v56 = vld [vmem:[#allocation2 + $0xf8] sm:$0xff]   ;;  %9249 = vmatpush3.bf16.msra.mxu1 %v10055_v47  ;;  %v10060_v28 = vld [vmem:[#allocation2 + $0xf0] sm:$0xff]   ;;  %v10063_v40 = vld [vmem:[#allocation2 + $0x28] sm:$0xff]  }
 0x21b   :  { %v10057_v51 = vld [vmem:[#allocation2 + $0xb8] sm:$0xff]   ;;  %9312 = vmatprep.subr.bf16.mxu0 %v10056_v56  ;;  %9250 = vmatprep.subr.bf16.mxu1 %v10058_v54  ;;  %v10061_v45 = vld [vmem:[#allocation2 + $0xb0] sm:$0xff]   ;;  %v10064_v2 = vld [vmem:[#allocation2 + $0xe8] sm:$0xff]   ;;  %v2959_v56 = vrot.slane %v12696_v38, 6  ;;  %v18379_v54 = vmov 0.0  }
 0x21c   :  { %9313 = vmatpush3.bf16.msra.mxu0 %v10057_v51  ;;  %v18369_v16 = vld [vmem:[#allocation71_spill] sm:$0xff]  ;;  %v10065_v32 = vld [vmem:[#allocation2 + $0xa8] sm:$0xff]   ;;  %v10066_v33 = vld [vmem:[#allocation2 + $0x60] sm:$0xff]   ;;  %v2960_v51 = vrot.slane %v12699_v9, 6 }
 0x21d   :  { %9314 = vmatprep.subr.bf16.mxu0 %v10060_v28  ;;  %v12708_v24 = vshra.s32 %v18369_v16, 1  ;;  %v10067_v27 = vld [vmem:[#allocation2 + $0x20] sm:$0xff]   ;;  %v10070_v21 = vld [vmem:[#allocation2 + $0x58] sm:$0xff]   ;;  %v10074_v46 = vld [vmem:[#allocation2 + $0x50] sm:$0xff]  }
 0x21e   :  { %9251 = vmatpush3.bf16.msra.mxu1 %v10059_v61  ;;  %v10068_v18 = vld [vmem:[#allocation2 + $0xe0] sm:$0xff]   ;;  %v10071_v3 = vld [vmem:[#allocation2 + $0x18] sm:$0xff]   ;;  %v10075_v35 = vld [vmem:[#allocation2 + $0x10] sm:$0xff]  }
 0x21f   :  { %9252 = vmatprep.subr.bf16.mxu1 %v10062_v4  ;;  %v2978_v42 = vadd.s32 4294967295, %v12708_v24  ;;  %v10069_v10 = vld [vmem:[#allocation2 + $0xa0] sm:$0xff]   ;;  %v10072_v41 = vld [vmem:[#allocation2 + $0xd8] sm:$0xff]   ;;  %v10076_v34 = vld [vmem:[#allocation2 + $0xd0] sm:$0xff]  }
 0x220   :  { %9315 = vmatpush3.bf16.msra.mxu0 %v10061_v45  ;;  %v10073_v58 = vld [vmem:[#allocation2 + $0x98] sm:$0xff]   ;;  %v18371_v39 = vld [vmem:[#allocation73_spill] sm:$0xff]  ;;  %v18374_v1 = vld [vmem:[#allocation74_spill] sm:$0xff] }
 0x221   :  { %9316 = vmatprep.subr.bf16.mxu0 %v10064_v2  ;;  %vm2994_vm13 = vcmp.ge.s32.totalorder %v2978_v42, 0  ;;  %vm3010_vm6 = vcmp.lt.s32.totalorder %v2978_v42, 4  ;;  %v18370_v49 = vld [vmem:[#allocation72_spill] sm:$0xff]  ;;  %v12715_v59 = vshra.s32 %v18371_v39, 1  ;;  %v12722_v15 = vshra.s32 %v18374_v1, 1  ;;  %v10077_v36 = vld [vmem:[#allocation2 + $0x90] sm:$0xff]  }
 0x222   :  { %9253 = vmatpush3.bf16.msra.mxu1 %v10063_v40  ;;  %v12712_v50 = vshra.s32 %v18370_v49, 1  ;;  %vm12717_vm10 = vmand %vm2994_vm13, %vm3010_vm6  ;;  %v10078_v17 = vld [vmem:[#allocation2 + $0x48] sm:$0xff]   ;;  %v10082_v8 = vld [vmem:[#allocation2 + $0x40] sm:$0xff]   ;;  %vm17362_vm13 = vcmp.lt.s32.totalorder %v18342_v62, 2  ;;  %v2945_v42 = vrot.slane %v12638_v52, 6  ;;  %v18407_v39 = vrot.slane %v12640_v5, 6 }
 0x223   :  { %9254 = vmatprep.subr.bf16.mxu1 %v10066_v33  ;;  %v10079_v11 = vld [vmem:[#allocation2 + $0x8] sm:$0xff]   ;;  %v12726_v31 = vadd.s32 4294967295, %v12715_v59  ;;  %v12729_v48 = vadd.s32 4294967295, %v12722_v15  ;;  %v10083_v55 = vld [vmem:[#allocation2] sm:$0xff]   ;;  %vm17346_vm3 = vcmp.ge.s32.totalorder %v12715_v59, 0  ;;  %vm17336_vm15 = vcmp.ge.s32.totalorder %v12722_v15, 0 }
 0x224   :  { %9317 = vmatpush3.bf16.msra.mxu0 %v10065_v32  ;;  %v2979_v23 = vadd.s32 4294967295, %v12712_v50  ;;  %v10080_v12 = vld [vmem:[#allocation2 + $0xc8] sm:$0xff]   ;;  %v10084_v13 = vld [vmem:[#allocation2 + $0xc0] sm:$0xff]   ;;  %vm17335_vm7 = vcmp.lt.s32.totalorder %v12715_v59, 4  ;;  %vm3194_vm11 = vmand %vm12717_vm10, %vm17346_vm3  ;;  %vm17334_vm4 = vcmp.lt.s32.totalorder %v12722_v15, 4  ;;  %v12779_v40 = vsel %vm17362_vm13, %v17349_v6, %v2959_v56 }
 0x225   :  { %9318 = vmatprep.subr.bf16.mxu0 %v10068_v18  ;;  %v10081_v43 = vld [vmem:[#allocation2 + $0x88] sm:$0xff]   ;;  %vm17340_vm14 = vcmp.ge.s32.totalorder %v12726_v31, 0  ;;  %v10085_v44 = vld [vmem:[#allocation2 + $0x80] sm:$0xff]   ;;  %v10086_v47 = vld [vmem:[#allocation2 + $0x178] sm:$0xff]   ;;  %vm17339_vm1 = vcmp.ge.s32.totalorder %v12729_v48, 0  ;;  %v12785_v2 = vsel %vm17362_vm13, %v2959_v56, %v2960_v51  ;;  %v12794_v33 = vadd.s32 1, %v12715_v59 }
 0x226   :  { %9255 = vmatpush3.bf16.msra.mxu1 %v10067_v27  ;;  %vm2995_vm2 = vcmp.ge.s32.totalorder %v2979_v23, 0  ;;  %vm3011_vm9 = vcmp.lt.s32.totalorder %v2979_v23, 4  ;;  %vm12742_vm0 = vmand %vm12717_vm10, %vm17340_vm14  ;;  %v12801_v18 = vadd.s32 1, %v12722_v15  ;;  %v18385_v23 = vld [vmem:[#allocation81_spill] sm:$0xff] }
 0x227   :  { %9256 = vmatprep.subr.bf16.mxu1 %v10070_v21  ;;  %vm12733_vm8 = vmand %vm2995_vm2, %vm3011_vm9  ;;  %vm17338_vm2 = vcmp.lt.s32.totalorder %v12726_v31, 4  ;;  %v10104_v1 = vld [vmem:[#allocation2 + $0x1e0] sm:$0xff]   ;;  %v10107_v49 = vld [vmem:[#allocation2 + $0x108] sm:$0xff]  }
 0x228   :  { %9319 = vmatpush3.bf16.msra.mxu0 %v10069_v10  ;;  %vm3195_vm5 = vmand %vm12733_vm8, %vm17336_vm15 }
 0x229   :  { %9320 = vmatprep.subr.bf16.mxu0 %v10072_v41  ;;  %vm3226_vm12 = vmand %vm3194_vm11, %vm17335_vm7  ;;  %vm17337_vm11 = vcmp.lt.s32.totalorder %v12729_v48, 4  ;;  %vm3484_vm7 = vcmp.lt.s32.totalorder %v12712_v50, 4  ;;  %v18380_v41 = vmov 0 }
 0x22a   :  { %9257 = vmatpush3.bf16.msra.mxu1 %v10071_v3  ;;  %vm3227_vm6 = vmand %vm3195_vm5, %vm17334_vm4  ;;  %v8485_v61 = vsel %vm3226_vm12, 1.0, %v18379_v54  ;;  %vm3467_vm5 = vcmp.ge.s32.totalorder %v12708_v24, 0  ;;  %vm3483_vm12 = vcmp.lt.s32.totalorder %v12708_v24, 4  ;;  %vm3468_vm4 = vcmp.ge.s32.totalorder %v12712_v50, 0 }
 0x22b   :  { %9258 = vmatprep.subr.bf16.mxu1 %v10074_v46  ;;  %vm3075_vm9 = vmand %vm12733_vm8, %vm17339_vm1  ;;  %v8486_v28 = vsel %vm3227_vm6, 1.0, %v18379_v54  ;;  %v3274_v45 = vmul.f32 %v8485_v61, %v12696_v38  ;;  %v17355_v3 = vrot.slane %v12640_v5, 6  ;;  %v18382_v46 = vmov 0 }
 0x22c   :  { %9321 = vmatpush3.bf16.msra.mxu0 %v10073_v58  ;;  %v3275_v4 = vmul.f32 %v8486_v28, %v12699_v9  ;;  %vm3106_vm6 = vmand %vm12742_vm0, %vm17338_vm2 }
 0x22d   :  { %9322 = vmatprep.subr.bf16.mxu0 %v10076_v34  ;;  %vm3107_vm15 = vmand %vm3075_vm9, %vm17337_vm11  ;;  %v8469_v27 = vsel %vm3106_vm6, 1.0, %v18379_v54  ;;  %v18384_v34 = vld [vmem:[#allocation79_spill] sm:$0xff] }
 0x22e   :  { %9259 = vmatpush3.bf16.msra.mxu1 %v10075_v35  ;;  %v3290_v32 = vpack.c.bf16 %v3275_v4, %v3274_v45  ;;  %v8470_v10 = vsel %vm3107_vm15, 1.0, %v18379_v54  ;;  %v3154_v21 = vmul.f32 %v8469_v27, %v12779_v40  ;;  %vm12808_vm0 = vmand %vm3467_vm5, %vm3483_vm12  ;;  %v10087_v35 = vld [vmem:[#allocation2 + $0x138] sm:$0xff]   ;;  %vm17341_vm5 = vcmp.ge.s32.totalorder %v12801_v18, 0  ;;  %v10089_v45 = vld [vmem:[#allocation2 + $0x130] sm:$0xff]  }
 0x22f   :  { %9260 = vmatprep.subr.bf16.mxu1 %v10078_v17  ;;  %v18381_v41 = vsel %vm12808_vm0, 4294967295, %v18380_v41  ;;  %v3155_v58 = vmul.f32 %v8470_v10, %v12785_v2  ;;  %vm12813_vm9 = vmand %vm3468_vm4, %vm3484_vm7  ;;  %v12825_v17 = vshra.s32 %v18385_v23, 1  ;;  %vm17342_vm4 = vcmp.ge.s32.totalorder %v12794_v33, 0  ;;  %v18389_v10 = vld [vmem:[#allocation82_spill] sm:$0xff] }
 0x230   :  { %9323 = vmatpush3.bf16.msra.mxu0 %v10077_v36  ;;  %4577 = vmatprep.mubr.bf16.mxu1 %v3290_v32  ;;  %v18383_v46 = vsel %vm12813_vm9, 4294967295, %v18382_v46  ;;  %v12818_v36 = vshra.s32 %v18384_v34, 1  ;;  %vm3515_vm15 = vmand %vm12808_vm0, %vm17340_vm14  ;;  %v18388_v32 = vld [vmem:[#allocation80_spill] sm:$0xff] }
 0x231   :  { %9324 = vmatprep.subr.bf16.mxu0 %v10080_v12  ;;  %v3170_v12 = vpack.c.bf16 %v3155_v58, %v3154_v21  ;;  %vm3516_vm7 = vmand %vm12813_vm9, %vm17339_vm1  ;;  %v2981_v28 = vadd.s32 4294967295, %v12825_v17  ;;  %v12863_v27 = vshra.s32 %v18388_v32, 1  ;;  %v12871_v21 = vshra.s32 %v18389_v10, 1  ;;  %v10103_v10 = vld [vmem:[#allocation2 + $0x1a8] sm:$0xff]  }
 0x232   :  { %9261 = vmatpush3.bf16.msra.mxu1 %v10079_v11  ;;  %v10088_v11 = vld [vmem:[#allocation2 + $0x170] sm:$0xff]   ;;  %vm3531_vm12 = vmand %vm3515_vm15, %vm17338_vm2  ;;  %v2980_v56 = vadd.s32 4294967295, %v12818_v36  ;;  %vm17353_vm15 = vcmp.lt.s32.totalorder %v18342_v62, 6 }
 0x233   :  { %9262 = vmatprep.subr.bf16.mxu1 %v10082_v8  ;;  %v12841_v8 = vsel %vm17362_vm13, %v2945_v42, %v17355_v3  ;;  %vm3532_vm6 = vmand %vm3516_vm7, %vm17337_vm11  ;;  %v8517_v29 = vsel %vm3531_vm12, 1.0, %v18379_v54  ;;  %vm17344_vm12 = vcmp.lt.s32.totalorder %v12794_v33, 4  ;;  %vm17343_vm11 = vcmp.lt.s32.totalorder %v12801_v18, 4  ;;  %18390 = vst [vmem:[#allocation102_spill] sm:$0xff] %v12871_v21 }
 0x234   :  { %9325 = vmatpush3.bf16.msra.mxu0 %v10081_v43  ;;  %v12829_v43 = vsel %vm17362_vm13, %v2960_v51, %v2945_v42  ;;  %18387 = vst [vmem:[#allocation106_spill] sm:$0xff] %v12841_v8  ;;  %v8518_v51 = vsel %vm3532_vm6, 1.0, %v18379_v54  ;;  %vm3363_vm7 = vmand %vm12717_vm10, %vm17342_vm4  ;;  %v10090_v42 = vld [vmem:[#allocation2 + $0x168] sm:$0xff]   ;;  %vm2996_vm10 = vcmp.ge.s32.totalorder %v2980_v56, 0  ;;  %vm3012_vm2 = vcmp.lt.s32.totalorder %v2980_v56, 4  ;;  %v10095_v56 = vld [vmem:[#allocation2 + $0x1b8] sm:$0xff]  }
 0x235   :  { %9326 = vmatprep.subr.bf16.mxu0 %v10084_v13  ;;  %18386 = vst [vmem:[#allocation101_spill] sm:$0xff] %v12829_v43  ;;  %v10094_v13 = vld [vmem:[#allocation2 + $0x1f8] sm:$0xff]   ;;  %v3579_v61 = vmul.f32 %v8517_v29, %v12829_v43  ;;  %v3580_v4 = vmul.f32 %v8518_v51, %v12841_v8  ;;  %vm3364_vm6 = vmand %vm12733_vm8, %vm17341_vm5  ;;  %vm2997_vm1 = vcmp.ge.s32.totalorder %v2981_v28, 0  ;;  %vm3013_vm14 = vcmp.lt.s32.totalorder %v2981_v28, 4  ;;  %v10098_v28 = vld [vmem:[#allocation2 + $0x1f0] sm:$0xff]  }
 0x236   :  { %9263 = vmatpush3.bf16.msra.mxu1 %v10083_v55  ;;  %v17350_v55 = vrot.slane %v12638_v52, 2  ;;  %vm3395_vm8 = vmand %vm3363_vm7, %vm17344_vm12  ;;  %vm17345_vm4 = vcmp.ge.s32.totalorder %v12863_v27, 0  ;;  %v18417_v51 = vrot.slane %v12650_v14, 2 }
 0x237   :  { %9376 = vmatprep.subr.bf16.mxu1 %v10086_v47  ;;  %v3313_v47 = vrot.slane %v12699_v9, 2  ;;  %v3595_v37 = vpack.c.bf16 %v3580_v4, %v3579_v61  ;;  %vm3396_vm5 = vmand %vm3364_vm6, %vm17343_vm11  ;;  %vm17347_vm6 = vcmp.ge.s32.totalorder %v12871_v21, 0  ;;  %v12904_v61 = vadd.s32 4294967295, %v12871_v21 }
 0x238   :  { %9327 = vmatpush3.bf16.msra.mxu0 %v10085_v44  ;;  %v17348_v44 = vrot.slane %v12696_v38, 2  ;;  %v8502_v29 = vsel %vm3396_vm5, 1.0, %v18379_v54  ;;  %vm12898_vm7 = vmand %vm2996_vm10, %vm3012_vm2  ;;  %vm17352_vm5 = vcmp.lt.s32.totalorder %v12863_v27, 4  ;;  %vm17351_vm10 = vcmp.lt.s32.totalorder %v12871_v21, 4 }
 0x239   :  { %4578 = vmatmul.mubr.bf16.vlgmr.msra.gmra.mxu1 %v3170_v12  ;;  %9440 = vmatprep.subr.bf16.mxu0 %v10094_v13  ;;  %v12883_v25 = vsel %vm17353_vm15, %v3313_v47, %v17350_v55  ;;  %v12892_v12 = vadd.s32 4294967295, %v12863_v27  ;;  %v10092_v13 = vld [vmem:[#allocation2 + $0x160] sm:$0xff]   ;;  %18396 = vst [vmem:[#allocation114_spill] sm:$0xff] %v12904_v61  ;;  %vm3196_vm2 = vmand %vm12898_vm7, %vm17345_vm4  ;;  %vm17354_vm12 = vcmp.ge.s32.totalorder %v12904_v61, 0 }
 0x23a   :  { %9377 = vmatpush3.bf16.msra.mxu1 %v10087_v35  ;;  %v12877_v58 = vsel %vm17353_vm15, %v17348_v44, %v3313_v47  ;;  %18392 = vst [vmem:[#allocation103_spill] sm:$0xff] %v12883_v25  ;;  %v10091_v35 = vld [vmem:[#allocation2 + $0x128] sm:$0xff]   ;;  %4674 = vmatprep.mubr.bf16.mxu0 %v3595_v37  ;;  %v3444_v4 = vmul.f32 %v8502_v29, %v12883_v25  ;;  %v10096_v37 = vld [vmem:[#allocation2 + $0x158] sm:$0xff]   ;;  %vm3228_vm11 = vmand %vm3196_vm2, %vm17352_vm5  ;;  %vm3470_vm5 = vcmp.ge.s32.totalorder %v12825_v17, 0  ;;  %vm3486_vm15 = vcmp.lt.s32.totalorder %v12825_v17, 4 }
 0x23b   :  { %9378 = vmatprep.subr.bf16.mxu1 %v10088_v11  ;;  %18391 = vst [vmem:[#allocation118_spill] sm:$0xff] %v12877_v58  ;;  %v8501_v11 = vsel %vm3395_vm8, 1.0, %v18379_v54  ;;  %18393 = vst [vmem:[#allocation112_spill] sm:$0xff] %v12892_v12  ;;  %vm17360_vm4 = vcmp.lt.s32.totalorder %v12892_v12, 4  ;;  %v10097_v29 = vld [vmem:[#allocation2 + $0x118] sm:$0xff]  }
 0x23c   :  { %v3443_v47 = vmul.f32 %v8501_v11, %v12877_v58  ;;  %vm12909_vm8 = vmand %vm2997_vm1, %vm3013_vm14  ;;  %vm17356_vm1 = vcmp.ge.s32.totalorder %v12892_v12, 0  ;;  %v10114_v58 = vld [vmem:[#allocation2 + $0x1c8] sm:$0xff]   ;;  %v18466_v12 = vmov 0 }
 0x23d   :  { %vm3197_vm14 = vmand %vm12909_vm8, %vm17347_vm6  ;;  %vm17359_vm6 = vcmp.lt.s32.totalorder %v12904_v61, 4 }
 0x23e   :  { %9379 = vmatpush3.bf16.msra.mxu1 %v10089_v45  ;;  %v10093_v45 = vld [vmem:[#allocation2 + $0x120] sm:$0xff]   ;;  %v3459_v11 = vpack.c.bf16 %v3444_v4, %v3443_v47  ;;  %vm3229_vm3 = vmand %vm3197_vm14, %vm17351_vm10  ;;  %v8487_v47 = vsel %vm3228_vm11, 1.0, %v18379_v54  ;;  %v10100_v4 = vld [vmem:[#allocation2 + $0x150] sm:$0xff]   ;;  %vm3485_vm14 = vcmp.lt.s32.totalorder %v12818_v36, 4 }
 0x23f   :  { %9380 = vmatprep.subr.bf16.mxu1 %v10090_v42  ;;  %v8488_v44 = vsel %vm3229_vm3, 1.0, %v18379_v54  ;;  %v3276_v6 = vmul.f32 %v8487_v47, %v12638_v52  ;;  %vm3076_vm2 = vmand %vm12898_vm7, %vm17356_vm1  ;;  %vm3469_vm3 = vcmp.ge.s32.totalorder %v12818_v36, 0 }
 0x240   :  { %4675 = vmatmul.mubr.bf16.vlgmr.msra.gmra.mxu0 %v3459_v11  ;;  %v3277_v55 = vmul.f32 %v8488_v44, %v12640_v5  ;;  %vm3077_vm11 = vmand %vm12909_vm8, %vm17354_vm12  ;;  %v12952_v44 = vadd.s32 1, %v12863_v27 }
 0x241   :  { %9441 = vmatpush3.bf16.msra.mxu0 %v10095_v56  ;;  %vm3108_vm10 = vmand %vm3076_vm2, %vm17360_vm4  ;;  %v10102_v56 = vld [vmem:[#allocation2 + $0x1e8] sm:$0xff]  }
 0x242   :  { %9381 = vmatpush3.bf16.msra.mxu1 %v10091_v35  ;;  %v10099_v35 = vld [vmem:[#allocation2 + $0x1b0] sm:$0xff]   ;;  %9442 = vmatprep.subr.bf16.mxu0 %v10098_v28  ;;  %v3291_v47 = vpack.c.bf16 %v3277_v55, %v3276_v6  ;;  %vm3109_vm12 = vmand %vm3077_vm11, %vm17359_vm6  ;;  %v8471_v11 = vsel %vm3108_vm10, 1.0, %v18379_v54  ;;  %v18399_v28 = vld [vmem:[#allocation88_spill] sm:$0xff]  ;;  %v18401_v6 = vmov 0  ;;  %vm17361_vm11 = vcmp.ge.s32.totalorder %v12952_v44, 0 }
 0x243   :  { %9382 = vmatprep.subr.bf16.mxu1 %v10092_v13  ;;  %v2947_v13 = vrot.slane %v12650_v14, 6  ;;  %v12961_v3 = vshra.s32 %v18399_v28, 1  ;;  %v8472_v32 = vsel %vm3109_vm12, 1.0, %v18379_v54  ;;  %v3156_v23 = vmul.f32 %v8471_v11, %v12829_v43  ;;  %vm12969_vm2 = vmand %vm3469_vm3, %vm3485_vm14  ;;  %v18403_v55 = vld [vmem:[#allocation90_spill] sm:$0xff] }
 0x244   :  { %v18402_v6 = vsel %vm12969_vm2, 4294967295, %v18401_v6  ;;  %v12974_v34 = vshra.s32 %v18403_v55, 1  ;;  %4585 = vmatprep.mubr.bf16.mxu1 %v3291_v47  ;;  %v3157_v28 = vmul.f32 %v8472_v32, %v12841_v8  ;;  %vm12981_vm12 = vmand %vm3470_vm5, %vm3486_vm15  ;;  %v18405_v11 = vmov 0  ;;  %v10105_v47 = vld [vmem:[#allocation2 + $0x1a0] sm:$0xff]   ;;  %v10108_v8 = vld [vmem:[#allocation2 + $0x1d8] sm:$0xff]  }
 0x245   :  { %18400 = vst [vmem:[#allocation115_spill] sm:$0xff] %v12961_v3  ;;  %9443 = vmatpush3.bf16.msra.mxu0 %v10099_v35  ;;  %v18406_v11 = vsel %vm12981_vm12, 4294967295, %v18405_v11  ;;  %v12989_v55 = vsel %vm17362_vm13, %v18407_v39, %v2947_v13  ;;  %vm3517_vm10 = vmand %vm12969_vm2, %vm17356_vm1  ;;  %vm18408_vm15 = vcmp.ge.s32.totalorder %v12904_v61, 0  ;;  %v2982_v35 = vadd.s32 4294967295, %v12961_v3 }
 0x246   :  { %9383 = vmatpush3.bf16.msra.mxu1 %v10093_v45  ;;  %v10101_v45 = vld [vmem:[#allocation2 + $0x110] sm:$0xff]   ;;  %18404 = vst [vmem:[#allocation147_spill] sm:$0xff] %v12974_v34  ;;  %9444 = vmatprep.subr.bf16.mxu0 %v10102_v56  ;;  %v3171_v32 = vpack.c.bf16 %v3157_v28, %v3156_v23  ;;  %vm3518_vm5 = vmand %vm12981_vm12, %vm18408_vm15  ;;  %v18409_v39 = vrot.slane %v12661_v30, 6  ;;  %v2983_v56 = vadd.s32 4294967295, %v12974_v34  ;;  %vm17366_vm1 = vcmp.lt.s32.totalorder %v12952_v44, 4  ;;  %v10106_v23 = vld [vmem:[#allocation2 + $0x148] sm:$0xff]  }
 0x247   :  { %9384 = vmatprep.subr.bf16.mxu1 %v10096_v37  ;;  %v12958_v37 = vadd.s32 1, %v12871_v21  ;;  %vm3533_vm3 = vmand %vm3517_vm10, %vm17360_vm4  ;;  %v18475_v21 = vrot.slane %v12665_v22, 6 }
 0x248   :  { %4586 = vmatmul.mubr.bf16.gmra.mxu1 %v3171_v32  ;;  %vm3534_vm15 = vmand %vm3518_vm5, %vm17359_vm6  ;;  %v8519_v28 = vsel %vm3533_vm3, 1.0, %v18379_v54  ;;  %vm18415_vm3 = vcmp.lt.s32.totalorder %v18342_v62, 6  ;;  %vm3014_vm6 = vcmp.lt.s32.totalorder %v2982_v35, 4 }
 0x249   :  { %vm17363_vm14 = vcmp.ge.s32.totalorder %v12958_v37, 0  ;;  %9445 = vmatpush3.bf16.msra.mxu0 %v10103_v10  ;;  %v8520_v16 = vsel %vm3534_vm15, 1.0, %v18379_v54  ;;  %vm3365_vm10 = vmand %vm12898_vm7, %vm17361_vm11  ;;  %vm17364_vm5 = vcmp.lt.s32.totalorder %v12958_v37, 4  ;;  %v18412_v10 = vld [vmem:[#allocation89_spill] sm:$0xff]  ;;  %vm2998_vm7 = vcmp.ge.s32.totalorder %v2982_v35, 0  ;;  %v10111_v35 = vld [vmem:[#allocation2 + $0x190] sm:$0xff]  }
 0x24a   :  { %9385 = vmatpush3.bf16.msra.mxu1 %v10097_v29  ;;  %v3299_v29 = vrot.slane %v12640_v5, 2  ;;  %9446 = vmatprep.subr.bf16.mxu0 %v10104_v1  ;;  %v13028_v32 = vshra.s32 %v18412_v10, 1  ;;  %v18414_v1 = vrot.slane %v12638_v52, 2  ;;  %vm3366_vm15 = vmand %vm12909_vm8, %vm17363_vm14  ;;  %v18427_v10 = vld [vmem:[#allocation98_spill] sm:$0xff] }
 0x24b   :  { %9386 = vmatprep.subr.bf16.mxu1 %v10100_v4  ;;  %v13006_v4 = vsel %vm17362_vm13, %v2947_v13, %v18409_v39  ;;  %v18410_v13 = vld [vmem:[#allocation87_spill] sm:$0xff]  ;;  %vm18418_vm4 = vmmov %vm18415_vm3  ;;  %vm2999_vm13 = vcmp.ge.s32.totalorder %v2983_v56, 0  ;;  %v13120_v25 = vshra.s32 %v18427_v10, 1 }
 0x24c   :  { %v13018_v39 = vshra.s32 %v18410_v13, 1  ;;  %18413 = vst [vmem:[#allocation134_spill] sm:$0xff] %v13028_v32  ;;  %v3582_v13 = vmul.f32 %v8520_v16, %v13006_v4  ;;  %v13035_v43 = vsel %vm18415_vm3, %v18414_v1, %v3299_v29  ;;  %vm3397_vm11 = vmand %vm3365_vm10, %vm17366_vm1  ;;  %vm3015_vm3 = vcmp.lt.s32.totalorder %v2983_v56, 4 }
 0x24d   :  { %18416 = vst [vmem:[#allocation116_spill] sm:$0xff] %v13035_v43  ;;  %9447 = vmatpush3.bf16.msra.mxu0 %v10105_v47  ;;  %vm3398_vm8 = vmand %vm3366_vm15, %vm17364_vm5  ;;  %v8503_v42 = vsel %vm3397_vm11, 1.0, %v18379_v54  ;;  %vm17367_vm10 = vcmp.ge.s32.totalorder %v13028_v32, 0  ;;  %v13066_v47 = vadd.s32 4294967295, %v13028_v32 }
 0x24e   :  { %9387 = vmatpush3.bf16.msra.mxu1 %v10101_v45  ;;  %18411 = vst [vmem:[#allocation149_spill] sm:$0xff] %v13018_v39  ;;  %v3581_v45 = vmul.f32 %v8519_v28, %v12989_v55  ;;  %v13045_v28 = vsel %vm18418_vm4, %v3299_v29, %v18417_v51  ;;  %vm17365_vm14 = vcmp.ge.s32.totalorder %v13018_v39, 0  ;;  %9448 = vmatprep.subr.bf16.mxu0 %v10108_v8  ;;  %v10109_v29 = vld [vmem:[#allocation2 + $0x198] sm:$0xff]   ;;  %v8504_v1 = vsel %vm3398_vm8, 1.0, %v18379_v54  ;;  %vm13060_vm4 = vmand %vm2998_vm7, %vm3014_vm6 }
 0x24f   :  { %9388 = vmatprep.subr.bf16.mxu1 %v10106_v23  ;;  %18419 = vst [vmem:[#allocation128_spill] sm:$0xff] %v13045_v28  ;;  %v13054_v23 = vadd.s32 4294967295, %v13018_v39  ;;  %v3445_v51 = vmul.f32 %v8503_v42, %v13035_v43  ;;  %18423 = vst [vmem:[#allocation131_spill] sm:$0xff] %v13066_v47  ;;  %v3446_v8 = vmul.f32 %v8504_v1, %v13045_v28  ;;  %vm17369_vm6 = vcmp.lt.s32.totalorder %v13018_v39, 4  ;;  %v10112_v1 = vld [vmem:[#allocation2 + $0x140] sm:$0xff]  }
 0x250   :  { %v3596_v16 = vpack.c.bf16 %v3582_v13, %v3581_v45  ;;  %v10110_v13 = vld [vmem:[#allocation2 + $0x1d0] sm:$0xff]   ;;  %vm13071_vm11 = vmand %vm2999_vm13, %vm3015_vm3  ;;  %vm17368_vm7 = vcmp.lt.s32.totalorder %v13028_v32, 4  ;;  %vm17371_vm5 = vcmp.ge.s32.totalorder %v13066_v47, 0  ;;  %18428 = vst [vmem:[#allocation146_spill] sm:$0xff] %v13120_v25 }
 0x251   :  { %18420 = vst [vmem:[#allocation130_spill] sm:$0xff] %v13054_v23  ;;  %vm3198_vm15 = vmand %vm13060_vm4, %vm17365_vm14  ;;  %9449 = vmatpush3.bf16.msra.mxu0 %v10109_v29  ;;  %vm17370_vm3 = vcmp.ge.s32.totalorder %v13054_v23, 0  ;;  %vm17388_vm1 = vcmp.lt.s32.totalorder %v13054_v23, 4 }
 0x252   :  { %9389 = vmatpush3.bf16.msra.mxu1 %v10107_v49  ;;  %4682 = vmatprep.mubr.bf16.mxu0 %v3596_v16  ;;  %v3460_v16 = vpack.c.bf16 %v3446_v8, %v3445_v51  ;;  %vm3199_vm13 = vmand %vm13071_vm11, %vm17367_vm10  ;;  %v2949_v8 = vrot.slane %v12663_v7, 6  ;;  %v18454_v49 = vrot.slane %v12663_v7, 2 }
 0x253   :  { %9450 = vmatprep.subr.bf16.mxu0 %v10110_v13  ;;  %vm3230_vm8 = vmand %vm3198_vm15, %vm17369_vm6  ;;  %vm17393_vm15 = vcmp.lt.s32.totalorder %v13066_v47, 4  ;;  %v10113_v13 = vld [vmem:[#allocation2 + $0x100] sm:$0xff]   ;;  %vm3472_vm6 = vcmp.ge.s32.totalorder %v12974_v34, 0  ;;  %9390 = vmatprep.subr.bf16.mxu1 %v10112_v1  ;;  %v13133_v1 = vadd.s32 1, %v13028_v32 }
 0x254   :  { %4683 = vmatmul.mubr.bf16.gmra.mxu0 %v3460_v16  ;;  %vm3231_vm14 = vmand %vm3199_vm13, %vm17368_vm7  ;;  %v8489_v56 = vsel %vm3230_vm8, 1.0, %v18379_v54  ;;  %vm3487_vm8 = vcmp.lt.s32.totalorder %v12961_v3, 4 }
 0x255   :  { %v8490_v42 = vsel %vm3231_vm14, 1.0, %v18379_v54  ;;  %v3278_v29 = vmul.f32 %v8489_v56, %v12650_v14  ;;  %vm3078_vm10 = vmand %vm13060_vm4, %vm17370_vm3  ;;  %9451 = vmatpush3.bf16.msra.mxu0 %v10111_v35  ;;  %vm3471_vm14 = vcmp.ge.s32.totalorder %v12961_v3, 0  ;;  %vm3488_vm3 = vcmp.lt.s32.totalorder %v12974_v34, 4  ;;  %18432 = vst [vmem:[#allocation75_spill] sm:$0xff] %v13133_v1 }
 0x256   :  { %v3279_v51 = vmul.f32 %v8490_v42, %v12661_v30  ;;  %vm3079_vm13 = vmand %vm13071_vm11, %vm17371_vm5  ;;  %v13117_v42 = vadd.s32 1, %v13018_v39  ;;  %9391 = vmatpush3.bf16.msra.mxu1 %v10113_v13  ;;  %v10115_v13 = vld [vmem:[#allocation2 + $0x188] sm:$0xff]   ;;  %9452 = vmatprep.subr.bf16.mxu0 %v10114_v58  ;;  %v18438_v3 = vrot.slane %v12665_v22, 6 }
 0x257   :  { %vm3110_vm7 = vmand %vm3078_vm10, %vm17388_vm1 }
 0x258   :  { %v3292_v16 = vpack.c.bf16 %v3279_v51, %v3278_v29  ;;  %vm3111_vm5 = vmand %vm3079_vm13, %vm17393_vm15  ;;  %v8473_v56 = vsel %vm3110_vm7, 1.0, %v18379_v54  ;;  %18426 = vst [vmem:[#allocation144_spill] sm:$0xff] %v13117_v42  ;;  %v18429_v29 = vmov 0  ;;  %v18433_v51 = vld [vmem:[#allocation100_spill] sm:$0xff]  ;;  %vm18439_vm7 = vcmp.lt.s32.totalorder %v18342_v62, 2 }
 0x259   :  { %v8474_v35 = vsel %vm3111_vm5, 1.0, %v18379_v54  ;;  %v3158_v9 = vmul.f32 %v8473_v56, %v12989_v55  ;;  %vm13128_vm10 = vmand %vm3471_vm14, %vm3487_vm8  ;;  %v13136_v10 = vshra.s32 %v18433_v51, 1  ;;  %v18435_v56 = vmov 0  ;;  %9453 = vmatpush3.bf16.msra.mxu0 %v10115_v13 }
 0x25a   :  { %v18430_v29 = vsel %vm13128_vm10, 4294967295, %v18429_v29  ;;  %4593 = vmatprep.mubr.bf16.mxu1 %v3292_v16  ;;  %v3159_v39 = vmul.f32 %v8474_v35, %v13006_v4  ;;  %vm13143_vm5 = vmand %vm3472_vm6, %vm3488_vm3  ;;  %v13151_v32 = vsel %vm18439_vm7, %v2949_v8, %v18438_v3  ;;  %v18441_v51 = vrot.slane %v12661_v30, 6  ;;  %v10116_v16 = vld [vmem:[#allocation2 + $0x1c0] sm:$0xff]  }
 0x25b   :  { %18431 = vst [vmem:[#allocation132_spill] sm:$0xff] %v18430_v29  ;;  %18434 = vst [vmem:[#allocation145_spill] sm:$0xff] %v13136_v10  ;;  %v18436_v56 = vsel %vm13143_vm5, 4294967295, %v18435_v56  ;;  %vm18444_vm14 = vcmp.ge.s32.totalorder %v13054_v23, 0  ;;  %vm18445_vm3 = vcmp.ge.s32.totalorder %v13066_v47, 0  ;;  %v3301_v3 = vrot.slane %v12661_v30, 2  ;;  %9454 = vmatprep.subr.bf16.mxu0 %v10116_v16 }
 0x25c   :  { %18437 = vst [vmem:[#allocation77_spill] sm:$0xff] %v18436_v56  ;;  %18440 = vst [vmem:[#allocation76_spill] sm:$0xff] %v13151_v32  ;;  %v3172_v58 = vpack.c.bf16 %v3159_v39, %v3158_v9  ;;  %v18446_v9 = vld [vmem:[#allocation96_spill] sm:$0xff]  ;;  %v2985_v13 = vadd.s32 4294967295, %v13136_v10  ;;  %v18449_v16 = vld [vmem:[#allocation97_spill] sm:$0xff]  ;;  %v18451_v29 = vrot.slane %v12650_v14, 2 }
 0x25d   :  { %vm18442_vm13 = vmmov %vm18439_vm7  ;;  %v13175_v39 = vshra.s32 %v18446_v9, 1  ;;  %vm17404_vm7 = vcmp.lt.s32.totalorder %v13117_v42, 4  ;;  %v13192_v9 = vld [vmem:[#allocation2 + $0x238] sm:$0xff]  }
 0x25e   :  { %v13157_v35 = vsel %vm18442_vm13, %v18441_v51, %v2949_v8  ;;  %vm3519_vm6 = vmand %vm13128_vm10, %vm18444_vm14  ;;  %v2984_v8 = vadd.s32 4294967295, %v13120_v25  ;;  %v10117_v51 = vld [vmem:[#allocation2 + $0x180] sm:$0xff]   ;;  %4594 = vmatmul.mubr.bf16.gmra.mxu1 %v3172_v58  ;;  %v13190_v58 = vshra.s32 %v18449_v16, 1  ;;  %vm3017_vm10 = vcmp.lt.s32.totalorder %v2985_v13, 4  ;;  %9877 = vmatprep.subr.bf16.mxu1 %v13192_v9 }
 0x25f   :  { %18443 = vst [vmem:[#allocation117_spill] sm:$0xff] %v13157_v35  ;;  %vm3520_vm8 = vmand %vm13143_vm5, %vm18445_vm3  ;;  %9455 = vmatpush3.bf16.msra.mxu0 %v10117_v51  ;;  %vm3001_vm5 = vcmp.ge.s32.totalorder %v2985_v13, 0 }
 0x260   :  { %vm3535_vm13 = vmand %vm3519_vm6, %vm17388_vm1  ;;  %18447 = vst [vmem:[#allocation85_spill] sm:$0xff] %v13175_v39  ;;  %vm18448_vm6 = vcmp.ge.s32.totalorder %v13117_v42, 0 }
 0x261   :  { %vm3536_vm3 = vmand %vm3520_vm8, %vm17393_vm15  ;;  %v8521_v56 = vsel %vm3535_vm13, 1.0, %v18379_v54  ;;  %18450 = vst [vmem:[#allocation86_spill] sm:$0xff] %v13190_v58  ;;  %vm18452_vm8 = vcmp.lt.s32.totalorder %v18342_v62, 6  ;;  %vm18453_vm13 = vcmp.ge.s32.totalorder %v13133_v1, 0 }
 0x262   :  { %v8522_v23 = vsel %vm3536_vm3, 1.0, %v18379_v54  ;;  %v3583_v34 = vmul.f32 %v8521_v56, %v13157_v35  ;;  %vm3367_vm1 = vmand %vm13060_vm4, %vm18448_vm6  ;;  %v13199_v56 = vsel %vm18452_vm8, %v18451_v29, %v3301_v3  ;;  %vm3000_vm3 = vcmp.ge.s32.totalorder %v2984_v8, 0 }
 0x263   :  { %v3584_v47 = vmul.f32 %v8522_v23, %v13151_v32  ;;  %vm3368_vm4 = vmand %vm13071_vm11, %vm18453_vm13  ;;  %vm3016_vm6 = vcmp.lt.s32.totalorder %v2984_v8, 4  ;;  %vm17400_vm11 = vcmp.ge.s32.totalorder %v13175_v39, 0  ;;  %v13219_v29 = vadd.s32 4294967295, %v13175_v39 }
 0x264   :  { %vm18455_vm15 = vmmov %vm18452_vm8  ;;  %vm18456_vm8 = vcmp.lt.s32.totalorder %v13133_v1, 4  ;;  %v13279_v1 = vadd.s32 1, %v13175_v39 }
 0x265   :  { %v13209_v51 = vsel %vm18455_vm15, %v3301_v3, %v18454_v49  ;;  %vm3399_vm14 = vmand %vm3367_vm1, %vm17404_vm7  ;;  %v3597_v23 = vpack.c.bf16 %v3584_v47, %v3583_v34  ;;  %18457 = vst [vmem:[#allocation78_spill] sm:$0xff] %v13219_v29  ;;  %vm17401_vm15 = vcmp.ge.s32.totalorder %v13190_v58, 0  ;;  %v13229_v34 = vadd.s32 4294967295, %v13190_v58 }
 0x266   :  { %vm3400_vm12 = vmand %vm3368_vm4, %vm18456_vm8  ;;  %v8505_v45 = vsel %vm3399_vm14, 1.0, %v18379_v54  ;;  %vm17402_vm4 = vcmp.lt.s32.totalorder %v13190_v58, 4  ;;  %vm3490_vm7 = vcmp.lt.s32.totalorder %v13136_v10, 4  ;;  %18463 = vst [vmem:[#allocation83_spill] sm:$0xff] %v13279_v1 }
 0x267   :  { %v8506_v3 = vsel %vm3400_vm12, 1.0, %v18379_v54  ;;  %v3447_v8 = vmul.f32 %v8505_v45, %v13199_v56  ;;  %vm13223_vm1 = vmand %vm3000_vm3, %vm3016_vm6  ;;  %18460 = vst [vmem:[#allocation95_spill] sm:$0xff] %v13229_v34  ;;  %4690 = vmatprep.mubr.bf16.mxu0 %v3597_v23  ;;  %vm17403_vm12 = vcmp.lt.s32.totalorder %v13175_v39, 4  ;;  %vm17422_vm6 = vcmp.ge.s32.totalorder %v13229_v34, 0 }
 0x268   :  { %v3448_v47 = vmul.f32 %v8506_v3, %v13209_v51  ;;  %vm13233_vm14 = vmand %vm3001_vm5, %vm3017_vm10  ;;  %vm17405_vm10 = vcmp.ge.s32.totalorder %v13219_v29, 0 }
 0x269   :  { %vm3200_vm13 = vmand %vm13223_vm1, %vm17400_vm11  ;;  %vm17429_vm11 = vcmp.lt.s32.totalorder %v13219_v29, 4 }
 0x26a   :  { %v3461_v45 = vpack.c.bf16 %v3448_v47, %v3447_v8  ;;  %vm3201_vm3 = vmand %vm13233_vm14, %vm17401_vm15  ;;  %v2951_v47 = vrot.slane %v12669_v53, 6 }
 0x26b   :  { %vm3232_vm5 = vmand %vm3200_vm13, %vm17403_vm12  ;;  %vm17433_vm13 = vcmp.lt.s32.totalorder %v13229_v34, 4  ;;  %vm3474_vm12 = vcmp.ge.s32.totalorder %v13136_v10, 0 }
 0x26c   :  { %4691 = vmatmul.mubr.bf16.gmra.mxu0 %v3461_v45  ;;  %vm3233_vm8 = vmand %vm3201_vm3, %vm17402_vm4  ;;  %v8491_v13 = vsel %vm3232_vm5, 1.0, %v18379_v54  ;;  %vm3473_vm5 = vcmp.ge.s32.totalorder %v13120_v25, 0 }
 0x26d   :  { %v8492_v23 = vsel %vm3233_vm8, 1.0, %v18379_v54  ;;  %v3280_v3 = vmul.f32 %v8491_v13, %v12663_v7  ;;  %vm3080_vm15 = vmand %vm13223_vm1, %vm17405_vm10  ;;  %vm3489_vm8 = vcmp.lt.s32.totalorder %v13120_v25, 4  ;;  %v18464_v25 = vld [vmem:[#allocation110_spill] sm:$0xff] }
 0x26e   :  { %v3281_v8 = vmul.f32 %v8492_v23, %v12665_v22  ;;  %vm3081_vm3 = vmand %vm13233_vm14, %vm17422_vm6  ;;  %v13282_v42 = vshra.s32 %v18464_v25, 1  ;;  %v18472_v25 = vmov 0 }
 0x26f   :  { %vm3112_vm4 = vmand %vm3080_vm15, %vm17429_vm11 }
 0x270   :  { %v3293_v13 = vpack.c.bf16 %v3281_v8, %v3280_v3  ;;  %vm3113_vm10 = vmand %vm3081_vm3, %vm17433_vm13  ;;  %v8475_v23 = vsel %vm3112_vm4, 1.0, %v18379_v54  ;;  %18465 = vst [vmem:[#allocation104_spill] sm:$0xff] %v13282_v42  ;;  %v13291_v3 = vadd.s32 1, %v13190_v58  ;;  %v18470_v8 = vld [vmem:[#allocation113_spill] sm:$0xff]  ;;  %vm18478_vm3 = vcmp.ge.s32.totalorder %v13219_v29, 0 }
 0x271   :  { %v8476_v61 = vsel %vm3113_vm10, 1.0, %v18379_v54  ;;  %v3160_v45 = vmul.f32 %v8475_v23, %v13157_v35  ;;  %vm13286_vm15 = vmand %vm3473_vm5, %vm3489_vm8  ;;  %v13294_v10 = vshra.s32 %v18470_v8, 1  ;;  %vm18476_vm10 = vcmp.lt.s32.totalorder %v18342_v62, 2 }
 0x272   :  { %v18467_v12 = vsel %vm13286_vm15, 4294967295, %v18466_v12  ;;  %18469 = vst [vmem:[#allocation107_spill] sm:$0xff] %v13291_v3  ;;  %4601 = vmatprep.mubr.bf16.mxu1 %v3293_v13  ;;  %v3161_v39 = vmul.f32 %v8476_v61, %v13151_v32  ;;  %vm13297_vm4 = vmand %vm3474_vm12, %vm3490_vm7  ;;  %v13305_v23 = vsel %vm18476_vm10, %v18475_v21, %v2951_v47  ;;  %v3303_v61 = vrot.slane %v12665_v22, 2 }
 0x273   :  { %18468 = vst [vmem:[#allocation108_spill] sm:$0xff] %v18467_v12  ;;  %18471 = vst [vmem:[#allocation120_spill] sm:$0xff] %v13294_v10  ;;  %v18473_v25 = vsel %vm13297_vm4, 4294967295, %v18472_v25  ;;  %v2986_v13 = vadd.s32 4294967295, %v13282_v42  ;;  %v18479_v21 = vrot.slane %v12677_v57, 6  ;;  %vm17438_vm12 = vcmp.lt.s32.totalorder %v13279_v1, 4 }
 0x274   :  { %18474 = vst [vmem:[#allocation121_spill] sm:$0xff] %v18473_v25  ;;  %18477 = vst [vmem:[#allocation84_spill] sm:$0xff] %v13305_v23  ;;  %v3173_v8 = vpack.c.bf16 %v3161_v39, %v3160_v45  ;;  %v2987_v45 = vadd.s32 4294967295, %v13294_v10  ;;  %v18482_v12 = vld [vmem:[#allocation109_spill] sm:$0xff]  ;;  %v18487_v32 = vrot.slane %v12663_v7, 2 }
 0x275   :  { %vm3521_vm5 = vmand %vm13286_vm15, %vm18478_vm3  ;;  %vm17443_vm3 = vcmp.ge.s32.totalorder %v13291_v3, 0 }
 0x276   :  { %vm3522_vm7 = vmand %vm13297_vm4, %vm17422_vm6  ;;  %4602 = vmatmul.mubr.bf16.gmra.mxu1 %v3173_v8  ;;  %v18485_v8 = vld [vmem:[#allocation111_spill] sm:$0xff]  ;;  %vm3019_vm4 = vcmp.lt.s32.totalorder %v2987_v45, 4 }
 0x277   :  { %vm18480_vm8 = vmmov %vm18476_vm10  ;;  %v13344_v39 = vshra.s32 %v18485_v8, 1 }
 0x278   :  { %v13322_v58 = vsel %vm18480_vm8, %v2951_v47, %v18479_v21  ;;  %vm3537_vm10 = vmand %vm3521_vm5, %vm17429_vm11  ;;  %v13334_v47 = vshra.s32 %v18482_v12, 1  ;;  %vm18484_vm5 = vcmp.ge.s32.totalorder %v13279_v1, 0  ;;  %vm3003_vm11 = vcmp.ge.s32.totalorder %v2987_v45, 0 }
 0x279   :  { %18481 = vst [vmem:[#allocation119_spill] sm:$0xff] %v13322_v58  ;;  %vm3538_vm6 = vmand %vm3522_vm7, %vm17433_vm13  ;;  %v8523_v25 = vsel %vm3537_vm10, 1.0, %v18379_v54  ;;  %vm18488_vm7 = vcmp.lt.s32.totalorder %v18342_v62, 6  ;;  %vm3002_vm10 = vcmp.ge.s32.totalorder %v2986_v13, 0 }
 0x27a   :  { %18483 = vst [vmem:[#allocation123_spill] sm:$0xff] %v13334_v47  ;;  %v8524_v21 = vsel %vm3538_vm6, 1.0, %v18379_v54  ;;  %v3585_v29 = vmul.f32 %v8523_v25, %v13305_v23  ;;  %vm3369_vm8 = vmand %vm13223_vm1, %vm18484_vm5  ;;  %v13351_v12 = vsel %vm18488_vm7, %v18487_v32, %v3303_v61  ;;  %vm3018_vm1 = vcmp.lt.s32.totalorder %v2986_v13, 4 }
 0x27b   :  { %18486 = vst [vmem:[#allocation133_spill] sm:$0xff] %v13344_v39  ;;  %v3586_v34 = vmul.f32 %v8524_v21, %v13322_v58  ;;  %18489 = vst [vmem:[#allocation139_spill] sm:$0xff] %v13351_v12  ;;  %v18490_v25 = vrot.slane %v12669_v53, 2  ;;  %v13370_v13 = vadd.s32 4294967295, %v13334_v47 }
 0x27c   :  { %vm3370_vm6 = vmand %vm13233_vm14, %vm17443_vm3  ;;  %vm17439_vm14 = vcmp.ge.s32.totalorder %v13334_v47, 0  ;;  %vm3492_vm3 = vcmp.lt.s32.totalorder %v13294_v10, 4 }
 0x27d   :  { %vm18491_vm5 = vmmov %vm18488_vm7  ;;  %v3598_v32 = vpack.c.bf16 %v3586_v34, %v3585_v29  ;;  %vm18493_vm7 = vcmp.lt.s32.totalorder %v13291_v3, 4  ;;  %18494 = vst [vmem:[#allocation137_spill] sm:$0xff] %v13370_v13  ;;  %v13380_v29 = vadd.s32 4294967295, %v13344_v39  ;;  %v13429_v3 = vadd.s32 1, %v13334_v47 }
 0x27e   :  { %v13361_v49 = vsel %vm18491_vm5, %v3303_v61, %v18490_v25  ;;  %vm3401_vm13 = vmand %vm3369_vm8, %vm17438_vm12  ;;  %vm17440_vm8 = vcmp.ge.s32.totalorder %v13344_v39, 0 }
 0x27f   :  { %18492 = vst [vmem:[#allocation136_spill] sm:$0xff] %v13361_v49  ;;  %vm3402_vm15 = vmand %vm3370_vm6, %vm18493_vm7  ;;  %v8507_v16 = vsel %vm3401_vm13, 1.0, %v18379_v54  ;;  %4698 = vmatprep.mubr.bf16.mxu0 %v3598_v32  ;;  %vm17460_vm7 = vcmp.ge.s32.totalorder %v13380_v29, 0 }
 0x280   :  { %v8508_v21 = vsel %vm3402_vm15, 1.0, %v18379_v54  ;;  %v3449_v61 = vmul.f32 %v8507_v16, %v13351_v12  ;;  %vm13374_vm5 = vmand %vm3002_vm10, %vm3018_vm1  ;;  %18497 = vst [vmem:[#allocation148_spill] sm:$0xff] %v13380_v29  ;;  %vm17442_vm15 = vcmp.lt.s32.totalorder %v13334_v47, 4  ;;  %vm17441_vm10 = vcmp.lt.s32.totalorder %v13344_v39, 4 }
 0x281   :  { %v3450_v34 = vmul.f32 %v8508_v21, %v13361_v49  ;;  %vm13383_vm13 = vmand %vm3003_vm11, %vm3019_vm4  ;;  %vm17444_vm11 = vcmp.ge.s32.totalorder %v13370_v13, 0  ;;  %18500 = vst [vmem:[#allocation91_spill] sm:$0xff] %v13429_v3  ;;  %v18503_v49 = vmov 0  ;;  %v18512_v12 = vrot.slane %v12677_v57, 6 }
 0x282   :  { %vm3202_vm6 = vmand %vm13374_vm5, %vm17439_vm14  ;;  %vm17467_vm14 = vcmp.lt.s32.totalorder %v13370_v13, 4 }
 0x283   :  { %v3462_v16 = vpack.c.bf16 %v3450_v34, %v3449_v61  ;;  %vm3203_vm1 = vmand %vm13383_vm13, %vm17440_vm8 }
 0x284   :  { %vm3234_vm4 = vmand %vm3202_vm6, %vm17442_vm15  ;;  %vm17471_vm6 = vcmp.lt.s32.totalorder %v13380_v29, 4  ;;  %vm3476_vm15 = vcmp.ge.s32.totalorder %v13294_v10, 0 }
 0x285   :  { %4699 = vmatmul.mubr.bf16.gmra.mxu0 %v3462_v16  ;;  %vm3235_vm12 = vmand %vm3203_vm1, %vm17441_vm10  ;;  %v8493_v32 = vsel %vm3234_vm4, 1.0, %v18379_v54  ;;  %vm3475_vm4 = vcmp.ge.s32.totalorder %v13282_v42, 0  ;;  %v2953_v16 = vrot.slane %v12679_v19, 6 }
 0x286   :  { %v8494_v21 = vsel %vm3235_vm12, 1.0, %v18379_v54  ;;  %v3282_v61 = vmul.f32 %v8493_v32, %v12669_v53  ;;  %vm3082_vm8 = vmand %vm13374_vm5, %vm17444_vm11  ;;  %vm3491_vm12 = vcmp.lt.s32.totalorder %v13282_v42, 4  ;;  %v18501_v42 = vld [vmem:[#allocation126_spill] sm:$0xff] }
 0x287   :  { %v3283_v34 = vmul.f32 %v8494_v21, %v12677_v57  ;;  %vm3083_vm1 = vmand %vm13383_vm13, %vm17460_vm7  ;;  %v13432_v1 = vshra.s32 %v18501_v42, 1  ;;  %v18509_v42 = vmov 0 }
 0x288   :  { %vm3114_vm10 = vmand %vm3082_vm8, %vm17467_vm14 }
 0x289   :  { %v3294_v21 = vpack.c.bf16 %v3283_v34, %v3282_v61  ;;  %vm3115_vm11 = vmand %vm3083_vm1, %vm17471_vm6  ;;  %v8477_v8 = vsel %vm3114_vm10, 1.0, %v18379_v54  ;;  %18502 = vst [vmem:[#allocation92_spill] sm:$0xff] %v13432_v1  ;;  %v13441_v61 = vadd.s32 1, %v13344_v39  ;;  %v18507_v34 = vld [vmem:[#allocation129_spill] sm:$0xff]  ;;  %vm18515_vm1 = vcmp.ge.s32.totalorder %v13370_v13, 0 }
 0x28a   :  { %v8478_v35 = vsel %vm3115_vm11, 1.0, %v18379_v54  ;;  %v3162_v32 = vmul.f32 %v8477_v8, %v13305_v23  ;;  %vm13436_vm8 = vmand %vm3475_vm4, %vm3491_vm12  ;;  %v13444_v10 = vshra.s32 %v18507_v34, 1  ;;  %vm18513_vm11 = vcmp.lt.s32.totalorder %v18342_v62, 2 }
 0x28b   :  { %v18504_v49 = vsel %vm13436_vm8, 4294967295, %v18503_v49  ;;  %18506 = vst [vmem:[#allocation135_spill] sm:$0xff] %v13441_v61  ;;  %4609 = vmatprep.mubr.bf16.mxu1 %v3294_v21  ;;  %v3163_v47 = vmul.f32 %v8478_v35, %v13322_v58  ;;  %vm13447_vm10 = vmand %vm3476_vm15, %vm3492_vm3  ;;  %v13455_v8 = vsel %vm18513_vm11, %v18512_v12, %v2953_v16  ;;  %v3305_v35 = vrot.slane %v12677_v57, 2 }
 0x28c   :  { %18505 = vst [vmem:[#allocation94_spill] sm:$0xff] %v18504_v49  ;;  %18508 = vst [vmem:[#allocation124_spill] sm:$0xff] %v13444_v10  ;;  %v18510_v42 = vsel %vm13447_vm10, 4294967295, %v18509_v42  ;;  %v2988_v21 = vadd.s32 4294967295, %v13432_v1  ;;  %v18516_v12 = vrot.slane %v12681_v60, 6  ;;  %vm17476_vm15 = vcmp.lt.s32.totalorder %v13429_v3, 4 }
 0x28d   :  { %18511 = vst [vmem:[#allocation138_spill] sm:$0xff] %v18510_v42  ;;  %18514 = vst [vmem:[#allocation93_spill] sm:$0xff] %v13455_v8  ;;  %v3174_v34 = vpack.c.bf16 %v3163_v47, %v3162_v32  ;;  %v2989_v32 = vadd.s32 4294967295, %v13444_v10  ;;  %v18519_v49 = vld [vmem:[#allocation125_spill] sm:$0xff]  ;;  %v18524_v58 = vrot.slane %v12669_v53, 2  ;;  %v18549_v23 = vrot.slane %v12681_v60, 6 }
 0x28e   :  { %vm3523_vm4 = vmand %vm13436_vm8, %vm18515_vm1  ;;  %vm17481_vm1 = vcmp.ge.s32.totalorder %v13441_v61, 0 }
 0x28f   :  { %vm3524_vm3 = vmand %vm13447_vm10, %vm17460_vm7  ;;  %4610 = vmatmul.mubr.bf16.gmra.mxu1 %v3174_v34  ;;  %v18522_v34 = vld [vmem:[#allocation127_spill] sm:$0xff]  ;;  %vm3021_vm10 = vcmp.lt.s32.totalorder %v2989_v32, 4 }
 0x290   :  { %vm18517_vm12 = vmmov %vm18513_vm11  ;;  %v13494_v47 = vshra.s32 %v18522_v34, 1 }
 0x291   :  { %v13472_v39 = vsel %vm18517_vm12, %v2953_v16, %v18516_v12  ;;  %vm3539_vm11 = vmand %vm3523_vm4, %vm17467_vm14  ;;  %v13484_v16 = vshra.s32 %v18519_v49, 1  ;;  %vm18521_vm4 = vcmp.ge.s32.totalorder %v13429_v3, 0  ;;  %vm3005_vm14 = vcmp.ge.s32.totalorder %v2989_v32, 0 }
 0x292   :  { %18518 = vst [vmem:[#allocation99_spill] sm:$0xff] %v13472_v39  ;;  %vm3540_vm7 = vmand %vm3524_vm3, %vm17471_vm6  ;;  %v8525_v42 = vsel %vm3539_vm11, 1.0, %v18379_v54  ;;  %vm18525_vm3 = vcmp.lt.s32.totalorder %v18342_v62, 6  ;;  %vm3004_vm11 = vcmp.ge.s32.totalorder %v2988_v21, 0 }
 0x293   :  { %18520 = vst [vmem:[#allocation122_spill] sm:$0xff] %v13484_v16  ;;  %v8526_v12 = vsel %vm3540_vm7, 1.0, %v18379_v54  ;;  %v3587_v13 = vmul.f32 %v8525_v42, %v13455_v8  ;;  %vm3371_vm12 = vmand %vm13374_vm5, %vm18521_vm4  ;;  %v13501_v49 = vsel %vm18525_vm3, %v18524_v58, %v3305_v35  ;;  %vm3020_vm5 = vcmp.lt.s32.totalorder %v2988_v21, 4 }
 0x294   :  { %18523 = vst [vmem:[#allocation154_spill] sm:$0xff] %v13494_v47  ;;  %v3588_v29 = vmul.f32 %v8526_v12, %v13472_v39  ;;  %18526 = vst [vmem:[#allocation155_spill] sm:$0xff] %v13501_v49  ;;  %v18527_v42 = vrot.slane %v12679_v19, 2  ;;  %v13520_v21 = vadd.s32 4294967295, %v13484_v16 }
 0x295   :  { %vm3372_vm7 = vmand %vm13383_vm13, %vm17481_vm1  ;;  %vm17477_vm13 = vcmp.ge.s32.totalorder %v13484_v16, 0  ;;  %vm3494_vm1 = vcmp.lt.s32.totalorder %v13444_v10, 4 }
 0x296   :  { %vm18528_vm4 = vmmov %vm18525_vm3  ;;  %v3599_v58 = vpack.c.bf16 %v3588_v29, %v3587_v13  ;;  %vm18530_vm3 = vcmp.lt.s32.totalorder %v13441_v61, 4  ;;  %18531 = vst [vmem:[#allocation157_spill] sm:$0xff] %v13520_v21  ;;  %v13530_v13 = vadd.s32 4294967295, %v13494_v47  ;;  %v13579_v61 = vadd.s32 1, %v13484_v16 }
 0x297   :  { %v13511_v25 = vsel %vm18528_vm4, %v3305_v35, %v18527_v42  ;;  %vm3403_vm6 = vmand %vm3371_vm12, %vm17476_vm15  ;;  %vm17478_vm12 = vcmp.ge.s32.totalorder %v13494_v47, 0 }
 0x298   :  { %18529 = vst [vmem:[#allocation156_spill] sm:$0xff] %v13511_v25  ;;  %vm3404_vm8 = vmand %vm3372_vm7, %vm18530_vm3  ;;  %v8509_v45 = vsel %vm3403_vm6, 1.0, %v18379_v54  ;;  %4706 = vmatprep.mubr.bf16.mxu0 %v3599_v58  ;;  %vm17498_vm3 = vcmp.ge.s32.totalorder %v13530_v13, 0 }
 0x299   :  { %v8510_v12 = vsel %vm3404_vm8, 1.0, %v18379_v54  ;;  %v3451_v35 = vmul.f32 %v8509_v45, %v13501_v49  ;;  %vm13524_vm4 = vmand %vm3004_vm11, %vm3020_vm5  ;;  %18534 = vst [vmem:[#allocation158_spill] sm:$0xff] %v13530_v13  ;;  %vm17480_vm8 = vcmp.lt.s32.totalorder %v13484_v16, 4  ;;  %vm17479_vm11 = vcmp.lt.s32.totalorder %v13494_v47, 4 }
 0x29a   :  { %v3452_v29 = vmul.f32 %v8510_v12, %v13511_v25  ;;  %vm13533_vm6 = vmand %vm3005_vm14, %vm3021_vm10  ;;  %vm17482_vm14 = vcmp.ge.s32.totalorder %v13520_v21, 0  ;;  %18537 = vst [vmem:[#allocation159_spill] sm:$0xff] %v13579_v61  ;;  %v18540_v49 = vmov 0 }
 0x29b   :  { %vm3204_vm7 = vmand %vm13524_vm4, %vm17477_vm13  ;;  %vm17505_vm13 = vcmp.lt.s32.totalorder %v13520_v21, 4 }
 0x29c   :  { %v3463_v45 = vpack.c.bf16 %v3452_v29, %v3451_v35  ;;  %vm3205_vm5 = vmand %vm13533_vm6, %vm17478_vm12 }
 0x29d   :  { %vm3236_vm10 = vmand %vm3204_vm7, %vm17480_vm8  ;;  %vm17509_vm7 = vcmp.lt.s32.totalorder %v13530_v13, 4  ;;  %vm3478_vm8 = vcmp.ge.s32.totalorder %v13444_v10, 0 }
 0x29e   :  { %4707 = vmatmul.mubr.bf16.gmra.mxu0 %v3463_v45  ;;  %vm3237_vm15 = vmand %vm3205_vm5, %vm17479_vm11  ;;  %v8495_v58 = vsel %vm3236_vm10, 1.0, %v18379_v54  ;;  %vm3477_vm10 = vcmp.ge.s32.totalorder %v13432_v1, 0  ;;  %v2955_v45 = vrot.slane %v12694_v0, 6 }
 0x29f   :  { %v8496_v12 = vsel %vm3237_vm15, 1.0, %v18379_v54  ;;  %v3284_v35 = vmul.f32 %v8495_v58, %v12679_v19  ;;  %vm3084_vm12 = vmand %vm13524_vm4, %vm17482_vm14  ;;  %vm3493_vm15 = vcmp.lt.s32.totalorder %v13432_v1, 4  ;;  %v18538_v1 = vld [vmem:[#allocation142_spill] sm:$0xff] }
 0x2a0   :  { %v3285_v29 = vmul.f32 %v8496_v12, %v12681_v60  ;;  %vm3085_vm5 = vmand %vm13533_vm6, %vm17498_vm3  ;;  %v13582_v3 = vshra.s32 %v18538_v1, 1  ;;  %v18546_v1 = vmov 0 }
 0x2a1   :  { %vm3116_vm11 = vmand %vm3084_vm12, %vm17505_vm13 }
 0x2a2   :  { %v3295_v12 = vpack.c.bf16 %v3285_v29, %v3284_v35  ;;  %vm3117_vm14 = vmand %vm3085_vm5, %vm17509_vm7  ;;  %v8479_v34 = vsel %vm3116_vm11, 1.0, %v18379_v54  ;;  %18539 = vst [vmem:[#allocation160_spill] sm:$0xff] %v13582_v3  ;;  %v13591_v35 = vadd.s32 1, %v13494_v47  ;;  %v18544_v29 = vld [vmem:[#allocation143_spill] sm:$0xff]  ;;  %vm18552_vm5 = vcmp.ge.s32.totalorder %v13520_v21, 0 }
 0x2a3   :  { %v8480_v25 = vsel %vm3117_vm14, 1.0, %v18379_v54  ;;  %v3164_v58 = vmul.f32 %v8479_v34, %v13455_v8  ;;  %vm13586_vm12 = vmand %vm3477_vm10, %vm3493_vm15  ;;  %v13594_v10 = vshra.s32 %v18544_v29, 1  ;;  %vm18550_vm14 = vcmp.lt.s32.totalorder %v18342_v62, 2 }
 0x2a4   :  { %v18541_v49 = vsel %vm13586_vm12, 4294967295, %v18540_v49  ;;  %18543 = vst [vmem:[#allocation162_spill] sm:$0xff] %v13591_v35  ;;  %4617 = vmatprep.mubr.bf16.mxu1 %v3295_v12  ;;  %v3165_v16 = vmul.f32 %v8480_v25, %v13472_v39  ;;  %vm13597_vm11 = vmand %vm3478_vm8, %vm3494_vm1  ;;  %v13605_v34 = vsel %vm18550_vm14, %v18549_v23, %v2955_v45  ;;  %v3307_v25 = vrot.slane %v12681_v60, 2 }
 0x2a5   :  { %18542 = vst [vmem:[#allocation161_spill] sm:$0xff] %v18541_v49  ;;  %18545 = vst [vmem:[#allocation163_spill] sm:$0xff] %v13594_v10  ;;  %v18547_v1 = vsel %vm13597_vm11, 4294967295, %v18546_v1  ;;  %v2990_v12 = vadd.s32 4294967295, %v13582_v3  ;;  %v18553_v23 = vrot.slane %v12701_v63, 6  ;;  %vm17514_vm8 = vcmp.lt.s32.totalorder %v13579_v61, 4 }
 0x2a6   :  { %18548 = vst [vmem:[#allocation164_spill] sm:$0xff] %v18547_v1  ;;  %18551 = vst [vmem:[#allocation165_spill] sm:$0xff] %v13605_v34  ;;  %v3175_v29 = vpack.c.bf16 %v3165_v16, %v3164_v58  ;;  %v2991_v58 = vadd.s32 4294967295, %v13594_v10  ;;  %v18556_v49 = vld [vmem:[#allocation140_spill] sm:$0xff]  ;;  %v18561_v39 = vrot.slane %v12679_v19, 2  ;;  %v18585_v8 = vrot.slane %v12701_v63, 6 }
 0x2a7   :  { %vm3525_vm10 = vmand %vm13586_vm12, %vm18552_vm5  ;;  %vm17519_vm5 = vcmp.ge.s32.totalorder %v13591_v35, 0 }
 0x2a8   :  { %vm3526_vm1 = vmand %vm13597_vm11, %vm17498_vm3  ;;  %4618 = vmatmul.mubr.bf16.gmra.mxu1 %v3175_v29  ;;  %v18559_v29 = vld [vmem:[#allocation141_spill] sm:$0xff]  ;;  %vm3023_vm11 = vcmp.lt.s32.totalorder %v2991_v58, 4 }
 0x2a9   :  { %vm18554_vm15 = vmmov %vm18550_vm14  ;;  %v13644_v16 = vshra.s32 %v18559_v29, 1 }
 0x2aa   :  { %v13622_v47 = vsel %vm18554_vm15, %v2955_v45, %v18553_v23  ;;  %vm3541_vm14 = vmand %vm3525_vm10, %vm17505_vm13  ;;  %v13634_v45 = vshra.s32 %v18556_v49, 1  ;;  %vm18558_vm10 = vcmp.ge.s32.totalorder %v13579_v61, 0  ;;  %vm3007_vm13 = vcmp.ge.s32.totalorder %v2991_v58, 0 }
 0x2ab   :  { %18555 = vst [vmem:[#allocation166_spill] sm:$0xff] %v13622_v47  ;;  %vm3542_vm3 = vmand %vm3526_vm1, %vm17509_vm7  ;;  %v8527_v1 = vsel %vm3541_vm14, 1.0, %v18379_v54  ;;  %vm18562_vm1 = vcmp.lt.s32.totalorder %v18342_v62, 6  ;;  %vm3006_vm14 = vcmp.ge.s32.totalorder %v2990_v12, 0 }
 0x2ac   :  { %18557 = vst [vmem:[#allocation167_spill] sm:$0xff] %v13634_v45  ;;  %v8528_v23 = vsel %vm3542_vm3, 1.0, %v18379_v54  ;;  %v3589_v21 = vmul.f32 %v8527_v1, %v13605_v34  ;;  %vm3373_vm15 = vmand %vm13524_vm4, %vm18558_vm10  ;;  %v13651_v49 = vsel %vm18562_vm1, %v18561_v39, %v3307_v25  ;;  %vm3022_vm4 = vcmp.lt.s32.totalorder %v2990_v12, 4 }
 0x2ad   :  { %18560 = vst [vmem:[#allocation168_spill] sm:$0xff] %v13644_v16  ;;  %v3590_v13 = vmul.f32 %v8528_v23, %v13622_v47  ;;  %18563 = vst [vmem:[#allocation169_spill] sm:$0xff] %v13651_v49  ;;  %v18564_v1 = vrot.slane %v12694_v0, 2  ;;  %v13670_v12 = vadd.s32 4294967295, %v13634_v45  ;;  %v13728_v29 = vadd.s32 1, %v13634_v45 }
 0x2ae   :  { %vm3374_vm3 = vmand %vm13533_vm6, %vm17519_vm5  ;;  %vm17515_vm6 = vcmp.ge.s32.totalorder %v13634_v45, 0  ;;  %vm3496_vm5 = vcmp.lt.s32.totalorder %v13594_v10, 4 }
 0x2af   :  { %vm18565_vm10 = vmmov %vm18562_vm1  ;;  %v3600_v39 = vpack.c.bf16 %v3590_v13, %v3589_v21  ;;  %vm18567_vm1 = vcmp.lt.s32.totalorder %v13591_v35, 4  ;;  %18568 = vst [vmem:[#allocation171_spill] sm:$0xff] %v13670_v12  ;;  %v13680_v21 = vadd.s32 4294967295, %v13644_v16  ;;  %v18575_v35 = vld [vmem:[#allocation152_spill] sm:$0xff] }
 0x2b0   :  { %v13661_v42 = vsel %vm18565_vm10, %v3307_v25, %v18564_v1  ;;  %vm3405_vm7 = vmand %vm3373_vm15, %vm17514_vm8  ;;  %vm17516_vm15 = vcmp.ge.s32.totalorder %v13644_v16, 0  ;;  %18574 = vst [vmem:[#allocation173_spill] sm:$0xff] %v13728_v29 }
 0x2b1   :  { %18566 = vst [vmem:[#allocation170_spill] sm:$0xff] %v13661_v42  ;;  %vm3406_vm12 = vmand %vm3374_vm3, %vm18567_vm1  ;;  %v8511_v32 = vsel %vm3405_vm7, 1.0, %v18379_v54  ;;  %4714 = vmatprep.mubr.bf16.mxu0 %v3600_v39  ;;  %vm17536_vm1 = vcmp.ge.s32.totalorder %v13680_v21, 0 }
 0x2b2   :  { %v8512_v23 = vsel %vm3406_vm12, 1.0, %v18379_v54  ;;  %v3453_v25 = vmul.f32 %v8511_v32, %v13651_v49  ;;  %vm13674_vm10 = vmand %vm3006_vm14, %vm3022_vm4  ;;  %18571 = vst [vmem:[#allocation172_spill] sm:$0xff] %v13680_v21  ;;  %vm17518_vm12 = vcmp.lt.s32.totalorder %v13634_v45, 4  ;;  %vm17517_vm14 = vcmp.lt.s32.totalorder %v13644_v16, 4 }
 0x2b3   :  { %v3454_v13 = vmul.f32 %v8512_v23, %v13661_v42  ;;  %vm13683_vm7 = vmand %vm3007_vm13, %vm3023_vm11  ;;  %vm17520_vm13 = vcmp.ge.s32.totalorder %v13670_v12, 0  ;;  %v18577_v49 = vmov 0 }
 0x2b4   :  { %vm3206_vm3 = vmand %vm13674_vm10, %vm17515_vm6  ;;  %vm17543_vm6 = vcmp.lt.s32.totalorder %v13670_v12, 4 }
 0x2b5   :  { %v3464_v32 = vpack.c.bf16 %v3454_v13, %v3453_v25  ;;  %vm3207_vm4 = vmand %vm13683_vm7, %vm17516_vm15 }
 0x2b6   :  { %vm3238_vm11 = vmand %vm3206_vm3, %vm17518_vm12  ;;  %vm17544_vm3 = vcmp.lt.s32.totalorder %v13680_v21, 4  ;;  %vm3480_vm12 = vcmp.ge.s32.totalorder %v13594_v10, 0 }
 0x2b7   :  { %4715 = vmatmul.mubr.bf16.gmra.mxu0 %v3464_v32  ;;  %vm3239_vm8 = vmand %vm3207_vm4, %vm17517_vm14  ;;  %v8497_v39 = vsel %vm3238_vm11, 1.0, %v18379_v54  ;;  %vm3479_vm11 = vcmp.ge.s32.totalorder %v13582_v3, 0  ;;  %v2957_v32 = vrot.slane %v12703_v26, 6 }
 0x2b8   :  { %v8498_v23 = vsel %vm3239_vm8, 1.0, %v18379_v54  ;;  %v3286_v25 = vmul.f32 %v8497_v39, %v12694_v0  ;;  %vm3086_vm15 = vmand %vm13674_vm10, %vm17520_vm13  ;;  %vm3495_vm8 = vcmp.lt.s32.totalorder %v13582_v3, 4  ;;  %v13731_v3 = vshra.s32 %v18575_v35, 1 }
 0x2b9   :  { %v3287_v13 = vmul.f32 %v8498_v23, %v12701_v63  ;;  %vm3087_vm4 = vmand %vm13683_vm7, %vm17536_vm1  ;;  %v18582_v35 = vmov 0 }
 0x2ba   :  { %vm3118_vm14 = vmand %vm3086_vm15, %vm17543_vm6  ;;  %18576 = vst [vmem:[#allocation174_spill] sm:$0xff] %v13731_v3 }
 0x2bb   :  { %v3296_v39 = vpack.c.bf16 %v3287_v13, %v3286_v25  ;;  %vm3119_vm13 = vmand %vm3087_vm4, %vm17544_vm3  ;;  %v8481_v23 = vsel %vm3118_vm14, 1.0, %v18379_v54  ;;  %v13740_v25 = vadd.s32 1, %v13644_v16  ;;  %v18581_v13 = vld [vmem:[#allocation153_spill] sm:$0xff]  ;;  %vm18587_vm4 = vcmp.ge.s32.totalorder %v13670_v12, 0 }
 0x2bc   :  { %v8482_v61 = vsel %vm3119_vm13, 1.0, %v18379_v54  ;;  %v3166_v42 = vmul.f32 %v8481_v23, %v13605_v34  ;;  %vm13735_vm15 = vmand %vm3479_vm11, %vm3495_vm8  ;;  %v13743_v10 = vshra.s32 %v18581_v13, 1  ;;  %vm18586_vm13 = vcmp.lt.s32.totalorder %v18342_v62, 2 }
 0x2bd   :  { %v18578_v49 = vsel %vm13735_vm15, 4294967295, %v18577_v49  ;;  %18580 = vst [vmem:[#allocation176_spill] sm:$0xff] %v13740_v25  ;;  %4625 = vmatprep.mubr.bf16.mxu1 %v3296_v39  ;;  %v3167_v45 = vmul.f32 %v8482_v61, %v13622_v47  ;;  %vm13746_vm14 = vmand %vm3480_vm12, %vm3496_vm5  ;;  %v13754_v23 = vsel %vm18586_vm13, %v18585_v8, %v2957_v32  ;;  %v3309_v61 = vrot.slane %v12701_v63, 2 }
 0x2be   :  { %18579 = vst [vmem:[#allocation175_spill] sm:$0xff] %v18578_v49  ;;  %v18583_v35 = vsel %vm13746_vm14, 4294967295, %v18582_v35  ;;  %vm3527_vm11 = vmand %vm13735_vm15, %vm18587_vm4  ;;  %v2992_v39 = vadd.s32 4294967295, %v13731_v3  ;;  %v18588_v8 = vrot.slane %v12705_v20, 6  ;;  %vm17561_vm4 = vcmp.ge.s32.totalorder %v13740_v25, 0  ;;  %v18590_v49 = vld [vmem:[#allocation150_spill] sm:$0xff] }
 0x2bf   :  { %18584 = vst [vmem:[#allocation177_spill] sm:$0xff] %v18583_v35  ;;  %v3176_v13 = vpack.c.bf16 %v3167_v45, %v3166_v42  ;;  %vm3528_vm5 = vmand %vm13746_vm14, %vm17536_vm1  ;;  %v2993_v42 = vadd.s32 4294967295, %v13743_v10  ;;  %vm17556_vm12 = vcmp.lt.s32.totalorder %v13728_v29, 4  ;;  %v18602_v47 = vrot.slane %v12703_v26, 2 }
 0x2c0   :  { %vm18589_vm8 = vmmov %vm18586_vm13 }
 0x2c1   :  { %v13771_v16 = vsel %vm18589_vm8, %v2957_v32, %v18588_v8  ;;  %vm3543_vm13 = vmand %vm3527_vm11, %vm17543_vm6  ;;  %4626 = vmatmul.mubr.bf16.gmra.mxu1 %v3176_v13  ;;  %v13783_v32 = vshra.s32 %v18590_v49, 1  ;;  %vm18591_vm11 = vcmp.ge.s32.totalorder %v13728_v29, 0  ;;  %v18592_v13 = vld [vmem:[#allocation151_spill] sm:$0xff]  ;;  %vm3024_vm6 = vcmp.lt.s32.totalorder %v2992_v39, 4 }
 0x2c2   :  { %vm3544_vm1 = vmand %vm3528_vm5, %vm17544_vm3  ;;  %v8529_v35 = vsel %vm3543_vm13, 1.0, %v18379_v54  ;;  %v13793_v45 = vshra.s32 %v18592_v13, 1  ;;  %vm18594_vm5 = vcmp.ge.s32.totalorder %v12715_v59, 0  ;;  %v18600_v13 = vrot.slane %v12694_v0, 2 }
 0x2c3   :  { %v8530_v8 = vsel %vm3544_vm1, 1.0, %v18379_v54  ;;  %v3591_v12 = vmul.f32 %v8529_v35, %v13754_v23  ;;  %vm3375_vm8 = vmand %vm13674_vm10, %vm18591_vm11  ;;  %vm18597_vm1 = vcmp.ge.s32.totalorder %v12722_v15, 0  ;;  %vm18601_vm10 = vcmp.lt.s32.totalorder %v18342_v62, 6 }
 0x2c4   :  { %18593 = vst [vmem:[#allocation178_spill] sm:$0xff] %v13793_v45  ;;  %vm13799_vm13 = vmand %vm12808_vm0, %vm18594_vm5  ;;  %v3592_v1 = vmul.f32 %v8530_v8, %v13771_v16  ;;  %v13816_v21 = vsel %vm18601_vm10, %v18600_v13, %v3309_v61  ;;  %vm3008_vm5 = vcmp.ge.s32.totalorder %v2992_v39, 0  ;;  %vm3009_vm15 = vcmp.ge.s32.totalorder %v2993_v42, 0 }
 0x2c5   :  { %vm13807_vm3 = vmand %vm12813_vm9, %vm18597_vm1  ;;  %vm3025_vm2 = vcmp.lt.s32.totalorder %v2993_v42, 4  ;;  %v13835_v39 = vadd.s32 4294967295, %v13783_v32  ;;  %vm3498_vm0 = vcmp.lt.s32.totalorder %v13743_v10, 4 }
 0x2c6   :  { %vm3376_vm11 = vmand %vm13683_vm7, %vm17561_vm4  ;;  %v3601_v8 = vpack.c.bf16 %v3592_v1, %v3591_v12  ;;  %vm17557_vm7 = vcmp.ge.s32.totalorder %v13783_v32, 0  ;;  %v13845_v12 = vadd.s32 4294967295, %v13793_v45  ;;  %vm18615_vm4 = vcmp.lt.s32.totalorder %v12722_v15, 4 }
 0x2c7   :  { %vm18603_vm1 = vmmov %vm18601_vm10  ;;  %vm18605_vm10 = vcmp.lt.s32.totalorder %v13740_v25, 4  ;;  %18606 = vst [vmem:[#allocation180_spill] sm:$0xff] %v13835_v39 }
 0x2c8   :  { %v13826_v34 = vsel %vm18603_vm1, %v3309_v61, %v18602_v47  ;;  %vm3407_vm14 = vmand %vm3375_vm8, %vm17556_vm12  ;;  %vm17558_vm8 = vcmp.ge.s32.totalorder %v13793_v45, 0  ;;  %18609 = vst [vmem:[#allocation181_spill] sm:$0xff] %v13845_v12  ;;  %4722 = vmatprep.mubr.bf16.mxu0 %v3601_v8  ;;  %v18627_v61 = vrot.slane %v12696_v38, 2 }
 0x2c9   :  { %18604 = vst [vmem:[#allocation179_spill] sm:$0xff] %v13826_v34  ;;  %vm3408_vm9 = vmand %vm3376_vm11, %vm18605_vm10  ;;  %v8513_v58 = vsel %vm3407_vm14, 1.0, %v18379_v54  ;;  %vm17559_vm11 = vcmp.lt.s32.totalorder %v13793_v45, 4  ;;  %vm17563_vm10 = vcmp.ge.s32.totalorder %v13845_v12, 0 }
 0x2ca   :  { %v8514_v13 = vsel %vm3408_vm9, 1.0, %v18379_v54  ;;  %v3455_v47 = vmul.f32 %v8513_v58, %v13816_v21  ;;  %vm13839_vm1 = vmand %vm3008_vm5, %vm3024_vm6  ;;  %vm17560_vm9 = vcmp.lt.s32.totalorder %v13783_v32, 4 }
 0x2cb   :  { %v3456_v42 = vmul.f32 %v8514_v13, %v13826_v34  ;;  %vm13848_vm14 = vmand %vm3009_vm15, %vm3025_vm2  ;;  %vm17562_vm2 = vcmp.ge.s32.totalorder %v13835_v39, 0  ;;  %v13917_v34 = vadd.s32 1, %v13793_v45  ;;  %v3311_v45 = vrot.slane %v12705_v20, 2 }
 0x2cc   :  { %vm3208_vm6 = vmand %vm13839_vm1, %vm17557_vm7  ;;  %vm17579_vm7 = vcmp.lt.s32.totalorder %v13835_v39, 4 }
 0x2cd   :  { %v3465_v58 = vpack.c.bf16 %v3456_v42, %v3455_v47  ;;  %vm3209_vm5 = vmand %vm13848_vm14, %vm17558_vm8 }
 0x2ce   :  { %vm3240_vm15 = vmand %vm3208_vm6, %vm17560_vm9  ;;  %vm3482_vm6 = vcmp.ge.s32.totalorder %v13743_v10, 0 }
 0x2cf   :  { %4723 = vmatmul.mubr.bf16.gmra.mxu0 %v3465_v58  ;;  %vm3241_vm12 = vmand %vm3209_vm5, %vm17559_vm11  ;;  %v8499_v8 = vsel %vm3240_vm15, 1.0, %v18379_v54  ;;  %vm3481_vm15 = vcmp.ge.s32.totalorder %v13731_v3, 0  ;;  %vm18612_vm11 = vcmp.lt.s32.totalorder %v12715_v59, 4 }
 0x2d0   :  { %v8500_v13 = vsel %vm3241_vm12, 1.0, %v18379_v54  ;;  %v3288_v47 = vmul.f32 %v8499_v8, %v12703_v26  ;;  %vm3088_vm8 = vmand %vm13839_vm1, %vm17562_vm2  ;;  %vm3497_vm12 = vcmp.lt.s32.totalorder %v13731_v3, 4  ;;  %v13908_v3 = vadd.s32 1, %v13783_v32 }
 0x2d1   :  { %v3289_v42 = vmul.f32 %v8500_v13, %v12705_v20  ;;  %vm3089_vm5 = vmand %vm13848_vm14, %vm17563_vm10 }
 0x2d2   :  { %vm13888_vm9 = vmand %vm13799_vm13, %vm18612_vm11  ;;  %vm18618_vm13 = vcmp.lt.s32.totalorder %v13845_v12, 4 }
 0x2d3   :  { %vm13896_vm2 = vmand %vm13807_vm3, %vm18615_vm4  ;;  %v3297_v49 = vpack.c.bf16 %v3289_v42, %v3288_v47 }
 0x2d4   :  { %vm3120_vm10 = vmand %vm3088_vm8, %vm17579_vm7  ;;  %vm18623_vm8 = vcmp.ge.s32.totalorder %v13835_v39, 0  ;;  %v8534_v1 = vsel %vm13896_vm2, 1.0, %v18379_v54  ;;  %vm18632_vm2 = vnez %v18383_v46 }
 0x2d5   :  { %vm3121_vm11 = vmand %vm3089_vm5, %vm18618_vm13  ;;  %v8483_v13 = vsel %vm3120_vm10, 1.0, %v18379_v54  ;;  %4633 = vmatprep.mubr.bf16.mxu1 %v3297_v49  ;;  %vm18624_vm5 = vcmp.ge.s32.totalorder %v13845_v12, 0  ;;  %v3668_v8 = vmul.f32 %v8534_v1, %v12640_v5  ;;  %v18637_v1 = vmov 0 }
 0x2d6   :  { %v8484_v35 = vsel %vm3121_vm11, 1.0, %v18379_v54  ;;  %v3168_v25 = vmul.f32 %v8483_v13, %v13754_v23  ;;  %vm13912_vm3 = vmand %vm3481_vm15, %vm3497_vm12  ;;  %vm17583_vm12 = vcmp.ge.s32.totalorder %v13908_v3, 0 }
 0x2d7   :  { %v3169_v47 = vmul.f32 %v8484_v35, %v13771_v16  ;;  %vm13920_vm4 = vmand %vm3482_vm6, %vm3498_vm0  ;;  %vm17582_vm6 = vcmp.ge.s32.totalorder %v13917_v34, 0 }
 0x2d8   :  { %vm3529_vm10 = vmand %vm13912_vm3, %vm18623_vm8  ;;  %vm17581_vm8 = vcmp.lt.s32.totalorder %v13908_v3, 4 }
 0x2d9   :  { %v3177_v13 = vpack.c.bf16 %v3169_v47, %v3168_v25  ;;  %vm3530_vm15 = vmand %vm13920_vm4, %vm18624_vm5 }
 0x2da   :  { %vm3545_vm0 = vmand %vm3529_vm10, %vm17579_vm7  ;;  %vm17580_vm10 = vcmp.lt.s32.totalorder %v13917_v34, 4 }
 0x2db   :  { %4634 = vmatmul.mubr.bf16.gmra.mxu1 %v3177_v13  ;;  %vm3546_vm11 = vmand %vm3530_vm15, %vm18618_vm13  ;;  %v8531_v25 = vsel %vm3545_vm0, 1.0, %v18379_v54  ;;  %v18625_v13 = vrot.slane %v12703_v26, 2  ;;  %vm18626_vm15 = vcmp.lt.s32.totalorder %v18342_v62, 6 }
 0x2dc   :  { %v8532_v49 = vsel %vm3546_vm11, 1.0, %v18379_v54  ;;  %v3593_v35 = vmul.f32 %v8531_v25, %v12779_v40  ;;  %vm3377_vm5 = vmand %vm13839_vm1, %vm17583_vm12  ;;  %v3779_v25 = vadd.s32 1, %v12708_v24  ;;  %vm18629_vm11 = vcmp.ge.s32.totalorder %v12794_v33, 0 }
 0x2dd   :  { %v3594_v47 = vmul.f32 %v8532_v49, %v12785_v2  ;;  %v13953_v12 = vsel %vm18626_vm15, %v18625_v13, %v3311_v45  ;;  %vm3378_vm0 = vmand %vm13848_vm14, %vm17582_vm6  ;;  %v3780_v49 = vadd.s32 1, %v12712_v50  ;;  %v8533_v13 = vsel %vm13888_vm9, 1.0, %v18379_v54 }
 0x2de   :  { %vm18628_vm1 = vmmov %vm18626_vm15  ;;  %vm18631_vm9 = vcmp.ge.s32.totalorder %v12801_v18, 0  ;;  %vm3811_vm7 = vcmp.lt.s32.totalorder %v3779_v25, 4  ;;  %v3667_v58 = vmul.f32 %v8533_v13, %v12638_v52 }
 0x2df   :  { %v13964_v39 = vsel %vm18628_vm1, %v3311_v45, %v18627_v61  ;;  %vm3409_vm13 = vmand %vm3377_vm5, %vm17581_vm8  ;;  %v3602_v24 = vpack.c.bf16 %v3594_v47, %v3593_v35  ;;  %vm18630_vm5 = vnez %v18381_v41  ;;  %vm3812_vm8 = vcmp.lt.s32.totalorder %v3780_v49, 4 }
 0x2e0   :  { %vm3410_vm14 = vmand %vm3378_vm0, %vm17580_vm10  ;;  %v8515_v45 = vsel %vm3409_vm13, 1.0, %v18379_v54  ;;  %vm3795_vm0 = vcmp.ge.s32.totalorder %v3779_v25, 0  ;;  %vm18633_vm13 = vcmp.lt.s32.totalorder %v12794_v33, 4  ;;  %vm3796_vm10 = vcmp.ge.s32.totalorder %v3780_v49, 0 }
 0x2e1   :  { %v8516_v61 = vsel %vm3410_vm14, 1.0, %v18379_v54  ;;  %v3457_v62 = vmul.f32 %v8515_v45, %v13953_v12  ;;  %vm3691_vm15 = vmand %vm18630_vm5, %vm18629_vm11  ;;  %4730 = vmatprep.mubr.bf16.mxu0 %v3602_v24  ;;  %vm18634_vm11 = vcmp.lt.s32.totalorder %v12801_v18, 4  ;;  %v10119_v24 = vld [vmem:[#allocation2 + $0x230] sm:$0xff]  }
 0x2e2   :  { %v3458_v50 = vmul.f32 %v8516_v61, %v13964_v39  ;;  %vm3692_vm1 = vmand %vm18632_vm2, %vm18631_vm9  ;;  %vm18639_vm2 = vcmp.ge.s32.totalorder %v12726_v31, 0 }
 0x2e3   :  { %vm3707_vm14 = vmand %vm3691_vm15, %vm18633_vm13  ;;  %vm18640_vm13 = vcmp.ge.s32.totalorder %v12729_v48, 0 }
 0x2e4   :  { %v3466_v41 = vpack.c.bf16 %v3458_v50, %v3457_v62  ;;  %vm3708_vm5 = vmand %vm3692_vm1, %vm18634_vm11  ;;  %v8549_v35 = vsel %vm3707_vm14, 1.0, %v18379_v54  ;;  %v3683_v62 = vpack.c.bf16 %v3668_v8, %v3667_v58  ;;  %vm18643_vm11 = vcmp.ge.s32.totalorder %v12715_v59, 0  ;;  %v10120_v50 = vld [vmem:[#allocation2 + $0x228] sm:$0xff]  }
 0x2e5   :  { %v8550_v46 = vsel %vm3708_vm5, 1.0, %v18379_v54  ;;  %v3755_v47 = vmul.f32 %v8549_v35, %v13035_v43  ;;  %vm13998_vm9 = vmand %vm3795_vm0, %vm3811_vm7  ;;  %vm18641_vm0 = vcmp.lt.s32.totalorder %v12726_v31, 4 }
 0x2e6   :  { %4731 = vmatmul.mubr.bf16.gmra.mxu0 %v3466_v41  ;;  %v3756_v13 = vmul.f32 %v8550_v46, %v13045_v28  ;;  %vm14003_vm15 = vmand %vm3796_vm10, %vm3812_vm8  ;;  %vm18642_vm8 = vcmp.lt.s32.totalorder %v12729_v48, 4 }
 0x2e7   :  { %v18638_v1 = vsel %vm14003_vm15, 4294967295, %v18637_v1  ;;  %vm3843_vm1 = vmand %vm13998_vm9, %vm18639_vm2  ;;  %vm18644_vm2 = vcmp.ge.s32.totalorder %v12722_v15, 0 }
 0x2e8   :  { %v3771_v49 = vpack.c.bf16 %v3756_v13, %v3755_v47  ;;  %vm3844_vm7 = vmand %vm14003_vm15, %vm18640_vm13  ;;  %vm18645_vm13 = vcmp.lt.s32.totalorder %v12715_v59, 4 }
 0x2e9   :  { %vm3859_vm14 = vmand %vm3843_vm1, %vm18641_vm0  ;;  %vm18646_vm0 = vcmp.lt.s32.totalorder %v12722_v15, 4  ;;  %v3781_v15 = vadd.s32 1, %v12818_v36 }
 0x2ea   :  { %4771 = vmatprep.mubr.bf16.mxu1 %v3771_v49  ;;  %vm3860_vm10 = vmand %vm3844_vm7, %vm18642_vm8  ;;  %v8565_v45 = vsel %vm3859_vm14, 1.0, %v18379_v54  ;;  %vm18647_vm8 = vcmp.ge.s32.totalorder %v12952_v44, 0 }
 0x2eb   :  { %4772 = vmatmul.mubr.bf16.vlgmr.msra.gmra.mxu1 %v3683_v62  ;;  %v8566_v61 = vsel %vm3860_vm10, 1.0, %v18379_v54  ;;  %vm3931_vm5 = vmand %vm13998_vm9, %vm18643_vm11  ;;  %v3907_v31 = vmul.f32 %v8565_v45, %v12989_v55  ;;  %vm18648_vm10 = vnez %v18402_v6  ;;  %v10122_v6 = vld [vmem:[#allocation2 + $0x218] sm:$0xff]  }
 0x2ec   :  { %vm3932_vm1 = vmand %vm14003_vm15, %vm18644_vm2  ;;  %9878 = vmatpush3.bf16.msra.mxu1 %v13192_v9  ;;  %v3908_v48 = vmul.f32 %v8566_v61, %v13006_v4  ;;  %vm18650_vm2 = vnez %v18406_v11  ;;  %v3782_v4 = vadd.s32 1, %v12825_v17  ;;  %v10121_v9 = vld [vmem:[#allocation2 + $0x220] sm:$0xff]   ;;  %v18654_v17 = vld [vmem:[#allocation102_spill] sm:$0xff] }
 0x2ed   :  { %vm3947_vm7 = vmand %vm3931_vm5, %vm18645_vm13  ;;  %9879 = vmatprep.subr.bf16.mxu1 %v10119_v24  ;;  %vm18649_vm5 = vcmp.ge.s32.totalorder %v12958_v37, 0  ;;  %v18683_v45 = vld [vmem:[#allocation75_spill] sm:$0xff] }
 0x2ee   :  { %vm3948_vm14 = vmand %vm3932_vm1, %vm18646_vm0  ;;  %v8581_v58 = vsel %vm3947_vm7, 1.0, %v18379_v54  ;;  %v3923_v55 = vpack.c.bf16 %v3908_v48, %v3907_v31  ;;  %vm18651_vm1 = vcmp.lt.s32.totalorder %v12952_v44, 4  ;;  %vm18652_vm0 = vcmp.lt.s32.totalorder %v12958_v37, 4  ;;  %v18687_v31 = vld [vmem:[#allocation115_spill] sm:$0xff] }
 0x2ef   :  { %v8582_v8 = vsel %vm3948_vm14, 1.0, %v18379_v54  ;;  %v3995_v41 = vmul.f32 %v8581_v58, %v12650_v14  ;;  %vm3693_vm11 = vmand %vm18648_vm10, %vm18647_vm8  ;;  %vm18653_vm8 = vcmp.ge.s32.totalorder %v12863_v27, 0  ;;  %vm3798_vm6 = vcmp.ge.s32.totalorder %v3782_v4, 0 }
 0x2f0   :  { %v3996_v59 = vmul.f32 %v8582_v8, %v12661_v30  ;;  %vm3694_vm13 = vmand %vm18650_vm2, %vm18649_vm5  ;;  %9880 = vmatpush3.bf16.msra.mxu1 %v10119_v24  ;;  %vm3814_vm12 = vcmp.lt.s32.totalorder %v3782_v4, 4  ;;  %v18671_v4 = vld [vmem:[#allocation139_spill] sm:$0xff] }
 0x2f1   :  { %vm3709_vm7 = vmand %vm3693_vm11, %vm18651_vm1  ;;  %9881 = vmatprep.subr.bf16.mxu1 %v10120_v50  ;;  %vm18655_vm11 = vcmp.ge.s32.totalorder %v18654_v17, 0 }
 0x2f2   :  { %v4011_v35 = vpack.c.bf16 %v3996_v59, %v3995_v41  ;;  %vm3710_vm14 = vmand %vm3694_vm13, %vm18652_vm0  ;;  %v8551_v46 = vsel %vm3709_vm7, 1.0, %v18379_v54  ;;  %vm3797_vm13 = vcmp.ge.s32.totalorder %v3781_v15, 0  ;;  %vm3813_vm0 = vcmp.lt.s32.totalorder %v3781_v15, 4 }
 0x2f3   :  { %v8552_v47 = vsel %vm3710_vm14, 1.0, %v18379_v54  ;;  %v3757_v13 = vmul.f32 %v8551_v46, %v13199_v56  ;;  %vm3605_vm5 = vmand %vm18648_vm10, %vm18653_vm8  ;;  %vm18656_vm7 = vcmp.lt.s32.totalorder %v12863_v27, 4  ;;  %vm18657_vm10 = vcmp.lt.s32.totalorder %v18654_v17, 4 }
 0x2f4   :  { %4868 = vmatprep.mubr.bf16.mxu0 %v4011_v35  ;;  %v3758_v36 = vmul.f32 %v8552_v47, %v13209_v51  ;;  %vm3606_vm1 = vmand %vm18650_vm2, %vm18655_vm11  ;;  %9882 = vmatpush3.bf16.msra.mxu1 %v10120_v50  ;;  %vm18662_vm11 = vcmp.ge.s32.totalorder %v12863_v27, 0  ;;  %v10124_v27 = vld [vmem:[#allocation2 + $0x208] sm:$0xff]   ;;  %v18674_v35 = vld [vmem:[#allocation136_spill] sm:$0xff] }
 0x2f5   :  { %4869 = vmatmul.mubr.bf16.vlgmr.msra.gmra.mxu0 %v3923_v55  ;;  %vm3621_vm14 = vmand %vm3605_vm5, %vm18656_vm7  ;;  %9883 = vmatprep.subr.bf16.mxu1 %v10121_v9  ;;  %v18669_v55 = vld [vmem:[#allocation112_spill] sm:$0xff] }
 0x2f6   :  { %v3772_v62 = vpack.c.bf16 %v3758_v36, %v3757_v13  ;;  %vm3622_vm8 = vmand %vm3606_vm1, %vm18657_vm10  ;;  %v8535_v49 = vsel %vm3621_vm14, 1.0, %v18379_v54 }
 0x2f7   :  { %v8536_v11 = vsel %vm3622_vm8, 1.0, %v18379_v54  ;;  %v3669_v24 = vmul.f32 %v8535_v49, %v12650_v14  ;;  %vm14073_vm2 = vmand %vm3797_vm13, %vm3813_vm0  ;;  %vm18663_vm13 = vcmp.ge.s32.totalorder %v18654_v17, 0  ;;  %v10123_v14 = vld [vmem:[#allocation2 + $0x210] sm:$0xff]   ;;  %v18677_v17 = vld [vmem:[#allocation117_spill] sm:$0xff] }
 0x2f8   :  { %4779 = vmatprep.mubr.bf16.mxu1 %v3772_v62  ;;  %v3670_v61 = vmul.f32 %v8536_v11, %v12661_v30  ;;  %vm14078_vm5 = vmand %vm3798_vm6, %vm3814_vm12  ;;  %9884 = vmatpush3.bf16.msra.mxu1 %v10121_v9  ;;  %v18678_v62 = vld [vmem:[#allocation144_spill] sm:$0xff] }
 0x2f9   :  { %vm3933_vm1 = vmand %vm14073_vm2, %vm18662_vm11  ;;  %9885 = vmatprep.subr.bf16.mxu1 %v10122_v6  ;;  %vm18666_vm11 = vcmp.ge.s32.totalorder %v12958_v37, 0  ;;  %v18680_v49 = vld [vmem:[#allocation132_spill] sm:$0xff] }
 0x2fa   :  { %v3684_v48 = vpack.c.bf16 %v3670_v61, %v3669_v24  ;;  %vm3934_vm0 = vmand %vm14078_vm5, %vm18663_vm13  ;;  %vm18667_vm13 = vcmp.lt.s32.totalorder %v12952_v44, 4  ;;  %v18682_v11 = vld [vmem:[#allocation76_spill] sm:$0xff]  ;;  %v18685_v61 = vld [vmem:[#allocation77_spill] sm:$0xff] }
 0x2fb   :  { %vm3949_vm12 = vmand %vm3933_vm1, %vm18656_vm7  ;;  %vm18668_vm7 = vcmp.lt.s32.totalorder %v12958_v37, 4  ;;  %v10125_v37 = vld [vmem:[#allocation2 + $0x200] sm:$0xff]  }
 0x2fc   :  { %4780 = vmatmul.mubr.bf16.gmra.mxu1 %v3684_v48  ;;  %vm18664_vm6 = vmmov %vm18657_vm10  ;;  %v8583_v30 = vsel %vm3949_vm12, 1.0, %v18379_v54  ;;  %vm18665_vm10 = vcmp.ge.s32.totalorder %v12952_v44, 0  ;;  %v18672_v44 = vld [vmem:[#allocation114_spill] sm:$0xff]  ;;  %v3783_v48 = vadd.s32 1, %v18687_v31 }
 0x2fd   :  { %vm3950_vm14 = vmand %vm3934_vm0, %vm18664_vm6  ;;  %v3997_v58 = vmul.f32 %v8583_v30, %v12663_v7  ;;  %9886 = vmatpush3.bf16.msra.mxu1 %v10122_v6  ;;  %vm18670_vm6 = vcmp.ge.s32.totalorder %v18669_v55, 0 }
 0x2fe   :  { %v8584_v50 = vsel %vm3950_vm14, 1.0, %v18379_v54  ;;  %vm4021_vm8 = vmand %vm14073_vm2, %vm18665_vm10  ;;  %9887 = vmatprep.subr.bf16.mxu1 %v10123_v14  ;;  %vm18673_vm10 = vcmp.ge.s32.totalorder %v18672_v44, 0 }
 0x2ff   :  { %v3998_v8 = vmul.f32 %v8584_v50, %v12665_v22  ;;  %vm4022_vm1 = vmand %vm14078_vm5, %vm18666_vm11  ;;  %vm18675_vm11 = vcmp.lt.s32.totalorder %v18669_v55, 4 }
 0x300   :  { %vm4037_vm0 = vmand %vm4021_vm8, %vm18667_vm13 }
 0x301   :  { %v4012_v41 = vpack.c.bf16 %v3998_v8, %v3997_v58  ;;  %vm4038_vm12 = vmand %vm4022_vm1, %vm18668_vm7  ;;  %v8599_v59 = vsel %vm4037_vm0, 1.0, %v18379_v54  ;;  %9888 = vmatpush3.bf16.msra.mxu1 %v10123_v14  ;;  %vm18681_vm0 = vnez %v18680_v49  ;;  %v18689_v14 = vld [vmem:[#allocation147_spill] sm:$0xff]  ;;  %v18704_v49 = vld [vmem:[#allocation130_spill] sm:$0xff] }
 0x302   :  { %v8600_v15 = vsel %vm4038_vm12, 1.0, %v18379_v54  ;;  %vm3845_vm14 = vmand %vm14073_vm2, %vm18670_vm6  ;;  %v14117_v9 = vmul.f32 %v8599_v59, %v18671_v4  ;;  %9889 = vmatprep.subr.bf16.mxu1 %v10124_v27  ;;  %vm18676_vm2 = vcmp.lt.s32.totalorder %v18672_v44, 4  ;;  %vm18684_vm12 = vcmp.ge.s32.totalorder %v18683_v45, 0 }
 0x303   :  { %4876 = vmatprep.mubr.bf16.mxu0 %v4012_v41  ;;  %vm3846_vm8 = vmand %vm14078_vm5, %vm18673_vm10  ;;  %v14124_v46 = vmul.f32 %v8600_v15, %v18674_v35  ;;  %vm18679_vm5 = vcmp.ge.s32.totalorder %v18678_v62, 0  ;;  %vm18686_vm6 = vnez %v18685_v61  ;;  %vm18688_vm10 = vcmp.lt.s32.totalorder %v18678_v62, 4  ;;  %v18691_v41 = vld [vmem:[#allocation149_spill] sm:$0xff]  ;;  %v18693_v15 = vld [vmem:[#allocation134_spill] sm:$0xff] }
 0x304   :  { %vm3861_vm1 = vmand %vm3845_vm14, %vm18675_vm11  ;;  %v3784_v30 = vadd.s32 1, %v18689_v14  ;;  %vm18690_vm11 = vcmp.lt.s32.totalorder %v18683_v45, 4  ;;  %vm18696_vm15 = vcmp.lt.s32.totalorder %v18693_v15, 4  ;;  %v18706_v61 = vld [vmem:[#allocation131_spill] sm:$0xff] }
 0x305   :  { %vm3862_vm13 = vmand %vm3846_vm8, %vm18676_vm2  ;;  %v8567_v47 = vsel %vm3861_vm1, 1.0, %v18379_v54  ;;  %9890 = vmatpush3.bf16.msra.mxu1 %v10124_v27  ;;  %vm18692_vm2 = vcmp.ge.s32.totalorder %v18691_v41, 0 }
 0x306   :  { %v8568_v36 = vsel %vm3862_vm13, 1.0, %v18379_v54  ;;  %v3909_v6 = vmul.f32 %v8567_v47, %v18677_v17  ;;  %vm3695_vm7 = vmand %vm18681_vm0, %vm18679_vm5  ;;  %9891 = vmatprep.subr.bf16.mxu1 %v10125_v37  ;;  %vm18694_vm5 = vcmp.ge.s32.totalorder %v18693_v15, 0 }
 0x307   :  { %v3910_v24 = vmul.f32 %v8568_v36, %v18682_v11  ;;  %vm3696_vm14 = vmand %vm18686_vm6, %vm18684_vm12  ;;  %vm3799_vm12 = vcmp.ge.s32.totalorder %v3783_v48, 0  ;;  %v18699_v36 = vmov 0  ;;  %v9264_v11 = vpop.f32.mrf.mxu1 }
 0x308   :  { %vm3711_vm8 = vmand %vm3695_vm7, %vm18688_vm10  ;;  %vm18695_vm10 = vcmp.lt.s32.totalorder %v18691_v41, 4 }
 0x309   :  { %v3924_v50 = vpack.c.bf16 %v3910_v24, %v3909_v6  ;;  %vm3712_vm1 = vmand %vm3696_vm14, %vm18690_vm11  ;;  %v8553_v58 = vsel %vm3711_vm8, 1.0, %v18379_v54  ;;  %9892 = vmatpush3.bf16.msra.mxu1 %v10125_v37  ;;  %vm3815_vm14 = vcmp.lt.s32.totalorder %v3783_v48, 4  ;;  %vm3800_vm11 = vcmp.ge.s32.totalorder %v3784_v30, 0  ;;  %v9265_v31 = vpop.f32.mrf.mxu1 }
 0x30a   :  { %v8554_v8 = vsel %vm3712_vm1, 1.0, %v18379_v54  ;;  %v3759_v27 = vmul.f32 %v8553_v58, %v18671_v4  ;;  %vm3607_vm13 = vmand %vm18681_vm0, %vm18692_vm2  ;;  %vm3816_vm1 = vcmp.lt.s32.totalorder %v3784_v30, 4  ;;  %v9266_v30 = vadd.f32 %v9265_v31, %v9264_v11  ;;  %v18710_v58 = vld [vmem:[#allocation84_spill] sm:$0xff] }
 0x30b   :  { %4877 = vmatmul.mubr.bf16.gmra.mxu0 %v3924_v50  ;;  %v3760_v59 = vmul.f32 %v8554_v8, %v18674_v35  ;;  %vm3608_vm7 = vmand %vm18686_vm6, %vm18694_vm5  ;;  %v18697_v35 = vmov 0 }
 0x30c   :  { %vm3623_vm8 = vmand %vm3607_vm13, %vm18695_vm10  ;;  %vm18701_vm13 = vcmp.ge.s32.totalorder %v18691_v41, 0  ;;  %v18713_v41 = vld [vmem:[#allocation108_spill] sm:$0xff] }
 0x30d   :  { %v3773_v55 = vpack.c.bf16 %v3760_v59, %v3759_v27  ;;  %vm3624_vm0 = vmand %vm3608_vm7, %vm18696_vm15  ;;  %v8537_v4 = vsel %vm3623_vm8, 1.0, %v18379_v54  ;;  %v18711_v27 = vld [vmem:[#allocation83_spill] sm:$0xff]  ;;  %v9267_v59 = vpop.f32.mrf.mxu1 }
 0x30e   :  { %v8538_v44 = vsel %vm3624_vm0, 1.0, %v18379_v54  ;;  %v3671_v37 = vmul.f32 %v8537_v4, %v12663_v7  ;;  %vm14169_vm2 = vmand %vm3799_vm12, %vm3815_vm14  ;;  %vm18707_vm0 = vcmp.ge.s32.totalorder %v18706_v61, 0  ;;  %v18716_v4 = vld [vmem:[#allocation107_spill] sm:$0xff] }
 0x30f   :  { %v18698_v35 = vsel %vm14169_vm2, 4294967295, %v18697_v35  ;;  %4787 = vmatprep.mubr.bf16.mxu1 %v3773_v55  ;;  %v3672_v47 = vmul.f32 %v8538_v44, %v12665_v22  ;;  %vm14174_vm6 = vmand %vm3800_vm11, %vm3816_vm1  ;;  %vm18705_vm11 = vcmp.ge.s32.totalorder %v18704_v49, 0  ;;  %v18718_v44 = vld [vmem:[#allocation121_spill] sm:$0xff] }
 0x310   :  { %v18700_v36 = vsel %vm14174_vm6, 4294967295, %v18699_v36  ;;  %vm3935_vm15 = vmand %vm14169_vm2, %vm18701_vm13 }
 0x311   :  { %v3685_v17 = vpack.c.bf16 %v3672_v47, %v3671_v37  ;;  %vm3936_vm7 = vmand %vm14174_vm6, %vm18694_vm5  ;;  %v18720_v37 = vld [vmem:[#allocation146_spill] sm:$0xff] }
 0x312   :  { %vm18702_vm12 = vmmov %vm18695_vm10  ;;  %vm18703_vm10 = vcmp.lt.s32.totalorder %v18693_v15, 4  ;;  %v18715_v15 = vld [vmem:[#allocation119_spill] sm:$0xff]  ;;  %v3785_v47 = vadd.s32 1, %v18720_v37 }
 0x313   :  { %vm3951_vm14 = vmand %vm3935_vm15, %vm18702_vm12  ;;  %4788 = vmatmul.mubr.bf16.gmra.mxu1 %v3685_v17  ;;  %vm18708_vm15 = vcmp.lt.s32.totalorder %v18704_v49, 4  ;;  %v14219_v17 = vld [vmem:[#allocation3] ss:$0 sm:$0xff] }
 0x314   :  { %vm3952_vm8 = vmand %vm3936_vm7, %vm18703_vm10  ;;  %v8585_v7 = vsel %vm3951_vm14, 1.0, %v18379_v54  ;;  %vm18709_vm7 = vcmp.lt.s32.totalorder %v18706_v61, 4  ;;  %vm18712_vm14 = vcmp.ge.s32.totalorder %v18711_v27, 0  ;;  %vm18714_vm10 = vnez %v18713_v41 }
 0x315   :  { %v8586_v22 = vsel %vm3952_vm8, 1.0, %v18379_v54  ;;  %v3999_v6 = vmul.f32 %v8585_v7, %v12669_v53  ;;  %vm3847_vm1 = vmand %vm14169_vm2, %vm18705_vm11  ;;  %vm18717_vm11 = vcmp.ge.s32.totalorder %v18716_v4, 0  ;;  %v18722_v7 = vld [vmem:[#allocation145_spill] sm:$0xff] }
 0x316   :  { %v4000_v24 = vmul.f32 %v8586_v22, %v12677_v57  ;;  %vm3848_vm13 = vmand %vm14174_vm6, %vm18707_vm0  ;;  %v3786_v22 = vadd.s32 1, %v18722_v7 }
 0x317   :  { %vm3863_vm5 = vmand %vm3847_vm1, %vm18708_vm15  ;;  %vm18719_vm1 = vnez %v18718_v44 }
 0x318   :  { %v4013_v48 = vpack.c.bf16 %v4000_v24, %v3999_v6  ;;  %vm3864_vm12 = vmand %vm3848_vm13, %vm18709_vm7  ;;  %v8569_v14 = vsel %vm3863_vm5, 1.0, %v18379_v54  ;;  %vm18721_vm13 = vcmp.lt.s32.totalorder %v18711_v27, 4  ;;  %v9268_v6 = vpop.f32.mrf.mxu1  ;;  %vm18723_vm5 = vcmp.lt.s32.totalorder %v18716_v4, 4  ;;  %v9328_v24 = vpop.f32.mrf.mxu0 }
 0x319   :  { %v8570_v50 = vsel %vm3864_vm12, 1.0, %v18379_v54  ;;  %v3911_v8 = vmul.f32 %v8569_v14, %v18710_v58  ;;  %vm3697_vm8 = vmand %vm18714_vm10, %vm18712_vm14  ;;  %v9269_v61 = vadd.f32 %v9268_v6, %v9267_v59  ;;  %v4580_v58 = vadd.f32 %v9266_v30, %v14219_v17 }
 0x31a   :  { %4884 = vmatprep.mubr.bf16.mxu0 %v4013_v48  ;;  %v3912_v55 = vmul.f32 %v8570_v50, %v18715_v15  ;;  %vm3698_vm0 = vmand %vm18719_vm1, %vm18717_vm11  ;;  %v18724_v48 = vld [vmem:[#allocation155_spill] sm:$0xff]  ;;  %v18725_v50 = vld [vmem:[#allocation85_spill] sm:$0xff]  ;;  %v9329_v59 = vpop.f32.mrf.mxu0  ;;  %vm3818_vm6 = vcmp.lt.s32.totalorder %v3786_v22, 4 }
 0x31b   :  { %vm3713_vm15 = vmand %vm3697_vm8, %vm18721_vm13  ;;  %vm18726_vm12 = vcmp.ge.s32.totalorder %v18725_v50, 0  ;;  %vm3817_vm13 = vcmp.lt.s32.totalorder %v3785_v47, 4  ;;  %v9330_v41 = vadd.f32 %v9329_v59, %v9328_v24  ;;  %v18735_v24 = vmov 0 }
 0x31c   :  { %v3925_v49 = vpack.c.bf16 %v3912_v55, %v3911_v8  ;;  %vm3714_vm7 = vmand %vm3698_vm0, %vm18723_vm5  ;;  %v8555_v11 = vsel %vm3713_vm15, 1.0, %v18379_v54  ;;  %v18727_v8 = vld [vmem:[#allocation156_spill] sm:$0xff]  ;;  %v18728_v55 = vld [vmem:[#allocation86_spill] sm:$0xff]  ;;  %vm3801_vm0 = vcmp.ge.s32.totalorder %v3785_v47, 0  ;;  %vm18730_vm15 = vcmp.lt.s32.totalorder %v18725_v50, 4  ;;  %v9331_v7 = vpop.f32.mrf.mxu0 }
 0x31d   :  { %v8556_v31 = vsel %vm3714_vm7, 1.0, %v18379_v54  ;;  %v3761_v14 = vmul.f32 %v8555_v11, %v18724_v48  ;;  %vm3609_vm14 = vmand %vm18714_vm10, %vm18726_vm12  ;;  %vm18729_vm8 = vcmp.ge.s32.totalorder %v18728_v55, 0  ;;  %vm3802_vm7 = vcmp.ge.s32.totalorder %v3786_v22, 0 }
 0x31e   :  { %4885 = vmatmul.mubr.bf16.gmra.mxu0 %v3925_v49  ;;  %v3762_v15 = vmul.f32 %v8556_v31, %v18727_v8  ;;  %vm3610_vm11 = vmand %vm18719_vm1, %vm18729_vm8  ;;  %vm18731_vm10 = vcmp.lt.s32.totalorder %v18728_v55, 4  ;;  %v18732_v47 = vmov 0  ;;  %v14250_v49 = vadd.f32 %v9330_v41, %v4580_v58  ;;  %v9332_v31 = vpop.f32.mrf.mxu0  ;;  %v9270_v58 = vpop.f32.mrf.mxu1  ;;  %v18741_v41 = vld [vmem:[#allocation78_spill] sm:$0xff] }
 0x31f   :  { %vm3625_vm5 = vmand %vm3609_vm14, %vm18730_vm15  ;;  %v4583_v22 = vadd.f32 %v9269_v61, %v14219_v17  ;;  %vm18737_vm8 = vcmp.ge.s32.totalorder %v18725_v50, 0 }
 0x320   :  { %v3774_v37 = vpack.c.bf16 %v3762_v15, %v3761_v14  ;;  %vm3626_vm12 = vmand %vm3610_vm11, %vm18731_vm10  ;;  %v8539_v30 = vsel %vm3625_vm5, 1.0, %v18379_v54  ;;  %18734 = vst [vmem:[#allocation102_spill] sm:$0xff] %v14250_v49  ;;  %v18762_v49 = vld [vmem:[#allocation123_spill] sm:$0xff] }
 0x321   :  { %v8540_v6 = vsel %vm3626_vm12, 1.0, %v18379_v54  ;;  %v3673_v44 = vmul.f32 %v8539_v30, %v12669_v53  ;;  %vm14246_vm1 = vmand %vm3801_vm0, %vm3817_vm13  ;;  %v9333_v53 = vadd.f32 %v9332_v31, %v9331_v7  ;;  %vm18738_vm0 = vcmp.ge.s32.totalorder %v18728_v55, 0  ;;  %v9271_v55 = vpop.f32.mrf.mxu1 }
 0x322   :  { %v18733_v47 = vsel %vm14246_vm1, 4294967295, %v18732_v47  ;;  %4795 = vmatprep.mubr.bf16.mxu1 %v3774_v37  ;;  %v3674_v11 = vmul.f32 %v8540_v6, %v12677_v57  ;;  %vm14254_vm14 = vmand %vm3802_vm7, %vm3818_vm6  ;;  %v18743_v37 = vld [vmem:[#allocation95_spill] sm:$0xff]  ;;  %v9272_v30 = vadd.f32 %v9271_v55, %v9270_v58  ;;  %v18759_v55 = vld [vmem:[#allocation120_spill] sm:$0xff] }
 0x323   :  { %v18736_v24 = vsel %vm14254_vm14, 4294967295, %v18735_v24  ;;  %vm3937_vm11 = vmand %vm14246_vm1, %vm18737_vm8  ;;  %v14268_v57 = vadd.f32 %v9333_v53, %v4583_v22  ;;  %vm18744_vm8 = vcmp.ge.s32.totalorder %v18743_v37, 0  ;;  %v18748_v53 = vld [vmem:[#allocation91_spill] sm:$0xff] }
 0x324   :  { %v3686_v14 = vpack.c.bf16 %v3674_v11, %v3673_v44  ;;  %vm3938_vm13 = vmand %vm14254_vm14, %vm18738_vm0  ;;  %vm18745_vm0 = vcmp.lt.s32.totalorder %v18741_v41, 4  ;;  %v9273_v44 = vpop.f32.mrf.mxu1  ;;  %v18747_v11 = vld [vmem:[#allocation93_spill] sm:$0xff]  ;;  %v18753_v58 = vld [vmem:[#allocation135_spill] sm:$0xff] }
 0x325   :  { %vm3953_vm5 = vmand %vm3937_vm11, %vm18730_vm15  ;;  %18739 = vst [vmem:[#allocation112_spill] sm:$0xff] %v14268_v57  ;;  %vm18746_vm15 = vcmp.lt.s32.totalorder %v18743_v37, 4 }
 0x326   :  { %4796 = vmatmul.mubr.bf16.gmra.mxu1 %v3686_v14  ;;  %vm18740_vm6 = vmmov %vm18731_vm10  ;;  %v8587_v61 = vsel %vm3953_vm5, 1.0, %v18379_v54  ;;  %vm18742_vm10 = vcmp.ge.s32.totalorder %v18741_v41, 0  ;;  %v18750_v14 = vld [vmem:[#allocation94_spill] sm:$0xff]  ;;  %v18757_v41 = vld [vmem:[#allocation104_spill] sm:$0xff]  ;;  %v9274_v37 = vpop.f32.mrf.mxu1 }
 0x327   :  { %vm3954_vm7 = vmand %vm3938_vm13, %vm18740_vm6  ;;  %v4001_v59 = vmul.f32 %v8587_v61, %v12679_v19  ;;  %vm18749_vm6 = vcmp.ge.s32.totalorder %v18748_v53, 0  ;;  %v18752_v61 = vld [vmem:[#allocation99_spill] sm:$0xff] }
 0x328   :  { %v8588_v15 = vsel %vm3954_vm7, 1.0, %v18379_v54  ;;  %vm3849_vm12 = vmand %vm14246_vm1, %vm18742_vm10  ;;  %vm18751_vm7 = vnez %v18750_v14 }
 0x329   :  { %v4002_v50 = vmul.f32 %v8588_v15, %v12681_v60  ;;  %vm3850_vm11 = vmand %vm14254_vm14, %vm18744_vm8 }
 0x32a   :  { %vm3865_vm13 = vmand %vm3849_vm12, %vm18745_vm0  ;;  %vm18754_vm12 = vcmp.ge.s32.totalorder %v18753_v58, 0  ;;  %vm18758_vm0 = vcmp.lt.s32.totalorder %v18748_v53, 4 }
 0x32b   :  { %v4014_v7 = vpack.c.bf16 %v4002_v50, %v4001_v59  ;;  %vm3866_vm5 = vmand %vm3850_vm11, %vm18746_vm15  ;;  %v8571_v6 = vsel %vm3865_vm13, 1.0, %v18379_v54  ;;  %v18755_v59 = vld [vmem:[#allocation138_spill] sm:$0xff]  ;;  %v3787_v50 = vadd.s32 1, %v18757_v41  ;;  %vm18760_vm15 = vcmp.lt.s32.totalorder %v18753_v58, 4 }
 0x32c   :  { %v8572_v22 = vsel %vm3866_vm5, 1.0, %v18379_v54  ;;  %v3913_v31 = vmul.f32 %v8571_v6, %v18747_v11  ;;  %vm3699_vm10 = vmand %vm18751_vm7, %vm18749_vm6  ;;  %vm18756_vm8 = vnez %v18755_v59  ;;  %v3788_v6 = vadd.s32 1, %v18759_v55  ;;  %v18764_v41 = vld [vmem:[#allocation170_spill] sm:$0xff]  ;;  %v18765_v55 = vld [vmem:[#allocation133_spill] sm:$0xff] }
 0x32d   :  { %4892 = vmatprep.mubr.bf16.mxu0 %v4014_v7  ;;  %v3914_v15 = vmul.f32 %v8572_v22, %v18752_v61  ;;  %vm3700_vm11 = vmand %vm18756_vm8, %vm18754_vm12  ;;  %v9275_v11 = vadd.f32 %v9274_v37, %v9273_v44  ;;  %v18761_v61 = vld [vmem:[#allocation169_spill] sm:$0xff]  ;;  %vm18763_vm6 = vcmp.ge.s32.totalorder %v18762_v49, 0  ;;  %v9334_v44 = vpop.f32.mrf.mxu0 }
 0x32e   :  { %vm3715_vm13 = vmand %vm3699_vm10, %vm18758_vm0  ;;  %vm18766_vm10 = vcmp.ge.s32.totalorder %v18765_v55, 0  ;;  %vm3804_vm14 = vcmp.ge.s32.totalorder %v3788_v6, 0  ;;  %vm3820_vm1 = vcmp.lt.s32.totalorder %v3788_v6, 4 }
 0x32f   :  { %v3926_v13 = vpack.c.bf16 %v3914_v15, %v3913_v31  ;;  %vm3716_vm5 = vmand %vm3700_vm11, %vm18760_vm15  ;;  %v8557_v7 = vsel %vm3715_vm13, 1.0, %v18379_v54  ;;  %vm3803_vm11 = vcmp.ge.s32.totalorder %v3787_v50, 0  ;;  %vm3819_vm15 = vcmp.lt.s32.totalorder %v3787_v50, 4  ;;  %v9335_v15 = vpop.f32.mrf.mxu0 }
 0x330   :  { %v8558_v22 = vsel %vm3716_vm5, 1.0, %v18379_v54  ;;  %v3763_v57 = vmul.f32 %v8557_v7, %v18761_v61  ;;  %vm3611_vm12 = vmand %vm18751_vm7, %vm18763_vm6  ;;  %vm18767_vm13 = vcmp.lt.s32.totalorder %v18762_v49, 4  ;;  %v4588_v31 = vadd.f32 %v9272_v30, %v14219_v17 }
 0x331   :  { %4893 = vmatmul.mubr.bf16.gmra.mxu0 %v3926_v13  ;;  %v3764_v28 = vmul.f32 %v8558_v22, %v18764_v41  ;;  %vm3612_vm0 = vmand %vm18756_vm8, %vm18766_vm10  ;;  %vm18768_vm7 = vcmp.lt.s32.totalorder %v18765_v55, 4  ;;  %v18769_v50 = vmov 0  ;;  %v9336_v7 = vadd.f32 %v9335_v15, %v9334_v44 }
 0x332   :  { %vm3627_vm5 = vmand %vm3611_vm12, %vm18767_vm13  ;;  %vm18773_vm10 = vcmp.ge.s32.totalorder %v18762_v49, 0 }
 0x333   :  { %v3775_v14 = vpack.c.bf16 %v3764_v28, %v3763_v57  ;;  %vm3628_vm6 = vmand %vm3612_vm0, %vm18768_vm7  ;;  %v8541_v13 = vsel %vm3627_vm5, 1.0, %v18379_v54  ;;  %v18771_v28 = vmov 0  ;;  %v9337_v57 = vpop.f32.mrf.mxu0  ;;  %v14339_v30 = vadd.f32 %v9336_v7, %v4588_v31 }
 0x334   :  { %v8542_v59 = vsel %vm3628_vm6, 1.0, %v18379_v54  ;;  %v3675_v37 = vmul.f32 %v8541_v13, %v12679_v19  ;;  %vm14326_vm8 = vmand %vm3803_vm11, %vm3819_vm15  ;;  %v4591_v19 = vadd.f32 %v9275_v11, %v14219_v17  ;;  %vm18775_vm11 = vcmp.ge.s32.totalorder %v18765_v55, 0  ;;  %v18778_v13 = vld [vmem:[#allocation137_spill] sm:$0xff]  ;;  %v9276_v55 = vpop.f32.mrf.mxu1 }
 0x335   :  { %v18770_v50 = vsel %vm14326_vm8, 4294967295, %v18769_v50  ;;  %4803 = vmatprep.mubr.bf16.mxu1 %v3775_v14  ;;  %v3676_v6 = vmul.f32 %v8542_v59, %v12681_v60  ;;  %vm14331_vm12 = vmand %vm3804_vm14, %vm3820_vm1  ;;  %18774 = vst [vmem:[#allocation139_spill] sm:$0xff] %v14339_v30  ;;  %v9338_v60 = vpop.f32.mrf.mxu0  ;;  %v18781_v59 = vld [vmem:[#allocation148_spill] sm:$0xff] }
 0x336   :  { %v18772_v28 = vsel %vm14331_vm12, 4294967295, %v18771_v28  ;;  %vm3939_vm0 = vmand %vm14326_vm8, %vm18773_vm10  ;;  %v9339_v44 = vadd.f32 %v9338_v60, %v9337_v57  ;;  %vm18782_vm10 = vcmp.ge.s32.totalorder %v18781_v59, 0  ;;  %v18786_v60 = vld [vmem:[#allocation159_spill] sm:$0xff] }
 0x337   :  { %v3687_v22 = vpack.c.bf16 %v3676_v6, %v3675_v37  ;;  %vm3940_vm15 = vmand %vm14331_vm12, %vm18775_vm11  ;;  %vm18783_vm11 = vcmp.lt.s32.totalorder %v18778_v13, 4  ;;  %v9277_v6 = vpop.f32.mrf.mxu1 }
 0x338   :  { %vm18776_vm1 = vmmov %vm18767_vm13  ;;  %v14357_v15 = vadd.f32 %v9339_v44, %v4591_v19  ;;  %v18785_v19 = vld [vmem:[#allocation165_spill] sm:$0xff] }
 0x339   :  { %vm3955_vm14 = vmand %vm3939_vm0, %vm18776_vm1  ;;  %4804 = vmatmul.mubr.bf16.gmra.mxu1 %v3687_v22  ;;  %vm18784_vm1 = vcmp.lt.s32.totalorder %v18781_v59, 4  ;;  %v18788_v44 = vld [vmem:[#allocation161_spill] sm:$0xff]  ;;  %v18795_v59 = vld [vmem:[#allocation92_spill] sm:$0xff]  ;;  %v9279_v30 = vpop.f32.mrf.mxu1 }
 0x33a   :  { %vm18777_vm13 = vmmov %vm18768_vm7  ;;  %v8589_v31 = vsel %vm3955_vm14, 1.0, %v18379_v54  ;;  %vm18779_vm7 = vcmp.ge.s32.totalorder %v18778_v13, 0  ;;  %18780 = vst [vmem:[#allocation114_spill] sm:$0xff] %v14357_v15  ;;  %v3789_v15 = vadd.s32 1, %v18795_v59 }
 0x33b   :  { %vm3956_vm5 = vmand %vm3940_vm15, %vm18777_vm13  ;;  %v4003_v11 = vmul.f32 %v8589_v31, %v12694_v0  ;;  %vm18787_vm13 = vcmp.ge.s32.totalorder %v18786_v60, 0  ;;  %v9278_v31 = vadd.f32 %v9277_v6, %v9276_v55 }
 0x33c   :  { %v8590_v14 = vsel %vm3956_vm5, 1.0, %v18379_v54  ;;  %vm3851_vm6 = vmand %vm14326_vm8, %vm18779_vm7  ;;  %vm18789_vm5 = vnez %v18788_v44 }
 0x33d   :  { %v4004_v49 = vmul.f32 %v8590_v14, %v12701_v63  ;;  %vm3852_vm0 = vmand %vm14331_vm12, %vm18782_vm10  ;;  %v18790_v14 = vld [vmem:[#allocation166_spill] sm:$0xff] }
 0x33e   :  { %vm3867_vm15 = vmand %vm3851_vm6, %vm18783_vm11  ;;  %vm18796_vm11 = vcmp.lt.s32.totalorder %v18786_v60, 4  ;;  %v18801_v60 = vld [vmem:[#allocation179_spill] sm:$0xff] }
 0x33f   :  { %v4015_v37 = vpack.c.bf16 %v4004_v49, %v4003_v11  ;;  %vm3868_vm14 = vmand %vm3852_vm0, %vm18784_vm1  ;;  %v8573_v7 = vsel %vm3867_vm15, 1.0, %v18379_v54  ;;  %v18791_v11 = vld [vmem:[#allocation162_spill] sm:$0xff]  ;;  %v18793_v49 = vld [vmem:[#allocation164_spill] sm:$0xff] }
 0x340   :  { %v8574_v57 = vsel %vm3868_vm14, 1.0, %v18379_v54  ;;  %v3915_v22 = vmul.f32 %v8573_v7, %v18785_v19  ;;  %vm3701_vm7 = vmand %vm18789_vm5, %vm18787_vm13  ;;  %vm18792_vm6 = vcmp.ge.s32.totalorder %v18791_v11, 0  ;;  %vm18794_vm10 = vnez %v18793_v49  ;;  %v18797_v7 = vld [vmem:[#allocation124_spill] sm:$0xff] }
 0x341   :  { %4900 = vmatprep.mubr.bf16.mxu0 %v4015_v37  ;;  %v3916_v13 = vmul.f32 %v8574_v57, %v18790_v14  ;;  %vm3702_vm0 = vmand %vm18794_vm10, %vm18792_vm6  ;;  %v3790_v19 = vadd.s32 1, %v18797_v7  ;;  %vm18798_vm1 = vcmp.lt.s32.totalorder %v18791_v11, 4  ;;  %v9280_v37 = vpop.f32.mrf.mxu1  ;;  %v18799_v14 = vld [vmem:[#allocation122_spill] sm:$0xff] }
 0x342   :  { %vm3717_vm15 = vmand %vm3701_vm7, %vm18796_vm11  ;;  %vm18800_vm13 = vcmp.ge.s32.totalorder %v18799_v14, 0  ;;  %v9281_v59 = vadd.f32 %v9280_v37, %v9279_v30  ;;  %vm3805_vm11 = vcmp.ge.s32.totalorder %v3789_v15, 0  ;;  %v9340_v30 = vpop.f32.mrf.mxu0  ;;  %v18808_v37 = vmov 0 }
 0x343   :  { %v3927_v43 = vpack.c.bf16 %v3916_v13, %v3915_v22  ;;  %vm3718_vm14 = vmand %vm3702_vm0, %vm18798_vm1  ;;  %v8559_v55 = vsel %vm3717_vm15, 1.0, %v18379_v54  ;;  %v18802_v22 = vld [vmem:[#allocation154_spill] sm:$0xff]  ;;  %vm3821_vm15 = vcmp.lt.s32.totalorder %v3789_v15, 4  ;;  %vm18804_vm1 = vcmp.lt.s32.totalorder %v18799_v14, 4 }
 0x344   :  { %v8560_v6 = vsel %vm3718_vm14, 1.0, %v18379_v54  ;;  %v3765_v57 = vmul.f32 %v8559_v55, %v13816_v21  ;;  %vm3613_vm6 = vmand %vm18789_vm5, %vm18800_vm13  ;;  %vm18803_vm7 = vcmp.ge.s32.totalorder %v18802_v22, 0  ;;  %vm3806_vm12 = vcmp.ge.s32.totalorder %v3790_v19, 0 }
 0x345   :  { %4901 = vmatmul.mubr.bf16.gmra.mxu0 %v3927_v43  ;;  %v3766_v7 = vmul.f32 %v8560_v6, %v18801_v60  ;;  %vm3614_vm0 = vmand %vm18794_vm10, %vm18803_vm7  ;;  %vm3822_vm8 = vcmp.lt.s32.totalorder %v3790_v19, 4  ;;  %vm18805_vm2 = vcmp.lt.s32.totalorder %v18802_v22, 4  ;;  %v4596_v15 = vadd.f32 %v9278_v31, %v14219_v17  ;;  %v9341_v6 = vpop.f32.mrf.mxu0 }
 0x346   :  { %vm3629_vm14 = vmand %vm3613_vm6, %vm18804_vm1 }
 0x347   :  { %v3776_v13 = vpack.c.bf16 %v3766_v7, %v3765_v57  ;;  %vm3630_vm5 = vmand %vm3614_vm0, %vm18805_vm2  ;;  %v8543_v43 = vsel %vm3629_vm14, 1.0, %v18379_v54  ;;  %vm18811_vm2 = vcmp.ge.s32.totalorder %v18799_v14, 0  ;;  %v9343_v31 = vpop.f32.mrf.mxu0  ;;  %v4599_v7 = vadd.f32 %v9281_v59, %v14219_v17  ;;  %v18817_v59 = vld [vmem:[#allocation158_spill] sm:$0xff] }
 0x348   :  { %v8544_v44 = vsel %vm3630_vm5, 1.0, %v18379_v54  ;;  %v3677_v55 = vmul.f32 %v8543_v43, %v12694_v0  ;;  %vm14405_vm13 = vmand %vm3805_vm11, %vm3821_vm15  ;;  %v9342_v0 = vadd.f32 %v9341_v6, %v9340_v30  ;;  %vm18818_vm5 = vcmp.ge.s32.totalorder %v18817_v59, 0 }
 0x349   :  { %4811 = vmatprep.mubr.bf16.mxu1 %v3776_v13  ;;  %v3678_v19 = vmul.f32 %v8544_v44, %v12701_v63  ;;  %vm14411_vm10 = vmand %vm3806_vm12, %vm3822_vm8  ;;  %vm18814_vm12 = vcmp.lt.s32.totalorder %v18802_v22, 4  ;;  %v9344_v43 = vpop.f32.mrf.mxu0 }
 0x34a   :  { %v18809_v37 = vsel %vm14411_vm10, 4294967295, %v18808_v37  ;;  %vm3941_vm6 = vmand %vm14405_vm13, %vm18811_vm2  ;;  %v14425_v63 = vadd.f32 %v9342_v0, %v4596_v15  ;;  %v9345_v14 = vadd.f32 %v9344_v43, %v9343_v31  ;;  %v9282_v0 = vpop.f32.mrf.mxu1  ;;  %v18824_v43 = vld [vmem:[#allocation175_spill] sm:$0xff] }
 0x34b   :  { %18810 = vst [vmem:[#allocation136_spill] sm:$0xff] %v18809_v37  ;;  %v3688_v57 = vpack.c.bf16 %v3678_v19, %v3677_v55  ;;  %vm3942_vm0 = vmand %vm14411_vm10, %vm18803_vm7  ;;  %v18815_v55 = vld [vmem:[#allocation157_spill] sm:$0xff]  ;;  %v18834_v37 = vld [vmem:[#allocation167_spill] sm:$0xff] }
 0x34c   :  { %vm18812_vm11 = vmmov %vm18804_vm1  ;;  %18813 = vst [vmem:[#allocation117_spill] sm:$0xff] %v14425_v63  ;;  %vm18816_vm1 = vcmp.ge.s32.totalorder %v18815_v55, 0  ;;  %v14444_v22 = vadd.f32 %v9345_v14, %v4599_v7 }
 0x34d   :  { %vm3957_vm8 = vmand %vm3941_vm6, %vm18812_vm11  ;;  %4812 = vmatmul.mubr.bf16.gmra.mxu1 %v3688_v57  ;;  %vm18819_vm6 = vcmp.lt.s32.totalorder %v18815_v55, 4  ;;  %v18830_v55 = vld [vmem:[#allocation160_spill] sm:$0xff] }
 0x34e   :  { %vm3958_vm15 = vmand %vm3942_vm0, %vm18814_vm12  ;;  %v8591_v13 = vsel %vm3957_vm8, 1.0, %v18379_v54  ;;  %18820 = vst [vmem:[#allocation144_spill] sm:$0xff] %v14444_v22  ;;  %vm18821_vm0 = vcmp.lt.s32.totalorder %v18817_v59, 4  ;;  %vm18825_vm12 = vnez %v18824_v43  ;;  %v3791_v14 = vadd.s32 1, %v18830_v55 }
 0x34f   :  { %v8592_v30 = vsel %vm3958_vm15, 1.0, %v18379_v54  ;;  %v4005_v44 = vmul.f32 %v8591_v13, %v12703_v26  ;;  %vm3853_vm14 = vmand %vm14405_vm13, %vm18816_vm1  ;;  %v18822_v13 = vld [vmem:[#allocation173_spill] sm:$0xff] }
 0x350   :  { %v4006_v15 = vmul.f32 %v8592_v30, %v12705_v20  ;;  %vm3854_vm2 = vmand %vm14411_vm10, %vm18818_vm5  ;;  %vm18823_vm8 = vcmp.ge.s32.totalorder %v18822_v13, 0  ;;  %v18826_v30 = vld [vmem:[#allocation176_spill] sm:$0xff] }
 0x351   :  { %vm3869_vm7 = vmand %vm3853_vm14, %vm18819_vm6  ;;  %vm18827_vm1 = vcmp.ge.s32.totalorder %v18826_v30, 0 }
 0x352   :  { %v4016_v19 = vpack.c.bf16 %v4006_v15, %v4005_v44  ;;  %vm3870_vm11 = vmand %vm3854_vm2, %vm18821_vm0  ;;  %v8575_v6 = vsel %vm3869_vm7, 1.0, %v18379_v54  ;;  %v18828_v44 = vld [vmem:[#allocation177_spill] sm:$0xff]  ;;  %v9283_v15 = vpop.f32.mrf.mxu1  ;;  %vm18831_vm2 = vcmp.lt.s32.totalorder %v18822_v13, 4  ;;  %vm18833_vm7 = vcmp.lt.s32.totalorder %v18826_v30, 4 }
 0x353   :  { %v8576_v57 = vsel %vm3870_vm11, 1.0, %v18379_v54  ;;  %v3917_v31 = vmul.f32 %v8575_v6, %v13754_v23  ;;  %vm3703_vm15 = vmand %vm18825_vm12, %vm18823_vm8  ;;  %vm18829_vm14 = vnez %v18828_v44  ;;  %v18832_v23 = vld [vmem:[#allocation163_spill] sm:$0xff]  ;;  %v9284_v6 = vadd.f32 %v9283_v15, %v9282_v0  ;;  %v18836_v0 = vld [vmem:[#allocation168_spill] sm:$0xff] }
 0x354   :  { %4908 = vmatprep.mubr.bf16.mxu0 %v4016_v19  ;;  %v3918_v7 = vmul.f32 %v8576_v57, %v13771_v16  ;;  %vm3704_vm5 = vmand %vm18829_vm14, %vm18827_vm1  ;;  %v3792_v59 = vadd.s32 1, %v18832_v23  ;;  %v9285_v19 = vpop.f32.mrf.mxu1  ;;  %vm18835_vm11 = vcmp.ge.s32.totalorder %v18834_v37, 0 }
 0x355   :  { %vm3719_vm6 = vmand %vm3703_vm15, %vm18831_vm2  ;;  %vm18837_vm15 = vcmp.ge.s32.totalorder %v18836_v0, 0  ;;  %vm3823_vm2 = vcmp.lt.s32.totalorder %v3791_v14, 4 }
 0x356   :  { %v3928_v22 = vpack.c.bf16 %v3918_v7, %v3917_v31  ;;  %vm3720_vm0 = vmand %vm3704_vm5, %vm18833_vm7  ;;  %v8561_v16 = vsel %vm3719_vm6, 1.0, %v18379_v54  ;;  %vm3807_vm5 = vcmp.ge.s32.totalorder %v3791_v14, 0  ;;  %v9286_v31 = vpop.f32.mrf.mxu1  ;;  %vm18838_vm6 = vcmp.lt.s32.totalorder %v18834_v37, 4 }
 0x357   :  { %v8562_v57 = vsel %vm3720_vm0, 1.0, %v18379_v54  ;;  %v3767_v63 = vmul.f32 %v8561_v16, %v13953_v12  ;;  %vm3615_vm8 = vmand %vm18825_vm12, %vm18835_vm11  ;;  %vm3808_vm0 = vcmp.ge.s32.totalorder %v3792_v59, 0  ;;  %vm3824_vm10 = vcmp.lt.s32.totalorder %v3792_v59, 4 }
 0x358   :  { %4909 = vmatmul.mubr.bf16.gmra.mxu0 %v3928_v22  ;;  %v3768_v55 = vmul.f32 %v8562_v57, %v13964_v39  ;;  %vm3616_vm1 = vmand %vm18829_vm14, %vm18837_vm15  ;;  %v9287_v7 = vadd.f32 %v9286_v31, %v9285_v19  ;;  %vm18839_vm12 = vcmp.lt.s32.totalorder %v18836_v0, 4  ;;  %vm18844_vm15 = vcmp.ge.s32.totalorder %v18834_v37, 0 }
 0x359   :  { %vm3631_vm7 = vmand %vm3615_vm8, %vm18838_vm6  ;;  %v4604_v16 = vadd.f32 %v9284_v6, %v14219_v17 }
 0x35a   :  { %v3777_v15 = vpack.c.bf16 %v3768_v55, %v3767_v63  ;;  %vm3632_vm11 = vmand %vm3616_vm1, %vm18839_vm12  ;;  %v8545_v22 = vsel %vm3631_vm7, 1.0, %v18379_v54  ;;  %v9346_v63 = vpop.f32.mrf.mxu0  ;;  %v4607_v37 = vadd.f32 %v9287_v7, %v14219_v17 }
 0x35b   :  { %v8546_v43 = vsel %vm3632_vm11, 1.0, %v18379_v54  ;;  %v3679_v44 = vmul.f32 %v8545_v22, %v12703_v26  ;;  %vm14485_vm14 = vmand %vm3807_vm5, %vm3823_vm2  ;;  %vm18845_vm5 = vcmp.ge.s32.totalorder %v18836_v0, 0  ;;  %v18851_v0 = vld [vmem:[#allocation172_spill] sm:$0xff] }
 0x35c   :  { %4819 = vmatprep.mubr.bf16.mxu1 %v3777_v15  ;;  %v3680_v14 = vmul.f32 %v8546_v43, %v12705_v20  ;;  %vm14490_vm8 = vmand %vm3808_vm0, %vm3824_vm10  ;;  %v9347_v19 = vpop.f32.mrf.mxu0  ;;  %v18848_v15 = vld [vmem:[#allocation171_spill] sm:$0xff]  ;;  %v18850_v43 = vld [vmem:[#allocation105_spill] sm:$0xff] }
 0x35d   :  { %vm3943_vm1 = vmand %vm14485_vm14, %vm18844_vm15  ;;  %v9348_v20 = vadd.f32 %v9347_v19, %v9346_v63  ;;  %vm18852_vm15 = vcmp.ge.s32.totalorder %v18851_v0, 0 }
 0x35e   :  { %v3689_v26 = vpack.c.bf16 %v3680_v14, %v3679_v44  ;;  %vm3944_vm2 = vmand %vm14490_vm8, %vm18845_vm5  ;;  %v9349_v55 = vpop.f32.mrf.mxu0  ;;  %vm18853_vm5 = vcmp.lt.s32.totalorder %v18848_v15, 4 }
 0x35f   :  { %vm18846_vm10 = vmmov %vm18838_vm6  ;;  %v14514_v22 = vadd.f32 %v9348_v20, %v4604_v16 }
 0x360   :  { %vm3959_vm6 = vmand %vm3943_vm1, %vm18846_vm10  ;;  %4820 = vmatmul.mubr.bf16.gmra.mxu1 %v3689_v26  ;;  %v9350_v14 = vpop.f32.mrf.mxu0  ;;  %vm18854_vm10 = vcmp.lt.s32.totalorder %v18851_v0, 4  ;;  %v18860_v0 = vld [vmem:[#allocation118_spill] sm:$0xff] }
 0x361   :  { %vm18847_vm7 = vmmov %vm18839_vm12  ;;  %v8593_v57 = vsel %vm3959_vm6, 1.0, %v18379_v54  ;;  %vm18849_vm12 = vcmp.ge.s32.totalorder %v18848_v15, 0  ;;  %v9351_v63 = vadd.f32 %v9350_v14, %v9349_v55  ;;  %v18857_v55 = vld [vmem:[#allocation174_spill] sm:$0xff] }
 0x362   :  { %vm3960_vm0 = vmand %vm3944_vm2, %vm18847_vm7  ;;  %v4007_v31 = vmul.f32 %v8593_v57, %v12696_v38  ;;  %vm18855_vm7 = vcmp.ge.s32.totalorder %v13908_v3, 0 }
 0x363   :  { %v8594_v6 = vsel %vm3960_vm0, 1.0, %v18379_v54  ;;  %vm3855_vm11 = vmand %vm14485_vm14, %vm18849_vm12  ;;  %v14533_v20 = vadd.f32 %v9351_v63, %v4607_v37  ;;  %vm18856_vm12 = vcmp.ge.s32.totalorder %v13917_v34, 0 }
 0x364   :  { %v4008_v44 = vmul.f32 %v8594_v6, %v18850_v43  ;;  %vm3856_vm1 = vmand %vm14490_vm8, %vm18852_vm15  ;;  %v3793_v6 = vadd.s32 1, %v18857_v55  ;;  %vm18858_vm15 = vcmp.lt.s32.totalorder %v13908_v3, 4 }
 0x365   :  { %vm3871_vm2 = vmand %vm3855_vm11, %vm18853_vm5  ;;  %vm18859_vm5 = vcmp.lt.s32.totalorder %v13917_v34, 4 }
 0x366   :  { %v4017_v26 = vpack.c.bf16 %v4008_v44, %v4007_v31  ;;  %vm3872_vm6 = vmand %vm3856_vm1, %vm18854_vm10  ;;  %v8577_v16 = vsel %vm3871_vm2, 1.0, %v18379_v54  ;;  %v9288_v31 = vpop.f32.mrf.mxu1  ;;  %vm18861_vm10 = vcmp.ge.s32.totalorder %v13783_v32, 0 }
 0x367   :  { %v8578_v7 = vsel %vm3872_vm6, 1.0, %v18379_v54  ;;  %v3919_v19 = vmul.f32 %v8577_v16, %v12779_v40  ;;  %vm3705_vm0 = vmand %vm13912_vm3, %vm18855_vm7  ;;  %v3794_v40 = vadd.s32 1, %v13743_v10  ;;  %v18863_v16 = vld [vmem:[#allocation178_spill] sm:$0xff] }
 0x368   :  { %4916 = vmatprep.mubr.bf16.mxu0 %v4017_v26  ;;  %v3920_v57 = vmul.f32 %v8578_v7, %v12785_v2  ;;  %vm3706_vm11 = vmand %vm13920_vm4, %vm18856_vm12  ;;  %v9289_v2 = vpop.f32.mrf.mxu1  ;;  %v18862_v26 = vld [vmem:[#allocation103_spill] sm:$0xff]  ;;  %vm18864_vm7 = vcmp.ge.s32.totalorder %v18863_v16, 0  ;;  %vm3809_vm12 = vcmp.ge.s32.totalorder %v3793_v6, 0 }
 0x369   :  { %vm3721_vm1 = vmand %vm3705_vm0, %vm18858_vm15  ;;  %v9290_v63 = vadd.f32 %v9289_v2, %v9288_v31  ;;  %vm18865_vm15 = vcmp.lt.s32.totalorder %v13783_v32, 4 }
 0x36a   :  { %v3929_v15 = vpack.c.bf16 %v3920_v57, %v3919_v19  ;;  %vm3722_vm2 = vmand %vm3706_vm11, %vm18859_vm5  ;;  %v8563_v37 = vsel %vm3721_vm1, 1.0, %v18379_v54  ;;  %vm3825_vm11 = vcmp.lt.s32.totalorder %v3793_v6, 4  ;;  %v9291_v7 = vpop.f32.mrf.mxu1  ;;  %vm3810_vm5 = vcmp.ge.s32.totalorder %v3794_v40, 0 }
 0x36b   :  { %v8564_v44 = vsel %vm3722_vm2, 1.0, %v18379_v54  ;;  %v3769_v14 = vmul.f32 %v8563_v37, %v18860_v0  ;;  %vm3617_vm6 = vmand %vm13912_vm3, %vm18861_vm10  ;;  %vm3826_vm2 = vcmp.lt.s32.totalorder %v3794_v40, 4  ;;  %vm18866_vm3 = vcmp.lt.s32.totalorder %v18863_v16, 4  ;;  %v18923_v40 = vld [vmem:[#allocation128_spill] sm:$0xff] }
 0x36c   :  { %4917 = vmatmul.mubr.bf16.gmra.mxu0 %v3929_v15  ;;  %v3770_v10 = vmul.f32 %v8564_v44, %v18862_v26  ;;  %vm3618_vm0 = vmand %vm13920_vm4, %vm18864_vm7  ;;  %v9292_v57 = vpop.f32.mrf.mxu1  ;;  %vm18871_vm7 = vcmp.ge.s32.totalorder %v13783_v32, 0 }
 0x36d   :  { %vm3633_vm1 = vmand %vm3617_vm6, %vm18865_vm15  ;;  %v9293_v6 = vadd.f32 %v9292_v57, %v9291_v7  ;;  %vm18872_vm15 = vcmp.ge.s32.totalorder %v18863_v16, 0  ;;  %v18875_v7 = vld [vmem:[#allocation180_spill] sm:$0xff] }
 0x36e   :  { %v3778_v19 = vpack.c.bf16 %v3770_v10, %v3769_v14  ;;  %vm3634_vm10 = vmand %vm3618_vm0, %vm18866_vm3  ;;  %v8547_v29 = vsel %vm3633_vm1, 1.0, %v18379_v54 }
 0x36f   :  { %v8548_v55 = vsel %vm3634_vm10, 1.0, %v18379_v54  ;;  %v3681_v42 = vmul.f32 %v8547_v29, %v12696_v38  ;;  %vm14565_vm4 = vmand %vm3809_vm12, %vm3825_vm11  ;;  %v9352_v38 = vpop.f32.mrf.mxu0  ;;  %vm18873_vm11 = vcmp.lt.s32.totalorder %v13783_v32, 4 }
 0x370   :  { %4827 = vmatprep.mubr.bf16.mxu1 %v3778_v19  ;;  %v3682_v15 = vmul.f32 %v8548_v55, %v18850_v43  ;;  %vm14570_vm6 = vmand %vm3810_vm5, %vm3826_vm2  ;;  %v4612_v43 = vadd.f32 %v9290_v63, %v14219_v17  ;;  %v18877_v63 = vld [vmem:[#allocation181_spill] sm:$0xff] }
 0x371   :  { %vm3945_vm0 = vmand %vm14565_vm4, %vm18871_vm7  ;;  %v9353_v44 = vpop.f32.mrf.mxu0  ;;  %vm18878_vm7 = vcmp.ge.s32.totalorder %v18877_v63, 0 }
 0x372   :  { %v3690_v37 = vpack.c.bf16 %v3682_v15, %v3681_v42  ;;  %vm3946_vm12 = vmand %vm14570_vm6, %vm18872_vm15  ;;  %v9354_v32 = vadd.f32 %v9353_v44, %v9352_v38  ;;  %vm18879_vm15 = vcmp.lt.s32.totalorder %v18875_v7, 4  ;;  %v18881_v15 = vld [vmem:[#allocation101_spill] sm:$0xff] }
 0x373   :  { %vm3961_vm1 = vmand %vm3945_vm0, %vm18873_vm11  ;;  %v9355_v16 = vpop.f32.mrf.mxu0  ;;  %vm18880_vm11 = vcmp.lt.s32.totalorder %v18877_v63, 4 }
 0x374   :  { %4828 = vmatmul.mubr.bf16.gmra.mxu1 %v3690_v37  ;;  %vm18874_vm5 = vmmov %vm18866_vm3  ;;  %v8595_v2 = vsel %vm3961_vm1, 1.0, %v18379_v54  ;;  %vm18876_vm3 = vcmp.ge.s32.totalorder %v18875_v7, 0  ;;  %v14601_v29 = vadd.f32 %v9354_v32, %v4612_v43  ;;  %v18883_v43 = vld [vmem:[#allocation106_spill] sm:$0xff] }
 0x375   :  { %vm3962_vm2 = vmand %vm3946_vm12, %vm18874_vm5  ;;  %v4009_v10 = vmul.f32 %v8595_v2, %v12638_v52  ;;  %v4615_v52 = vadd.f32 %v9293_v6, %v14219_v17  ;;  %vm18882_vm5 = vcmp.ge.s32.totalorder %v12794_v33, 0 }
 0x376   :  { %v8596_v14 = vsel %vm3962_vm2, 1.0, %v18379_v54  ;;  %vm3857_vm10 = vmand %vm14565_vm4, %vm18876_vm3  ;;  %vm18884_vm3 = vcmp.ge.s32.totalorder %v12801_v18, 0 }
 0x377   :  { %v4010_v19 = vmul.f32 %v8596_v14, %v12640_v5  ;;  %vm3858_vm0 = vmand %vm14570_vm6, %vm18878_vm7  ;;  %v9356_v5 = vpop.f32.mrf.mxu0  ;;  %v9294_v14 = vpop.f32.mrf.mxu1 }
 0x378   :  { %vm3873_vm12 = vmand %vm3857_vm10, %vm18879_vm15  ;;  %v9357_v38 = vadd.f32 %v9356_v5, %v9355_v16  ;;  %vm18885_vm10 = vnez %v18638_v1 }
 0x379   :  { %v4018_v57 = vpack.c.bf16 %v4010_v19, %v4009_v10  ;;  %vm3874_vm1 = vmand %vm3858_vm0, %vm18880_vm11  ;;  %v8579_v55 = vsel %vm3873_vm12, 1.0, %v18379_v54  ;;  %vm18886_vm0 = vcmp.lt.s32.totalorder %v12794_v33, 4  ;;  %vm18887_vm12 = vcmp.lt.s32.totalorder %v12801_v18, 4  ;;  %v9295_v18 = vpop.f32.mrf.mxu1 }
 0x37a   :  { %v8580_v42 = vsel %vm3874_vm1, 1.0, %v18379_v54  ;;  %v3921_v37 = vmul.f32 %v8579_v55, %v18881_v15  ;;  %vm4019_vm2 = vmand %vm13998_vm9, %vm18882_vm5  ;;  %v14620_v2 = vadd.f32 %v9357_v38, %v4615_v52  ;;  %vm18888_vm9 = vcmp.ge.s32.totalorder %v18678_v62, 0  ;;  %v18907_v52 = vld [vmem:[#allocation159_spill] sm:$0xff] }
 0x37b   :  { %4924 = vmatprep.mubr.bf16.mxu0 %v4018_v57  ;;  %v3922_v6 = vmul.f32 %v8580_v42, %v18883_v43  ;;  %vm4020_vm7 = vmand %vm18885_vm10, %vm18884_vm3  ;;  %vm18889_vm1 = vnez %v18698_v35  ;;  %vm18891_vm3 = vnez %v18700_v36  ;;  %v9296_v1 = vadd.f32 %v9295_v18, %v9294_v14  ;;  %v9297_v35 = vpop.f32.mrf.mxu1  ;;  %v18910_v57 = vld [vmem:[#allocation136_spill] sm:$0xff] }
 0x37c   :  { %vm4035_vm15 = vmand %vm4019_vm2, %vm18886_vm0  ;;  %vm18890_vm2 = vcmp.ge.s32.totalorder %v18683_v45, 0  ;;  %v18898_v36 = vpack.c.bf16 %v14124_v46, %v14117_v9  ;;  %v9358_v46 = vpop.f32.mrf.mxu0 }
 0x37d   :  { %v3930_v44 = vpack.c.bf16 %v3922_v6, %v3921_v37  ;;  %vm4036_vm11 = vmand %vm4020_vm7, %vm18887_vm12  ;;  %v8597_v25 = vsel %vm4035_vm15, 1.0, %v18379_v54  ;;  %vm18892_vm7 = vcmp.lt.s32.totalorder %v18678_v62, 4  ;;  %vm18893_vm15 = vcmp.lt.s32.totalorder %v18683_v45, 4  ;;  %v9298_v45 = vpop.f32.mrf.mxu1 }
 0x37e   :  { %v8598_v10 = vsel %vm4036_vm11, 1.0, %v18379_v54  ;;  %v4083_v7 = vmul.f32 %v8597_v25, %v13199_v56  ;;  %vm4023_vm5 = vmand %vm18889_vm1, %vm18888_vm9  ;;  %vm18894_vm11 = vcmp.ge.s32.totalorder %v18711_v27, 0  ;;  %vm18895_vm9 = vnez %v18733_v47  ;;  %v18922_v25 = vld [vmem:[#allocation116_spill] sm:$0xff] }
 0x37f   :  { %4925 = vmatmul.mubr.bf16.gmra.mxu0 %v3930_v44  ;;  %v4084_v33 = vmul.f32 %v8598_v10, %v13209_v51  ;;  %vm4024_vm10 = vmand %vm18891_vm3, %vm18890_vm2  ;;  %vm18897_vm2 = vnez %v18736_v24 }
 0x380   :  { %vm4039_vm0 = vmand %vm4023_vm5, %vm18892_vm7  ;;  %vm18896_vm5 = vcmp.ge.s32.totalorder %v18716_v4, 0 }
 0x381   :  { %v4099_v32 = vpack.c.bf16 %v4084_v33, %v4083_v7  ;;  %vm4040_vm12 = vmand %vm4024_vm10, %vm18893_vm15  ;;  %v8601_v56 = vsel %vm4039_vm0, 1.0, %v18379_v54  ;;  %vm18899_vm10 = vcmp.lt.s32.totalorder %v18711_v27, 4  ;;  %vm18900_vm0 = vcmp.lt.s32.totalorder %v18716_v4, 4  ;;  %v9300_v43 = vpop.f32.mrf.mxu1 }
 0x382   :  { %v8602_v19 = vsel %vm4040_vm12, 1.0, %v18379_v54  ;;  %v4087_v51 = vmul.f32 %v8601_v56, %v18724_v48  ;;  %vm4025_vm1 = vmand %vm18895_vm9, %vm18894_vm11  ;;  %v9299_v48 = vadd.f32 %v9298_v45, %v9297_v35  ;;  %vm18901_vm12 = vcmp.ge.s32.totalorder %v18748_v53, 0 }
 0x383   :  { %9893 = vmatprep.mubr.bf16.mxu1 %v4099_v32  ;;  %v4088_v62 = vmul.f32 %v8602_v19, %v18727_v8  ;;  %vm4026_vm3 = vmand %vm18897_vm2, %vm18896_vm5  ;;  %vm18902_vm11 = vnez %v18770_v50  ;;  %vm18904_vm5 = vnez %v18772_v28  ;;  %v4620_v27 = vadd.f32 %v9296_v1, %v14219_v17  ;;  %v9359_v50 = vpop.f32.mrf.mxu0 }
 0x384   :  { %9894 = vmatmul.mubr.bf16.vlgmr.msra.gmra.mxu1 %v18898_v36  ;;  %vm4041_vm7 = vmand %vm4025_vm1, %vm18899_vm10  ;;  %vm18903_vm1 = vcmp.ge.s32.totalorder %v18753_v58, 0 }
 0x385   :  { %v4101_v63 = vpack.c.bf16 %v4088_v62, %v4087_v51  ;;  %vm4042_vm15 = vmand %vm4026_vm3, %vm18900_vm0  ;;  %v8603_v8 = vsel %vm4041_vm7, 1.0, %v18379_v54  ;;  %vm18905_vm3 = vcmp.lt.s32.totalorder %v18748_v53, 4  ;;  %vm18906_vm7 = vcmp.lt.s32.totalorder %v18753_v58, 4  ;;  %v9361_v58 = vpop.f32.mrf.mxu0 }
 0x386   :  { %v8604_v47 = vsel %vm4042_vm15, 1.0, %v18379_v54  ;;  %v4089_v24 = vmul.f32 %v8603_v8, %v18761_v61  ;;  %vm4027_vm9 = vmand %vm18902_vm11, %vm18901_vm12  ;;  %vm18908_vm15 = vcmp.ge.s32.totalorder %v18907_v52, 0  ;;  %v9360_v53 = vadd.f32 %v9359_v50, %v9358_v46 }
 0x387   :  { %9897 = vmatprep.mubr.bf16.mxu1 %v4101_v63  ;;  %v4090_v9 = vmul.f32 %v8604_v47, %v18764_v41  ;;  %vm4028_vm2 = vmand %vm18904_vm5, %vm18903_vm1  ;;  %vm18909_vm11 = vcmp.ge.s32.totalorder %v18791_v11, 0  ;;  %vm18912_vm5 = vcmp.lt.s32.totalorder %v18907_v52, 4  ;;  %v9362_v49 = vpop.f32.mrf.mxu0 }
 0x388   :  { %vm4043_vm10 = vmand %vm4027_vm9, %vm18905_vm3  ;;  %vm18911_vm9 = vnez %v18910_v57  ;;  %v14690_v55 = vadd.f32 %v9360_v53, %v4620_v27  ;;  %v9363_v37 = vadd.f32 %v9362_v49, %v9361_v58  ;;  %v18927_v53 = vld [vmem:[#allocation102_spill] sm:$0xff] }
 0x389   :  { %v4102_v4 = vpack.c.bf16 %v4090_v9, %v4089_v24  ;;  %vm4044_vm0 = vmand %vm4028_vm2, %vm18906_vm7  ;;  %v8605_v61 = vsel %vm4043_vm10, 1.0, %v18379_v54  ;;  %vm18914_vm10 = vcmp.ge.s32.totalorder %v18822_v13, 0 }
 0x38a   :  { %v8606_v41 = vsel %vm4044_vm0, 1.0, %v18379_v54  ;;  %v4091_v16 = vmul.f32 %v8605_v61, %v13816_v21  ;;  %vm4029_vm12 = vmand %vm14405_vm13, %vm18908_vm15  ;;  %v4623_v21 = vadd.f32 %v9299_v48, %v14219_v17  ;;  %vm18913_vm13 = vcmp.lt.s32.totalorder %v18791_v11, 4 }
 0x38b   :  { %v4092_v28 = vmul.f32 %v8606_v41, %v18801_v60  ;;  %vm4030_vm1 = vmand %vm18911_vm9, %vm18909_vm11  ;;  %vm18915_vm0 = vcmp.ge.s32.totalorder %v18826_v30, 0  ;;  %vm18917_vm9 = vcmp.lt.s32.totalorder %v18826_v30, 4  ;;  %v9301_v30 = vpop.f32.mrf.mxu1 }
 0x38c   :  { %9898 = vmatmul.mubr.bf16.gmra.mxu1 %v4102_v4  ;;  %vm4045_vm2 = vmand %vm4029_vm12, %vm18912_vm5  ;;  %vm18916_vm12 = vcmp.lt.s32.totalorder %v18822_v13, 4  ;;  %v14709_v11 = vadd.f32 %v9363_v37, %v4623_v21  ;;  %vm18919_vm5 = vcmp.ge.s32.totalorder %v13917_v34, 0  ;;  %v9302_v59 = vadd.f32 %v9301_v30, %v9300_v43  ;;  %v18928_v21 = vld [vmem:[#allocation112_spill] sm:$0xff] }
 0x38d   :  { %v4103_v5 = vpack.c.bf16 %v4092_v28, %v4091_v16  ;;  %vm4046_vm3 = vmand %vm4030_vm1, %vm18913_vm13  ;;  %v8607_v60 = vsel %vm4045_vm2, 1.0, %v18379_v54  ;;  %vm18920_vm13 = vcmp.lt.s32.totalorder %v13908_v3, 4  ;;  %v9303_v31 = vpop.f32.mrf.mxu1 }
 0x38e   :  { %v8608_v42 = vsel %vm4046_vm3, 1.0, %v18379_v54  ;;  %v4093_v15 = vmul.f32 %v8607_v60, %v13953_v12  ;;  %vm4031_vm7 = vmand %vm14485_vm14, %vm18914_vm10  ;;  %vm18918_vm14 = vcmp.ge.s32.totalorder %v13908_v3, 0  ;;  %vm18921_vm10 = vcmp.lt.s32.totalorder %v13917_v34, 4 }
 0x38f   :  { %9901 = vmatprep.mubr.bf16.mxu1 %v4103_v5  ;;  %v4094_v38 = vmul.f32 %v8608_v42, %v13964_v39  ;;  %vm4032_vm15 = vmand %vm14490_vm8, %vm18915_vm0  ;;  %v9304_v7 = vpop.f32.mrf.mxu1  ;;  %v9364_v3 = vpop.f32.mrf.mxu0  ;;  %v4628_v1 = vadd.f32 %v9302_v59, %v14219_v17 }
 0x390   :  { %vm4047_vm11 = vmand %vm4031_vm7, %vm18916_vm12  ;;  %v9305_v33 = vadd.f32 %v9304_v7, %v9303_v31  ;;  %v18932_v7 = vld [vmem:[#allocation144_spill] sm:$0xff] }
 0x391   :  { %v4104_v12 = vpack.c.bf16 %v4094_v38, %v4093_v15  ;;  %vm4048_vm1 = vmand %vm4032_vm15, %vm18917_vm9  ;;  %v8609_v23 = vsel %vm4047_vm11, 1.0, %v18379_v54  ;;  %v9365_v32 = vpop.f32.mrf.mxu0  ;;  %v18929_v15 = vld [vmem:[#allocation139_spill] sm:$0xff] }
 0x392   :  { %v8610_v6 = vsel %vm4048_vm1, 1.0, %v18379_v54  ;;  %v4095_v39 = vmul.f32 %v8609_v23, %v18860_v0  ;;  %vm4033_vm8 = vmand %vm14565_vm4, %vm18918_vm14  ;;  %v9366_v34 = vadd.f32 %v9365_v32, %v9364_v3  ;;  %v4631_v19 = vadd.f32 %v9305_v33, %v14219_v17  ;;  %v18930_v23 = vld [vmem:[#allocation114_spill] sm:$0xff] }
 0x393   :  { %v4096_v13 = vmul.f32 %v8610_v6, %v18862_v26  ;;  %vm4034_vm2 = vmand %vm14570_vm6, %vm18919_vm5  ;;  %v9367_v56 = vpop.f32.mrf.mxu0 }
 0x394   :  { %9902 = vmatmul.mubr.bf16.gmra.mxu1 %v4104_v12  ;;  %vm4049_vm3 = vmand %vm4033_vm8, %vm18920_vm13  ;;  %v14734_v35 = vadd.f32 %v9366_v34, %v4628_v1 }
 0x395   :  { %v4105_v44 = vpack.c.bf16 %v4096_v13, %v4095_v39  ;;  %vm4050_vm7 = vmand %vm4034_vm2, %vm18921_vm10  ;;  %v8611_v0 = vsel %vm4049_vm3, 1.0, %v18379_v54  ;;  %v9368_v51 = vpop.f32.mrf.mxu0 }
 0x396   :  { %v8612_v26 = vsel %vm4050_vm7, 1.0, %v18379_v54  ;;  %v4097_v14 = vmul.f32 %v8611_v0, %v18922_v25  ;;  %18924 = vst [vmem:[#allocation132_spill] sm:$0xff] %v14734_v35  ;;  %v9369_v62 = vadd.f32 %v9368_v51, %v9367_v56 }
 0x397   :  { %9905 = vmatprep.mubr.bf16.mxu1 %v4105_v44  ;;  %v4098_v10 = vmul.f32 %v8612_v26, %v18923_v40  ;;  %v18931_v26 = vld [vmem:[#allocation117_spill] sm:$0xff] }
 0x398   :  { %v14737_v45 = vadd.f32 %v9369_v62, %v4631_v19 }
 0x399   :  { %v4106_v18 = vpack.c.bf16 %v4098_v10, %v4097_v14 }
 0x39a   :  { %18925 = vst [vmem:[#allocation76_spill] sm:$0xff] %v14737_v45 }
 0x39b   :  { %v9306_v36 = vpop.f32.mrf.mxu1 }
 0x39c   :  { %9906 = vmatmul.mubr.bf16.gmra.mxu1 %v4106_v18 }
 0x39d   :  { %v9307_v48 = vpop.f32.mrf.mxu1 }
 0x39e   :  { %v9308_v63 = vadd.f32 %v9307_v48, %v9306_v36 }
 0x39f   :  { %v9309_v8 = vpop.f32.mrf.mxu1 }
 0x3a0   :  { %v4636_v46 = vadd.f32 %v9308_v63, %v14219_v17 }
 0x3a1   :  { %v9310_v47 = vpop.f32.mrf.mxu1 }
 0x3a2   :  { %v14739_v24 = vadd.f32 %v9310_v47, %v9309_v8 }
 0x3a6   :  { %v9370_v9 = vpop.f32.mrf.mxu0 }
 0x3a8   :  { %v9371_v27 = vpop.f32.mrf.mxu0 }
 0x3a9   :  { %v9372_v4 = vadd.f32 %v9371_v27, %v9370_v9 }
 0x3aa   :  { %v14756_v6 = vpop.f32.mrf.mxu0 }
 0x3ab   :  { %v14742_v61 = vadd.f32 %v9372_v4, %v4636_v46  ;;  %v9392_v50 = vpop.f32.mrf.mxu1 }
 0x3ac   :  { %v14758_v39 = vpop.f32.mrf.mxu0 }
 0x3ad   :  { %18926 = vst [vmem:[#allocation75_spill] sm:$0xff] %v14742_v61  ;;  %v9393_v41 = vpop.f32.mrf.mxu1 }
 0x3ae   :  { %v9394_v16 = vadd.f32 %v9393_v41, %v9392_v50 }
 0x3af   :  { %v9395_v52 = vpop.f32.mrf.mxu1 }
 0x3b0   :  { %v14745_v28 = vadd.f32 %v9394_v16, %v18927_v53 }
 0x3b1   :  { %v9396_v57 = vpop.f32.mrf.mxu1 }
 0x3b2   :  { %v9397_v58 = vadd.f32 %v9396_v57, %v9395_v52 }
 0x3b4   :  { %v14748_v5 = vadd.f32 %v9397_v58, %v18928_v21 }
 0x3b5   :  { %v9456_v30 = vpop.f32.mrf.mxu0 }
 0x3b7   :  { %v9457_v31 = vpop.f32.mrf.mxu0 }
 0x3b8   :  { %v9458_v54 = vadd.f32 %v9457_v31, %v9456_v30 }
 0x3b9   :  { %v9459_v10 = vpop.f32.mrf.mxu0 }
 0x3bb   :  { %v9460_v18 = vpop.f32.mrf.mxu0 }
 0x3bc   :  { %v9398_v60 = vpop.f32.mrf.mxu1  ;;  %v9461_v61 = vadd.f32 %v9460_v18, %v9459_v10 }
 0x3be   :  { %v9399_v49 = vpop.f32.mrf.mxu1  ;;  %v4874_v18 = vadd.f32 %v9461_v61, %v14748_v5 }
 0x3bf   :  { %v9400_v42 = vadd.f32 %v9399_v49, %v9398_v60 }
 0x3c0   :  { %v9401_v17 = vpop.f32.mrf.mxu1 }
 0x3c1   :  { %v14751_v37 = vadd.f32 %v9400_v42, %v18929_v15 }
 0x3c2   :  { %v9402_v38 = vpop.f32.mrf.mxu1 }
 0x3c3   :  { %v9403_v12 = vadd.f32 %v9402_v38, %v9401_v17 }
 0x3c5   :  { %v14754_v43 = vadd.f32 %v9403_v12, %v18930_v23 }
 0x3cb   :  { %v9462_v3 = vpop.f32.mrf.mxu0 }
 0x3cd   :  { %v9463_v34 = vpop.f32.mrf.mxu0 }
 0x3cf   :  { %v9465_v51 = vpop.f32.mrf.mxu0 }
 0x3d1   :  { %v9466_v62 = vpop.f32.mrf.mxu0 }
 0x3d2   :  { %v9467_v45 = vadd.f32 %v9466_v62, %v9465_v51 }
 0x3d3   :  { %v9404_v13 = vpop.f32.mrf.mxu1 }
 0x3d5   :  { %v9405_v59 = vpop.f32.mrf.mxu1 }
 0x3d6   :  { %v9406_v44 = vadd.f32 %v9405_v59, %v9404_v13 }
 0x3d7   :  { %v9407_v0 = vpop.f32.mrf.mxu1 }
 0x3d8   :  { %v14761_v25 = vadd.f32 %v9406_v44, %v18931_v26 }
 0x3d9   :  { %v9408_v14 = vpop.f32.mrf.mxu1 }
 0x3da   :  { %v9409_v40 = vadd.f32 %v9408_v14, %v9407_v0 }
 0x3dc   :  { %v14764_v33 = vadd.f32 %v9409_v40, %v18932_v7 }
 0x3de   :  { %v9468_v36 = vpop.f32.mrf.mxu0 }
 0x3e0   :  { %v9469_v63 = vpop.f32.mrf.mxu0 }
 0x3e2   :  { %v9471_v47 = vpop.f32.mrf.mxu0 }
 0x3e4   :  { %v9472_v46 = vpop.f32.mrf.mxu0 }
 0x3e5   :  { %v9473_v31 = vadd.f32 %v9472_v46, %v9471_v47 }
 0x3e6   :  { %v9410_v1 = vpop.f32.mrf.mxu1 }
 0x3e8   :  { %v9411_v32 = vpop.f32.mrf.mxu1 }
 0x3e9   :  { %v9412_v56 = vadd.f32 %v9411_v32, %v9410_v1  ;;  %v9464_v1 = vadd.f32 %v9463_v34, %v9462_v3  ;;  %v9375_v34 = vadd.f32 %v14758_v39, %v14756_v6 }
 0x3ea   :  { %v9413_v48 = vpop.f32.mrf.mxu1 }
 0x3eb   :  { %v14767_v19 = vadd.f32 %v9412_v56, %v14514_v22  ;;  %v4879_v35 = vadd.f32 %v9464_v1, %v14751_v37  ;;  %v4882_v37 = vadd.f32 %v9467_v45, %v14754_v43 }
 0x3ec   :  { %v9414_v8 = vpop.f32.mrf.mxu1 }
 0x3f1   :  { %v9474_v4 = vpop.f32.mrf.mxu0 }
 0x3f3   :  { %v9475_v41 = vpop.f32.mrf.mxu0 }
 0x3f4   :  { %v9476_v51 = vadd.f32 %v9475_v41, %v9474_v4 }
 0x3f5   :  { %v9477_v52 = vpop.f32.mrf.mxu0 }
 0x3f7   :  { %v9478_v57 = vpop.f32.mrf.mxu0 }
 0x3f9   :  { %v9416_v9 = vpop.f32.mrf.mxu1 }
 0x3fb   :  { %v9417_v27 = vpop.f32.mrf.mxu1 }
 0x3fd   :  { %v9419_v50 = vpop.f32.mrf.mxu1 }
 0x3ff   :  { %v9420_v16 = vpop.f32.mrf.mxu1 }
 0x405   :  { %v9480_v22 = vpop.f32.mrf.mxu0 }
 0x407   :  { %v9481_v60 = vpop.f32.mrf.mxu0 }
 0x409   :  { %v14769_v42 = vpop.f32.mrf.mxu0 }
 0x40b   :  { %v9484_v15 = vpop.f32.mrf.mxu0 }
 0x40d   :  { %v9422_v53 = vpop.f32.mrf.mxu1 }
 0x40f   :  { %v9423_v58 = vpop.f32.mrf.mxu1 }
 0x411   :  { %v9425_v21 = vpop.f32.mrf.mxu1 }
 0x413   :  { %v9426_v49 = vpop.f32.mrf.mxu1 }
 0x414   :  { %v9427_v46 = vadd.f32 %v9426_v49, %v9425_v21 }
 0x418   :  { %v9486_v12 = vpop.f32.mrf.mxu0 }
 0x41a   :  { %v9487_v13 = vpop.f32.mrf.mxu0 }
 0x41c   :  { %v14779_v44 = vpop.f32.mrf.mxu0 }
 0x41e   :  { %v14783_v26 = vpop.f32.mrf.mxu0 }
 0x420   :  { %v14771_v17 = vpop.f32.mrf.mxu1 }
 0x421   :  { %18933 = vst [vmem:[#allocation77_spill] sm:$0xff] %v14771_v17  ;;  %v10126_v17 = vld [vmem:[#allocation3] ss:$0 sm:$0xff] }
 0x422   :  { %v14773_v38 = vpop.f32.mrf.mxu1  ;;  %v4639_v3 = vadd.f32 %v10126_v17, %v14739_v24  ;;  %v4817_v17 = vadd.f32 %v9427_v46, %v14709_v11 }
 0x423   :  { %18934 = vst [vmem:[#allocation115_spill] sm:$0xff] %v14773_v38  ;;  %v9418_v38 = vadd.f32 %v9417_v27, %v9416_v9 }
 0x424   :  { %v14775_v23 = vpop.f32.mrf.mxu1 }
 0x425   :  { %18935 = vst [vmem:[#allocation147_spill] sm:$0xff] %v14775_v23  ;;  %v4806_v24 = vadd.f32 %v9418_v38, %v14601_v29  ;;  %v4895_v29 = vadd.f32 %v9476_v51, %v14767_v19  ;;  %v9491_v38 = vadd.f32 %v14783_v26, %v14779_v44 }
 0x426   :  { %v14777_v59 = vpop.f32.mrf.mxu1 }
 0x427   :  { %18936 = vst [vmem:[#allocation149_spill] sm:$0xff] %v14777_v59  ;;  %v9415_v59 = vadd.f32 %v9414_v8, %v9413_v48  ;;  %v9421_v48 = vadd.f32 %v9420_v16, %v9419_v50  ;;  %v9482_v8 = vadd.f32 %v9481_v60, %v9480_v22 }
 0x429   :  { %v4801_v62 = vadd.f32 %v9415_v59, %v14533_v20  ;;  %v4890_v20 = vadd.f32 %v9473_v31, %v14764_v33  ;;  %v4809_v9 = vadd.f32 %v9421_v48, %v14620_v2  ;;  %v18941_v2 = vld [vmem:[#allocation70_spill] sm:$0xff] }
 0x42a   :  { %vm18942_vm4 = vcmp.lt.s32.totalorder %v18941_v2, 6  ;;  %v18944_v59 = vld [vmem:[#allocation115_spill] sm:$0xff] }
 0x42b   :  { %vm18947_vm6 = vmmov %vm18942_vm4 }
 0x42c   :  { %v14787_v40 = vpop.f32.mrf.mxu0  ;;  %vm18948_vm0 = vmmov %vm18942_vm4 }
 0x42d   :  { %18939 = vst [vmem:[#allocation131_spill] sm:$0xff] %v14787_v40  ;;  %v4871_v40 = vadd.f32 %v9458_v54, %v14745_v28  ;;  %vm18952_vm15 = vmmov %vm18948_vm0 }
 0x42e   :  { %v14791_v32 = vpop.f32.mrf.mxu0  ;;  %vm18957_vm12 = vmmov %vm18948_vm0 }
 0x42f   :  { %vm18958_vm11 = vmmov %vm18948_vm0 }
 0x430   :  { %vm18959_vm9 = vmmov %vm18948_vm0 }
 0x431   :  { %vm18960_vm1 = vmmov %vm18948_vm0 }
 0x432   :  { %vm18961_vm14 = vmmov %vm18948_vm0 }
 0x433   :  { %vm18962_vm8 = vmmov %vm18948_vm0 }
 0x434   :  { %v14781_v0 = vpop.f32.mrf.mxu1  ;;  %vm18963_vm5 = vmmov %vm18948_vm0 }
 0x435   :  { %18937 = vst [vmem:[#allocation134_spill] sm:$0xff] %v14781_v0  ;;  %v14796_v0 = vpop.f32.mrf.mxu0  ;;  %vm18964_vm2 = vmmov %vm18948_vm0 }
 0x436   :  { %v14785_v14 = vpop.f32.mrf.mxu1  ;;  %vm18965_vm13 = vmmov %vm18948_vm0 }
 0x437   :  { %18938 = vst [vmem:[#allocation130_spill] sm:$0xff] %v14785_v14  ;;  %v14805_v54 = vpop.f32.mrf.mxu0  ;;  %vm18966_vm3 = vmmov %vm18948_vm0 }
 0x438   :  { %v14789_v7 = vpop.f32.mrf.mxu1  ;;  %vm18967_vm10 = vmmov %vm18948_vm0 }
 0x439   :  { %vm18968_vm7 = vmmov %vm18948_vm0 }
 0x43a   :  { %v14793_v56 = vpop.f32.mrf.mxu1 }
 0x43b   :  { %18940 = vst [vmem:[#allocation84_spill] sm:$0xff] %v14793_v56  ;;  %v9470_v56 = vadd.f32 %v9469_v63, %v9468_v36  ;;  %v14808_v36 = vadd.f32 %v9375_v34, %v4639_v3  ;;  %v9424_v63 = vadd.f32 %v9423_v58, %v9422_v53  ;;  %v4903_v53 = vadd.f32 %v9482_v8, %v4806_v24 }
 0x43c   :  { %v9488_v58 = vadd.f32 %v9487_v13, %v9486_v12  ;;  %v18945_v13 = vld [vmem:[#allocation147_spill] sm:$0xff]  ;;  %v18949_v51 = vld [vmem:[#allocation134_spill] sm:$0xff] }
 0x43d   :  { %v4887_v45 = vadd.f32 %v9470_v56, %v14761_v25  ;;  %v4814_v25 = vadd.f32 %v9424_v63, %v14690_v55 }
 0x43f   :  { %v9498_v27 = vpop.f32.mrf.mxu0 }
 0x444   :  { %v9895_v23 = vpop.f32.mrf.mxu1 }
 0x445   :  { %v4976_v14 = vadd.f32 %v9895_v23, %v4879_v35  ;;  %v9479_v35 = vadd.f32 %v9478_v57, %v9477_v52  ;;  %v9485_v57 = vadd.f32 %v9484_v15, %v14769_v42  ;;  %v18943_v23 = vld [vmem:[#allocation77_spill] sm:$0xff]  ;;  %v9499_v15 = vpop.f32.mrf.mxu0 }
 0x446   :  { %v4967_v30 = vpop.f32.mrf.mxu1  ;;  %v9430_v42 = vadd.f32 %v18944_v59, %v18943_v23 }
 0x447   :  { %v4968_v10 = vadd.f32 %v4967_v30, %v4871_v40  ;;  %v5032_v6 = vmax.f32 %v4976_v14, 0.0  ;;  %v4898_v50 = vadd.f32 %v9479_v35, %v4801_v62  ;;  %v18946_v14 = vld [vmem:[#allocation149_spill] sm:$0xff]  ;;  %v18950_v62 = vld [vmem:[#allocation130_spill] sm:$0xff]  ;;  %v9501_v48 = vpop.f32.mrf.mxu0 }
 0x448   :  { %v9896_v28 = vpop.f32.mrf.mxu1  ;;  %v9433_v40 = vadd.f32 %v18946_v14, %v18945_v13  ;;  %v9436_v35 = vadd.f32 %v18950_v62, %v18949_v51 }
 0x449   :  { %v4979_v39 = vadd.f32 %v9896_v28, %v4882_v37  ;;  %v5030_v61 = vmax.f32 %v4968_v10, 0.0  ;;  %v5048_v41 = vrot.slane %v5032_v6, 2  ;;  %v4911_v37 = vadd.f32 %v9488_v58, %v4814_v25 }
 0x44a   :  { %v4970_v47 = vpop.f32.mrf.mxu1 }
 0x44b   :  { %v5033_v5 = vmax.f32 %v4979_v39, 0.0  ;;  %v4971_v43 = vadd.f32 %v4970_v47, %v4874_v18  ;;  %v14816_v33 = vrot.slane %v5030_v61, 2  ;;  %v4906_v18 = vadd.f32 %v9485_v57, %v4809_v9  ;;  %v18951_v39 = vld [vmem:[#allocation132_spill] sm:$0xff] }
 0x44c   :  { %v9899_v4 = vpop.f32.mrf.mxu1  ;;  %v4822_v63 = vadd.f32 %v9430_v42, %v18951_v39 }
 0x44d   :  { %v5049_v16 = vrot.slane %v5033_v5, 2  ;;  %v5031_v52 = vmax.f32 %v4971_v43, 0.0  ;;  %v4992_v22 = vadd.f32 %v9899_v4, %v4895_v29  ;;  %v18953_v43 = vld [vmem:[#allocation76_spill] sm:$0xff] }
 0x44e   :  { %v4983_v60 = vpop.f32.mrf.mxu1 }
 0x44f   :  { %v5074_v21 = vsel %vm18942_vm4, %v5048_v41, %v5049_v16  ;;  %v5047_v49 = vrot.slane %v5031_v52, 2  ;;  %v4984_v19 = vadd.f32 %v4983_v60, %v4887_v45  ;;  %v5036_v26 = vmax.f32 %v4992_v22, 0.0  ;;  %v18956_v22 = vld [vmem:[#allocation75_spill] sm:$0xff] }
 0x450   :  { %v5080_v55 = vmax.f32 %v5032_v6, %v5074_v21  ;;  %v9900_v12 = vpop.f32.mrf.mxu1  ;;  %v4914_v6 = vadd.f32 %v9491_v38, %v4817_v17  ;;  %v4830_v60 = vadd.f32 %v9436_v35, %v18956_v22  ;;  %v9500_v21 = vadd.f32 %v9499_v15, %v9498_v27 }
 0x451   :  { %v5075_v1 = vsel %vm18947_vm6, %v5047_v49, %v5048_v41  ;;  %v5076_v56 = vsel %vm18948_vm0, %v14816_v33, %v5047_v49  ;;  %v5034_v11 = vmax.f32 %v4984_v19, 0.0  ;;  %v4995_v34 = vadd.f32 %v9900_v12, %v4898_v50  ;;  %v18954_v50 = vld [vmem:[#allocation131_spill] sm:$0xff] }
 0x452   :  { %v14832_v3 = vmax.f32 %v5030_v61, %v5076_v56  ;;  %v14834_v44 = vmax.f32 %v5031_v52, %v5075_v1  ;;  %v4986_v30 = vpop.f32.mrf.mxu1  ;;  %v5052_v9 = vrot.slane %v5036_v26, 2  ;;  %v9494_v41 = vadd.f32 %v14791_v32, %v18954_v50  ;;  %v18955_v52 = vld [vmem:[#allocation84_spill] sm:$0xff] }
 0x453   :  { %v5050_v31 = vrot.slane %v5034_v11, 2  ;;  %v4987_v10 = vadd.f32 %v4986_v30, %v4890_v20  ;;  %v5037_v24 = vmax.f32 %v4995_v34, 0.0  ;;  %v4825_v20 = vadd.f32 %v9433_v40, %v18953_v43 }
 0x454   :  { %v14839_v28 = vmax.f32 %v14832_v3, %v5080_v55  ;;  %v9903_v8 = vpop.f32.mrf.mxu1  ;;  %v9439_v57 = vadd.f32 %v18955_v52, %v14789_v7  ;;  %v9497_v15 = vadd.f32 %v14805_v54, %v14796_v0  ;;  %v4919_v0 = vadd.f32 %v9494_v41, %v4822_v63 }
 0x455   :  { %v5073_v47 = vsel %vm18952_vm15, %v5049_v16, %v5050_v31  ;;  %v5035_v45 = vmax.f32 %v4987_v10, 0.0  ;;  %v5008_v61 = vadd.f32 %v9903_v8, %v4911_v37  ;;  %v5053_v46 = vrot.slane %v5037_v24, 2  ;;  %v9502_v16 = vpop.f32.mrf.mxu0 }
 0x456   :  { %v5081_v29 = vmax.f32 %v5033_v5, %v5073_v47  ;;  %v4999_v4 = vpop.f32.mrf.mxu1  ;;  %v4833_v12 = vadd.f32 %v9439_v57, %v14808_v36  ;;  %v9503_v13 = vadd.f32 %v9502_v16, %v9501_v48  ;;  %v4922_v8 = vadd.f32 %v9497_v15, %v4825_v20 }
 0x457   :  { %v5051_v25 = vrot.slane %v5035_v45, 2  ;;  %v5000_v58 = vadd.f32 %v4999_v4, %v4903_v53  ;;  %v5070_v49 = vsel %vm18957_vm12, %v5052_v9, %v5053_v46  ;;  %v5040_v38 = vmax.f32 %v5008_v61, 0.0 }
 0x458   :  { %v14853_v19 = vmax.f32 %v14834_v44, %v5081_v29  ;;  %v9904_v5 = vpop.f32.mrf.mxu1  ;;  %v5084_v17 = vmax.f32 %v5036_v26, %v5070_v49  ;;  %v4930_v35 = vadd.f32 %v9503_v13, %v4833_v12 }
 0x459   :  { %v5071_v32 = vsel %vm18958_vm11, %v5051_v25, %v5052_v9  ;;  %v5072_v7 = vsel %vm18959_vm9, %v5050_v31, %v5051_v25  ;;  %v5038_v59 = vmax.f32 %v5000_v58, 0.0  ;;  %v5011_v27 = vadd.f32 %v9904_v5, %v4914_v6 }
 0x45a   :  { %v5082_v53 = vmax.f32 %v5034_v11, %v5072_v7  ;;  %v5083_v23 = vmax.f32 %v5035_v45, %v5071_v32  ;;  %v5002_v42 = vpop.f32.mrf.mxu1  ;;  %v4927_v31 = vadd.f32 %v9500_v21, %v4830_v60  ;;  %v5056_v10 = vrot.slane %v5040_v38, 2 }
 0x45b   :  { %v5003_v14 = vadd.f32 %v5002_v42, %v4906_v18  ;;  %v5054_v26 = vrot.slane %v5038_v59, 2  ;;  %v5041_v11 = vmax.f32 %v5011_v27, 0.0 }
 0x45c   :  { %v14862_v40 = vmax.f32 %v5080_v55, %v5082_v53  ;;  %v14864_v1 = vmax.f32 %v5081_v29, %v5083_v23  ;;  %v14866_v56 = vmax.f32 %v5082_v53, %v5084_v17  ;;  %v9907_v34 = vpop.f32.mrf.mxu1 }
 0x45d   :  { %v5039_v30 = vmax.f32 %v5003_v14, 0.0  ;;  %v5069_v37 = vsel %vm18960_vm1, %v5053_v46, %v5054_v26  ;;  %v5057_v36 = vrot.slane %v5041_v11, 2  ;;  %v5024_v55 = vadd.f32 %v9907_v34, %v4927_v31 }
 0x45e   :  { %v5015_v54 = vpop.f32.mrf.mxu1  ;;  %v5085_v18 = vmax.f32 %v5037_v24, %v5069_v37 }
 0x45f   :  { %v5055_v51 = vrot.slane %v5039_v30, 2  ;;  %v5016_v62 = vadd.f32 %v5015_v54, %v4919_v0  ;;  %v5066_v6 = vsel %vm18961_vm14, %v5056_v10, %v5057_v36  ;;  %v5044_v9 = vmax.f32 %v5024_v55, 0.0 }
 0x460   :  { %v9908_v48 = vpop.f32.mrf.mxu1  ;;  %v14876_v45 = vmax.f32 %v5083_v23, %v5085_v18  ;;  %v5088_v63 = vmax.f32 %v5040_v38, %v5066_v6 }
 0x461   :  { %v5067_v39 = vsel %vm18962_vm8, %v5055_v51, %v5056_v10  ;;  %v5068_v47 = vsel %vm18963_vm5, %v5054_v26, %v5055_v51  ;;  %v5042_v46 = vmax.f32 %v5016_v62, 0.0  ;;  %v5027_v29 = vadd.f32 %v9908_v48, %v4930_v35 }
 0x462   :  { %v5086_v61 = vmax.f32 %v5038_v59, %v5068_v47  ;;  %v5087_v43 = vmax.f32 %v5039_v30, %v5067_v39  ;;  %v5018_v24 = vpop.f32.mrf.mxu1  ;;  %v5060_v58 = vrot.slane %v5044_v9, 2 }
 0x463   :  { %v5019_v4 = vadd.f32 %v5018_v24, %v4922_v8  ;;  %v5058_v52 = vrot.slane %v5042_v46, 2  ;;  %v5045_v57 = vmax.f32 %v5027_v29, 0.0 }
 0x464   :  { %v14878_v20 = vmax.f32 %v5084_v17, %v5086_v61  ;;  %v14880_v50 = vmax.f32 %v5085_v18, %v5087_v43  ;;  %v14882_v41 = vmax.f32 %v5086_v61, %v5088_v63 }
 0x465   :  { %v5043_v25 = vmax.f32 %v5019_v4, 0.0  ;;  %v5065_v22 = vsel %vm18964_vm2, %v5057_v36, %v5058_v52  ;;  %v5061_v60 = vrot.slane %v5045_v57, 2 }
 0x466   :  { %v5089_v16 = vmax.f32 %v5041_v11, %v5065_v22 }
 0x467   :  { %v5059_v21 = vrot.slane %v5043_v25, 2  ;;  %v5062_v49 = vsel %vm18965_vm13, %v5060_v58, %v5061_v60  ;;  %v5077_v5 = vsel %vm18966_vm3, %v5061_v60, %v14816_v33 }
 0x468   :  { %v5092_v7 = vmax.f32 %v5044_v9, %v5062_v49  ;;  %v5093_v38 = vmax.f32 %v5045_v57, %v5077_v5  ;;  %v14895_v59 = vmax.f32 %v5087_v43, %v5089_v16 }
 0x469   :  { %v5063_v17 = vsel %vm18967_vm10, %v5059_v21, %v5060_v58  ;;  %v5064_v32 = vsel %vm18968_vm7, %v5058_v52, %v5059_v21 }
 0x46a   :  { %v5090_v53 = vmax.f32 %v5042_v46, %v5064_v32  ;;  %v5091_v23 = vmax.f32 %v5043_v25, %v5063_v17  ;;  %v14898_v27 = vmax.f32 %v5092_v7, %v14832_v3  ;;  %v14901_v42 = vmax.f32 %v5093_v38, %v14834_v44 }
 0x46c   :  { %18969 = vst [vmem:[#allocation83_spill] sm:$0xff] %v14898_v27  ;;  %18970 = vst [vmem:[#allocation108_spill] sm:$0xff] %v14901_v42  ;;  %v14903_v15 = vmax.f32 %v5088_v63, %v5090_v53  ;;  %v14905_v33 = vmax.f32 %v5089_v16, %v5091_v23  ;;  %v14907_v12 = vmax.f32 %v5090_v53, %v5092_v7 }
 0x46d   :  { %v14909_v13 = vmax.f32 %v5091_v23, %v5093_v38 }
 0x46e   :  { %18971 = vst [vmem:[#allocation119_spill] sm:$0xff] %v14907_v12 }
 0x46f   :  { %18972 = vst [vmem:[#allocation107_spill] sm:$0xff] %v14909_v13 }
 0x470   :  { %10338 = dma.done.wait [#allocation10 + $0x2], 9216 }
 0x471   :  { %10339 = vsyncadd [#allocation10 + $0x2], 4294958080 }
 0x472   :  { %10340 = dma.done.wait [#allocation10 + $0x3], 16 }
 0x473   :  { %10341 = vsyncadd [#allocation10 + $0x3], 4294967280  ;;  %v10127_v14 = vld [vmem:[#allocation4 + $0x78] sm:$0xff]   ;;  %v10131_v44 = vld [vmem:[#allocation4 + $0x70] sm:$0xff]   ;;  %v5305_v53 = vrot.slane %v14898_v27, 4 }
 0x474   :  { %v10128_v26 = vld [vmem:[#allocation4 + $0x38] sm:$0xff]   ;;  %9520 = vmatprep.subr.bf16.mxu0 %v10127_v14  ;;  %v10132_v11 = vld [vmem:[#allocation4 + $0x30] sm:$0xff]   ;;  %v10135_v10 = vld [vmem:[#allocation4 + $0x68] sm:$0xff]  }
 0x475   :  { %v10129_v3 = vld [vmem:[#allocation4 + $0xf8] sm:$0xff]   ;;  %9521 = vmatpush3.bf16.msra.mxu0 %v10128_v26  ;;  %v10133_v30 = vld [vmem:[#allocation4 + $0xf0] sm:$0xff]   ;;  %v10136_v37 = vld [vmem:[#allocation4 + $0x28] sm:$0xff]   ;;  %v17615_v26 = vrot.slane %v14905_v33, 4 }
 0x476   :  { %v10130_v34 = vld [vmem:[#allocation4 + $0xb8] sm:$0xff]   ;;  %9584 = vmatprep.subr.bf16.mxu1 %v10129_v3  ;;  %9522 = vmatprep.subr.bf16.mxu0 %v10131_v44  ;;  %v10134_v31 = vld [vmem:[#allocation4 + $0xb0] sm:$0xff]   ;;  %v10137_v36 = vld [vmem:[#allocation4 + $0xe8] sm:$0xff]   ;;  %v5303_v3 = vrot.slane %v14907_v12, 4  ;;  %v5304_v44 = vrot.slane %v14909_v13, 4 }
 0x477   :  { %9585 = vmatpush3.bf16.msra.mxu1 %v10130_v34  ;;  %v18973_v0 = vld [vmem:[#allocation71_spill] sm:$0xff]  ;;  %v10138_v51 = vld [vmem:[#allocation4 + $0xa8] sm:$0xff]   ;;  %v10139_v18 = vld [vmem:[#allocation4 + $0x60] sm:$0xff]  }
 0x478   :  { %9586 = vmatprep.subr.bf16.mxu1 %v10133_v30  ;;  %v14912_v54 = vshra.s32 %v18973_v0, 2  ;;  %v10140_v55 = vld [vmem:[#allocation4 + $0x20] sm:$0xff]   ;;  %v10143_v8 = vld [vmem:[#allocation4 + $0x58] sm:$0xff]   ;;  %v10147_v43 = vld [vmem:[#allocation4 + $0x50] sm:$0xff]  }
 0x479   :  { %9523 = vmatpush3.bf16.msra.mxu0 %v10132_v11  ;;  %v10141_v35 = vld [vmem:[#allocation4 + $0xe0] sm:$0xff]   ;;  %v10144_v6 = vld [vmem:[#allocation4 + $0x18] sm:$0xff]   ;;  %v10148_v24 = vld [vmem:[#allocation4 + $0x10] sm:$0xff]   ;;  %v18983_v11 = vmov 0.0  }
 0x47a   :  { %9524 = vmatprep.subr.bf16.mxu0 %v10135_v10  ;;  %v5324_v62 = vadd.s32 4294967295, %v14912_v54  ;;  %v10142_v48 = vld [vmem:[#allocation4 + $0xa0] sm:$0xff]   ;;  %v10145_v39 = vld [vmem:[#allocation4 + $0xd8] sm:$0xff]   ;;  %v10149_v4 = vld [vmem:[#allocation4 + $0xd0] sm:$0xff]  }
 0x47b   :  { %9587 = vmatpush3.bf16.msra.mxu1 %v10134_v31  ;;  %v10146_v47 = vld [vmem:[#allocation4 + $0x98] sm:$0xff]   ;;  %v18975_v9 = vld [vmem:[#allocation73_spill] sm:$0xff]  ;;  %v18978_v52 = vld [vmem:[#allocation74_spill] sm:$0xff] }
 0x47c   :  { %9588 = vmatprep.subr.bf16.mxu1 %v10137_v36  ;;  %vm5340_vm4 = vcmp.ge.s32.totalorder %v5324_v62, 0  ;;  %vm5356_vm6 = vcmp.lt.s32.totalorder %v5324_v62, 2  ;;  %v18974_v63 = vld [vmem:[#allocation72_spill] sm:$0xff]  ;;  %v14919_v46 = vshra.s32 %v18975_v9, 2  ;;  %v14926_v57 = vshra.s32 %v18978_v52, 2  ;;  %v10150_v25 = vld [vmem:[#allocation4 + $0x90] sm:$0xff]  }
 0x47d   :  { %9525 = vmatpush3.bf16.msra.mxu0 %v10136_v37  ;;  %v14916_v61 = vshra.s32 %v18974_v63, 2  ;;  %vm14921_vm0 = vmand %vm5340_vm4, %vm5356_vm6  ;;  %v10151_v22 = vld [vmem:[#allocation4 + $0x48] sm:$0xff]   ;;  %v10155_v17 = vld [vmem:[#allocation4 + $0x40] sm:$0xff]   ;;  %vm17619_vm4 = vcmp.lt.s32.totalorder %v18941_v2, 4  ;;  %v5306_v62 = vrot.slane %v14901_v42, 4 }
 0x47e   :  { %9526 = vmatprep.subr.bf16.mxu0 %v10139_v18  ;;  %v10152_v60 = vld [vmem:[#allocation4 + $0x8] sm:$0xff]   ;;  %v14930_v21 = vadd.s32 4294967295, %v14919_v46  ;;  %v14933_v49 = vadd.s32 4294967295, %v14926_v57  ;;  %v10156_v32 = vld [vmem:[#allocation4] sm:$0xff]   ;;  %vm17612_vm9 = vcmp.ge.s32.totalorder %v14919_v46, 0  ;;  %vm17599_vm14 = vcmp.ge.s32.totalorder %v14926_v57, 0 }
 0x47f   :  { %9589 = vmatpush3.bf16.msra.mxu1 %v10138_v51  ;;  %v5325_v58 = vadd.s32 4294967295, %v14916_v61  ;;  %v10153_v16 = vld [vmem:[#allocation4 + $0xc8] sm:$0xff]   ;;  %v10157_v7 = vld [vmem:[#allocation4 + $0xc0] sm:$0xff]   ;;  %vm17598_vm5 = vcmp.lt.s32.totalorder %v14919_v46, 2  ;;  %v10159_v14 = vld [vmem:[#allocation4 + $0x178] sm:$0xff]   ;;  %vm17597_vm13 = vcmp.lt.s32.totalorder %v14926_v57, 2  ;;  %v14983_v0 = vsel %vm17619_vm4, %v17615_v26, %v5303_v3 }
 0x480   :  { %9590 = vmatprep.subr.bf16.mxu1 %v10141_v35  ;;  %v10154_v5 = vld [vmem:[#allocation4 + $0x88] sm:$0xff]   ;;  %vm17603_vm11 = vcmp.ge.s32.totalorder %v14930_v21, 0  ;;  %v10158_v23 = vld [vmem:[#allocation4 + $0x80] sm:$0xff]   ;;  %vm5540_vm2 = vmand %vm14921_vm0, %vm17612_vm9  ;;  %vm17602_vm3 = vcmp.ge.s32.totalorder %v14933_v49, 0  ;;  %v14991_v36 = vsel %vm17619_vm4, %v5303_v3, %v5304_v44  ;;  %v15005_v35 = vadd.s32 1, %v14919_v46 }
 0x481   :  { %9527 = vmatpush3.bf16.msra.mxu0 %v10140_v55  ;;  %vm5341_vm15 = vcmp.ge.s32.totalorder %v5325_v58, 0  ;;  %vm5357_vm12 = vcmp.lt.s32.totalorder %v5325_v58, 2  ;;  %vm14946_vm8 = vmand %vm14921_vm0, %vm17603_vm11  ;;  %v10161_v34 = vld [vmem:[#allocation4 + $0x1f8] sm:$0xff]   ;;  %18984 = vst [vmem:[#allocation121_spill] sm:$0xff] %v14991_v36  ;;  %v5291_v55 = vrot.slane %v14839_v28, 4  ;;  %v18990_v52 = vld [vmem:[#allocation81_spill] sm:$0xff] }
 0x482   :  { %9528 = vmatprep.subr.bf16.mxu0 %v10143_v8  ;;  %vm14937_vm1 = vmand %vm5341_vm15, %vm5357_vm12  ;;  %vm17601_vm15 = vcmp.lt.s32.totalorder %v14930_v21, 2  ;;  %v10163_v58 = vld [vmem:[#allocation4 + $0x170] sm:$0xff]   ;;  %v10168_v38 = vld [vmem:[#allocation4 + $0x128] sm:$0xff]  }
 0x483   :  { %9591 = vmatpush3.bf16.msra.mxu1 %v10142_v48  ;;  %vm5541_vm10 = vmand %vm14937_vm1, %vm17599_vm14 }
 0x484   :  { %9592 = vmatprep.subr.bf16.mxu1 %v10145_v39  ;;  %vm5572_vm7 = vmand %vm5540_vm2, %vm17598_vm5  ;;  %vm17600_vm2 = vcmp.lt.s32.totalorder %v14933_v49, 2  ;;  %vm5797_vm5 = vcmp.lt.s32.totalorder %v14916_v61, 2  ;;  %v18985_v39 = vmov 0 }
 0x485   :  { %9529 = vmatpush3.bf16.msra.mxu0 %v10144_v6  ;;  %vm5573_vm6 = vmand %vm5541_vm10, %vm17597_vm13  ;;  %v8702_v30 = vsel %vm5572_vm7, 1.0, %v18983_v11  ;;  %vm5780_vm10 = vcmp.ge.s32.totalorder %v14912_v54, 0  ;;  %vm5796_vm7 = vcmp.lt.s32.totalorder %v14912_v54, 2  ;;  %vm5781_vm13 = vcmp.ge.s32.totalorder %v14916_v61, 0 }
 0x486   :  { %9530 = vmatprep.subr.bf16.mxu0 %v10147_v43  ;;  %vm5421_vm12 = vmand %vm14937_vm1, %vm17602_vm3  ;;  %v8703_v31 = vsel %vm5573_vm6, 1.0, %v18983_v11  ;;  %v5620_v10 = vmul.f32 %v8702_v30, %v14907_v12  ;;  %v5292_v6 = vrot.slane %v14853_v19, 4  ;;  %v18987_v43 = vmov 0 }
 0x487   :  { %9593 = vmatpush3.bf16.msra.mxu1 %v10146_v47  ;;  %v5621_v37 = vmul.f32 %v8703_v31, %v14909_v13  ;;  %vm5452_vm6 = vmand %vm14946_vm8, %vm17601_vm15  ;;  %v15017_v47 = vadd.s32 1, %v14926_v57  ;;  %v10167_v31 = vld [vmem:[#allocation4 + $0x168] sm:$0xff]  }
 0x488   :  { %9594 = vmatprep.subr.bf16.mxu1 %v10149_v4  ;;  %vm5453_vm14 = vmand %vm5421_vm12, %vm17600_vm2  ;;  %v8686_v18 = vsel %vm5452_vm6, 1.0, %v18983_v11  ;;  %v10160_v4 = vld [vmem:[#allocation4 + $0x138] sm:$0xff]  }
 0x489   :  { %9531 = vmatpush3.bf16.msra.mxu0 %v10148_v24  ;;  %v5636_v51 = vpack.c.bf16 %v5621_v37, %v5620_v10  ;;  %v8687_v48 = vsel %vm5453_vm14, 1.0, %v18983_v11  ;;  %v5500_v8 = vmul.f32 %v8686_v18, %v14983_v0  ;;  %vm15012_vm8 = vmand %vm5780_vm10, %vm5796_vm7  ;;  %v18989_v24 = vld [vmem:[#allocation79_spill] sm:$0xff]  ;;  %vm17604_vm7 = vcmp.ge.s32.totalorder %v15017_v47, 0  ;;  %v18993_v10 = vld [vmem:[#allocation82_spill] sm:$0xff] }
 0x48a   :  { %9532 = vmatprep.subr.bf16.mxu0 %v10151_v22  ;;  %v18986_v39 = vsel %vm15012_vm8, 4294967295, %v18985_v39  ;;  %v5501_v63 = vmul.f32 %v8687_v48, %v14991_v36  ;;  %vm15022_vm12 = vmand %vm5781_vm13, %vm5797_vm5  ;;  %v15027_v9 = vshra.s32 %v18989_v24, 2  ;;  %vm17608_vm13 = vcmp.ge.s32.totalorder %v15005_v35, 0 }
 0x48b   :  { %9595 = vmatpush3.bf16.msra.mxu1 %v10150_v25  ;;  %6890 = vmatprep.mubr.bf16.mxu0 %v5636_v51  ;;  %v18988_v43 = vsel %vm15022_vm12, 4294967295, %v18987_v43  ;;  %vm5828_vm14 = vmand %vm15012_vm8, %vm17603_vm11  ;;  %v15034_v25 = vshra.s32 %v18990_v52, 2  ;;  %v15079_v37 = vshra.s32 %v18993_v10, 2  ;;  %v15087_v51 = vsel %vm17619_vm4, %v5304_v44, %v5305_v53  ;;  %v10171_v44 = vld [vmem:[#allocation4 + $0x160] sm:$0xff]  }
 0x48c   :  { %9596 = vmatprep.subr.bf16.mxu1 %v10153_v16  ;;  %v5516_v22 = vpack.c.bf16 %v5501_v63, %v5500_v8  ;;  %vm5829_vm5 = vmand %vm15022_vm12, %vm17602_vm3  ;;  %v15051_v16 = vsel %vm17619_vm4, %v5291_v55, %v5292_v6  ;;  %v5293_v10 = vrot.slane %v14862_v40, 4  ;;  %v10181_v63 = vld [vmem:[#allocation4 + $0x1d0] sm:$0xff]  }
 0x48d   :  { %9533 = vmatpush3.bf16.msra.mxu0 %v10152_v60  ;;  %v15040_v60 = vsel %vm17619_vm4, %v5306_v62, %v5291_v55  ;;  %vm5844_vm10 = vmand %vm5828_vm14, %vm17601_vm15  ;;  %v15108_v24 = vadd.s32 4294967295, %v15079_v37  ;;  %vm5799_vm9 = vcmp.lt.s32.totalorder %v15034_v25, 2 }
 0x48e   :  { %9534 = vmatprep.subr.bf16.mxu0 %v10155_v17  ;;  %18991 = vst [vmem:[#allocation146_spill] sm:$0xff] %v15040_v60  ;;  %vm5845_vm6 = vmand %vm5829_vm5, %vm17600_vm2  ;;  %v5326_v17 = vadd.s32 4294967295, %v15027_v9  ;;  %vm17606_vm5 = vcmp.lt.s32.totalorder %v15005_v35, 2 }
 0x48f   :  { %9597 = vmatpush3.bf16.msra.mxu1 %v10154_v5  ;;  %v8734_v5 = vsel %vm5844_vm10, 1.0, %v18983_v11  ;;  %vm5676_vm14 = vmand %vm14921_vm0, %vm17608_vm13  ;;  %18996 = vst [vmem:[#allocation145_spill] sm:$0xff] %v15108_v24 }
 0x490   :  { %9598 = vmatprep.subr.bf16.mxu1 %v10157_v7  ;;  %v5892_v7 = vmul.f32 %v8734_v5, %v15040_v60  ;;  %vm5677_vm10 = vmand %vm14937_vm1, %vm17604_vm7  ;;  %vm5342_vm0 = vcmp.ge.s32.totalorder %v5326_v17, 0  ;;  %vm5358_vm2 = vcmp.lt.s32.totalorder %v5326_v17, 2  ;;  %v10172_v5 = vld [vmem:[#allocation4 + $0x120] sm:$0xff]   ;;  %v10175_v17 = vld [vmem:[#allocation4 + $0x158] sm:$0xff]  }
 0x491   :  { %9535 = vmatpush3.bf16.msra.mxu0 %v10156_v32  ;;  %v8735_v32 = vsel %vm5845_vm6, 1.0, %v18983_v11  ;;  %vm17605_vm6 = vcmp.lt.s32.totalorder %v15017_v47, 2  ;;  %vm5708_vm15 = vmand %vm5676_vm14, %vm17606_vm5  ;;  %vm17613_vm5 = vcmp.ge.s32.totalorder %v15108_v24, 0 }
 0x492   :  { %9648 = vmatprep.subr.bf16.mxu0 %v10159_v14  ;;  %v10164_v14 = vld [vmem:[#allocation4 + $0x130] sm:$0xff]   ;;  %v5893_v3 = vmul.f32 %v8735_v32, %v15051_v16  ;;  %vm5709_vm11 = vmand %vm5677_vm10, %vm17605_vm6  ;;  %v8718_v18 = vsel %vm5708_vm15, 1.0, %v18983_v11  ;;  %vm17611_vm10 = vcmp.ge.s32.totalorder %v15079_v37, 0 }
 0x493   :  { %9599 = vmatpush3.bf16.msra.mxu1 %v10158_v23  ;;  %v5327_v23 = vadd.s32 4294967295, %v15034_v25  ;;  %v8719_v48 = vsel %vm5709_vm11, 1.0, %v18983_v11  ;;  %v5756_v8 = vmul.f32 %v8718_v18, %v14991_v36  ;;  %vm15102_vm14 = vmand %vm5342_vm0, %vm5358_vm2  ;;  %vm17610_vm0 = vcmp.lt.s32.totalorder %v15079_v37, 2 }
 0x494   :  { %9712 = vmatprep.subr.bf16.mxu1 %v10161_v34  ;;  %6891 = vmatmul.mubr.bf16.vlgmr.msra.gmra.mxu0 %v5516_v22  ;;  %v18992_v34 = vld [vmem:[#allocation80_spill] sm:$0xff]  ;;  %v5908_v29 = vpack.c.bf16 %v5893_v3, %v5892_v7  ;;  %v5757_v52 = vmul.f32 %v8719_v48, %v15087_v51  ;;  %v10165_v22 = vld [vmem:[#allocation4 + $0x1f0] sm:$0xff]   ;;  %v17622_v18 = vrot.slane %v14864_v1, 4 }
 0x495   :  { %9649 = vmatpush3.bf16.msra.mxu0 %v10160_v4  ;;  %v15071_v30 = vshra.s32 %v18992_v34, 2  ;;  %vm5343_vm1 = vcmp.ge.s32.totalorder %v5327_v23, 0  ;;  %vm5359_vm3 = vcmp.lt.s32.totalorder %v5327_v23, 2  ;;  %v10162_v4 = vld [vmem:[#allocation4 + $0x1b8] sm:$0xff]   ;;  %v10166_v23 = vld [vmem:[#allocation4 + $0x1b0] sm:$0xff]  }
 0x496   :  { %9650 = vmatprep.subr.bf16.mxu0 %v10163_v58  ;;  %6987 = vmatprep.mubr.bf16.mxu1 %v5908_v29  ;;  %vm15113_vm15 = vmand %vm5343_vm1, %vm5359_vm3  ;;  %v5772_v32 = vpack.c.bf16 %v5757_v52, %v5756_v8  ;;  %v10176_v34 = vld [vmem:[#allocation4 + $0x118] sm:$0xff]   ;;  %v10169_v29 = vld [vmem:[#allocation4 + $0x1e8] sm:$0xff]  }
 0x497   :  { %vm17607_vm7 = vcmp.ge.s32.totalorder %v15071_v30, 0  ;;  %v15096_v55 = vadd.s32 4294967295, %v15071_v30  ;;  %vm17609_vm11 = vcmp.lt.s32.totalorder %v15071_v30, 2  ;;  %vm5543_vm3 = vmand %vm15113_vm15, %vm17611_vm10  ;;  %vm5783_vm10 = vcmp.ge.s32.totalorder %v15034_v25, 0  ;;  %v10173_v52 = vld [vmem:[#allocation4 + $0x1e0] sm:$0xff]  }
 0x498   :  { %vm5542_vm2 = vmand %vm15102_vm14, %vm17607_vm7  ;;  %6988 = vmatmul.mubr.bf16.vlgmr.msra.gmra.mxu1 %v5772_v32  ;;  %v15183_v32 = vadd.s32 1, %v15079_v37 }
 0x499   :  { %9651 = vmatpush3.bf16.msra.mxu0 %v10164_v14  ;;  %vm17614_vm1 = vcmp.ge.s32.totalorder %v15096_v55, 0  ;;  %vm5574_vm6 = vmand %vm5542_vm2, %vm17609_vm11  ;;  %vm17617_vm13 = vcmp.lt.s32.totalorder %v15096_v55, 2  ;;  %vm17616_vm11 = vcmp.lt.s32.totalorder %v15108_v24, 2  ;;  %9713 = vmatpush3.bf16.msra.mxu1 %v10162_v4  ;;  %v15167_v4 = vadd.s32 1, %v15071_v30 }
 0x49a   :  { %9652 = vmatprep.subr.bf16.mxu0 %v10167_v31  ;;  %vm5575_vm7 = vmand %vm5543_vm3, %vm17610_vm0  ;;  %v8704_v7 = vsel %vm5574_vm6, 1.0, %v18983_v11  ;;  %vm5798_vm3 = vcmp.lt.s32.totalorder %v15027_v9, 2  ;;  %9714 = vmatprep.subr.bf16.mxu1 %v10165_v22 }
 0x49b   :  { %v8705_v14 = vsel %vm5575_vm7, 1.0, %v18983_v11  ;;  %v5622_v3 = vmul.f32 %v8704_v7, %v14898_v27  ;;  %vm5422_vm2 = vmand %vm15102_vm14, %vm17614_vm1  ;;  %vm5782_vm7 = vcmp.ge.s32.totalorder %v15027_v9, 0  ;;  %v19003_v7 = vld [vmem:[#allocation90_spill] sm:$0xff] }
 0x49c   :  { %v5623_v31 = vmul.f32 %v8705_v14, %v14901_v42  ;;  %vm5423_vm6 = vmand %vm15113_vm15, %vm17613_vm5  ;;  %v15186_v14 = vshra.s32 %v19003_v7, 2  ;;  %v19008_v7 = vld [vmem:[#allocation87_spill] sm:$0xff] }
 0x49d   :  { %9653 = vmatpush3.bf16.msra.mxu0 %v10168_v38  ;;  %v15156_v38 = vsel %vm17619_vm4, %v5305_v53, %v5306_v62  ;;  %vm5454_vm0 = vmand %vm5422_vm2, %vm17617_vm13  ;;  %v18999_v62 = vld [vmem:[#allocation88_spill] sm:$0xff]  ;;  %9715 = vmatpush3.bf16.msra.mxu1 %v10166_v23 }
 0x49e   :  { %9654 = vmatprep.subr.bf16.mxu0 %v10171_v44  ;;  %v10170_v44 = vld [vmem:[#allocation4 + $0x1a8] sm:$0xff]   ;;  %v5637_v48 = vpack.c.bf16 %v5623_v31, %v5622_v3  ;;  %vm5455_vm5 = vmand %vm5423_vm6, %vm17616_vm11  ;;  %v8688_v8 = vsel %vm5454_vm0, 1.0, %v18983_v11  ;;  %v15170_v53 = vshra.s32 %v18999_v62, 2  ;;  %19004 = vst [vmem:[#allocation85_spill] sm:$0xff] %v15186_v14  ;;  %v10179_v3 = vld [vmem:[#allocation4 + $0x150] sm:$0xff]   ;;  %9716 = vmatprep.subr.bf16.mxu1 %v10169_v29  ;;  %vm17618_vm6 = vcmp.ge.s32.totalorder %v15167_v4, 0 }
 0x49f   :  { %v8689_v22 = vsel %vm5455_vm5, 1.0, %v18983_v11  ;;  %vm15178_vm2 = vmand %vm5782_vm7, %vm5798_vm3  ;;  %v10180_v62 = vld [vmem:[#allocation4 + $0x110] sm:$0xff]   ;;  %vm17631_vm3 = vcmp.ge.s32.totalorder %v15183_v32, 0 }
 0x4a0   :  { %19000 = vst [vmem:[#allocation155_spill] sm:$0xff] %v15170_v53  ;;  %6898 = vmatprep.mubr.bf16.mxu0 %v5637_v48  ;;  %v5503_v31 = vmul.f32 %v8689_v22, %v15156_v38  ;;  %vm15193_vm5 = vmand %vm5783_vm10, %vm5799_vm9  ;;  %vm19007_vm9 = vcmp.ge.s32.totalorder %v15108_v24, 0  ;;  %v5328_v29 = vadd.s32 4294967295, %v15170_v53  ;;  %v10174_v48 = vld [vmem:[#allocation4 + $0x1a0] sm:$0xff]   ;;  %v15217_v22 = vsel %vm17619_vm4, %v5293_v10, %v17622_v18 }
 0x4a1   :  { %9655 = vmatpush3.bf16.msra.mxu0 %v10172_v5  ;;  %v5502_v5 = vmul.f32 %v8688_v8, %v15087_v51  ;;  %v19005_v8 = vmov 0  ;;  %vm5830_vm0 = vmand %vm15178_vm2, %vm17614_vm1  ;;  %9717 = vmatpush3.bf16.msra.mxu1 %v10170_v44  ;;  %vm17627_vm1 = vcmp.lt.s32.totalorder %v15167_v4, 2  ;;  %v19010_v44 = vld [vmem:[#allocation89_spill] sm:$0xff]  ;;  %v19107_v24 = vmov 0 }
 0x4a2   :  { %9656 = vmatprep.subr.bf16.mxu0 %v10175_v17  ;;  %v19001_v17 = vmov 0  ;;  %v19006_v8 = vsel %vm15193_vm5, 4294967295, %v19005_v8  ;;  %vm5831_vm10 = vmand %vm15193_vm5, %vm19007_vm9  ;;  %9718 = vmatprep.subr.bf16.mxu1 %v10173_v52  ;;  %v10183_v52 = vld [vmem:[#allocation4 + $0x148] sm:$0xff]  }
 0x4a3   :  { %v19002_v17 = vsel %vm15178_vm2, 4294967295, %v19001_v17  ;;  %v5517_v23 = vpack.c.bf16 %v5503_v31, %v5502_v5  ;;  %vm5846_vm7 = vmand %vm5830_vm0, %vm17617_vm13 }
 0x4a4   :  { %vm5847_vm9 = vmand %vm5831_vm10, %vm17616_vm11  ;;  %v8736_v5 = vsel %vm5846_vm7, 1.0, %v18983_v11  ;;  %vm17625_vm10 = vcmp.lt.s32.totalorder %v15183_v32, 2  ;;  %vm5360_vm11 = vcmp.lt.s32.totalorder %v5328_v29, 2 }
 0x4a5   :  { %9657 = vmatpush3.bf16.msra.mxu0 %v10176_v34  ;;  %v15205_v34 = vsel %vm17619_vm4, %v5292_v6, %v5293_v10  ;;  %v5329_v6 = vadd.s32 4294967295, %v15186_v14  ;;  %v15228_v10 = vshra.s32 %v19008_v7, 2  ;;  %v8737_v31 = vsel %vm5847_vm9, 1.0, %v18983_v11  ;;  %vm5678_vm0 = vmand %vm15102_vm14, %vm17618_vm6  ;;  %9719 = vmatpush3.bf16.msra.mxu1 %v10174_v48 }
 0x4a6   :  { %9658 = vmatprep.subr.bf16.mxu0 %v10179_v3  ;;  %6899 = vmatmul.mubr.bf16.gmra.mxu0 %v5517_v23  ;;  %v10177_v3 = vld [vmem:[#allocation4 + $0x1d8] sm:$0xff]   ;;  %v5894_v26 = vmul.f32 %v8736_v5, %v15205_v34  ;;  %v5895_v7 = vmul.f32 %v8737_v31, %v15217_v22  ;;  %vm5679_vm7 = vmand %vm15113_vm15, %vm17631_vm3  ;;  %vm5344_vm9 = vcmp.ge.s32.totalorder %v5328_v29, 0  ;;  %v10185_v29 = vld [vmem:[#allocation4 + $0x1c8] sm:$0xff]   ;;  %vm5801_vm3 = vcmp.lt.s32.totalorder %v15186_v14, 2 }
 0x4a7   :  { %19009 = vst [vmem:[#allocation156_spill] sm:$0xff] %v15228_v10  ;;  %v10178_v23 = vld [vmem:[#allocation4 + $0x198] sm:$0xff]   ;;  %vm5710_vm13 = vmand %vm5678_vm0, %vm17627_vm1  ;;  %vm5345_vm14 = vcmp.ge.s32.totalorder %v5329_v6, 0  ;;  %vm5361_vm6 = vcmp.lt.s32.totalorder %v5329_v6, 2  ;;  %vm17626_vm5 = vcmp.ge.s32.totalorder %v15228_v10, 0  ;;  %v15252_v58 = vadd.s32 4294967295, %v15228_v10  ;;  %9720 = vmatprep.subr.bf16.mxu1 %v10177_v3 }
 0x4a8   :  { %v5909_v5 = vpack.c.bf16 %v5895_v7, %v5894_v26  ;;  %vm5711_vm4 = vmand %vm5679_vm7, %vm17625_vm10  ;;  %v8720_v31 = vsel %vm5710_vm13, 1.0, %v18983_v11  ;;  %v10182_v7 = vld [vmem:[#allocation4 + $0x190] sm:$0xff]   ;;  %v10186_v6 = vld [vmem:[#allocation4 + $0x188] sm:$0xff]  }
 0x4a9   :  { %9659 = vmatpush3.bf16.msra.mxu0 %v10180_v62  ;;  %v15238_v62 = vshra.s32 %v19010_v44, 2  ;;  %19012 = vst [vmem:[#allocation78_spill] sm:$0xff] %v15252_v58  ;;  %v10184_v44 = vld [vmem:[#allocation4 + $0x108] sm:$0xff]   ;;  %v8721_v18 = vsel %vm5711_vm4, 1.0, %v18983_v11  ;;  %v5758_v42 = vmul.f32 %v8720_v31, %v15156_v38  ;;  %vm15258_vm15 = vmand %vm5344_vm9, %vm5360_vm11  ;;  %vm17628_vm11 = vcmp.lt.s32.totalorder %v15228_v10, 2  ;;  %9721 = vmatpush3.bf16.msra.mxu1 %v10178_v23 }
 0x4aa   :  { %9660 = vmatprep.subr.bf16.mxu0 %v10183_v52  ;;  %6995 = vmatprep.mubr.bf16.mxu1 %v5909_v5  ;;  %v5759_v3 = vmul.f32 %v8721_v18, %v15040_v60  ;;  %vm15269_vm4 = vmand %vm5345_vm14, %vm5361_vm6  ;;  %v10187_v5 = vld [vmem:[#allocation4 + $0x140] sm:$0xff]   ;;  %vm17641_vm9 = vcmp.ge.s32.totalorder %v15252_v58, 0  ;;  %vm17649_vm1 = vcmp.lt.s32.totalorder %v15252_v58, 2 }
 0x4ab   :  { %19011 = vst [vmem:[#allocation86_spill] sm:$0xff] %v15238_v62  ;;  %vm17630_vm13 = vcmp.ge.s32.totalorder %v15238_v62, 0  ;;  %v15264_v48 = vadd.s32 4294967295, %v15238_v62  ;;  %vm5544_vm0 = vmand %vm15258_vm15, %vm17626_vm5  ;;  %vm17629_vm7 = vcmp.lt.s32.totalorder %v15238_v62, 2  ;;  %9722 = vmatprep.subr.bf16.mxu1 %v10181_v63  ;;  %v10188_v63 = vld [vmem:[#allocation4 + $0x100] sm:$0xff]  }
 0x4ac   :  { %v5773_v18 = vpack.c.bf16 %v5759_v3, %v5758_v42  ;;  %vm5545_vm6 = vmand %vm15269_vm4, %vm17630_vm13  ;;  %v10189_v3 = vld [vmem:[#allocation4 + $0x1c0] sm:$0xff]   ;;  %vm5785_vm13 = vcmp.ge.s32.totalorder %v15186_v14, 0 }
 0x4ad   :  { %19015 = vst [vmem:[#allocation95_spill] sm:$0xff] %v15264_v48  ;;  %9661 = vmatpush3.bf16.msra.mxu0 %v10184_v44  ;;  %vm5576_vm14 = vmand %vm5544_vm0, %vm17628_vm11  ;;  %vm17632_vm10 = vcmp.ge.s32.totalorder %v15264_v48, 0  ;;  %vm17648_vm11 = vcmp.lt.s32.totalorder %v15264_v48, 2  ;;  %9723 = vmatpush3.bf16.msra.mxu1 %v10182_v7 }
 0x4ae   :  { %9662 = vmatprep.subr.bf16.mxu0 %v10187_v5  ;;  %6996 = vmatmul.mubr.bf16.gmra.mxu1 %v5773_v18  ;;  %vm5577_vm5 = vmand %vm5545_vm6, %vm17629_vm7  ;;  %v8706_v42 = vsel %vm5576_vm14, 1.0, %v18983_v11  ;;  %vm5800_vm14 = vcmp.lt.s32.totalorder %v15170_v53, 2  ;;  %v5295_v5 = vrot.slane %v14866_v56, 4 }
 0x4af   :  { %v8707_v23 = vsel %vm5577_vm5, 1.0, %v18983_v11  ;;  %v5624_v31 = vmul.f32 %v8706_v42, %v14839_v28  ;;  %vm5424_vm0 = vmand %vm15258_vm15, %vm17641_vm9  ;;  %vm5784_vm5 = vcmp.ge.s32.totalorder %v15170_v53, 0  ;;  %9724 = vmatprep.subr.bf16.mxu1 %v10185_v29  ;;  %v15315_v29 = vadd.s32 1, %v15228_v10 }
 0x4b0   :  { %v5625_v44 = vmul.f32 %v8707_v23, %v14853_v19  ;;  %vm5425_vm6 = vmand %vm15269_vm4, %vm17632_vm10  ;;  %v19019_v23 = vld [vmem:[#allocation98_spill] sm:$0xff] }
 0x4b1   :  { %vm5456_vm7 = vmand %vm5424_vm0, %vm17649_vm1  ;;  %9663 = vmatpush3.bf16.msra.mxu0 %v10188_v63  ;;  %19018 = vst [vmem:[#allocation93_spill] sm:$0xff] %v15315_v29  ;;  %v15318_v27 = vshra.s32 %v19019_v23, 2  ;;  %v15331_v63 = vadd.s32 1, %v15238_v62  ;;  %9725 = vmatpush3.bf16.msra.mxu1 %v10186_v6  ;;  %v10190_v23 = vld [vmem:[#allocation4 + $0x180] sm:$0xff]   ;;  %v19030_v6 = vrot.slane %v14864_v1, 4 }
 0x4b2   :  { %v5638_v18 = vpack.c.bf16 %v5625_v44, %v5624_v31  ;;  %vm5457_vm10 = vmand %vm5425_vm6, %vm17648_vm11  ;;  %v8690_v42 = vsel %vm5456_vm7, 1.0, %v18983_v11  ;;  %v19021_v31 = vmov 0  ;;  %v19025_v44 = vld [vmem:[#allocation100_spill] sm:$0xff]  ;;  %9726 = vmatprep.subr.bf16.mxu1 %v10189_v3  ;;  %vm19031_vm6 = vcmp.lt.s32.totalorder %v18941_v2, 4 }
 0x4b3   :  { %19020 = vst [vmem:[#allocation91_spill] sm:$0xff] %v15318_v27  ;;  %v8691_v13 = vsel %vm5457_vm10, 1.0, %v18983_v11  ;;  %v5504_v7 = vmul.f32 %v8690_v42, %v15040_v60  ;;  %vm15326_vm0 = vmand %vm5784_vm5, %vm5800_vm14  ;;  %v15334_v12 = vshra.s32 %v19025_v44, 2  ;;  %v19027_v42 = vmov 0  ;;  %v19036_v60 = vld [vmem:[#allocation96_spill] sm:$0xff] }
 0x4b4   :  { %v19022_v31 = vsel %vm15326_vm0, 4294967295, %v19021_v31  ;;  %19024 = vst [vmem:[#allocation99_spill] sm:$0xff] %v15331_v63  ;;  %6906 = vmatprep.mubr.bf16.mxu0 %v5638_v18  ;;  %v5505_v10 = vmul.f32 %v8691_v13, %v15051_v16  ;;  %vm15341_vm10 = vmand %vm5785_vm13, %vm5801_vm3  ;;  %v15353_v13 = vsel %vm19031_vm6, %v19030_v6, %v5295_v5  ;;  %vm19033_vm5 = vcmp.ge.s32.totalorder %v15264_v48, 0 }
 0x4b5   :  { %19023 = vst [vmem:[#allocation94_spill] sm:$0xff] %v19022_v31  ;;  %19026 = vst [vmem:[#allocation135_spill] sm:$0xff] %v15334_v12  ;;  %v19028_v42 = vsel %vm15341_vm10, 4294967295, %v19027_v42  ;;  %v5330_v3 = vadd.s32 4294967295, %v15318_v27  ;;  %v19034_v18 = vrot.slane %v14876_v45, 4  ;;  %9727 = vmatpush3.bf16.msra.mxu1 %v10190_v23  ;;  %vm17655_vm13 = vcmp.lt.s32.totalorder %v15315_v29, 2 }
 0x4b6   :  { %19029 = vst [vmem:[#allocation138_spill] sm:$0xff] %v19028_v42  ;;  %vm5832_vm7 = vmand %vm15326_vm0, %vm17641_vm9  ;;  %v5518_v44 = vpack.c.bf16 %v5505_v10, %v5504_v7  ;;  %v5331_v7 = vadd.s32 4294967295, %v15334_v12  ;;  %v15376_v62 = vshra.s32 %v19036_v60, 2  ;;  %9941 = vmatprep.subr.bf16.mxu1 %v18983_v11  ;;  %v19039_v23 = vld [vmem:[#allocation97_spill] sm:$0xff]  ;;  %v19050_v42 = vmov 0 }
 0x4b7   :  { %19032 = vst [vmem:[#allocation104_spill] sm:$0xff] %v15353_v13  ;;  %vm5833_vm3 = vmand %vm15341_vm10, %vm19033_vm5  ;;  %v19079_v31 = vmov 0 }
 0x4b8   :  { %vm19035_vm14 = vmmov %vm19031_vm6  ;;  %vm17660_vm6 = vcmp.ge.s32.totalorder %v15331_v63, 0  ;;  %6907 = vmatmul.mubr.bf16.gmra.mxu0 %v5518_v44  ;;  %19037 = vst [vmem:[#allocation120_spill] sm:$0xff] %v15376_v62  ;;  %v15387_v44 = vshra.s32 %v19039_v23, 2  ;;  %vm5347_vm10 = vcmp.ge.s32.totalorder %v5331_v7, 0  ;;  %vm5363_vm0 = vcmp.lt.s32.totalorder %v5331_v7, 2 }
 0x4b9   :  { %v15365_v10 = vsel %vm19035_vm14, %v5295_v5, %v19034_v18  ;;  %vm5848_vm9 = vmand %vm5832_vm7, %vm17649_vm1  ;;  %vm19038_vm7 = vcmp.ge.s32.totalorder %v15315_v29, 0  ;;  %v15460_v58 = vadd.s32 1, %v15376_v62  ;;  %v19089_v29 = vrot.slane %v14880_v50, 4 }
 0x4ba   :  { %vm5849_vm5 = vmand %vm5833_vm3, %vm17648_vm11  ;;  %v8738_v6 = vsel %vm5848_vm9, 1.0, %v18983_v11  ;;  %vm17654_vm3 = vcmp.lt.s32.totalorder %v15331_v63, 2  ;;  %19040 = vst [vmem:[#allocation169_spill] sm:$0xff] %v15387_v44  ;;  %vm5362_vm11 = vcmp.lt.s32.totalorder %v5330_v3, 2  ;;  %v19060_v63 = vrot.slane %v14876_v45, 4 }
 0x4bb   :  { %v8739_v5 = vsel %vm5849_vm5, 1.0, %v18983_v11  ;;  %v5896_v18 = vmul.f32 %v8738_v6, %v15353_v13  ;;  %vm5680_vm14 = vmand %vm15258_vm15, %vm19038_vm7  ;;  %vm5346_vm5 = vcmp.ge.s32.totalorder %v5330_v3, 0  ;;  %vm17656_vm7 = vcmp.ge.s32.totalorder %v15376_v62, 0  ;;  %19047 = vst [vmem:[#allocation133_spill] sm:$0xff] %v15460_v58 }
 0x4bc   :  { %v5897_v48 = vmul.f32 %v8739_v5, %v15365_v10  ;;  %vm5681_vm9 = vmand %vm15269_vm4, %vm17660_vm6  ;;  %v15401_v6 = vadd.s32 4294967295, %v15376_v62  ;;  %vm5803_vm6 = vcmp.lt.s32.totalorder %v15334_v12, 2 }
 0x4bd   :  { %vm5712_vm1 = vmand %vm5680_vm14, %vm17655_vm13  ;;  %vm17657_vm14 = vcmp.ge.s32.totalorder %v15387_v44, 0 }
 0x4be   :  { %v5910_v60 = vpack.c.bf16 %v5897_v48, %v5896_v18  ;;  %vm5713_vm15 = vmand %vm5681_vm9, %vm17654_vm3  ;;  %v8722_v26 = vsel %vm5712_vm1, 1.0, %v18983_v11  ;;  %19041 = vst [vmem:[#allocation123_spill] sm:$0xff] %v15401_v6  ;;  %v15411_v48 = vadd.s32 4294967295, %v15387_v44  ;;  %vm17659_vm9 = vcmp.lt.s32.totalorder %v15376_v62, 2 }
 0x4bf   :  { %v8723_v52 = vsel %vm5713_vm15, 1.0, %v18983_v11  ;;  %v5760_v3 = vmul.f32 %v8722_v26, %v15051_v16  ;;  %vm15405_vm4 = vmand %vm5346_vm5, %vm5362_vm11  ;;  %vm17658_vm5 = vcmp.lt.s32.totalorder %v15387_v44, 2 }
 0x4c0   :  { %19044 = vst [vmem:[#allocation170_spill] sm:$0xff] %v15411_v48  ;;  %7003 = vmatprep.mubr.bf16.mxu1 %v5910_v60  ;;  %v5761_v7 = vmul.f32 %v8723_v52, %v15205_v34  ;;  %vm15414_vm1 = vmand %vm5347_vm10, %vm5363_vm0  ;;  %vm17661_vm0 = vcmp.ge.s32.totalorder %v15401_v6, 0  ;;  %vm17676_vm3 = vcmp.ge.s32.totalorder %v15411_v48, 0 }
 0x4c1   :  { %vm5546_vm11 = vmand %vm15405_vm4, %vm17656_vm7  ;;  %vm17679_vm7 = vcmp.lt.s32.totalorder %v15401_v6, 2 }
 0x4c2   :  { %v5774_v23 = vpack.c.bf16 %v5761_v7, %v5760_v3  ;;  %vm5547_vm15 = vmand %vm15414_vm1, %vm17657_vm14  ;;  %v5297_v7 = vrot.slane %v14878_v20, 4 }
 0x4c3   :  { %vm5578_vm10 = vmand %vm5546_vm11, %vm17659_vm9  ;;  %vm17684_vm11 = vcmp.lt.s32.totalorder %v15411_v48, 2  ;;  %vm5787_vm9 = vcmp.ge.s32.totalorder %v15334_v12, 0 }
 0x4c4   :  { %7004 = vmatmul.mubr.bf16.gmra.mxu1 %v5774_v23  ;;  %vm5579_vm13 = vmand %vm5547_vm15, %vm17658_vm5  ;;  %v8708_v60 = vsel %vm5578_vm10, 1.0, %v18983_v11  ;;  %vm5786_vm10 = vcmp.ge.s32.totalorder %v15318_v27, 0 }
 0x4c5   :  { %v8709_v26 = vsel %vm5579_vm13, 1.0, %v18983_v11  ;;  %v5626_v52 = vmul.f32 %v8708_v60, %v14862_v40  ;;  %vm5426_vm14 = vmand %vm15405_vm4, %vm17661_vm0  ;;  %vm5802_vm13 = vcmp.lt.s32.totalorder %v15318_v27, 2  ;;  %v19048_v27 = vld [vmem:[#allocation110_spill] sm:$0xff] }
 0x4c6   :  { %v5627_v3 = vmul.f32 %v8709_v26, %v14864_v1  ;;  %vm5427_vm15 = vmand %vm15414_vm1, %vm17676_vm3  ;;  %v15463_v14 = vshra.s32 %v19048_v27, 2  ;;  %v19056_v27 = vmov 0 }
 0x4c7   :  { %vm5458_vm5 = vmand %vm5426_vm14, %vm17679_vm7 }
 0x4c8   :  { %v5639_v60 = vpack.c.bf16 %v5627_v3, %v5626_v52  ;;  %vm5459_vm0 = vmand %vm5427_vm15, %vm17684_vm11  ;;  %v8692_v26 = vsel %vm5458_vm5, 1.0, %v18983_v11  ;;  %19049 = vst [vmem:[#allocation137_spill] sm:$0xff] %v15463_v14  ;;  %v15472_v52 = vadd.s32 1, %v15387_v44  ;;  %v19054_v3 = vld [vmem:[#allocation113_spill] sm:$0xff] }
 0x4c9   :  { %v8693_v53 = vsel %vm5459_vm0, 1.0, %v18983_v11  ;;  %v5506_v23 = vmul.f32 %v8692_v26, %v15205_v34  ;;  %vm15467_vm14 = vmand %vm5786_vm10, %vm5802_vm13  ;;  %v15475_v12 = vshra.s32 %v19054_v3, 2  ;;  %vm19059_vm0 = vcmp.ge.s32.totalorder %v15401_v6, 0  ;;  %v19065_v3 = vld [vmem:[#allocation109_spill] sm:$0xff] }
 0x4ca   :  { %v19051_v42 = vsel %vm15467_vm14, 4294967295, %v19050_v42  ;;  %19053 = vst [vmem:[#allocation165_spill] sm:$0xff] %v15472_v52  ;;  %6914 = vmatprep.mubr.bf16.mxu0 %v5639_v60  ;;  %v5507_v62 = vmul.f32 %v8693_v53, %v15217_v22  ;;  %vm15478_vm5 = vmand %vm5787_vm9, %vm5803_vm6  ;;  %vm19061_vm10 = vcmp.lt.s32.totalorder %v18941_v2, 4  ;;  %v5332_v53 = vadd.s32 4294967295, %v15463_v14 }
 0x4cb   :  { %19052 = vst [vmem:[#allocation148_spill] sm:$0xff] %v19051_v42  ;;  %19055 = vst [vmem:[#allocation161_spill] sm:$0xff] %v15475_v12  ;;  %v19057_v27 = vsel %vm15478_vm5, 4294967295, %v19056_v27  ;;  %v15490_v44 = vsel %vm19061_vm10, %v19060_v63, %v5297_v7  ;;  %v19063_v60 = vrot.slane %v14880_v50, 4  ;;  %v5333_v63 = vadd.s32 4294967295, %v15475_v12 }
 0x4cc   :  { %19058 = vst [vmem:[#allocation166_spill] sm:$0xff] %v19057_v27  ;;  %vm5834_vm15 = vmand %vm15467_vm14, %vm19059_vm0  ;;  %v5519_v26 = vpack.c.bf16 %v5507_v62, %v5506_v23  ;;  %vm17690_vm9 = vcmp.lt.s32.totalorder %v15460_v58, 2  ;;  %v15513_v27 = vshra.s32 %v19065_v3, 2 }
 0x4cd   :  { %19062 = vst [vmem:[#allocation162_spill] sm:$0xff] %v15490_v44  ;;  %vm5835_vm6 = vmand %vm15478_vm5, %vm17676_vm3  ;;  %vm5349_vm5 = vcmp.ge.s32.totalorder %v5333_v63, 0  ;;  %vm5365_vm14 = vcmp.lt.s32.totalorder %v5333_v63, 2 }
 0x4ce   :  { %vm19064_vm13 = vmmov %vm19061_vm10  ;;  %vm17695_vm10 = vcmp.ge.s32.totalorder %v15472_v52, 0  ;;  %6915 = vmatmul.mubr.bf16.gmra.mxu0 %v5519_v26  ;;  %19066 = vst [vmem:[#allocation164_spill] sm:$0xff] %v15513_v27  ;;  %v19068_v26 = vld [vmem:[#allocation111_spill] sm:$0xff]  ;;  %v15537_v3 = vadd.s32 4294967295, %v15513_v27 }
 0x4cf   :  { %v15502_v62 = vsel %vm19064_vm13, %v5297_v7, %v19063_v60  ;;  %vm5850_vm0 = vmand %vm5834_vm15, %vm17679_vm7  ;;  %vm19067_vm15 = vcmp.ge.s32.totalorder %v15460_v58, 0  ;;  %vm17689_vm7 = vcmp.lt.s32.totalorder %v15472_v52, 2  ;;  %v15523_v48 = vshra.s32 %v19068_v26, 2 }
 0x4d0   :  { %vm5851_vm3 = vmand %vm5835_vm6, %vm17684_vm11  ;;  %v8740_v23 = vsel %vm5850_vm0, 1.0, %v18983_v11  ;;  %vm5364_vm0 = vcmp.lt.s32.totalorder %v5332_v53, 2  ;;  %19070 = vst [vmem:[#allocation124_spill] sm:$0xff] %v15537_v3  ;;  %v15596_v52 = vadd.s32 1, %v15513_v27 }
 0x4d1   :  { %v8741_v7 = vsel %vm5851_vm3, 1.0, %v18983_v11  ;;  %v5898_v60 = vmul.f32 %v8740_v23, %v15490_v44  ;;  %vm5682_vm13 = vmand %vm15405_vm4, %vm19067_vm15  ;;  %19069 = vst [vmem:[#allocation92_spill] sm:$0xff] %v15523_v48  ;;  %vm5348_vm3 = vcmp.ge.s32.totalorder %v5332_v53, 0  ;;  %vm17691_vm15 = vcmp.ge.s32.totalorder %v15513_v27, 0 }
 0x4d2   :  { %v5899_v6 = vmul.f32 %v8741_v7, %v15502_v62  ;;  %vm5683_vm6 = vmand %vm15414_vm1, %vm17695_vm10  ;;  %vm5805_vm10 = vcmp.lt.s32.totalorder %v15475_v12, 2  ;;  %19076 = vst [vmem:[#allocation179_spill] sm:$0xff] %v15596_v52 }
 0x4d3   :  { %vm5714_vm11 = vmand %vm5682_vm13, %vm17690_vm9  ;;  %vm17692_vm13 = vcmp.ge.s32.totalorder %v15523_v48, 0 }
 0x4d4   :  { %v5911_v5 = vpack.c.bf16 %v5899_v6, %v5898_v60  ;;  %vm5715_vm4 = vmand %vm5683_vm6, %vm17689_vm7  ;;  %v8724_v23 = vsel %vm5714_vm11, 1.0, %v18983_v11  ;;  %v15547_v6 = vadd.s32 4294967295, %v15523_v48  ;;  %vm17694_vm6 = vcmp.lt.s32.totalorder %v15513_v27, 2 }
 0x4d5   :  { %v8725_v18 = vsel %vm5715_vm4, 1.0, %v18983_v11  ;;  %v5762_v53 = vmul.f32 %v8724_v23, %v15217_v22  ;;  %vm15541_vm1 = vmand %vm5348_vm3, %vm5364_vm0  ;;  %vm17693_vm0 = vcmp.lt.s32.totalorder %v15523_v48, 2 }
 0x4d6   :  { %19073 = vst [vmem:[#allocation122_spill] sm:$0xff] %v15547_v6  ;;  %7011 = vmatprep.mubr.bf16.mxu1 %v5911_v5  ;;  %v5763_v63 = vmul.f32 %v8725_v18, %v15353_v13  ;;  %vm15550_vm11 = vmand %vm5349_vm5, %vm5365_vm14  ;;  %vm17696_vm14 = vcmp.ge.s32.totalorder %v15537_v3, 0  ;;  %vm17713_vm7 = vcmp.ge.s32.totalorder %v15547_v6, 0 }
 0x4d7   :  { %vm5548_vm3 = vmand %vm15541_vm1, %vm17691_vm15  ;;  %vm17716_vm15 = vcmp.lt.s32.totalorder %v15537_v3, 2 }
 0x4d8   :  { %v5775_v26 = vpack.c.bf16 %v5763_v63, %v5762_v53  ;;  %vm5549_vm4 = vmand %vm15550_vm11, %vm17692_vm13  ;;  %v5299_v63 = vrot.slane %v14882_v41, 4 }
 0x4d9   :  { %vm5580_vm5 = vmand %vm5548_vm3, %vm17694_vm6  ;;  %vm17721_vm3 = vcmp.lt.s32.totalorder %v15547_v6, 2  ;;  %vm5789_vm6 = vcmp.ge.s32.totalorder %v15475_v12, 0 }
 0x4da   :  { %7012 = vmatmul.mubr.bf16.gmra.mxu1 %v5775_v26  ;;  %vm5581_vm9 = vmand %vm5549_vm4, %vm17693_vm0  ;;  %v8710_v5 = vsel %vm5580_vm5, 1.0, %v18983_v11  ;;  %vm5788_vm5 = vcmp.ge.s32.totalorder %v15463_v14, 0 }
 0x4db   :  { %v8711_v23 = vsel %vm5581_vm9, 1.0, %v18983_v11  ;;  %v5628_v18 = vmul.f32 %v8710_v5, %v14866_v56  ;;  %vm5428_vm13 = vmand %vm15541_vm1, %vm17696_vm14  ;;  %vm5804_vm9 = vcmp.lt.s32.totalorder %v15463_v14, 2  ;;  %v19077_v14 = vld [vmem:[#allocation126_spill] sm:$0xff] }
 0x4dc   :  { %v5629_v53 = vmul.f32 %v8711_v23, %v14876_v45  ;;  %vm5429_vm4 = vmand %vm15550_vm11, %vm17713_vm7  ;;  %v15599_v42 = vshra.s32 %v19077_v14, 2  ;;  %v19085_v14 = vmov 0 }
 0x4dd   :  { %vm5460_vm0 = vmand %vm5428_vm13, %vm17716_vm15 }
 0x4de   :  { %v5640_v5 = vpack.c.bf16 %v5629_v53, %v5628_v18  ;;  %vm5461_vm14 = vmand %vm5429_vm4, %vm17721_vm3  ;;  %v8694_v23 = vsel %vm5460_vm0, 1.0, %v18983_v11  ;;  %19078 = vst [vmem:[#allocation154_spill] sm:$0xff] %v15599_v42  ;;  %v15608_v18 = vadd.s32 1, %v15523_v48  ;;  %v19083_v53 = vld [vmem:[#allocation129_spill] sm:$0xff] }
 0x4df   :  { %v8695_v58 = vsel %vm5461_vm14, 1.0, %v18983_v11  ;;  %v5508_v26 = vmul.f32 %v8694_v23, %v15353_v13  ;;  %vm15603_vm13 = vmand %vm5788_vm5, %vm5804_vm9  ;;  %v15611_v12 = vshra.s32 %v19083_v53, 2  ;;  %vm19088_vm14 = vcmp.ge.s32.totalorder %v15537_v3, 0  ;;  %v19093_v53 = vld [vmem:[#allocation125_spill] sm:$0xff] }
 0x4e0   :  { %v19080_v31 = vsel %vm15603_vm13, 4294967295, %v19079_v31  ;;  %19082 = vst [vmem:[#allocation158_spill] sm:$0xff] %v15608_v18  ;;  %6922 = vmatprep.mubr.bf16.mxu0 %v5640_v5  ;;  %v5509_v27 = vmul.f32 %v8695_v58, %v15365_v10  ;;  %vm15614_vm0 = vmand %vm5789_vm6, %vm5805_vm10  ;;  %vm19090_vm5 = vcmp.lt.s32.totalorder %v18941_v2, 4  ;;  %v5334_v58 = vadd.s32 4294967295, %v15599_v42 }
 0x4e1   :  { %19081 = vst [vmem:[#allocation157_spill] sm:$0xff] %v19080_v31  ;;  %19084 = vst [vmem:[#allocation173_spill] sm:$0xff] %v15611_v12  ;;  %v19086_v14 = vsel %vm15614_vm0, 4294967295, %v19085_v14  ;;  %v15626_v48 = vsel %vm19090_vm5, %v19089_v29, %v5299_v63  ;;  %v19091_v5 = vrot.slane %v14895_v59, 4  ;;  %v5335_v29 = vadd.s32 4294967295, %v15611_v12 }
 0x4e2   :  { %19087 = vst [vmem:[#allocation175_spill] sm:$0xff] %v19086_v14  ;;  %vm5836_vm4 = vmand %vm15603_vm13, %vm19088_vm14  ;;  %v5520_v23 = vpack.c.bf16 %v5509_v27, %v5508_v26  ;;  %vm17727_vm6 = vcmp.lt.s32.totalorder %v15596_v52, 2  ;;  %v15649_v14 = vshra.s32 %v19093_v53, 2 }
 0x4e3   :  { %vm5837_vm10 = vmand %vm15614_vm0, %vm17713_vm7  ;;  %vm5351_vm0 = vcmp.ge.s32.totalorder %v5335_v29, 0  ;;  %vm5367_vm13 = vcmp.lt.s32.totalorder %v5335_v29, 2 }
 0x4e4   :  { %vm19092_vm9 = vmmov %vm19090_vm5  ;;  %vm17732_vm5 = vcmp.ge.s32.totalorder %v15608_v18, 0  ;;  %6923 = vmatmul.mubr.bf16.gmra.mxu0 %v5520_v23  ;;  %19094 = vst [vmem:[#allocation176_spill] sm:$0xff] %v15649_v14  ;;  %v19096_v23 = vld [vmem:[#allocation127_spill] sm:$0xff]  ;;  %v15673_v53 = vadd.s32 4294967295, %v15649_v14 }
 0x4e5   :  { %v15638_v27 = vsel %vm19092_vm9, %v5299_v63, %v19091_v5  ;;  %vm5852_vm14 = vmand %vm5836_vm4, %vm17716_vm15  ;;  %vm19095_vm4 = vcmp.ge.s32.totalorder %v15596_v52, 0  ;;  %vm17726_vm15 = vcmp.lt.s32.totalorder %v15608_v18, 2  ;;  %v15659_v6 = vshra.s32 %v19096_v23, 2  ;;  %v19105_v18 = vld [vmem:[#allocation142_spill] sm:$0xff] }
 0x4e6   :  { %vm5853_vm7 = vmand %vm5837_vm10, %vm17721_vm3  ;;  %v8742_v26 = vsel %vm5852_vm14, 1.0, %v18983_v11  ;;  %vm5366_vm14 = vcmp.lt.s32.totalorder %v5334_v58, 2  ;;  %19098 = vst [vmem:[#allocation160_spill] sm:$0xff] %v15673_v53 }
 0x4e7   :  { %v8743_v63 = vsel %vm5853_vm7, 1.0, %v18983_v11  ;;  %v5900_v5 = vmul.f32 %v8742_v26, %v15626_v48  ;;  %vm5684_vm9 = vmand %vm15541_vm1, %vm19095_vm4  ;;  %19097 = vst [vmem:[#allocation177_spill] sm:$0xff] %v15659_v6  ;;  %vm5350_vm7 = vcmp.ge.s32.totalorder %v5334_v58, 0  ;;  %vm17728_vm4 = vcmp.ge.s32.totalorder %v15649_v14, 0 }
 0x4e8   :  { %v5901_v3 = vmul.f32 %v8743_v63, %v15638_v27  ;;  %vm5685_vm10 = vmand %vm15550_vm11, %vm17732_vm5  ;;  %vm5807_vm5 = vcmp.lt.s32.totalorder %v15611_v12, 2 }
 0x4e9   :  { %vm5716_vm3 = vmand %vm5684_vm9, %vm17727_vm6  ;;  %vm17729_vm9 = vcmp.ge.s32.totalorder %v15659_v6, 0 }
 0x4ea   :  { %v5912_v7 = vpack.c.bf16 %v5901_v3, %v5900_v5  ;;  %vm5717_vm1 = vmand %vm5685_vm10, %vm17726_vm15  ;;  %v8726_v26 = vsel %vm5716_vm3, 1.0, %v18983_v11  ;;  %v15683_v3 = vadd.s32 4294967295, %v15659_v6  ;;  %vm17731_vm10 = vcmp.lt.s32.totalorder %v15649_v14, 2 }
 0x4eb   :  { %v8727_v60 = vsel %vm5717_vm1, 1.0, %v18983_v11  ;;  %v5764_v58 = vmul.f32 %v8726_v26, %v15365_v10  ;;  %vm15677_vm11 = vmand %vm5350_vm7, %vm5366_vm14  ;;  %vm17730_vm14 = vcmp.lt.s32.totalorder %v15659_v6, 2 }
 0x4ec   :  { %19101 = vst [vmem:[#allocation163_spill] sm:$0xff] %v15683_v3  ;;  %7019 = vmatprep.mubr.bf16.mxu1 %v5912_v7  ;;  %v5765_v29 = vmul.f32 %v8727_v60, %v15490_v44  ;;  %vm15686_vm3 = vmand %vm5351_vm0, %vm5367_vm13  ;;  %vm17733_vm13 = vcmp.ge.s32.totalorder %v15673_v53, 0  ;;  %vm17750_vm15 = vcmp.ge.s32.totalorder %v15683_v3, 0 }
 0x4ed   :  { %vm5550_vm7 = vmand %vm15677_vm11, %vm17728_vm4  ;;  %vm17759_vm4 = vcmp.lt.s32.totalorder %v15673_v53, 2 }
 0x4ee   :  { %v5776_v23 = vpack.c.bf16 %v5765_v29, %v5764_v58  ;;  %vm5551_vm1 = vmand %vm15686_vm3, %vm17729_vm9  ;;  %v5301_v29 = vrot.slane %v14903_v15, 4 }
 0x4ef   :  { %vm5582_vm0 = vmand %vm5550_vm7, %vm17731_vm10  ;;  %vm17758_vm7 = vcmp.lt.s32.totalorder %v15683_v3, 2  ;;  %vm5791_vm10 = vcmp.ge.s32.totalorder %v15611_v12, 0 }
 0x4f0   :  { %7020 = vmatmul.mubr.bf16.gmra.mxu1 %v5776_v23  ;;  %vm5583_vm6 = vmand %vm5551_vm1, %vm17730_vm14  ;;  %v8712_v7 = vsel %vm5582_vm0, 1.0, %v18983_v11  ;;  %vm5790_vm0 = vcmp.ge.s32.totalorder %v15599_v42, 0 }
 0x4f1   :  { %v8713_v26 = vsel %vm5583_vm6, 1.0, %v18983_v11  ;;  %v5630_v60 = vmul.f32 %v8712_v7, %v14878_v20  ;;  %vm5430_vm9 = vmand %vm15677_vm11, %vm17733_vm13  ;;  %vm5806_vm6 = vcmp.lt.s32.totalorder %v15599_v42, 2  ;;  %v15734_v42 = vshra.s32 %v19105_v18, 2 }
 0x4f2   :  { %v5631_v58 = vmul.f32 %v8713_v26, %v14880_v50  ;;  %vm5431_vm1 = vmand %vm15686_vm3, %vm17750_vm15  ;;  %v15731_v26 = vadd.s32 1, %v15649_v14  ;;  %v19113_v18 = vmov 0 }
 0x4f3   :  { %vm5462_vm14 = vmand %vm5430_vm9, %vm17759_vm4  ;;  %19106 = vst [vmem:[#allocation168_spill] sm:$0xff] %v15734_v42 }
 0x4f4   :  { %v5641_v23 = vpack.c.bf16 %v5631_v58, %v5630_v60  ;;  %vm5463_vm13 = vmand %vm5431_vm1, %vm17758_vm7  ;;  %v8696_v7 = vsel %vm5462_vm14, 1.0, %v18983_v11  ;;  %19104 = vst [vmem:[#allocation167_spill] sm:$0xff] %v15731_v26  ;;  %v15743_v60 = vadd.s32 1, %v15659_v6  ;;  %v19111_v58 = vld [vmem:[#allocation143_spill] sm:$0xff] }
 0x4f5   :  { %v8697_v31 = vsel %vm5463_vm13, 1.0, %v18983_v11  ;;  %v5510_v52 = vmul.f32 %v8696_v7, %v15490_v44  ;;  %vm15738_vm9 = vmand %vm5790_vm0, %vm5806_vm6  ;;  %v15746_v12 = vshra.s32 %v19111_v58, 2  ;;  %vm19116_vm13 = vcmp.ge.s32.totalorder %v15673_v53, 0  ;;  %v19121_v58 = vld [vmem:[#allocation140_spill] sm:$0xff] }
 0x4f6   :  { %v19108_v24 = vsel %vm15738_vm9, 4294967295, %v19107_v24  ;;  %19110 = vst [vmem:[#allocation105_spill] sm:$0xff] %v15743_v60  ;;  %6930 = vmatprep.mubr.bf16.mxu0 %v5641_v23  ;;  %v5511_v14 = vmul.f32 %v8697_v31, %v15502_v62  ;;  %vm15749_vm14 = vmand %vm5791_vm10, %vm5807_vm5  ;;  %v19117_v44 = vrot.slane %v14895_v59, 4  ;;  %vm19118_vm0 = vcmp.lt.s32.totalorder %v18941_v2, 4 }
 0x4f7   :  { %19109 = vst [vmem:[#allocation171_spill] sm:$0xff] %v19108_v24  ;;  %19112 = vst [vmem:[#allocation172_spill] sm:$0xff] %v15746_v12  ;;  %v19114_v18 = vsel %vm15749_vm14, 4294967295, %v19113_v18  ;;  %v5336_v31 = vadd.s32 4294967295, %v15734_v42  ;;  %v19119_v23 = vrot.slane %v14905_v33, 4  ;;  %vm17765_vm10 = vcmp.lt.s32.totalorder %v15731_v26, 2 }
 0x4f8   :  { %19115 = vst [vmem:[#allocation174_spill] sm:$0xff] %v19114_v18  ;;  %vm5838_vm1 = vmand %vm15738_vm9, %vm19116_vm13  ;;  %v5521_v7 = vpack.c.bf16 %v5511_v14, %v5510_v52  ;;  %v15761_v6 = vsel %vm19118_vm0, %v19117_v44, %v5301_v29  ;;  %v5337_v44 = vadd.s32 4294967295, %v15746_v12  ;;  %v15784_v18 = vshra.s32 %v19121_v58, 2 }
 0x4f9   :  { %vm5839_vm5 = vmand %vm15749_vm14, %vm17750_vm15 }
 0x4fa   :  { %vm19120_vm6 = vmmov %vm19118_vm0  ;;  %vm17770_vm0 = vcmp.ge.s32.totalorder %v15743_v60, 0  ;;  %6931 = vmatmul.mubr.bf16.gmra.mxu0 %v5521_v7  ;;  %19122 = vst [vmem:[#allocation118_spill] sm:$0xff] %v15784_v18  ;;  %v19124_v7 = vld [vmem:[#allocation141_spill] sm:$0xff]  ;;  %vm17766_vm9 = vcmp.ge.s32.totalorder %v15784_v18, 0  ;;  %v15811_v5 = vadd.s32 4294967295, %v15784_v18 }
 0x4fb   :  { %v15773_v52 = vsel %vm19120_vm6, %v5301_v29, %v19119_v23  ;;  %vm5854_vm13 = vmand %vm5838_vm1, %vm17759_vm4  ;;  %v15786_v29 = vld [vmem:[#allocation4 + $0x238] sm:$0xff]   ;;  %vm19123_vm1 = vcmp.ge.s32.totalorder %v15731_v26, 0  ;;  %v15796_v3 = vshra.s32 %v19124_v7, 2  ;;  %v19135_v26 = vmov 0 }
 0x4fc   :  { %vm5855_vm15 = vmand %vm5839_vm5, %vm17758_vm7  ;;  %v8744_v14 = vsel %vm5854_vm13, 1.0, %v18983_v11  ;;  %vm17764_vm5 = vcmp.lt.s32.totalorder %v15743_v60, 2  ;;  %vm5368_vm7 = vcmp.lt.s32.totalorder %v5336_v31, 2  ;;  %9909 = vmatprep.subr.bf16.mxu0 %v15786_v29  ;;  %19126 = vst [vmem:[#allocation178_spill] sm:$0xff] %v15811_v5 }
 0x4fd   :  { %v8745_v23 = vsel %vm5855_vm15, 1.0, %v18983_v11  ;;  %v5902_v2 = vmul.f32 %v8744_v14, %v15761_v6  ;;  %vm5686_vm6 = vmand %vm15677_vm11, %vm19123_vm1  ;;  %19125 = vst [vmem:[#allocation103_spill] sm:$0xff] %v15796_v3  ;;  %vm5352_vm15 = vcmp.ge.s32.totalorder %v5336_v31, 0  ;;  %vm5353_vm11 = vcmp.ge.s32.totalorder %v5337_v44, 0 }
 0x4fe   :  { %v5903_v53 = vmul.f32 %v8745_v23, %v15773_v52  ;;  %vm5687_vm13 = vmand %vm15686_vm3, %vm17770_vm0  ;;  %vm5369_vm1 = vcmp.lt.s32.totalorder %v5337_v44, 2  ;;  %vm5809_vm0 = vcmp.lt.s32.totalorder %v15746_v12, 2 }
 0x4ff   :  { %vm5718_vm4 = vmand %vm5686_vm6, %vm17765_vm10  ;;  %vm17767_vm6 = vcmp.ge.s32.totalorder %v15796_v3, 0 }
 0x500   :  { %v5913_v63 = vpack.c.bf16 %v5903_v53, %v5902_v2  ;;  %vm5719_vm14 = vmand %vm5687_vm13, %vm17764_vm5  ;;  %v8728_v14 = vsel %vm5718_vm4, 1.0, %v18983_v11  ;;  %v15821_v2 = vadd.s32 4294967295, %v15796_v3  ;;  %vm17768_vm13 = vcmp.lt.s32.totalorder %v15796_v3, 2 }
 0x501   :  { %v8729_v31 = vsel %vm5719_vm14, 1.0, %v18983_v11  ;;  %v5766_v58 = vmul.f32 %v8728_v14, %v15502_v62  ;;  %vm15815_vm3 = vmand %vm5352_vm15, %vm5368_vm7  ;;  %vm17769_vm14 = vcmp.lt.s32.totalorder %v15784_v18, 2 }
 0x502   :  { %19129 = vst [vmem:[#allocation180_spill] sm:$0xff] %v15821_v2  ;;  %7027 = vmatprep.mubr.bf16.mxu1 %v5913_v63  ;;  %v5767_v53 = vmul.f32 %v8729_v31, %v15626_v48  ;;  %vm15824_vm4 = vmand %vm5353_vm11, %vm5369_vm1  ;;  %vm17771_vm11 = vcmp.ge.s32.totalorder %v15811_v5, 0  ;;  %vm17792_vm5 = vcmp.ge.s32.totalorder %v15821_v2, 0 }
 0x503   :  { %vm5552_vm7 = vmand %vm15815_vm3, %vm17766_vm9  ;;  %vm17788_vm9 = vcmp.lt.s32.totalorder %v15811_v5, 2 }
 0x504   :  { %v5777_v7 = vpack.c.bf16 %v5767_v53, %v5766_v58  ;;  %vm5553_vm15 = vmand %vm15824_vm4, %vm17767_vm6 }
 0x505   :  { %vm5584_vm1 = vmand %vm5552_vm7, %vm17769_vm14  ;;  %vm17791_vm7 = vcmp.lt.s32.totalorder %v15821_v2, 2  ;;  %vm5793_vm14 = vcmp.ge.s32.totalorder %v15746_v12, 0 }
 0x506   :  { %7028 = vmatmul.mubr.bf16.gmra.mxu1 %v5777_v7  ;;  %vm5585_vm10 = vmand %vm5553_vm15, %vm17768_vm13  ;;  %v8714_v63 = vsel %vm5584_vm1, 1.0, %v18983_v11  ;;  %vm5792_vm1 = vcmp.ge.s32.totalorder %v15734_v42, 0 }
 0x507   :  { %v8715_v14 = vsel %vm5585_vm10, 1.0, %v18983_v11  ;;  %v5632_v31 = vmul.f32 %v8714_v63, %v14882_v41  ;;  %vm5432_vm6 = vmand %vm15815_vm3, %vm17771_vm11  ;;  %vm5808_vm10 = vcmp.lt.s32.totalorder %v15734_v42, 2  ;;  %v15868_v63 = vadd.s32 1, %v15784_v18 }
 0x508   :  { %v5633_v58 = vmul.f32 %v8715_v14, %v14895_v59  ;;  %vm5433_vm15 = vmand %vm15824_vm4, %vm17792_vm5  ;;  %v19133_v14 = vld [vmem:[#allocation152_spill] sm:$0xff] }
 0x509   :  { %vm5464_vm13 = vmand %vm5432_vm6, %vm17788_vm9  ;;  %19132 = vst [vmem:[#allocation181_spill] sm:$0xff] %v15868_v63  ;;  %v15871_v60 = vshra.s32 %v19133_v14, 2  ;;  %v19140_v14 = vmov 0 }
 0x50a   :  { %v5642_v53 = vpack.c.bf16 %v5633_v58, %v5632_v31  ;;  %vm5465_vm11 = vmand %vm5433_vm15, %vm17791_vm7  ;;  %v8698_v7 = vsel %vm5464_vm13, 1.0, %v18983_v11  ;;  %v15880_v31 = vadd.s32 1, %v15796_v3  ;;  %v19139_v58 = vld [vmem:[#allocation153_spill] sm:$0xff] }
 0x50b   :  { %19134 = vst [vmem:[#allocation101_spill] sm:$0xff] %v15871_v60  ;;  %v8699_v42 = vsel %vm5465_vm11, 1.0, %v18983_v11  ;;  %v5512_v24 = vmul.f32 %v8698_v7, %v15626_v48  ;;  %vm15875_vm6 = vmand %vm5792_vm1, %vm5808_vm10  ;;  %v15883_v12 = vshra.s32 %v19139_v58, 2  ;;  %vm19143_vm11 = vcmp.ge.s32.totalorder %v15811_v5, 0 }
 0x50c   :  { %v19136_v26 = vsel %vm15875_vm6, 4294967295, %v19135_v26  ;;  %19138 = vst [vmem:[#allocation159_spill] sm:$0xff] %v15880_v31  ;;  %6938 = vmatprep.mubr.bf16.mxu0 %v5642_v53  ;;  %v5513_v18 = vmul.f32 %v8699_v42, %v15638_v27  ;;  %vm15886_vm13 = vmand %vm5793_vm14, %vm5809_vm0  ;;  %vm17793_vm10 = vcmp.ge.s32.totalorder %v15868_v63, 0  ;;  %v5338_v53 = vadd.s32 4294967295, %v15871_v60 }
 0x50d   :  { %19137 = vst [vmem:[#allocation106_spill] sm:$0xff] %v19136_v26  ;;  %v19141_v14 = vsel %vm15886_vm13, 4294967295, %v19140_v14  ;;  %vm5840_vm15 = vmand %vm15875_vm6, %vm19143_vm11  ;;  %vm17808_vm14 = vcmp.ge.s32.totalorder %v15880_v31, 0  ;;  %v5339_v42 = vadd.s32 4294967295, %v15883_v12  ;;  %vm17803_vm6 = vcmp.lt.s32.totalorder %v15868_v63, 2 }
 0x50e   :  { %19142 = vst [vmem:[#allocation136_spill] sm:$0xff] %v19141_v14  ;;  %v5522_v7 = vpack.c.bf16 %v5513_v18, %v5512_v24  ;;  %vm5841_vm1 = vmand %vm15886_vm13, %vm17792_vm5  ;;  %v19144_v18 = vld [vmem:[#allocation150_spill] sm:$0xff]  ;;  %vm5354_vm5 = vcmp.ge.s32.totalorder %v5338_v53, 0 }
 0x50f   :  { %vm5856_vm0 = vmand %vm5840_vm15, %vm17788_vm9  ;;  %v15909_v58 = vshra.s32 %v19144_v18, 2  ;;  %vm5355_vm9 = vcmp.ge.s32.totalorder %v5339_v42, 0  ;;  %vm5371_vm13 = vcmp.lt.s32.totalorder %v5339_v42, 2 }
 0x510   :  { %6939 = vmatmul.mubr.bf16.gmra.mxu0 %v5522_v7  ;;  %vm5857_vm11 = vmand %vm5841_vm1, %vm17791_vm7  ;;  %v8746_v24 = vsel %vm5856_vm0, 1.0, %v18983_v11  ;;  %v19145_v7 = vld [vmem:[#allocation151_spill] sm:$0xff]  ;;  %vm19146_vm1 = vcmp.ge.s32.totalorder %v14919_v46, 0 }
 0x511   :  { %v8747_v3 = vsel %vm5857_vm11, 1.0, %v18983_v11  ;;  %v5904_v5 = vmul.f32 %v8746_v24, %v14983_v0  ;;  %vm5688_vm15 = vmand %vm15815_vm3, %vm17793_vm10  ;;  %v15919_v2 = vshra.s32 %v19145_v7, 2  ;;  %vm19149_vm11 = vcmp.ge.s32.totalorder %v14926_v57, 0 }
 0x512   :  { %vm15925_vm0 = vmand %vm15012_vm8, %vm19146_vm1  ;;  %v5905_v24 = vmul.f32 %v8747_v3, %v14991_v36  ;;  %vm5370_vm1 = vcmp.lt.s32.totalorder %v5338_v53, 2  ;;  %v15949_v3 = vadd.s32 4294967295, %v15909_v58  ;;  %vm5811_vm8 = vcmp.lt.s32.totalorder %v15883_v12, 2 }
 0x513   :  { %vm15933_vm7 = vmand %vm15022_vm12, %vm19149_vm11  ;;  %vm19152_vm11 = vcmp.lt.s32.totalorder %v15880_v31, 2  ;;  %vm17804_vm12 = vcmp.ge.s32.totalorder %v15909_v58, 0  ;;  %v16031_v36 = vadd.s32 1, %v15919_v2 }
 0x514   :  { %vm5689_vm3 = vmand %vm15824_vm4, %vm17808_vm14  ;;  %v5914_v7 = vpack.c.bf16 %v5905_v24, %v5904_v5  ;;  %19153 = vst [vmem:[#allocation116_spill] sm:$0xff] %v15949_v3  ;;  %v15959_v5 = vadd.s32 4294967295, %v15919_v2  ;;  %vm19162_vm14 = vcmp.lt.s32.totalorder %v14926_v57, 2 }
 0x515   :  { %vm5720_vm10 = vmand %vm5688_vm15, %vm17803_vm6  ;;  %vm17805_vm15 = vcmp.ge.s32.totalorder %v15919_v2, 0 }
 0x516   :  { %vm5721_vm2 = vmand %vm5689_vm3, %vm19152_vm11  ;;  %v8730_v14 = vsel %vm5720_vm10, 1.0, %v18983_v11  ;;  %19156 = vst [vmem:[#allocation128_spill] sm:$0xff] %v15959_v5  ;;  %7035 = vmatprep.mubr.bf16.mxu1 %v5914_v7  ;;  %vm17806_vm3 = vcmp.lt.s32.totalorder %v15919_v2, 2  ;;  %vm17810_vm11 = vcmp.ge.s32.totalorder %v15959_v5, 0 }
 0x517   :  { %v8731_v44 = vsel %vm5721_vm2, 1.0, %v18983_v11  ;;  %v5768_v53 = vmul.f32 %v8730_v14, %v15638_v27  ;;  %vm15953_vm4 = vmand %vm5354_vm5, %vm5370_vm1  ;;  %vm17807_vm2 = vcmp.lt.s32.totalorder %v15909_v58, 2 }
 0x518   :  { %v5769_v42 = vmul.f32 %v8731_v44, %v15761_v6  ;;  %vm15962_vm10 = vmand %vm5355_vm9, %vm5371_vm13  ;;  %vm17809_vm9 = vcmp.ge.s32.totalorder %v15949_v3, 0 }
 0x519   :  { %vm5554_vm5 = vmand %vm15953_vm4, %vm17804_vm12  ;;  %vm17823_vm12 = vcmp.lt.s32.totalorder %v15949_v3, 2 }
 0x51a   :  { %v5778_v14 = vpack.c.bf16 %v5769_v42, %v5768_v53  ;;  %vm5555_vm1 = vmand %vm15962_vm10, %vm17805_vm15 }
 0x51b   :  { %vm5586_vm13 = vmand %vm5554_vm5, %vm17807_vm2  ;;  %vm5795_vm5 = vcmp.ge.s32.totalorder %v15883_v12, 0 }
 0x51c   :  { %7036 = vmatmul.mubr.bf16.gmra.mxu1 %v5778_v14  ;;  %vm5587_vm6 = vmand %vm5555_vm1, %vm17806_vm3  ;;  %v8716_v7 = vsel %vm5586_vm13, 1.0, %v18983_v11  ;;  %vm5794_vm13 = vcmp.ge.s32.totalorder %v15871_v60, 0  ;;  %vm19159_vm3 = vcmp.lt.s32.totalorder %v14919_v46, 2 }
 0x51d   :  { %v8717_v44 = vsel %vm5587_vm6, 1.0, %v18983_v11  ;;  %v5634_v53 = vmul.f32 %v8716_v7, %v14903_v15  ;;  %vm5434_vm15 = vmand %vm15953_vm4, %vm17809_vm9  ;;  %vm5810_vm6 = vcmp.lt.s32.totalorder %v15871_v60, 2  ;;  %v16022_v60 = vadd.s32 1, %v15909_v58 }
 0x51e   :  { %v5635_v42 = vmul.f32 %v8717_v44, %v14905_v33  ;;  %vm5435_vm1 = vmand %vm15962_vm10, %vm17810_vm11 }
 0x51f   :  { %vm16002_vm2 = vmand %vm15925_vm0, %vm19159_vm3  ;;  %vm19165_vm0 = vcmp.lt.s32.totalorder %v15959_v5, 2 }
 0x520   :  { %vm16010_vm9 = vmand %vm15933_vm7, %vm19162_vm14  ;;  %v5643_v18 = vpack.c.bf16 %v5635_v42, %v5634_v53  ;;  %v8750_v26 = vsel %vm16002_vm2, 1.0, %v18983_v11  ;;  %vm19175_vm2 = vcmp.ge.s32.totalorder %v15017_v47, 0 }
 0x521   :  { %vm5466_vm11 = vmand %vm5434_vm15, %vm17823_vm12  ;;  %vm19170_vm15 = vcmp.ge.s32.totalorder %v15949_v3, 0  ;;  %v5980_v14 = vmul.f32 %v8750_v26, %v14839_v28  ;;  %v19181_v26 = vmov 0 }
 0x522   :  { %vm5467_vm3 = vmand %vm5435_vm1, %vm19165_vm0  ;;  %v8700_v44 = vsel %vm5466_vm11, 1.0, %v18983_v11  ;;  %6946 = vmatprep.mubr.bf16.mxu0 %v5643_v18  ;;  %vm19171_vm1 = vcmp.ge.s32.totalorder %v15959_v5, 0 }
 0x523   :  { %v8701_v23 = vsel %vm5467_vm3, 1.0, %v18983_v11  ;;  %v5514_v31 = vmul.f32 %v8700_v44, %v15761_v6  ;;  %vm16026_vm7 = vmand %vm5794_vm13, %vm5810_vm6  ;;  %vm17827_vm6 = vcmp.ge.s32.totalorder %v16022_v60, 0 }
 0x524   :  { %v5515_v53 = vmul.f32 %v8701_v23, %v15773_v52  ;;  %vm16034_vm14 = vmand %vm5795_vm5, %vm5811_vm8  ;;  %vm17826_vm8 = vcmp.ge.s32.totalorder %v16031_v36, 0  ;;  %vm19172_vm5 = vcmp.lt.s32.totalorder %v15959_v5, 2 }
 0x525   :  { %vm5842_vm11 = vmand %vm16026_vm7, %vm19170_vm15  ;;  %vm17825_vm15 = vcmp.lt.s32.totalorder %v16022_v60, 2 }
 0x526   :  { %v5523_v44 = vpack.c.bf16 %v5515_v53, %v5514_v31  ;;  %vm5843_vm13 = vmand %vm16034_vm14, %vm19171_vm1 }
 0x527   :  { %vm5858_vm0 = vmand %vm5842_vm11, %vm17823_vm12  ;;  %vm17824_vm11 = vcmp.lt.s32.totalorder %v16031_v36, 2 }
 0x528   :  { %6947 = vmatmul.mubr.bf16.gmra.mxu0 %v5523_v44  ;;  %vm5859_vm3 = vmand %vm5843_vm13, %vm19172_vm5  ;;  %v8748_v18 = vsel %vm5858_vm0, 1.0, %v18983_v11  ;;  %v6092_v44 = vadd.s32 1, %v14912_v54  ;;  %vm19174_vm5 = vnez %v18986_v39 }
 0x529   :  { %v8749_v31 = vsel %vm5859_vm3, 1.0, %v18983_v11  ;;  %v5906_v23 = vmul.f32 %v8748_v18, %v15087_v51  ;;  %vm5690_vm1 = vmand %vm15953_vm4, %vm17827_vm6  ;;  %v6093_v18 = vadd.s32 1, %v14916_v61 }
 0x52a   :  { %v5907_v53 = vmul.f32 %v8749_v31, %v15156_v38  ;;  %vm5691_vm13 = vmand %vm15962_vm10, %vm17826_vm8  ;;  %v8751_v31 = vsel %vm16010_vm9, 1.0, %v18983_v11  ;;  %vm19173_vm10 = vcmp.ge.s32.totalorder %v15005_v35, 0  ;;  %vm19176_vm9 = vnez %v18988_v43 }
 0x52b   :  { %vm5722_vm0 = vmand %vm5690_vm1, %vm17825_vm15  ;;  %vm6124_vm12 = vcmp.lt.s32.totalorder %v6092_v44, 2  ;;  %v5981_v7 = vmul.f32 %v8751_v31, %v14853_v19  ;;  %vm6125_vm15 = vcmp.lt.s32.totalorder %v6093_v18, 2  ;;  %v10192_v31 = vld [vmem:[#allocation4 + $0x230] sm:$0xff]  }
 0x52c   :  { %v5915_v5 = vpack.c.bf16 %v5907_v53, %v5906_v23  ;;  %vm5723_vm4 = vmand %vm5691_vm13, %vm17824_vm11  ;;  %v8732_v24 = vsel %vm5722_vm0, 1.0, %v18983_v11  ;;  %vm6108_vm13 = vcmp.ge.s32.totalorder %v6092_v44, 0  ;;  %vm19177_vm0 = vcmp.lt.s32.totalorder %v15005_v35, 2 }
 0x52d   :  { %v8733_v54 = vsel %vm5723_vm4, 1.0, %v18983_v11  ;;  %v5770_v3 = vmul.f32 %v8732_v24, %v15773_v52  ;;  %vm6004_vm3 = vmand %vm19174_vm5, %vm19173_vm10  ;;  %vm6109_vm11 = vcmp.ge.s32.totalorder %v6093_v18, 0  ;;  %vm19178_vm10 = vcmp.lt.s32.totalorder %v15017_v47, 2 }
 0x52e   :  { %7043 = vmatprep.mubr.bf16.mxu1 %v5915_v5  ;;  %v5771_v61 = vmul.f32 %v8733_v54, %v14983_v0  ;;  %vm6005_vm1 = vmand %vm19176_vm9, %vm19175_vm2  ;;  %vm19183_vm9 = vcmp.ge.s32.totalorder %v14930_v21, 0 }
 0x52f   :  { %vm6020_vm4 = vmand %vm6004_vm3, %vm19177_vm0  ;;  %vm19184_vm0 = vcmp.ge.s32.totalorder %v14933_v49, 0 }
 0x530   :  { %v5779_v39 = vpack.c.bf16 %v5771_v61, %v5770_v3  ;;  %vm6021_vm5 = vmand %vm6005_vm1, %vm19178_vm10  ;;  %v8766_v5 = vsel %vm6020_vm4, 1.0, %v18983_v11  ;;  %v5996_v3 = vpack.c.bf16 %v5981_v7, %v5980_v14  ;;  %vm19187_vm10 = vcmp.ge.s32.totalorder %v14919_v46, 0  ;;  %v10193_v61 = vld [vmem:[#allocation4 + $0x228] sm:$0xff]  }
 0x531   :  { %v8767_v43 = vsel %vm6021_vm5, 1.0, %v18983_v11  ;;  %v6068_v23 = vmul.f32 %v8766_v5, %v15051_v16  ;;  %vm16099_vm2 = vmand %vm6108_vm13, %vm6124_vm12  ;;  %vm19185_vm13 = vcmp.lt.s32.totalorder %v14930_v21, 2  ;;  %v6095_v5 = vadd.s32 1, %v15034_v25  ;;  %v10195_v25 = vld [vmem:[#allocation4 + $0x218] sm:$0xff]  }
 0x532   :  { %7044 = vmatmul.mubr.bf16.gmra.mxu1 %v5779_v39  ;;  %v6069_v44 = vmul.f32 %v8767_v43, %v15205_v34  ;;  %vm16104_vm3 = vmand %vm6109_vm11, %vm6125_vm15  ;;  %vm19186_vm15 = vcmp.lt.s32.totalorder %v14933_v49, 2  ;;  %v10194_v43 = vld [vmem:[#allocation4 + $0x220] sm:$0xff]  }
 0x533   :  { %v19182_v26 = vsel %vm16104_vm3, 4294967295, %v19181_v26  ;;  %vm6156_vm1 = vmand %vm16099_vm2, %vm19183_vm9  ;;  %vm19188_vm9 = vcmp.ge.s32.totalorder %v14926_v57, 0  ;;  %vm6111_vm8 = vcmp.ge.s32.totalorder %v6095_v5, 0  ;;  %vm6127_vm6 = vcmp.lt.s32.totalorder %v6095_v5, 2 }
 0x534   :  { %v6084_v18 = vpack.c.bf16 %v6069_v44, %v6068_v23  ;;  %vm6157_vm12 = vmand %vm16104_vm3, %vm19184_vm0  ;;  %vm19189_vm0 = vcmp.lt.s32.totalorder %v14919_v46, 2 }
 0x535   :  { %vm6172_vm4 = vmand %vm6156_vm1, %vm19185_vm13  ;;  %vm19190_vm13 = vcmp.lt.s32.totalorder %v14926_v57, 2  ;;  %v6094_v57 = vadd.s32 1, %v15027_v9 }
 0x536   :  { %7084 = vmatprep.mubr.bf16.mxu0 %v6084_v18  ;;  %vm6173_vm11 = vmand %vm6157_vm12, %vm19186_vm15  ;;  %v8782_v24 = vsel %vm6172_vm4, 1.0, %v18983_v11  ;;  %vm19191_vm15 = vcmp.ge.s32.totalorder %v15167_v4, 0 }
 0x537   :  { %7085 = vmatmul.mubr.bf16.vlgmr.msra.gmra.mxu0 %v5996_v3  ;;  %v8783_v54 = vsel %vm6173_vm11, 1.0, %v18983_v11  ;;  %vm6244_vm5 = vmand %vm16099_vm2, %vm19187_vm10  ;;  %v6220_v21 = vmul.f32 %v8782_v24, %v15353_v13  ;;  %vm19192_vm11 = vnez %v19002_v17 }
 0x538   :  { %vm6245_vm1 = vmand %vm16104_vm3, %vm19188_vm9  ;;  %9910 = vmatpush3.bf16.msra.mxu0 %v15786_v29  ;;  %v6221_v49 = vmul.f32 %v8783_v54, %v15365_v10  ;;  %vm19194_vm9 = vnez %v19006_v8  ;;  %v19226_v54 = vld [vmem:[#allocation155_spill] sm:$0xff] }
 0x539   :  { %vm6260_vm12 = vmand %vm6244_vm5, %vm19189_vm0  ;;  %9911 = vmatprep.subr.bf16.mxu0 %v10192_v31  ;;  %vm19193_vm5 = vcmp.ge.s32.totalorder %v15183_v32, 0 }
 0x53a   :  { %vm6261_vm4 = vmand %vm6245_vm1, %vm19190_vm13  ;;  %v8798_v14 = vsel %vm6260_vm12, 1.0, %v18983_v11  ;;  %v6236_v29 = vpack.c.bf16 %v6221_v49, %v6220_v21  ;;  %vm19195_vm1 = vcmp.lt.s32.totalorder %v15167_v4, 2  ;;  %vm19196_vm13 = vcmp.lt.s32.totalorder %v15183_v32, 2  ;;  %v19228_v49 = vld [vmem:[#allocation85_spill] sm:$0xff] }
 0x53b   :  { %v8799_v7 = vsel %vm6261_vm4, 1.0, %v18983_v11  ;;  %v6308_v39 = vmul.f32 %v8798_v14, %v14866_v56  ;;  %vm6006_vm10 = vmand %vm19192_vm11, %vm19191_vm15  ;;  %vm19197_vm15 = vcmp.ge.s32.totalorder %v15071_v30, 0  ;;  %v10196_v14 = vld [vmem:[#allocation4 + $0x210] sm:$0xff]  }
 0x53c   :  { %v6309_v46 = vmul.f32 %v8799_v7, %v14876_v45  ;;  %vm6007_vm0 = vmand %vm19194_vm9, %vm19193_vm5  ;;  %9912 = vmatpush3.bf16.msra.mxu0 %v10192_v31 }
 0x53d   :  { %vm6022_vm12 = vmand %vm6006_vm10, %vm19195_vm1  ;;  %9913 = vmatprep.subr.bf16.mxu0 %v10193_v61  ;;  %vm19198_vm10 = vcmp.ge.s32.totalorder %v15079_v37, 0 }
 0x53e   :  { %v6324_v23 = vpack.c.bf16 %v6309_v46, %v6308_v39  ;;  %vm6023_vm4 = vmand %vm6007_vm0, %vm19196_vm13  ;;  %v8768_v44 = vsel %vm6022_vm12, 1.0, %v18983_v11  ;;  %vm6110_vm0 = vcmp.ge.s32.totalorder %v6094_v57, 0  ;;  %vm6126_vm13 = vcmp.lt.s32.totalorder %v6094_v57, 2 }
 0x53f   :  { %v8769_v3 = vsel %vm6023_vm4, 1.0, %v18983_v11  ;;  %v6070_v18 = vmul.f32 %v8768_v44, %v15217_v22  ;;  %vm5918_vm5 = vmand %vm19192_vm11, %vm19197_vm15  ;;  %vm19199_vm12 = vcmp.lt.s32.totalorder %v15071_v30, 2  ;;  %vm19200_vm11 = vcmp.lt.s32.totalorder %v15079_v37, 2 }
 0x540   :  { %7181 = vmatprep.mubr.bf16.mxu1 %v6324_v23  ;;  %v6071_v9 = vmul.f32 %v8769_v3, %v15353_v13  ;;  %vm5919_vm1 = vmand %vm19194_vm9, %vm19198_vm10  ;;  %9914 = vmatpush3.bf16.msra.mxu0 %v10193_v61  ;;  %vm19205_vm10 = vcmp.ge.s32.totalorder %v15071_v30, 0  ;;  %v10197_v30 = vld [vmem:[#allocation4 + $0x208] sm:$0xff]   ;;  %v19294_v3 = vld [vmem:[#allocation164_spill] sm:$0xff] }
 0x541   :  { %7182 = vmatmul.mubr.bf16.vlgmr.msra.gmra.mxu1 %v6236_v29  ;;  %vm5934_vm4 = vmand %vm5918_vm5, %vm19199_vm12  ;;  %9915 = vmatprep.subr.bf16.mxu0 %v10194_v43 }
 0x542   :  { %v6085_v17 = vpack.c.bf16 %v6071_v9, %v6070_v18  ;;  %vm5935_vm15 = vmand %vm5919_vm1, %vm19200_vm11  ;;  %v8752_v31 = vsel %vm5934_vm4, 1.0, %v18983_v11  ;;  %v19217_v9 = vld [vmem:[#allocation162_spill] sm:$0xff] }
 0x543   :  { %v8753_v8 = vsel %vm5935_vm15, 1.0, %v18983_v11  ;;  %v5982_v24 = vmul.f32 %v8752_v31, %v14862_v40  ;;  %vm16174_vm9 = vmand %vm6110_vm0, %vm6126_vm13  ;;  %vm19206_vm0 = vcmp.ge.s32.totalorder %v15079_v37, 0  ;;  %v19220_v31 = vld [vmem:[#allocation94_spill] sm:$0xff] }
 0x544   :  { %7092 = vmatprep.mubr.bf16.mxu0 %v6085_v17  ;;  %v5983_v21 = vmul.f32 %v8753_v8, %v14864_v1  ;;  %vm16179_vm5 = vmand %vm6111_vm8, %vm6127_vm6  ;;  %9916 = vmatpush3.bf16.msra.mxu0 %v10194_v43  ;;  %v19218_v17 = vld [vmem:[#allocation93_spill] sm:$0xff]  ;;  %v19222_v8 = vld [vmem:[#allocation99_spill] sm:$0xff] }
 0x545   :  { %vm6246_vm1 = vmand %vm16174_vm9, %vm19205_vm10  ;;  %9917 = vmatprep.subr.bf16.mxu0 %v10195_v25  ;;  %vm19209_vm10 = vcmp.ge.s32.totalorder %v15183_v32, 0 }
 0x546   :  { %v5997_v61 = vpack.c.bf16 %v5983_v21, %v5982_v24  ;;  %vm6247_vm13 = vmand %vm16179_vm5, %vm19206_vm0  ;;  %vm19210_vm0 = vcmp.lt.s32.totalorder %v15167_v4, 2  ;;  %v19224_v24 = vld [vmem:[#allocation138_spill] sm:$0xff]  ;;  %v6096_v21 = vadd.s32 1, %v19226_v54 }
 0x547   :  { %vm6262_vm6 = vmand %vm6246_vm1, %vm19199_vm12  ;;  %vm19211_vm12 = vcmp.lt.s32.totalorder %v15183_v32, 2  ;;  %v10198_v32 = vld [vmem:[#allocation4 + $0x200] sm:$0xff]  }
 0x548   :  { %7093 = vmatmul.mubr.bf16.gmra.mxu0 %v5997_v61  ;;  %vm19207_vm8 = vmmov %vm19200_vm11  ;;  %v8800_v7 = vsel %vm6262_vm6, 1.0, %v18983_v11  ;;  %vm19208_vm11 = vcmp.ge.s32.totalorder %v15167_v4, 0  ;;  %v19213_v4 = vld [vmem:[#allocation145_spill] sm:$0xff]  ;;  %v6097_v61 = vadd.s32 1, %v19228_v49  ;;  %v19245_v49 = vld [vmem:[#allocation95_spill] sm:$0xff] }
 0x549   :  { %vm6263_vm4 = vmand %vm6247_vm13, %vm19207_vm8  ;;  %v6310_v46 = vmul.f32 %v8800_v7, %v14878_v20  ;;  %9918 = vmatpush3.bf16.msra.mxu0 %v10195_v25  ;;  %vm19212_vm8 = vcmp.ge.s32.totalorder %v15096_v55, 0 }
 0x54a   :  { %v8801_v39 = vsel %vm6263_vm4, 1.0, %v18983_v11  ;;  %vm6334_vm15 = vmand %vm16174_vm9, %vm19208_vm11  ;;  %9919 = vmatprep.subr.bf16.mxu0 %v10196_v14  ;;  %vm19214_vm11 = vcmp.ge.s32.totalorder %v19213_v4, 0 }
 0x54b   :  { %v6311_v57 = vmul.f32 %v8801_v39, %v14880_v50  ;;  %vm6335_vm1 = vmand %vm16179_vm5, %vm19209_vm10  ;;  %vm19215_vm10 = vcmp.lt.s32.totalorder %v15096_v55, 2 }
 0x54c   :  { %vm6350_vm13 = vmand %vm6334_vm15, %vm19210_vm0 }
 0x54d   :  { %v6325_v37 = vpack.c.bf16 %v6311_v57, %v6310_v46  ;;  %vm6351_vm6 = vmand %vm6335_vm1, %vm19211_vm12  ;;  %v8816_v29 = vsel %vm6350_vm13, 1.0, %v18983_v11  ;;  %9920 = vmatpush3.bf16.msra.mxu0 %v10196_v14  ;;  %vm19221_vm13 = vnez %v19220_v31  ;;  %v19230_v57 = vld [vmem:[#allocation156_spill] sm:$0xff] }
 0x54e   :  { %v8817_v5 = vsel %vm6351_vm6, 1.0, %v18983_v11  ;;  %vm6158_vm4 = vmand %vm16174_vm9, %vm19212_vm8  ;;  %v16218_v43 = vmul.f32 %v8816_v29, %v15502_v62  ;;  %9921 = vmatprep.subr.bf16.mxu0 %v10197_v30  ;;  %vm19216_vm9 = vcmp.lt.s32.totalorder %v19213_v4, 2  ;;  %vm19223_vm6 = vcmp.ge.s32.totalorder %v19222_v8, 0 }
 0x54f   :  { %7189 = vmatprep.mubr.bf16.mxu1 %v6325_v37  ;;  %vm6159_vm15 = vmand %vm16179_vm5, %vm19214_vm11  ;;  %v16225_v23 = vmul.f32 %v8817_v5, %v15626_v48  ;;  %vm19219_vm5 = vcmp.ge.s32.totalorder %v19218_v17, 0  ;;  %vm19225_vm8 = vnez %v19224_v24  ;;  %vm19227_vm11 = vcmp.lt.s32.totalorder %v19218_v17, 2  ;;  %v19232_v37 = vld [vmem:[#allocation86_spill] sm:$0xff] }
 0x550   :  { %vm6174_vm1 = vmand %vm6158_vm4, %vm19215_vm10  ;;  %vm19229_vm10 = vcmp.lt.s32.totalorder %v19222_v8, 2  ;;  %vm19235_vm3 = vcmp.lt.s32.totalorder %v19232_v37, 2  ;;  %v19243_v24 = vld [vmem:[#allocation78_spill] sm:$0xff] }
 0x551   :  { %vm6175_vm0 = vmand %vm6159_vm15, %vm19216_vm9  ;;  %v8784_v44 = vsel %vm6174_vm1, 1.0, %v18983_v11  ;;  %9922 = vmatpush3.bf16.msra.mxu0 %v10197_v30  ;;  %vm19231_vm9 = vcmp.ge.s32.totalorder %v19230_v57, 0 }
 0x552   :  { %v8785_v18 = vsel %vm6175_vm0, 1.0, %v18983_v11  ;;  %v6222_v25 = vmul.f32 %v8784_v44, %v19217_v9  ;;  %vm6008_vm12 = vmand %vm19221_vm13, %vm19219_vm5  ;;  %9923 = vmatprep.subr.bf16.mxu0 %v10198_v32  ;;  %vm19233_vm5 = vcmp.ge.s32.totalorder %v19232_v37, 0  ;;  %v19236_v44 = vmov 0 }
 0x553   :  { %v6223_v55 = vmul.f32 %v8785_v18, %v15502_v62  ;;  %vm6009_vm4 = vmand %vm19225_vm8, %vm19223_vm6  ;;  %vm6112_vm6 = vcmp.ge.s32.totalorder %v6096_v21, 0 }
 0x554   :  { %vm6024_vm15 = vmand %vm6008_vm12, %vm19227_vm11  ;;  %vm19234_vm11 = vcmp.lt.s32.totalorder %v19230_v57, 2  ;;  %v9536_v54 = vpop.f32.mrf.mxu0 }
 0x555   :  { %v6237_v14 = vpack.c.bf16 %v6223_v55, %v6222_v25  ;;  %vm6025_vm1 = vmand %vm6009_vm4, %vm19229_vm10  ;;  %v8770_v7 = vsel %vm6024_vm15, 1.0, %v18983_v11  ;;  %9924 = vmatpush3.bf16.msra.mxu0 %v10198_v32  ;;  %vm6128_vm4 = vcmp.lt.s32.totalorder %v6096_v21, 2  ;;  %vm6113_vm10 = vcmp.ge.s32.totalorder %v6097_v61, 0 }
 0x556   :  { %v8771_v39 = vsel %vm6025_vm1, 1.0, %v18983_v11  ;;  %v6072_v46 = vmul.f32 %v8770_v7, %v15365_v10  ;;  %vm5920_vm0 = vmand %vm19221_vm13, %vm19231_vm9  ;;  %vm6129_vm1 = vcmp.lt.s32.totalorder %v6097_v61, 2  ;;  %v19238_v25 = vmov 0  ;;  %v9537_v61 = vpop.f32.mrf.mxu0 }
 0x557   :  { %7190 = vmatmul.mubr.bf16.gmra.mxu1 %v6237_v14  ;;  %v6073_v30 = vmul.f32 %v8771_v39, %v19217_v9  ;;  %vm5921_vm12 = vmand %vm19225_vm8, %vm19233_vm5  ;;  %v9538_v39 = vadd.f32 %v9537_v61, %v9536_v54 }
 0x558   :  { %vm5936_vm15 = vmand %vm5920_vm0, %vm19234_vm11  ;;  %vm19240_vm0 = vcmp.ge.s32.totalorder %v19230_v57, 0 }
 0x559   :  { %v6086_v29 = vpack.c.bf16 %v6073_v30, %v6072_v46  ;;  %vm5937_vm13 = vmand %vm5921_vm12, %vm19235_vm3  ;;  %v8754_v5 = vsel %vm5936_vm15, 1.0, %v18983_v11  ;;  %v19249_v30 = vld [vmem:[#allocation133_spill] sm:$0xff] }
 0x55a   :  { %v8755_v4 = vsel %vm5937_vm13, 1.0, %v18983_v11  ;;  %v5984_v32 = vmul.f32 %v8754_v5, %v14866_v56  ;;  %vm16270_vm9 = vmand %vm6112_vm6, %vm6128_vm4  ;;  %vm19246_vm13 = vcmp.ge.s32.totalorder %v19245_v49, 0 }
 0x55b   :  { %v19237_v44 = vsel %vm16270_vm9, 4294967295, %v19236_v44  ;;  %7100 = vmatprep.mubr.bf16.mxu0 %v6086_v29  ;;  %v5985_v18 = vmul.f32 %v8755_v4, %v14876_v45  ;;  %vm16275_vm8 = vmand %vm6113_vm10, %vm6129_vm1  ;;  %vm19244_vm10 = vcmp.ge.s32.totalorder %v19243_v24, 0  ;;  %v9539_v29 = vpop.f32.mrf.mxu0  ;;  %v19253_v4 = vld [vmem:[#allocation165_spill] sm:$0xff] }
 0x55c   :  { %v19239_v25 = vsel %vm16275_vm8, 4294967295, %v19238_v25  ;;  %vm6248_vm3 = vmand %vm16270_vm9, %vm19240_vm0 }
 0x55d   :  { %v5998_v31 = vpack.c.bf16 %v5985_v18, %v5984_v32  ;;  %vm6249_vm12 = vmand %vm16275_vm8, %vm19233_vm5  ;;  %v19255_v32 = vld [vmem:[#allocation166_spill] sm:$0xff]  ;;  %v19257_v18 = vld [vmem:[#allocation91_spill] sm:$0xff] }
 0x55e   :  { %vm19241_vm6 = vmmov %vm19234_vm11  ;;  %vm19242_vm11 = vcmp.lt.s32.totalorder %v19232_v37, 2  ;;  %v19251_v37 = vld [vmem:[#allocation148_spill] sm:$0xff] }
 0x55f   :  { %vm6264_vm4 = vmand %vm6248_vm3, %vm19241_vm6  ;;  %7101 = vmatmul.mubr.bf16.gmra.mxu0 %v5998_v31  ;;  %vm19247_vm3 = vcmp.lt.s32.totalorder %v19243_v24, 2  ;;  %v6098_v31 = vadd.s32 1, %v19257_v18  ;;  %v9540_v24 = vpop.f32.mrf.mxu0 }
 0x560   :  { %vm6265_vm15 = vmand %vm6249_vm12, %vm19242_vm11  ;;  %v8802_v56 = vsel %vm6264_vm4, 1.0, %v18983_v11  ;;  %vm19248_vm12 = vcmp.lt.s32.totalorder %v19245_v49, 2  ;;  %vm19250_vm4 = vcmp.ge.s32.totalorder %v19249_v30, 0  ;;  %vm19252_vm11 = vnez %v19251_v37  ;;  %v9600_v49 = vpop.f32.mrf.mxu1 }
 0x561   :  { %v8803_v45 = vsel %vm6265_vm15, 1.0, %v18983_v11  ;;  %v6312_v55 = vmul.f32 %v8802_v56, %v14882_v41  ;;  %vm6160_vm1 = vmand %vm16270_vm9, %vm19244_vm10  ;;  %vm19254_vm10 = vcmp.ge.s32.totalorder %v19253_v4, 0  ;;  %v16320_v56 = vld [vmem:[#allocation5] ss:$0 sm:$0xff]  ;;  %v9541_v61 = vadd.f32 %v9540_v24, %v9539_v29 }
 0x562   :  { %v6313_v21 = vmul.f32 %v8803_v45, %v14895_v59  ;;  %vm6161_vm0 = vmand %vm16275_vm8, %vm19246_vm13  ;;  %v19259_v45 = vld [vmem:[#allocation135_spill] sm:$0xff]  ;;  %v6893_v18 = vadd.f32 %v9538_v39, %v16320_v56  ;;  %v9601_v29 = vpop.f32.mrf.mxu1 }
 0x563   :  { %vm6176_vm5 = vmand %vm6160_vm1, %vm19247_vm3  ;;  %vm19256_vm1 = vnez %v19255_v32 }
 0x564   :  { %v6326_v14 = vpack.c.bf16 %v6313_v21, %v6312_v55  ;;  %vm6177_vm6 = vmand %vm6161_vm0, %vm19248_vm12  ;;  %v8786_v7 = vsel %vm6176_vm5, 1.0, %v18983_v11  ;;  %vm19258_vm0 = vcmp.lt.s32.totalorder %v19249_v30, 2  ;;  %v6099_v55 = vadd.s32 1, %v19259_v45  ;;  %v9603_v39 = vpop.f32.mrf.mxu1 }
 0x565   :  { %v8787_v46 = vsel %vm6177_vm6, 1.0, %v18983_v11  ;;  %v6224_v57 = vmul.f32 %v8786_v7, %v15626_v48  ;;  %vm6010_vm15 = vmand %vm19252_vm11, %vm19250_vm4  ;;  %vm19260_vm5 = vcmp.lt.s32.totalorder %v19253_v4, 2 }
 0x566   :  { %7197 = vmatprep.mubr.bf16.mxu1 %v6326_v14  ;;  %v6225_v5 = vmul.f32 %v8787_v46, %v15638_v27  ;;  %vm6011_vm13 = vmand %vm19256_vm1, %vm19254_vm10  ;;  %v19261_v46 = vld [vmem:[#allocation120_spill] sm:$0xff]  ;;  %vm6131_vm8 = vcmp.lt.s32.totalorder %v6099_v55, 2 }
 0x567   :  { %vm6026_vm3 = vmand %vm6010_vm15, %vm19258_vm0  ;;  %vm19262_vm6 = vcmp.ge.s32.totalorder %v19261_v46, 0  ;;  %vm6130_vm0 = vcmp.lt.s32.totalorder %v6098_v31, 2 }
 0x568   :  { %v6238_v54 = vpack.c.bf16 %v6225_v5, %v6224_v57  ;;  %vm6027_vm12 = vmand %vm6011_vm13, %vm19260_vm5  ;;  %v8772_v21 = vsel %vm6026_vm3, 1.0, %v18983_v11  ;;  %v19263_v5 = vld [vmem:[#allocation169_spill] sm:$0xff]  ;;  %vm6114_vm13 = vcmp.ge.s32.totalorder %v6098_v31, 0  ;;  %vm19265_vm3 = vcmp.lt.s32.totalorder %v19261_v46, 2 }
 0x569   :  { %v8773_v14 = vsel %vm6027_vm12, 1.0, %v18983_v11  ;;  %v6074_v7 = vmul.f32 %v8772_v21, %v15502_v62  ;;  %vm5922_vm4 = vmand %vm19252_vm11, %vm19262_vm6  ;;  %vm19264_vm15 = vcmp.ge.s32.totalorder %v19263_v5, 0  ;;  %vm6115_vm12 = vcmp.ge.s32.totalorder %v6099_v55, 0 }
 0x56a   :  { %7198 = vmatmul.mubr.bf16.gmra.mxu1 %v6238_v54  ;;  %v6075_v57 = vmul.f32 %v8773_v14, %v15626_v48  ;;  %vm5923_vm10 = vmand %vm19256_vm1, %vm19264_vm15  ;;  %v9602_v62 = vadd.f32 %v9601_v29, %v9600_v49  ;;  %vm19266_vm11 = vcmp.lt.s32.totalorder %v19263_v5, 2  ;;  %v19267_v31 = vmov 0  ;;  %v9604_v49 = vpop.f32.mrf.mxu1  ;;  %v19276_v29 = vld [vmem:[#allocation123_spill] sm:$0xff] }
 0x56b   :  { %vm5938_vm5 = vmand %vm5922_vm4, %vm19265_vm3  ;;  %v6896_v55 = vadd.f32 %v9541_v61, %v16320_v56  ;;  %v19270_v21 = vmov 0  ;;  %vm19272_vm15 = vcmp.ge.s32.totalorder %v19261_v46, 0 }
 0x56c   :  { %v6087_v37 = vpack.c.bf16 %v6075_v57, %v6074_v7  ;;  %vm5939_vm6 = vmand %vm5923_vm10, %vm19266_vm11  ;;  %v8756_v48 = vsel %vm5938_vm5, 1.0, %v18983_v11  ;;  %v16351_v24 = vadd.f32 %v9602_v62, %v6893_v18  ;;  %v9542_v7 = vpop.f32.mrf.mxu0  ;;  %v19278_v62 = vld [vmem:[#allocation170_spill] sm:$0xff] }
 0x56d   :  { %v8757_v45 = vsel %vm5939_vm6, 1.0, %v18983_v11  ;;  %v5986_v32 = vmul.f32 %v8756_v48, %v14878_v20  ;;  %vm16347_vm1 = vmand %vm6114_vm13, %vm6130_vm0  ;;  %v9605_v20 = vadd.f32 %v9604_v49, %v9603_v39  ;;  %vm19273_vm13 = vcmp.ge.s32.totalorder %v19263_v5, 0  ;;  %v19284_v49 = vld [vmem:[#allocation157_spill] sm:$0xff] }
 0x56e   :  { %v19268_v31 = vsel %vm16347_vm1, 4294967295, %v19267_v31  ;;  %19269 = vst [vmem:[#allocation102_spill] sm:$0xff] %v16351_v24  ;;  %7108 = vmatprep.mubr.bf16.mxu0 %v6087_v37  ;;  %v5987_v54 = vmul.f32 %v8757_v45, %v14880_v50  ;;  %vm16355_vm4 = vmand %vm6115_vm12, %vm6131_vm8  ;;  %v9543_v5 = vpop.f32.mrf.mxu0 }
 0x56f   :  { %v19271_v21 = vsel %vm16355_vm4, 4294967295, %v19270_v21  ;;  %vm6250_vm10 = vmand %vm16347_vm1, %vm19272_vm15  ;;  %v16369_v50 = vadd.f32 %v9605_v20, %v6896_v55  ;;  %vm19279_vm15 = vcmp.ge.s32.totalorder %v19278_v62, 0  ;;  %v9544_v37 = vadd.f32 %v9543_v5, %v9542_v7  ;;  %v19290_v7 = vld [vmem:[#allocation137_spill] sm:$0xff] }
 0x570   :  { %v5999_v14 = vpack.c.bf16 %v5987_v54, %v5986_v32  ;;  %vm6251_vm0 = vmand %vm16355_vm4, %vm19273_vm13  ;;  %vm19280_vm13 = vcmp.lt.s32.totalorder %v19276_v29, 2  ;;  %v9545_v45 = vpop.f32.mrf.mxu0  ;;  %v19282_v54 = vld [vmem:[#allocation179_spill] sm:$0xff] }
 0x571   :  { %vm6266_vm5 = vmand %vm6250_vm10, %vm19265_vm3  ;;  %19274 = vst [vmem:[#allocation112_spill] sm:$0xff] %v16369_v50  ;;  %vm19281_vm3 = vcmp.lt.s32.totalorder %v19278_v62, 2 }
 0x572   :  { %7109 = vmatmul.mubr.bf16.gmra.mxu0 %v5999_v14  ;;  %vm19275_vm8 = vmmov %vm19266_vm11  ;;  %v8804_v61 = vsel %vm6266_vm5, 1.0, %v18983_v11  ;;  %vm19277_vm11 = vcmp.ge.s32.totalorder %v19276_v29, 0  ;;  %v19286_v14 = vld [vmem:[#allocation158_spill] sm:$0xff]  ;;  %v19292_v29 = vld [vmem:[#allocation161_spill] sm:$0xff] }
 0x573   :  { %vm6267_vm12 = vmand %vm6251_vm0, %vm19275_vm8  ;;  %v6314_v57 = vmul.f32 %v8804_v61, %v14903_v15  ;;  %vm19283_vm8 = vcmp.ge.s32.totalorder %v19282_v54, 0  ;;  %v19288_v61 = vld [vmem:[#allocation175_spill] sm:$0xff] }
 0x574   :  { %v8805_v18 = vsel %vm6267_vm12, 1.0, %v18983_v11  ;;  %vm6162_vm6 = vmand %vm16347_vm1, %vm19277_vm11  ;;  %vm19285_vm12 = vnez %v19284_v49 }
 0x575   :  { %v6315_v46 = vmul.f32 %v8805_v18, %v14905_v33  ;;  %vm6163_vm10 = vmand %vm16355_vm4, %vm19279_vm15  ;;  %vm19289_vm15 = vnez %v19288_v61  ;;  %v6100_v18 = vadd.s32 1, %v19290_v7 }
 0x576   :  { %vm6178_vm0 = vmand %vm6162_vm6, %vm19280_vm13  ;;  %vm19287_vm6 = vcmp.ge.s32.totalorder %v19286_v14, 0  ;;  %vm19291_vm13 = vcmp.lt.s32.totalorder %v19282_v54, 2 }
 0x577   :  { %v6327_v48 = vpack.c.bf16 %v6315_v46, %v6314_v57  ;;  %vm6179_vm5 = vmand %vm6163_vm10, %vm19281_vm3  ;;  %v8788_v39 = vsel %vm6178_vm0, 1.0, %v18983_v11  ;;  %v9546_v57 = vpop.f32.mrf.mxu0  ;;  %v6101_v46 = vadd.s32 1, %v19292_v29  ;;  %vm19293_vm3 = vcmp.lt.s32.totalorder %v19286_v14, 2  ;;  %v19296_v29 = vld [vmem:[#allocation92_spill] sm:$0xff]  ;;  %v19369_v14 = vld [vmem:[#allocation118_spill] sm:$0xff] }
 0x578   :  { %v8789_v32 = vsel %vm6179_vm5, 1.0, %v18983_v11  ;;  %v6226_v55 = vmul.f32 %v8788_v39, %v15761_v6  ;;  %vm6012_vm11 = vmand %vm19285_vm12, %vm19283_vm8  ;;  %v9547_v62 = vadd.f32 %v9546_v57, %v9545_v45  ;;  %vm19295_vm8 = vcmp.ge.s32.totalorder %v19294_v3, 0  ;;  %v9606_v45 = vpop.f32.mrf.mxu1 }
 0x579   :  { %7205 = vmatprep.mubr.bf16.mxu1 %v6327_v48  ;;  %v6227_v20 = vmul.f32 %v8789_v32, %v15773_v52  ;;  %vm6013_vm10 = vmand %vm19289_vm15, %vm19287_vm6  ;;  %vm6117_vm4 = vcmp.ge.s32.totalorder %v6101_v46, 0  ;;  %vm6133_vm1 = vcmp.lt.s32.totalorder %v6101_v46, 2 }
 0x57a   :  { %vm6028_vm0 = vmand %vm6012_vm11, %vm19291_vm13  ;;  %vm19297_vm11 = vcmp.ge.s32.totalorder %v19296_v29, 0  ;;  %v9607_v57 = vpop.f32.mrf.mxu1 }
 0x57b   :  { %v6239_v5 = vpack.c.bf16 %v6227_v20, %v6226_v55  ;;  %vm6029_vm5 = vmand %vm6013_vm10, %vm19293_vm3  ;;  %v8774_v48 = vsel %vm6028_vm0, 1.0, %v18983_v11  ;;  %vm6116_vm10 = vcmp.ge.s32.totalorder %v6100_v18, 0  ;;  %vm6132_vm3 = vcmp.lt.s32.totalorder %v6100_v18, 2 }
 0x57c   :  { %v8775_v39 = vsel %vm6029_vm5, 1.0, %v18983_v11  ;;  %v6076_v32 = vmul.f32 %v8774_v48, %v15638_v27  ;;  %vm5924_vm6 = vmand %vm19285_vm12, %vm19295_vm8  ;;  %vm19298_vm0 = vcmp.lt.s32.totalorder %v19294_v3, 2  ;;  %v6901_v55 = vadd.f32 %v9544_v37, %v16320_v56 }
 0x57d   :  { %7206 = vmatmul.mubr.bf16.gmra.mxu1 %v6239_v5  ;;  %v6077_v7 = vmul.f32 %v8775_v39, %v15761_v6  ;;  %vm5925_vm13 = vmand %vm19289_vm15, %vm19297_vm11  ;;  %vm19299_vm12 = vcmp.lt.s32.totalorder %v19296_v29, 2  ;;  %v19300_v18 = vmov 0  ;;  %v9608_v48 = vadd.f32 %v9607_v57, %v9606_v45  ;;  %v9609_v39 = vpop.f32.mrf.mxu1  ;;  %v19311_v57 = vld [vmem:[#allocation124_spill] sm:$0xff] }
 0x57e   :  { %vm5940_vm5 = vmand %vm5924_vm6, %vm19298_vm0  ;;  %v19302_v37 = vmov 0  ;;  %vm19305_vm11 = vcmp.ge.s32.totalorder %v19294_v3, 0  ;;  %v19314_v3 = vld [vmem:[#allocation107_spill] sm:$0xff] }
 0x57f   :  { %v6088_v49 = vpack.c.bf16 %v6077_v7, %v6076_v32  ;;  %vm5941_vm8 = vmand %vm5925_vm13, %vm19299_vm12  ;;  %v8758_v20 = vsel %vm5940_vm5, 1.0, %v18983_v11  ;;  %v16440_v32 = vadd.f32 %v9608_v48, %v6901_v55  ;;  %v19315_v48 = vld [vmem:[#allocation122_spill] sm:$0xff] }
 0x580   :  { %v8759_v61 = vsel %vm5941_vm8, 1.0, %v18983_v11  ;;  %v5988_v5 = vmul.f32 %v8758_v20, %v14882_v41  ;;  %vm16427_vm15 = vmand %vm6116_vm10, %vm6132_vm3  ;;  %v6904_v41 = vadd.f32 %v9547_v62, %v16320_v56  ;;  %vm19307_vm10 = vcmp.ge.s32.totalorder %v19296_v29, 0  ;;  %v19310_v62 = vld [vmem:[#allocation119_spill] sm:$0xff]  ;;  %v9548_v29 = vpop.f32.mrf.mxu0 }
 0x581   :  { %v19301_v18 = vsel %vm16427_vm15, 4294967295, %v19300_v18  ;;  %7116 = vmatprep.mubr.bf16.mxu0 %v6088_v49  ;;  %v5989_v46 = vmul.f32 %v8759_v61, %v14895_v59  ;;  %vm16432_vm6 = vmand %vm6117_vm4, %vm6133_vm1  ;;  %19306 = vst [vmem:[#allocation114_spill] sm:$0xff] %v16440_v32  ;;  %v9610_v59 = vpop.f32.mrf.mxu1 }
 0x582   :  { %v19303_v37 = vsel %vm16432_vm6, 4294967295, %v19302_v37  ;;  %vm6252_vm13 = vmand %vm16427_vm15, %vm19305_vm11  ;;  %v9611_v45 = vadd.f32 %v9610_v59, %v9609_v39  ;;  %vm19316_vm11 = vcmp.ge.s32.totalorder %v19315_v48, 0 }
 0x583   :  { %19304 = vst [vmem:[#allocation139_spill] sm:$0xff] %v19303_v37  ;;  %v6000_v7 = vpack.c.bf16 %v5989_v46, %v5988_v5  ;;  %vm6253_vm3 = vmand %vm16432_vm6, %vm19307_vm10  ;;  %vm19317_vm10 = vcmp.lt.s32.totalorder %v19311_v57, 2  ;;  %v19332_v37 = vld [vmem:[#allocation176_spill] sm:$0xff] }
 0x584   :  { %vm19308_vm1 = vmmov %vm19298_vm0  ;;  %v16458_v61 = vadd.f32 %v9611_v45, %v6904_v41  ;;  %v19319_v45 = vld [vmem:[#allocation167_spill] sm:$0xff] }
 0x585   :  { %vm6268_vm4 = vmand %vm6252_vm13, %vm19308_vm1  ;;  %7117 = vmatmul.mubr.bf16.gmra.mxu0 %v6000_v7  ;;  %vm19318_vm1 = vcmp.lt.s32.totalorder %v19315_v48, 2  ;;  %v9549_v7 = vpop.f32.mrf.mxu0  ;;  %v19328_v48 = vld [vmem:[#allocation154_spill] sm:$0xff] }
 0x586   :  { %vm19309_vm0 = vmmov %vm19299_vm12  ;;  %v8806_v55 = vsel %vm6268_vm4, 1.0, %v18983_v11  ;;  %vm19312_vm12 = vcmp.ge.s32.totalorder %v19311_v57, 0  ;;  %19313 = vst [vmem:[#allocation117_spill] sm:$0xff] %v16458_v61  ;;  %v19323_v57 = vld [vmem:[#allocation121_spill] sm:$0xff]  ;;  %v6102_v32 = vadd.s32 1, %v19328_v48 }
 0x587   :  { %vm6269_vm5 = vmand %vm6253_vm3, %vm19309_vm0  ;;  %v6316_v20 = vmul.f32 %v8806_v55, %v19310_v62  ;;  %vm19320_vm0 = vcmp.ge.s32.totalorder %v19319_v45, 0  ;;  %v19321_v55 = vld [vmem:[#allocation171_spill] sm:$0xff]  ;;  %v9551_v50 = vpop.f32.mrf.mxu0 }
 0x588   :  { %v8807_v49 = vsel %vm6269_vm5, 1.0, %v18983_v11  ;;  %vm6164_vm8 = vmand %vm16427_vm15, %vm19312_vm12  ;;  %vm19322_vm5 = vnez %v19321_v55 }
 0x589   :  { %v6317_v5 = vmul.f32 %v8807_v49, %v19314_v3  ;;  %vm6165_vm13 = vmand %vm16432_vm6, %vm19316_vm11  ;;  %v9550_v49 = vadd.f32 %v9549_v7, %v9548_v29 }
 0x58a   :  { %vm6180_vm3 = vmand %vm6164_vm8, %vm19317_vm10  ;;  %vm19329_vm10 = vcmp.lt.s32.totalorder %v19319_v45, 2 }
 0x58b   :  { %v6328_v46 = vpack.c.bf16 %v6317_v5, %v6316_v20  ;;  %vm6181_vm4 = vmand %vm6165_vm13, %vm19318_vm1  ;;  %v8790_v39 = vsel %vm6180_vm3, 1.0, %v18983_v11  ;;  %v19324_v20 = vld [vmem:[#allocation105_spill] sm:$0xff]  ;;  %v19326_v5 = vld [vmem:[#allocation174_spill] sm:$0xff] }
 0x58c   :  { %v8791_v41 = vsel %vm6181_vm4, 1.0, %v18983_v11  ;;  %v6228_v59 = vmul.f32 %v8790_v39, %v14983_v0  ;;  %vm6014_vm12 = vmand %vm19322_vm5, %vm19320_vm0  ;;  %vm19325_vm8 = vcmp.ge.s32.totalorder %v19324_v20, 0  ;;  %vm19327_vm11 = vnez %v19326_v5  ;;  %v19330_v39 = vld [vmem:[#allocation173_spill] sm:$0xff] }
 0x58d   :  { %7213 = vmatprep.mubr.bf16.mxu1 %v6328_v46  ;;  %v6229_v61 = vmul.f32 %v8791_v41, %v19323_v57  ;;  %vm6015_vm13 = vmand %vm19327_vm11, %vm19325_vm8  ;;  %v6103_v24 = vadd.s32 1, %v19330_v39  ;;  %vm19331_vm1 = vcmp.lt.s32.totalorder %v19324_v20, 2  ;;  %v9552_v46 = vpop.f32.mrf.mxu0  ;;  %vm19333_vm0 = vcmp.ge.s32.totalorder %v19332_v37, 0 }
 0x58e   :  { %vm6030_vm3 = vmand %vm6014_vm12, %vm19329_vm10  ;;  %v9553_v48 = vadd.f32 %v9552_v46, %v9551_v50  ;;  %vm6118_vm10 = vcmp.ge.s32.totalorder %v6102_v32, 0  ;;  %v9612_v50 = vpop.f32.mrf.mxu1  ;;  %v19338_v5 = vmov 0  ;;  %v19341_v46 = vmov 0 }
 0x58f   :  { %v6240_v13 = vpack.c.bf16 %v6229_v61, %v6228_v59  ;;  %vm6031_vm4 = vmand %vm6015_vm13, %vm19331_vm1  ;;  %v8776_v29 = vsel %vm6030_vm3, 1.0, %v18983_v11  ;;  %v19334_v61 = vld [vmem:[#allocation177_spill] sm:$0xff]  ;;  %vm6134_vm3 = vcmp.lt.s32.totalorder %v6102_v32, 2  ;;  %vm19336_vm1 = vcmp.lt.s32.totalorder %v19332_v37, 2 }
 0x590   :  { %v8777_v7 = vsel %vm6031_vm4, 1.0, %v18983_v11  ;;  %v6078_v41 = vmul.f32 %v8776_v29, %v15773_v52  ;;  %vm5926_vm8 = vmand %vm19322_vm5, %vm19333_vm0  ;;  %vm19335_vm12 = vcmp.ge.s32.totalorder %v19334_v61, 0  ;;  %vm6119_vm6 = vcmp.ge.s32.totalorder %v6103_v24, 0 }
 0x591   :  { %7214 = vmatmul.mubr.bf16.gmra.mxu1 %v6240_v13  ;;  %v6079_v39 = vmul.f32 %v8777_v7, %v14983_v0  ;;  %vm5927_vm13 = vmand %vm19327_vm11, %vm19335_vm12  ;;  %vm6135_vm15 = vcmp.lt.s32.totalorder %v6103_v24, 2  ;;  %vm19337_vm9 = vcmp.lt.s32.totalorder %v19334_v61, 2  ;;  %v6909_v32 = vadd.f32 %v9550_v49, %v16320_v56  ;;  %v9613_v7 = vpop.f32.mrf.mxu1 }
 0x592   :  { %vm5942_vm4 = vmand %vm5926_vm8, %vm19336_vm1 }
 0x593   :  { %v6089_v59 = vpack.c.bf16 %v6079_v39, %v6078_v41  ;;  %vm5943_vm5 = vmand %vm5927_vm13, %vm19337_vm9  ;;  %v8760_v13 = vsel %vm5942_vm4, 1.0, %v18983_v11  ;;  %vm19344_vm9 = vcmp.ge.s32.totalorder %v19332_v37, 0  ;;  %v9615_v49 = vpop.f32.mrf.mxu1  ;;  %v6912_v39 = vadd.f32 %v9553_v48, %v16320_v56  ;;  %v19352_v48 = vld [vmem:[#allocation163_spill] sm:$0xff] }
 0x594   :  { %v8761_v55 = vsel %vm5943_vm5, 1.0, %v18983_v11  ;;  %v5990_v29 = vmul.f32 %v8760_v13, %v14903_v15  ;;  %vm16506_vm0 = vmand %vm6118_vm10, %vm6134_vm3  ;;  %v9614_v15 = vadd.f32 %v9613_v7, %v9612_v50  ;;  %vm19353_vm5 = vcmp.ge.s32.totalorder %v19352_v48, 0 }
 0x595   :  { %v19339_v5 = vsel %vm16506_vm0, 4294967295, %v19338_v5  ;;  %7124 = vmatprep.mubr.bf16.mxu0 %v6089_v59  ;;  %v5991_v24 = vmul.f32 %v8761_v55, %v14905_v33  ;;  %vm16512_vm11 = vmand %vm6119_vm6, %vm6135_vm15  ;;  %vm19347_vm6 = vcmp.lt.s32.totalorder %v19334_v61, 2  ;;  %v9616_v13 = vpop.f32.mrf.mxu1  ;;  %v19348_v55 = vld [vmem:[#allocation83_spill] sm:$0xff] }
 0x596   :  { %19340 = vst [vmem:[#allocation144_spill] sm:$0xff] %v19339_v5  ;;  %v19342_v46 = vsel %vm16512_vm11, 4294967295, %v19341_v46  ;;  %vm6254_vm8 = vmand %vm16506_vm0, %vm19344_vm9  ;;  %v16526_v33 = vadd.f32 %v9614_v15, %v6909_v32  ;;  %v9617_v37 = vadd.f32 %v9616_v13, %v9615_v49  ;;  %v19351_v32 = vld [vmem:[#allocation108_spill] sm:$0xff] }
 0x597   :  { %19343 = vst [vmem:[#allocation77_spill] sm:$0xff] %v19342_v46  ;;  %v6001_v41 = vpack.c.bf16 %v5991_v24, %v5990_v29  ;;  %vm6255_vm13 = vmand %vm16512_vm11, %vm19335_vm12  ;;  %v19349_v24 = vld [vmem:[#allocation160_spill] sm:$0xff] }
 0x598   :  { %vm19345_vm10 = vmmov %vm19336_vm1  ;;  %19346 = vst [vmem:[#allocation115_spill] sm:$0xff] %v16526_v33  ;;  %vm19350_vm1 = vcmp.ge.s32.totalorder %v19349_v24, 0  ;;  %v16545_v61 = vadd.f32 %v9617_v37, %v6912_v39  ;;  %v19359_v33 = vld [vmem:[#allocation106_spill] sm:$0xff]  ;;  %v19365_v37 = vld [vmem:[#allocation168_spill] sm:$0xff] }
 0x599   :  { %vm6270_vm15 = vmand %vm6254_vm8, %vm19345_vm10  ;;  %7125 = vmatmul.mubr.bf16.gmra.mxu0 %v6001_v41  ;;  %vm19354_vm8 = vcmp.lt.s32.totalorder %v19349_v24, 2  ;;  %v19361_v24 = vld [vmem:[#allocation159_spill] sm:$0xff] }
 0x59a   :  { %vm6271_vm3 = vmand %vm6255_vm13, %vm19347_vm6  ;;  %v8808_v59 = vsel %vm6270_vm15, 1.0, %v18983_v11  ;;  %19355 = vst [vmem:[#allocation147_spill] sm:$0xff] %v16545_v61  ;;  %vm19356_vm13 = vcmp.lt.s32.totalorder %v19352_v48, 2  ;;  %vm19360_vm6 = vnez %v19359_v33 }
 0x59b   :  { %v8809_v50 = vsel %vm6271_vm3, 1.0, %v18983_v11  ;;  %v6318_v29 = vmul.f32 %v8808_v59, %v19348_v55  ;;  %vm6166_vm4 = vmand %vm16506_vm0, %vm19350_vm1  ;;  %v9554_v59 = vpop.f32.mrf.mxu0  ;;  %vm19362_vm1 = vcmp.ge.s32.totalorder %v19361_v24, 0 }
 0x59c   :  { %v6319_v7 = vmul.f32 %v8809_v50, %v19351_v32  ;;  %vm6167_vm9 = vmand %vm16512_vm11, %vm19353_vm5  ;;  %v19357_v50 = vld [vmem:[#allocation181_spill] sm:$0xff] }
 0x59d   :  { %vm6182_vm12 = vmand %vm6166_vm4, %vm19354_vm8  ;;  %vm19358_vm15 = vcmp.ge.s32.totalorder %v19357_v50, 0  ;;  %v9555_v48 = vpop.f32.mrf.mxu0 }
 0x59e   :  { %v6329_v15 = vpack.c.bf16 %v6319_v7, %v6318_v29  ;;  %vm6183_vm10 = vmand %vm6167_vm9, %vm19356_vm13  ;;  %v8792_v41 = vsel %vm6182_vm12, 1.0, %v18983_v11  ;;  %v19363_v29 = vld [vmem:[#allocation136_spill] sm:$0xff]  ;;  %v6104_v7 = vadd.s32 1, %v19365_v37  ;;  %vm19366_vm9 = vcmp.lt.s32.totalorder %v19357_v50, 2 }
 0x59f   :  { %v8793_v49 = vsel %vm6183_vm10, 1.0, %v18983_v11  ;;  %v6230_v13 = vmul.f32 %v8792_v41, %v15087_v51  ;;  %vm6016_vm3 = vmand %vm19360_vm6, %vm19358_vm15  ;;  %vm19364_vm4 = vnez %v19363_v29  ;;  %v19367_v41 = vld [vmem:[#allocation172_spill] sm:$0xff]  ;;  %v9556_v46 = vadd.f32 %v9555_v48, %v9554_v59  ;;  %v19371_v59 = vld [vmem:[#allocation103_spill] sm:$0xff] }
 0x5a0   :  { %7221 = vmatprep.mubr.bf16.mxu1 %v6329_v15  ;;  %v6231_v39 = vmul.f32 %v8793_v49, %v15156_v38  ;;  %vm6017_vm5 = vmand %vm19364_vm4, %vm19362_vm1  ;;  %v6105_v61 = vadd.s32 1, %v19367_v41  ;;  %vm19368_vm12 = vcmp.lt.s32.totalorder %v19361_v24, 2  ;;  %v9557_v49 = vpop.f32.mrf.mxu0  ;;  %vm19370_vm10 = vcmp.ge.s32.totalorder %v19369_v14, 0 }
 0x5a1   :  { %vm6032_vm8 = vmand %vm6016_vm3, %vm19366_vm9  ;;  %vm19372_vm3 = vcmp.ge.s32.totalorder %v19371_v59, 0  ;;  %vm6136_vm9 = vcmp.lt.s32.totalorder %v6104_v7, 2  ;;  %v6917_v41 = vadd.f32 %v9556_v46, %v16320_v56 }
 0x5a2   :  { %v6241_v20 = vpack.c.bf16 %v6231_v39, %v6230_v13  ;;  %vm6033_vm13 = vmand %vm6017_vm5, %vm19368_vm12  ;;  %v8778_v15 = vsel %vm6032_vm8, 1.0, %v18983_v11  ;;  %vm6120_vm5 = vcmp.ge.s32.totalorder %v6104_v7, 0  ;;  %v9558_v13 = vpop.f32.mrf.mxu0  ;;  %vm19373_vm8 = vcmp.lt.s32.totalorder %v19369_v14, 2 }
 0x5a3   :  { %v8779_v5 = vsel %vm6033_vm13, 1.0, %v18983_v11  ;;  %v6080_v45 = vmul.f32 %v8778_v15, %v19323_v57  ;;  %vm5928_vm15 = vmand %vm19360_vm6, %vm19370_vm10  ;;  %vm6121_vm13 = vcmp.ge.s32.totalorder %v6105_v61, 0  ;;  %vm6137_vm11 = vcmp.lt.s32.totalorder %v6105_v61, 2 }
 0x5a4   :  { %7222 = vmatmul.mubr.bf16.gmra.mxu1 %v6241_v20  ;;  %v6081_v37 = vmul.f32 %v8779_v5, %v15087_v51  ;;  %vm5929_vm1 = vmand %vm19364_vm4, %vm19372_vm3  ;;  %v9559_v39 = vadd.f32 %v9558_v13, %v9557_v49  ;;  %vm19374_vm6 = vcmp.lt.s32.totalorder %v19371_v59, 2  ;;  %vm19379_vm3 = vcmp.ge.s32.totalorder %v19369_v14, 0 }
 0x5a5   :  { %vm5944_vm12 = vmand %vm5928_vm15, %vm19373_vm8 }
 0x5a6   :  { %v6090_v48 = vpack.c.bf16 %v6081_v37, %v6080_v45  ;;  %vm5945_vm10 = vmand %vm5929_vm1, %vm19374_vm6  ;;  %v8762_v20 = vsel %vm5944_vm12, 1.0, %v18983_v11  ;;  %v9618_v45 = vpop.f32.mrf.mxu1  ;;  %v6920_v14 = vadd.f32 %v9559_v39, %v16320_v56 }
 0x5a7   :  { %v8763_v5 = vsel %vm5945_vm10, 1.0, %v18983_v11  ;;  %v5992_v33 = vmul.f32 %v8762_v20, %v19310_v62  ;;  %vm16586_vm4 = vmand %vm6120_vm5, %vm6136_vm9  ;;  %vm19380_vm5 = vcmp.ge.s32.totalorder %v19371_v59, 0  ;;  %v19385_v59 = vld [vmem:[#allocation180_spill] sm:$0xff] }
 0x5a8   :  { %7132 = vmatprep.mubr.bf16.mxu0 %v6090_v48  ;;  %v5993_v7 = vmul.f32 %v8763_v5, %v19314_v3  ;;  %vm16591_vm15 = vmand %vm6121_vm13, %vm6137_vm11  ;;  %v9619_v15 = vpop.f32.mrf.mxu1  ;;  %v19383_v48 = vld [vmem:[#allocation178_spill] sm:$0xff] }
 0x5a9   :  { %vm6256_vm1 = vmand %vm16586_vm4, %vm19379_vm3  ;;  %v9620_v3 = vadd.f32 %v9619_v15, %v9618_v45  ;;  %vm19386_vm3 = vcmp.ge.s32.totalorder %v19385_v59, 0 }
 0x5aa   :  { %v6002_v62 = vpack.c.bf16 %v5993_v7, %v5992_v33  ;;  %vm6257_vm9 = vmand %vm16591_vm15, %vm19380_vm5  ;;  %v9621_v37 = vpop.f32.mrf.mxu1  ;;  %vm19387_vm5 = vcmp.lt.s32.totalorder %v19383_v48, 2 }
 0x5ab   :  { %vm19381_vm11 = vmmov %vm19373_vm8  ;;  %v16615_v20 = vadd.f32 %v9620_v3, %v6917_v41  ;;  %v19389_v41 = vld [vmem:[#allocation146_spill] sm:$0xff]  ;;  %v19392_v3 = vld [vmem:[#allocation101_spill] sm:$0xff] }
 0x5ac   :  { %vm6272_vm8 = vmand %vm6256_vm1, %vm19381_vm11  ;;  %7133 = vmatmul.mubr.bf16.gmra.mxu0 %v6002_v62  ;;  %v9622_v33 = vpop.f32.mrf.mxu1  ;;  %vm19388_vm11 = vcmp.lt.s32.totalorder %v19385_v59, 2 }
 0x5ad   :  { %vm19382_vm12 = vmmov %vm19374_vm6  ;;  %v8810_v49 = vsel %vm6272_vm8, 1.0, %v18983_v11  ;;  %vm19384_vm6 = vcmp.ge.s32.totalorder %v19383_v48, 0 }
 0x5ae   :  { %vm6273_vm13 = vmand %vm6257_vm9, %vm19382_vm12  ;;  %v6320_v13 = vmul.f32 %v8810_v49, %v14839_v28  ;;  %v9623_v28 = vadd.f32 %v9622_v33, %v9621_v37  ;;  %vm19390_vm12 = vcmp.ge.s32.totalorder %v16022_v60, 0  ;;  %v6106_v49 = vadd.s32 1, %v19392_v3  ;;  %v9560_v37 = vpop.f32.mrf.mxu0 }
 0x5af   :  { %v8811_v46 = vsel %vm6273_vm13, 1.0, %v18983_v11  ;;  %vm6168_vm10 = vmand %vm16586_vm4, %vm19384_vm6  ;;  %vm19391_vm6 = vcmp.ge.s32.totalorder %v16031_v36, 0 }
 0x5b0   :  { %v6321_v5 = vmul.f32 %v8811_v46, %v14853_v19  ;;  %vm6169_vm1 = vmand %vm16591_vm15, %vm19386_vm3  ;;  %v16634_v62 = vadd.f32 %v9623_v28, %v6920_v14  ;;  %vm19393_vm3 = vcmp.lt.s32.totalorder %v16022_v60, 2  ;;  %v6107_v46 = vadd.s32 1, %v15883_v12  ;;  %v9561_v14 = vpop.f32.mrf.mxu0 }
 0x5b1   :  { %vm6184_vm9 = vmand %vm6168_vm10, %vm19387_vm5  ;;  %vm19394_vm5 = vcmp.lt.s32.totalorder %v16031_v36, 2  ;;  %v9562_v33 = vadd.f32 %v9561_v14, %v9560_v37 }
 0x5b2   :  { %v6330_v7 = vpack.c.bf16 %v6321_v5, %v6320_v13  ;;  %vm6185_vm8 = vmand %vm6169_vm1, %vm19388_vm11  ;;  %v8794_v45 = vsel %vm6184_vm9, 1.0, %v18983_v11  ;;  %vm19395_vm11 = vcmp.ge.s32.totalorder %v15909_v58, 0  ;;  %v9563_v28 = vpop.f32.mrf.mxu0 }
 0x5b3   :  { %v8795_v39 = vsel %vm6185_vm8, 1.0, %v18983_v11  ;;  %v6232_v19 = vmul.f32 %v8794_v45, %v19389_v41  ;;  %vm6018_vm13 = vmand %vm16026_vm7, %vm19390_vm12  ;;  %vm19396_vm12 = vcmp.ge.s32.totalorder %v15919_v2, 0 }
 0x5b4   :  { %7229 = vmatprep.mubr.bf16.mxu1 %v6330_v7  ;;  %v6233_v15 = vmul.f32 %v8795_v39, %v15051_v16  ;;  %vm6019_vm10 = vmand %vm16034_vm14, %vm19391_vm6  ;;  %vm6122_vm6 = vcmp.ge.s32.totalorder %v6106_v49, 0  ;;  %v9564_v45 = vpop.f32.mrf.mxu0 }
 0x5b5   :  { %vm6034_vm1 = vmand %vm6018_vm13, %vm19393_vm3  ;;  %vm19397_vm3 = vcmp.lt.s32.totalorder %v15909_v58, 2 }
 0x5b6   :  { %v6242_v13 = vpack.c.bf16 %v6233_v15, %v6232_v19  ;;  %vm6035_vm9 = vmand %vm6019_vm10, %vm19394_vm5  ;;  %v8780_v48 = vsel %vm6034_vm1, 1.0, %v18983_v11  ;;  %vm6138_vm10 = vcmp.lt.s32.totalorder %v6106_v49, 2  ;;  %vm6123_vm5 = vcmp.ge.s32.totalorder %v6107_v46, 0  ;;  %v19456_v49 = vld [vmem:[#allocation104_spill] sm:$0xff] }
 0x5b7   :  { %v8781_v5 = vsel %vm6035_vm9, 1.0, %v18983_v11  ;;  %v6082_v59 = vmul.f32 %v8780_v48, %v15156_v38  ;;  %vm5930_vm8 = vmand %vm16026_vm7, %vm19395_vm11  ;;  %vm6139_vm9 = vcmp.lt.s32.totalorder %v6107_v46, 2  ;;  %vm19398_vm7 = vcmp.lt.s32.totalorder %v15919_v2, 2 }
 0x5b8   :  { %7230 = vmatmul.mubr.bf16.gmra.mxu1 %v6242_v13  ;;  %v6083_v12 = vmul.f32 %v8781_v5, %v19389_v41  ;;  %vm5931_vm13 = vmand %vm16034_vm14, %vm19396_vm12  ;;  %v9565_v15 = vadd.f32 %v9564_v45, %v9563_v28  ;;  %vm19403_vm12 = vcmp.ge.s32.totalorder %v15909_v58, 0  ;;  %v19407_v5 = vld [vmem:[#allocation116_spill] sm:$0xff] }
 0x5b9   :  { %vm5946_vm1 = vmand %vm5930_vm8, %vm19397_vm3  ;;  %vm19404_vm3 = vcmp.ge.s32.totalorder %v15919_v2, 0 }
 0x5ba   :  { %v6091_v7 = vpack.c.bf16 %v6083_v12, %v6082_v59  ;;  %vm5947_vm11 = vmand %vm5931_vm13, %vm19398_vm7  ;;  %v8764_v63 = vsel %vm5946_vm1, 1.0, %v18983_v11 }
 0x5bb   :  { %v8765_v39 = vsel %vm5947_vm11, 1.0, %v18983_v11  ;;  %v5994_v42 = vmul.f32 %v8764_v63, %v19348_v55  ;;  %vm16666_vm14 = vmand %vm6122_vm6, %vm6138_vm10  ;;  %v9624_v55 = vpop.f32.mrf.mxu1  ;;  %vm19405_vm10 = vcmp.lt.s32.totalorder %v15909_v58, 2 }
 0x5bc   :  { %7140 = vmatprep.mubr.bf16.mxu0 %v6091_v7  ;;  %v5995_v3 = vmul.f32 %v8765_v39, %v19351_v32  ;;  %vm16671_vm8 = vmand %vm6123_vm5, %vm6139_vm9  ;;  %v6925_v32 = vadd.f32 %v9562_v33, %v16320_v56  ;;  %v19409_v33 = vld [vmem:[#allocation128_spill] sm:$0xff] }
 0x5bd   :  { %vm6258_vm13 = vmand %vm16666_vm14, %vm19403_vm12  ;;  %v9625_v13 = vpop.f32.mrf.mxu1  ;;  %vm19410_vm12 = vcmp.ge.s32.totalorder %v19409_v33, 0 }
 0x5be   :  { %v6003_v37 = vpack.c.bf16 %v5995_v3, %v5994_v42  ;;  %vm6259_vm6 = vmand %vm16671_vm8, %vm19404_vm3  ;;  %v9626_v58 = vadd.f32 %v9625_v13, %v9624_v55  ;;  %vm19411_vm3 = vcmp.lt.s32.totalorder %v19407_v5, 2 }
 0x5bf   :  { %vm6274_vm1 = vmand %vm6258_vm13, %vm19405_vm10  ;;  %v9627_v2 = vpop.f32.mrf.mxu1  ;;  %vm19412_vm10 = vcmp.lt.s32.totalorder %v19409_v33, 2 }
 0x5c0   :  { %7141 = vmatmul.mubr.bf16.gmra.mxu0 %v6003_v37  ;;  %vm19406_vm5 = vmmov %vm19398_vm7  ;;  %v8812_v46 = vsel %vm6274_vm1, 1.0, %v18983_v11  ;;  %vm19408_vm7 = vcmp.ge.s32.totalorder %v19407_v5, 0  ;;  %v16702_v12 = vadd.f32 %v9626_v58, %v6925_v32  ;;  %v9566_v37 = vpop.f32.mrf.mxu0 }
 0x5c1   :  { %vm6275_vm9 = vmand %vm6259_vm6, %vm19406_vm5  ;;  %v6322_v14 = vmul.f32 %v8812_v46, %v14862_v40  ;;  %v6928_v40 = vadd.f32 %v9565_v15, %v16320_v56  ;;  %vm19413_vm5 = vcmp.ge.s32.totalorder %v15005_v35, 0 }
 0x5c2   :  { %v8813_v48 = vsel %vm6275_vm9, 1.0, %v18983_v11  ;;  %vm6170_vm11 = vmand %vm16666_vm14, %vm19408_vm7  ;;  %vm19414_vm7 = vcmp.ge.s32.totalorder %v15017_v47, 0 }
 0x5c3   :  { %v6323_v59 = vmul.f32 %v8813_v48, %v14864_v1  ;;  %vm6171_vm13 = vmand %vm16671_vm8, %vm19410_vm12  ;;  %v9628_v1 = vpop.f32.mrf.mxu1 }
 0x5c4   :  { %vm6186_vm6 = vmand %vm6170_vm11, %vm19411_vm3  ;;  %v9629_v39 = vadd.f32 %v9628_v1, %v9627_v2  ;;  %vm19415_vm11 = vnez %v19182_v26 }
 0x5c5   :  { %v6331_v28 = vpack.c.bf16 %v6323_v59, %v6322_v14  ;;  %vm6187_vm1 = vmand %vm6171_vm13, %vm19412_vm10  ;;  %v8796_v7 = vsel %vm6186_vm6, 1.0, %v18983_v11  ;;  %vm19416_vm13 = vcmp.lt.s32.totalorder %v15005_v35, 2  ;;  %vm19417_vm6 = vcmp.lt.s32.totalorder %v15017_v47, 2  ;;  %v9567_v47 = vpop.f32.mrf.mxu0  ;;  %v19439_v59 = vld [vmem:[#allocation167_spill] sm:$0xff] }
 0x5c6   :  { %v8797_v63 = vsel %vm6187_vm1, 1.0, %v18983_v11  ;;  %v6234_v45 = vmul.f32 %v8796_v7, %v15205_v34  ;;  %vm6332_vm9 = vmand %vm16099_vm2, %vm19413_vm5  ;;  %v16721_v15 = vadd.f32 %v9629_v39, %v6928_v40  ;;  %vm19418_vm2 = vcmp.ge.s32.totalorder %v19218_v17, 0  ;;  %v19442_v40 = vld [vmem:[#allocation105_spill] sm:$0xff] }
 0x5c7   :  { %7237 = vmatprep.mubr.bf16.mxu1 %v6331_v28  ;;  %v6235_v42 = vmul.f32 %v8797_v63, %v15217_v22  ;;  %vm6333_vm12 = vmand %vm19415_vm11, %vm19414_vm7  ;;  %vm19419_vm1 = vnez %v19237_v44  ;;  %vm19421_vm7 = vnez %v19239_v25  ;;  %v9568_v26 = vadd.f32 %v9567_v47, %v9566_v37  ;;  %v9569_v44 = vpop.f32.mrf.mxu0  ;;  %v19444_v28 = vld [vmem:[#allocation77_spill] sm:$0xff] }
 0x5c8   :  { %vm6348_vm3 = vmand %vm6332_vm9, %vm19416_vm13  ;;  %vm19420_vm9 = vcmp.ge.s32.totalorder %v19222_v8, 0  ;;  %v19428_v25 = vpack.c.bf16 %v16225_v23, %v16218_v43  ;;  %v19433_v23 = vld [vmem:[#allocation158_spill] sm:$0xff] }
 0x5c9   :  { %v6243_v3 = vpack.c.bf16 %v6235_v42, %v6234_v45  ;;  %vm6349_vm10 = vmand %vm6333_vm12, %vm19417_vm6  ;;  %v8814_v53 = vsel %vm6348_vm3, 1.0, %v18983_v11  ;;  %vm19422_vm12 = vcmp.lt.s32.totalorder %v19218_v17, 2  ;;  %vm19423_vm3 = vcmp.lt.s32.totalorder %v19222_v8, 2  ;;  %v9570_v8 = vpop.f32.mrf.mxu0 }
 0x5ca   :  { %v8815_v55 = vsel %vm6349_vm10, 1.0, %v18983_v11  ;;  %v6396_v32 = vmul.f32 %v8814_v53, %v15365_v10  ;;  %vm6336_vm5 = vmand %vm19419_vm1, %vm19418_vm2  ;;  %vm19424_vm10 = vcmp.ge.s32.totalorder %v19249_v30, 0  ;;  %vm19425_vm2 = vnez %v19268_v31 }
 0x5cb   :  { %7238 = vmatmul.mubr.bf16.gmra.mxu1 %v6243_v3  ;;  %v6397_v35 = vmul.f32 %v8815_v55, %v19217_v9  ;;  %vm6337_vm11 = vmand %vm19421_vm7, %vm19420_vm9  ;;  %vm19427_vm9 = vnez %v19271_v21  ;;  %v6933_v14 = vadd.f32 %v9568_v26, %v16320_v56 }
 0x5cc   :  { %vm6352_vm13 = vmand %vm6336_vm5, %vm19422_vm12  ;;  %vm19426_vm5 = vcmp.ge.s32.totalorder %v19253_v4, 0 }
 0x5cd   :  { %v6412_v46 = vpack.c.bf16 %v6397_v35, %v6396_v32  ;;  %vm6353_vm6 = vmand %vm6337_vm11, %vm19423_vm3  ;;  %v8818_v10 = vsel %vm6352_vm13, 1.0, %v18983_v11  ;;  %vm19429_vm11 = vcmp.lt.s32.totalorder %v19249_v30, 2  ;;  %vm19430_vm13 = vcmp.lt.s32.totalorder %v19253_v4, 2  ;;  %v19435_v30 = vld [vmem:[#allocation139_spill] sm:$0xff]  ;;  %v9630_v4 = vpop.f32.mrf.mxu1 }
 0x5ce   :  { %v8819_v13 = vsel %vm6353_vm6, 1.0, %v18983_v11  ;;  %v6400_v9 = vmul.f32 %v8818_v10, %v15638_v27  ;;  %vm6338_vm1 = vmand %vm19425_vm2, %vm19424_vm10  ;;  %v9571_v27 = vadd.f32 %v9570_v8, %v9569_v44  ;;  %vm19431_vm6 = vcmp.ge.s32.totalorder %v19282_v54, 0 }
 0x5cf   :  { %9925 = vmatprep.mubr.bf16.mxu0 %v6412_v46  ;;  %v6401_v17 = vmul.f32 %v8819_v13, %v15761_v6  ;;  %vm6339_vm7 = vmand %vm19427_vm9, %vm19426_vm5  ;;  %vm19432_vm10 = vnez %v19301_v18  ;;  %vm19436_vm5 = vnez %v19435_v30  ;;  %v9631_v5 = vpop.f32.mrf.mxu1 }
 0x5d0   :  { %9926 = vmatmul.mubr.bf16.vlgmr.msra.gmra.mxu0 %v19428_v25  ;;  %vm6354_vm12 = vmand %vm6338_vm1, %vm19429_vm11  ;;  %vm19434_vm1 = vcmp.ge.s32.totalorder %v19433_v23, 0  ;;  %v9572_v55 = vpop.f32.mrf.mxu0 }
 0x5d1   :  { %v6414_v48 = vpack.c.bf16 %v6401_v17, %v6400_v9  ;;  %vm6355_vm3 = vmand %vm6339_vm7, %vm19430_vm13  ;;  %v8820_v6 = vsel %vm6354_vm12, 1.0, %v18983_v11  ;;  %vm19437_vm7 = vcmp.lt.s32.totalorder %v19282_v54, 2  ;;  %vm19438_vm12 = vcmp.lt.s32.totalorder %v19433_v23, 2  ;;  %v9633_v7 = vpop.f32.mrf.mxu1 }
 0x5d2   :  { %v8821_v31 = vsel %vm6355_vm3, 1.0, %v18983_v11  ;;  %v6402_v21 = vmul.f32 %v8820_v6, %v15773_v52  ;;  %vm6340_vm2 = vmand %vm19432_vm10, %vm19431_vm6  ;;  %vm19440_vm3 = vcmp.ge.s32.totalorder %v19439_v59, 0  ;;  %v9632_v54 = vadd.f32 %v9631_v5, %v9630_v4 }
 0x5d3   :  { %9929 = vmatprep.mubr.bf16.mxu0 %v6414_v48  ;;  %v6403_v43 = vmul.f32 %v8821_v31, %v14983_v0  ;;  %vm6341_vm9 = vmand %vm19436_vm5, %vm19434_vm1  ;;  %vm19443_vm10 = vcmp.ge.s32.totalorder %v19442_v40, 0  ;;  %vm19446_vm5 = vcmp.lt.s32.totalorder %v19439_v59, 2  ;;  %v9634_v45 = vpop.f32.mrf.mxu1 }
 0x5d4   :  { %vm6356_vm11 = vmand %vm6340_vm2, %vm19437_vm7  ;;  %vm19445_vm2 = vnez %v19444_v28  ;;  %v16791_v1 = vadd.f32 %v9632_v54, %v6933_v14  ;;  %v9635_v3 = vadd.f32 %v9634_v45, %v9633_v7  ;;  %v19460_v54 = vld [vmem:[#allocation102_spill] sm:$0xff]  ;;  %v19461_v7 = vld [vmem:[#allocation112_spill] sm:$0xff] }
 0x5d5   :  { %v6415_v52 = vpack.c.bf16 %v6403_v43, %v6402_v21  ;;  %vm6357_vm13 = vmand %vm6341_vm9, %vm19438_vm12  ;;  %v8822_v18 = vsel %vm6356_vm11, 1.0, %v18983_v11  ;;  %vm19448_vm11 = vcmp.ge.s32.totalorder %v19357_v50, 0 }
 0x5d6   :  { %v8823_v0 = vsel %vm6357_vm13, 1.0, %v18983_v11  ;;  %v6404_v58 = vmul.f32 %v8822_v18, %v19323_v57  ;;  %vm6342_vm6 = vmand %vm16506_vm0, %vm19440_vm3  ;;  %v6936_v57 = vadd.f32 %v9571_v27, %v16320_v56  ;;  %vm19447_vm0 = vcmp.lt.s32.totalorder %v19442_v40, 2 }
 0x5d7   :  { %v6405_v2 = vmul.f32 %v8823_v0, %v15087_v51  ;;  %vm6343_vm1 = vmand %vm19445_vm2, %vm19443_vm10  ;;  %vm19449_vm13 = vcmp.ge.s32.totalorder %v19361_v24, 0  ;;  %vm19451_vm2 = vcmp.lt.s32.totalorder %v19361_v24, 2  ;;  %v9573_v24 = vpop.f32.mrf.mxu0 }
 0x5d8   :  { %9930 = vmatmul.mubr.bf16.gmra.mxu0 %v6415_v52  ;;  %vm6358_vm9 = vmand %vm6342_vm6, %vm19446_vm5  ;;  %vm19450_vm6 = vcmp.lt.s32.totalorder %v19357_v50, 2  ;;  %v16810_v37 = vadd.f32 %v9635_v3, %v6936_v57  ;;  %vm19453_vm5 = vcmp.ge.s32.totalorder %v16031_v36, 0  ;;  %v9574_v61 = vadd.f32 %v9573_v24, %v9572_v55 }
 0x5d9   :  { %v6416_v63 = vpack.c.bf16 %v6405_v2, %v6404_v58  ;;  %vm6359_vm7 = vmand %vm6343_vm1, %vm19447_vm0  ;;  %v8824_v51 = vsel %vm6358_vm9, 1.0, %v18983_v11  ;;  %vm19454_vm0 = vcmp.lt.s32.totalorder %v16022_v60, 2  ;;  %v9575_v19 = vpop.f32.mrf.mxu0 }
 0x5da   :  { %v8825_v39 = vsel %vm6359_vm7, 1.0, %v18983_v11  ;;  %v6406_v42 = vmul.f32 %v8824_v51, %v15156_v38  ;;  %vm6344_vm12 = vmand %vm16586_vm4, %vm19448_vm11  ;;  %vm19452_vm4 = vcmp.ge.s32.totalorder %v16022_v60, 0  ;;  %vm19455_vm11 = vcmp.lt.s32.totalorder %v16031_v36, 2 }
 0x5db   :  { %9933 = vmatprep.mubr.bf16.mxu0 %v6416_v63  ;;  %v6407_v53 = vmul.f32 %v8825_v39, %v19389_v41  ;;  %vm6345_vm3 = vmand %vm16591_vm15, %vm19449_vm13  ;;  %v9576_v46 = vpop.f32.mrf.mxu0  ;;  %v6941_v13 = vadd.f32 %v9574_v61, %v16320_v56  ;;  %v19462_v39 = vld [vmem:[#allocation114_spill] sm:$0xff] }
 0x5dc   :  { %vm6360_vm10 = vmand %vm6344_vm12, %vm19450_vm6  ;;  %v9577_v10 = vadd.f32 %v9576_v46, %v9575_v19  ;;  %v9636_v60 = vpop.f32.mrf.mxu1  ;;  %v19464_v19 = vld [vmem:[#allocation115_spill] sm:$0xff] }
 0x5dd   :  { %v6417_v38 = vpack.c.bf16 %v6407_v53, %v6406_v42  ;;  %vm6361_vm1 = vmand %vm6345_vm3, %vm19451_vm2  ;;  %v8826_v29 = vsel %vm6360_vm10, 1.0, %v18983_v11  ;;  %v19465_v46 = vld [vmem:[#allocation147_spill] sm:$0xff] }
 0x5de   :  { %v8827_v32 = vsel %vm6361_vm1, 1.0, %v18983_v11  ;;  %v6408_v41 = vmul.f32 %v8826_v29, %v15051_v16  ;;  %vm6346_vm15 = vmand %vm16666_vm14, %vm19452_vm4  ;;  %v9637_v9 = vpop.f32.mrf.mxu1  ;;  %v6944_v25 = vadd.f32 %v9577_v10, %v16320_v56  ;;  %vm10359_vm14 = vmmov 0  }
 0x5df   :  { %v6409_v50 = vmul.f32 %v8827_v32, %v15205_v34  ;;  %vm6347_vm9 = vmand %vm16671_vm8, %vm19453_vm5  ;;  %v9638_v36 = vadd.f32 %v9637_v9, %v9636_v60  ;;  %9957 = vmatprep.mubr.msk.bf16.mxu1 %vm10359_vm14, %v18983_v11 }
 0x5e0   :  { %9934 = vmatmul.mubr.bf16.gmra.mxu0 %v6417_v38  ;;  %vm6362_vm7 = vmand %vm6346_vm15, %vm19454_vm0  ;;  %v9639_v17 = vpop.f32.mrf.mxu1  ;;  %v19463_v38 = vld [vmem:[#allocation117_spill] sm:$0xff] }
 0x5e1   :  { %v6418_v35 = vpack.c.bf16 %v6409_v50, %v6408_v41  ;;  %vm6363_vm12 = vmand %vm6347_vm9, %vm19455_vm11  ;;  %v8828_v16 = vsel %vm6362_vm7, 1.0, %v18983_v11  ;;  %v16835_v8 = vadd.f32 %v9638_v36, %v6941_v13 }
 0x5e2   :  { %v8829_v34 = vsel %vm6363_vm12, 1.0, %v18983_v11  ;;  %v6410_v47 = vmul.f32 %v8828_v16, %v15217_v22  ;;  %v9640_v27 = vpop.f32.mrf.mxu1 }
 0x5e3   :  { %9937 = vmatprep.mubr.bf16.mxu0 %v6418_v35  ;;  %v6411_v26 = vmul.f32 %v8829_v34, %v19456_v49  ;;  %19457 = vst [vmem:[#allocation149_spill] sm:$0xff] %v16835_v8  ;;  %v9641_v48 = vadd.f32 %v9640_v27, %v9639_v17 }
 0x5e5   :  { %v6419_v44 = vpack.c.bf16 %v6411_v26, %v6410_v47  ;;  %v16838_v22 = vadd.f32 %v9641_v48, %v6944_v25 }
 0x5e7   :  { %19458 = vst [vmem:[#allocation134_spill] sm:$0xff] %v16838_v22 }
 0x5e8   :  { %9938 = vmatmul.mubr.bf16.gmra.mxu0 %v6419_v44  ;;  %v9578_v6 = vpop.f32.mrf.mxu0 }
 0x5ea   :  { %v9579_v31 = vpop.f32.mrf.mxu0 }
 0x5eb   :  { %v9580_v21 = vadd.f32 %v9579_v31, %v9578_v6 }
 0x5ec   :  { %v9581_v43 = vpop.f32.mrf.mxu0 }
 0x5ed   :  { %v6949_v14 = vadd.f32 %v9580_v21, %v16320_v56 }
 0x5ee   :  { %v9582_v23 = vpop.f32.mrf.mxu0 }
 0x5ef   :  { %v16840_v30 = vadd.f32 %v9582_v23, %v9581_v43 }
 0x5f2   :  { %v9642_v4 = vpop.f32.mrf.mxu1 }
 0x5f4   :  { %v9643_v52 = vpop.f32.mrf.mxu1 }
 0x5f5   :  { %v9644_v18 = vadd.f32 %v9643_v52, %v9642_v4 }
 0x5f6   :  { %v16857_v55 = vpop.f32.mrf.mxu1 }
 0x5f7   :  { %v16843_v5 = vadd.f32 %v9644_v18, %v6949_v14  ;;  %v9664_v0 = vpop.f32.mrf.mxu0 }
 0x5f8   :  { %v16859_v32 = vpop.f32.mrf.mxu1 }
 0x5f9   :  { %19459 = vst [vmem:[#allocation130_spill] sm:$0xff] %v16843_v5  ;;  %v9665_v58 = vpop.f32.mrf.mxu0 }
 0x5fa   :  { %v9666_v59 = vadd.f32 %v9665_v58, %v9664_v0 }
 0x5fb   :  { %v9667_v33 = vpop.f32.mrf.mxu0 }
 0x5fc   :  { %v16846_v2 = vadd.f32 %v9666_v59, %v19460_v54 }
 0x5fd   :  { %v9668_v40 = vpop.f32.mrf.mxu0 }
 0x5fe   :  { %v9669_v28 = vadd.f32 %v9668_v40, %v9667_v33 }
 0x600   :  { %v16849_v57 = vadd.f32 %v9669_v28, %v19461_v7 }
 0x601   :  { %v9728_v50 = vpop.f32.mrf.mxu1 }
 0x603   :  { %v9729_v16 = vpop.f32.mrf.mxu1 }
 0x605   :  { %v9731_v26 = vpop.f32.mrf.mxu1 }
 0x607   :  { %v9732_v44 = vpop.f32.mrf.mxu1 }
 0x608   :  { %v9670_v63 = vpop.f32.mrf.mxu0  ;;  %v9733_v5 = vadd.f32 %v9732_v44, %v9731_v26 }
 0x60a   :  { %v9671_v51 = vpop.f32.mrf.mxu0 }
 0x60b   :  { %v9672_v45 = vadd.f32 %v9671_v51, %v9670_v63 }
 0x60c   :  { %v9673_v56 = vpop.f32.mrf.mxu0 }
 0x60d   :  { %v16852_v42 = vadd.f32 %v9672_v45, %v19462_v39 }
 0x60e   :  { %v9674_v3 = vpop.f32.mrf.mxu0 }
 0x60f   :  { %v9675_v53 = vadd.f32 %v9674_v3, %v9673_v56 }
 0x611   :  { %v16855_v29 = vadd.f32 %v9675_v53, %v19463_v38 }
 0x617   :  { %v9734_v60 = vpop.f32.mrf.mxu1 }
 0x619   :  { %v9735_v36 = vpop.f32.mrf.mxu1 }
 0x61b   :  { %v9737_v6 = vpop.f32.mrf.mxu1 }
 0x61d   :  { %v9738_v43 = vpop.f32.mrf.mxu1 }
 0x61f   :  { %v9676_v41 = vpop.f32.mrf.mxu0 }
 0x621   :  { %v9677_v24 = vpop.f32.mrf.mxu0 }
 0x622   :  { %v9678_v61 = vadd.f32 %v9677_v24, %v9676_v41 }
 0x623   :  { %v9679_v35 = vpop.f32.mrf.mxu0 }
 0x624   :  { %v16862_v34 = vadd.f32 %v9678_v61, %v19464_v19 }
 0x625   :  { %v9680_v47 = vpop.f32.mrf.mxu0 }
 0x626   :  { %v9681_v49 = vadd.f32 %v9680_v47, %v9679_v35 }
 0x628   :  { %v16865_v10 = vadd.f32 %v9681_v49, %v19465_v46 }
 0x62a   :  { %v9740_v23 = vpop.f32.mrf.mxu1 }
 0x62c   :  { %v9741_v14 = vpop.f32.mrf.mxu1 }
 0x62e   :  { %v9743_v0 = vpop.f32.mrf.mxu1 }
 0x630   :  { %v9744_v59 = vpop.f32.mrf.mxu1 }
 0x632   :  { %v9682_v13 = vpop.f32.mrf.mxu0 }
 0x634   :  { %v9683_v9 = vpop.f32.mrf.mxu0 }
 0x635   :  { %v9684_v17 = vadd.f32 %v9683_v9, %v9682_v13 }
 0x636   :  { %v9685_v25 = vpop.f32.mrf.mxu0 }
 0x637   :  { %v16868_v27 = vadd.f32 %v9684_v17, %v16615_v20  ;;  %v9736_v17 = vadd.f32 %v9735_v36, %v9734_v60  ;;  %v9647_v60 = vadd.f32 %v16859_v32, %v16857_v55  ;;  %v9742_v36 = vadd.f32 %v9741_v14, %v9740_v23 }
 0x638   :  { %v9686_v48 = vpop.f32.mrf.mxu0 }
 0x639   :  { %v9687_v31 = vadd.f32 %v9686_v48, %v9685_v25 }
 0x63b   :  { %v16871_v21 = vadd.f32 %v9687_v31, %v16634_v62  ;;  %v9730_v31 = vadd.f32 %v9729_v16, %v9728_v50 }
 0x63d   :  { %v9746_v33 = vpop.f32.mrf.mxu1  ;;  %v7184_v8 = vadd.f32 %v9730_v31, %v16846_v2 }
 0x63f   :  { %v9747_v54 = vpop.f32.mrf.mxu1 }
 0x641   :  { %v9749_v62 = vpop.f32.mrf.mxu1 }
 0x643   :  { %v9750_v7 = vpop.f32.mrf.mxu1 }
 0x645   :  { %v9688_v4 = vpop.f32.mrf.mxu0 }
 0x647   :  { %v9689_v52 = vpop.f32.mrf.mxu0 }
 0x648   :  { %v9690_v18 = vadd.f32 %v9689_v52, %v9688_v4  ;;  %v9739_v4 = vadd.f32 %v9738_v43, %v9737_v6  ;;  %v7192_v52 = vadd.f32 %v9736_v17, %v16852_v42  ;;  %v9748_v42 = vadd.f32 %v9747_v54, %v9746_v33 }
 0x649   :  { %v9691_v20 = vpop.f32.mrf.mxu0  ;;  %v9751_v6 = vadd.f32 %v9750_v7, %v9749_v62 }
 0x64a   :  { %v16874_v58 = vadd.f32 %v9690_v18, %v16702_v12  ;;  %v7195_v16 = vadd.f32 %v9739_v4, %v16855_v29 }
 0x64b   :  { %v9692_v40 = vpop.f32.mrf.mxu0 }
 0x64c   :  { %v9693_v43 = vadd.f32 %v9692_v40, %v9691_v20  ;;  %v7208_v20 = vadd.f32 %v9748_v42, %v16868_v27 }
 0x651   :  { %v9752_v51 = vpop.f32.mrf.mxu1 }
 0x653   :  { %v9753_v56 = vpop.f32.mrf.mxu1 }
 0x654   :  { %v9754_v26 = vadd.f32 %v9753_v56, %v9752_v51 }
 0x655   :  { %v9755_v3 = vpop.f32.mrf.mxu1 }
 0x657   :  { %v9756_v12 = vpop.f32.mrf.mxu1 }
 0x659   :  { %v9694_v28 = vpop.f32.mrf.mxu0 }
 0x65b   :  { %v9695_v63 = vpop.f32.mrf.mxu0 }
 0x65c   :  { %v9696_v55 = vadd.f32 %v9695_v63, %v9694_v28  ;;  %v9757_v28 = vadd.f32 %v9756_v12, %v9755_v3 }
 0x65d   :  { %v9697_v45 = vpop.f32.mrf.mxu0 }
 0x65e   :  { %v7127_v7 = vadd.f32 %v9696_v55, %v16791_v1  ;;  %v19478_v55 = vld [vmem:[#allocation134_spill] sm:$0xff] }
 0x65f   :  { %v9698_v39 = vpop.f32.mrf.mxu0 }
 0x660   :  { %v9699_v33 = vadd.f32 %v9698_v39, %v9697_v45 }
 0x664   :  { %v9758_v41 = vpop.f32.mrf.mxu1 }
 0x666   :  { %v9759_v61 = vpop.f32.mrf.mxu1 }
 0x667   :  { %v9760_v63 = vadd.f32 %v9759_v61, %v9758_v41 }
 0x668   :  { %v9761_v19 = vpop.f32.mrf.mxu1 }
 0x66a   :  { %v9762_v49 = vpop.f32.mrf.mxu1 }
 0x66c   :  { %v16877_v53 = vpop.f32.mrf.mxu0 }
 0x66e   :  { %v16879_v38 = vpop.f32.mrf.mxu0 }
 0x670   :  { %v16881_v24 = vpop.f32.mrf.mxu0 }
 0x672   :  { %v16883_v35 = vpop.f32.mrf.mxu0 }
 0x673   :  { %v9705_v12 = vadd.f32 %v16883_v35, %v16881_v24  ;;  %v7224_v35 = vadd.f32 %v9760_v63, %v7127_v7 }
 0x678   :  { %v16889_v13 = vpop.f32.mrf.mxu1 }
 0x679   :  { %19467 = vst [vmem:[#allocation76_spill] sm:$0xff] %v16889_v13 }
 0x67a   :  { %v16893_v25 = vpop.f32.mrf.mxu1 }
 0x67b   :  { %19468 = vst [vmem:[#allocation131_spill] sm:$0xff] %v16893_v25 }
 0x67c   :  { %v16898_v18 = vpop.f32.mrf.mxu1 }
 0x67e   :  { %v16905_v17 = vpop.f32.mrf.mxu1 }
 0x680   :  { %v16885_v47 = vpop.f32.mrf.mxu0 }
 0x682   :  { %v16887_v46 = vpop.f32.mrf.mxu0 }
 0x683   :  { %19466 = vst [vmem:[#allocation132_spill] sm:$0xff] %v16887_v46  ;;  %v10199_v46 = vld [vmem:[#allocation5] ss:$0 sm:$0xff] }
 0x684   :  { %v16891_v9 = vpop.f32.mrf.mxu0  ;;  %v6952_v13 = vadd.f32 %v10199_v46, %v16840_v30  ;;  %v7187_v30 = vadd.f32 %v9733_v5, %v16849_v57  ;;  %v7211_v5 = vadd.f32 %v9751_v6, %v16871_v21  ;;  %v7130_v21 = vadd.f32 %v9699_v33, %v16810_v37 }
 0x686   :  { %v16895_v48 = vpop.f32.mrf.mxu0  ;;  %v16910_v46 = vadd.f32 %v9647_v60, %v6952_v13  ;;  %v9763_v13 = vadd.f32 %v9762_v49, %v9761_v19 }
 0x687   :  { %19469 = vst [vmem:[#allocation84_spill] sm:$0xff] %v16895_v48  ;;  %v9745_v48 = vadd.f32 %v9744_v59, %v9743_v0  ;;  %v7122_v59 = vadd.f32 %v9693_v43, %v16721_v15  ;;  %v19470_v15 = vld [vmem:[#allocation70_spill] sm:$0xff] }
 0x688   :  { %vm19471_vm8 = vcmp.lt.s32.totalorder %v19470_v15, 4  ;;  %v7227_v6 = vadd.f32 %v9763_v13, %v7130_v21 }
 0x689   :  { %v7203_v0 = vadd.f32 %v9745_v48, %v16865_v10  ;;  %vm19472_vm13 = vmmov %vm19471_vm8  ;;  %v7219_v43 = vadd.f32 %v9757_v28, %v7122_v59  ;;  %v19480_v59 = vld [vmem:[#allocation76_spill] sm:$0xff] }
 0x68a   :  { %vm19473_vm3 = vmmov %vm19471_vm8  ;;  %v19474_v31 = vld [vmem:[#allocation132_spill] sm:$0xff] }
 0x68b   :  { %v9708_v4 = vadd.f32 %v19474_v31, %v16885_v47  ;;  %vm19477_vm6 = vmmov %vm19473_vm3  ;;  %v7138_v47 = vadd.f32 %v9705_v12, %v19478_v55 }
 0x68c   :  { %vm19482_vm10 = vmmov %vm19473_vm3 }
 0x68d   :  { %vm19483_vm2 = vmmov %vm19473_vm3 }
 0x68e   :  { %v19475_v60 = vld [vmem:[#allocation84_spill] sm:$0xff]  ;;  %vm19484_vm1 = vmmov %vm19483_vm2 }
 0x68f   :  { %vm19485_vm4 = vmmov %vm19484_vm1 }
 0x690   :  { %v9927_v11 = vpop.f32.mrf.mxu0  ;;  %vm19486_vm15 = vmmov %vm19484_vm1 }
 0x691   :  { %v7289_v22 = vadd.f32 %v9927_v11, %v7192_v52  ;;  %vm19487_vm5 = vmmov %vm19484_vm1 }
 0x692   :  { %v7280_v25 = vpop.f32.mrf.mxu0  ;;  %vm19488_vm9 = vmmov %vm19484_vm1 }
 0x693   :  { %v7281_v50 = vadd.f32 %v7280_v25, %v7184_v8  ;;  %v7345_v2 = vmax.f32 %v7289_v22, 0.0  ;;  %v7200_v8 = vadd.f32 %v9742_v36, %v16862_v34  ;;  %v9770_v22 = vpop.f32.mrf.mxu1  ;;  %v7216_v34 = vadd.f32 %v9754_v26, %v16874_v58  ;;  %vm19489_vm0 = vmmov %vm19484_vm1 }
 0x694   :  { %v9928_v11 = vpop.f32.mrf.mxu0  ;;  %v9702_v25 = vadd.f32 %v16879_v38, %v16877_v53  ;;  %v9711_v36 = vadd.f32 %v19475_v60, %v16891_v9  ;;  %v19479_v9 = vld [vmem:[#allocation130_spill] sm:$0xff]  ;;  %vm19490_vm7 = vmmov %vm19489_vm0 }
 0x695   :  { %v16907_v44 = vadd.f32 %v9928_v11, %v7195_v16  ;;  %v7343_v23 = vmax.f32 %v7281_v50, 0.0  ;;  %v7361_v57 = vrot.slane %v7345_v2, 4  ;;  %v9771_v58 = vpop.f32.mrf.mxu1  ;;  %v19476_v11 = vld [vmem:[#allocation149_spill] sm:$0xff]  ;;  %vm19491_vm11 = vmmov %vm19489_vm0 }
 0x696   :  { %v7283_v32 = vpop.f32.mrf.mxu0  ;;  %v7135_v26 = vadd.f32 %v9702_v25, %v19476_v11  ;;  %v9772_v33 = vadd.f32 %v9771_v58, %v9770_v22  ;;  %vm19492_vm12 = vmmov %vm19489_vm0 }
 0x697   :  { %v7346_v29 = vmax.f32 %v16907_v44, 0.0  ;;  %v7284_v14 = vadd.f32 %v7283_v32, %v7187_v30  ;;  %v16920_v56 = vrot.slane %v7343_v23, 4  ;;  %v9773_v50 = vpop.f32.mrf.mxu1  ;;  %vm19493_vm14 = vmmov %vm19489_vm0 }
 0x698   :  { %v9931_v54 = vpop.f32.mrf.mxu0 }
 0x699   :  { %v7362_v40 = vrot.slane %v7346_v29, 4  ;;  %v7344_v62 = vmax.f32 %v7284_v14, 0.0  ;;  %v7305_v51 = vadd.f32 %v9931_v54, %v7208_v20  ;;  %v9774_v28 = vpop.f32.mrf.mxu1 }
 0x69a   :  { %v7296_v10 = vpop.f32.mrf.mxu0 }
 0x69b   :  { %v7387_v45 = vsel %vm19471_vm8, %v7361_v57, %v7362_v40  ;;  %v7360_v27 = vrot.slane %v7344_v62, 4  ;;  %v7297_v39 = vadd.f32 %v7296_v10, %v7200_v8  ;;  %v7349_v53 = vmax.f32 %v7305_v51, 0.0 }
 0x69c   :  { %v16927_v3 = vmax.f32 %v7345_v2, %v7387_v45  ;;  %v9932_v1 = vpop.f32.mrf.mxu0 }
 0x69d   :  { %v7388_v41 = vsel %vm19472_vm13, %v7360_v27, %v7361_v57  ;;  %v7389_v61 = vsel %vm19473_vm3, %v16920_v56, %v7360_v27  ;;  %v7347_v48 = vmax.f32 %v7297_v39, 0.0  ;;  %v7308_v38 = vadd.f32 %v9932_v1, %v7211_v5  ;;  %v19481_v5 = vld [vmem:[#allocation131_spill] sm:$0xff] }
 0x69e   :  { %v16936_v37 = vmax.f32 %v7343_v23, %v7389_v61  ;;  %v16938_v19 = vmax.f32 %v7344_v62, %v7388_v41  ;;  %v7299_v49 = vpop.f32.mrf.mxu0  ;;  %v7365_v32 = vrot.slane %v7349_v53, 4  ;;  %v9766_v57 = vadd.f32 %v19481_v5, %v19480_v59 }
 0x69f   :  { %v7363_v52 = vrot.slane %v7347_v48, 4  ;;  %v7300_v24 = vadd.f32 %v7299_v49, %v7203_v0  ;;  %v7350_v16 = vmax.f32 %v7308_v38, 0.0  ;;  %v7143_v0 = vadd.f32 %v9708_v4, %v19479_v9 }
 0x6a0   :  { %v9935_v42 = vpop.f32.mrf.mxu0  ;;  %v7146_v62 = vadd.f32 %v9711_v36, %v16910_v46  ;;  %v9775_v46 = vadd.f32 %v9774_v28, %v9773_v50 }
 0x6a1   :  { %v7386_v2 = vsel %vm19477_vm6, %v7362_v40, %v7363_v52  ;;  %v7348_v44 = vmax.f32 %v7300_v24, 0.0  ;;  %v7321_v30 = vadd.f32 %v9935_v42, %v7224_v35  ;;  %v7366_v8 = vrot.slane %v7350_v16, 4 }
 0x6a2   :  { %v7312_v23 = vpop.f32.mrf.mxu0  ;;  %v16948_v14 = vmax.f32 %v7346_v29, %v7386_v2  ;;  %v9769_v40 = vadd.f32 %v16905_v17, %v16898_v18  ;;  %v7240_v21 = vadd.f32 %v9772_v33, %v7143_v0  ;;  %v7243_v50 = vadd.f32 %v9775_v46, %v7146_v62 }
 0x6a3   :  { %v7364_v20 = vrot.slane %v7348_v44, 4  ;;  %v7313_v54 = vadd.f32 %v7312_v23, %v7216_v34  ;;  %v7383_v7 = vsel %vm19482_vm10, %v7365_v32, %v7366_v8  ;;  %v7353_v51 = vmax.f32 %v7321_v30, 0.0 }
 0x6a4   :  { %v9936_v63 = vpop.f32.mrf.mxu0  ;;  %v16958_v29 = vmax.f32 %v7349_v53, %v7383_v7 }
 0x6a5   :  { %v7384_v22 = vsel %vm19483_vm2, %v7364_v20, %v7365_v32  ;;  %v7385_v34 = vsel %vm19484_vm1, %v7363_v52, %v7364_v20  ;;  %v7351_v27 = vmax.f32 %v7313_v54, 0.0  ;;  %v7324_v18 = vadd.f32 %v9936_v63, %v7227_v6 }
 0x6a6   :  { %v7395_v10 = vmax.f32 %v7347_v48, %v7385_v34  ;;  %v7396_v45 = vmax.f32 %v7348_v44, %v7384_v22  ;;  %v7315_v17 = vpop.f32.mrf.mxu0  ;;  %v7409_v13 = vmax.f32 %v16927_v3, %v16958_v29  ;;  %v7232_v48 = vadd.f32 %v9766_v57, %v7135_v26 }
 0x6a7   :  { %v7316_v39 = vadd.f32 %v7315_v17, %v7219_v43  ;;  %v7367_v1 = vrot.slane %v7351_v27, 4  ;;  %v7354_v12 = vmax.f32 %v7324_v18, 0.0  ;;  %v7369_v49 = vrot.slane %v7353_v51, 4 }
 0x6a8   :  { %v7407_v25 = vmax.f32 %v16936_v37, %v7395_v10  ;;  %v7408_v58 = vmax.f32 %v16938_v19, %v7396_v45  ;;  %v9939_v41 = vpop.f32.mrf.mxu0  ;;  %v7235_v6 = vadd.f32 %v9769_v40, %v7138_v47 }
 0x6a9   :  { %v7352_v61 = vmax.f32 %v7316_v39, 0.0  ;;  %v7337_v53 = vadd.f32 %v9939_v41, %v7240_v21  ;;  %v7382_v31 = vsel %vm19485_vm4, %v7366_v8, %v7367_v1  ;;  %v7370_v4 = vrot.slane %v7354_v12, 4 }
 0x6aa   :  { %v16968_v38 = vpack.c.bf16 %v7408_v58, %v7407_v25  ;;  %v7328_v52 = vpop.f32.mrf.mxu0  ;;  %v7398_v24 = vmax.f32 %v7350_v16, %v7382_v31 }
 0x6ab   :  { %v7368_v35 = vrot.slane %v7352_v61, 4  ;;  %v7329_v60 = vadd.f32 %v7328_v52, %v7232_v48  ;;  %v7379_v36 = vsel %vm19486_vm15, %v7369_v49, %v7370_v4  ;;  %v7357_v2 = vmax.f32 %v7337_v53, 0.0 }
 0x6ac   :  { %v9940_v42 = vpop.f32.mrf.mxu0  ;;  %v7401_v43 = vmax.f32 %v7353_v51, %v7379_v36  ;;  %v7410_v8 = vmax.f32 %v16948_v14, %v7398_v24  ;;  %v19494_v48 = vmov 0.0  }
 0x6ad   :  { %v7380_v11 = vsel %vm19487_vm5, %v7368_v35, %v7369_v49  ;;  %v7381_v26 = vsel %vm19488_vm9, %v7367_v1, %v7368_v35  ;;  %v7355_v55 = vmax.f32 %v7329_v60, 0.0  ;;  %v7340_v16 = vadd.f32 %v9940_v42, %v7243_v50 }
 0x6ae   :  { %v7399_v44 = vmax.f32 %v7351_v27, %v7381_v26  ;;  %v7400_v30 = vmax.f32 %v7352_v61, %v7380_v11  ;;  %v7331_v32 = vpop.f32.mrf.mxu0  ;;  %v7413_v9 = vmax.f32 %v16958_v29, %v7401_v43  ;;  %v7424_v59 = vpack.c.bf16 %v7410_v8, %v7409_v13 }
 0x6af   :  { %v7332_v23 = vadd.f32 %v7331_v32, %v7235_v6  ;;  %v7371_v33 = vrot.slane %v7355_v55, 4  ;;  %v7358_v20 = vmax.f32 %v7340_v16, 0.0  ;;  %v7373_v57 = vrot.slane %v7357_v2, 4 }
 0x6b0   :  { %v7411_v0 = vmax.f32 %v7395_v10, %v7399_v44  ;;  %v7412_v47 = vmax.f32 %v7396_v45, %v7400_v30 }
 0x6b1   :  { %v7356_v54 = vmax.f32 %v7332_v23, 0.0  ;;  %v7378_v40 = vsel %vm19489_vm0, %v7370_v4, %v7371_v33  ;;  %v7374_v62 = vrot.slane %v7358_v20, 4 }
 0x6b2   :  { %v7425_v5 = vpack.c.bf16 %v7412_v47, %v7411_v0  ;;  %v7402_v28 = vmax.f32 %v7354_v12, %v7378_v40 }
 0x6b3   :  { %v7372_v7 = vrot.slane %v7356_v54, 4  ;;  %v7375_v63 = vsel %vm19490_vm7, %v7373_v57, %v7374_v62  ;;  %v7390_v29 = vsel %vm19491_vm11, %v7374_v62, %v16920_v56 }
 0x6b4   :  { %v7405_v22 = vmax.f32 %v7357_v2, %v7375_v63  ;;  %v7406_v34 = vmax.f32 %v7358_v20, %v7390_v29  ;;  %v7414_v51 = vmax.f32 %v7398_v24, %v7402_v28 }
 0x6b5   :  { %v7376_v10 = vsel %vm19492_vm12, %v7372_v7, %v7373_v57  ;;  %v7377_v45 = vsel %vm19493_vm14, %v7371_v33, %v7372_v7 }
 0x6b6   :  { %v7404_v27 = vmax.f32 %v7356_v54, %v7376_v10  ;;  %v7417_v18 = vmax.f32 %v7401_v43, %v7405_v22  ;;  %v7418_v17 = vmax.f32 %v7402_v28, %v7406_v34  ;;  %v7421_v46 = vmax.f32 %v7405_v22, %v16927_v3  ;;  %v7431_v3 = vld [vmem:[%s17094_s1] sm:$0x1] }
 0x6b7   :  { %v7422_v39 = vmax.f32 %v7406_v34, %v16948_v14  ;;  %v7403_v21 = vmax.f32 %v7355_v55, %v7377_v45  ;;  %v7426_v25 = vpack.c.bf16 %v7414_v51, %v7413_v9 }
 0x6b8   :  { %v7416_v13 = vmax.f32 %v7400_v30, %v7404_v27  ;;  %v7420_v56 = vmax.f32 %v7404_v27, %v16938_v19  ;;  %v7428_v58 = vpack.c.bf16 %v7418_v17, %v7417_v18 }
 0x6b9   :  { %v7430_v1 = vpack.c.bf16 %v7422_v39, %v7421_v46  ;;  %v7415_v12 = vmax.f32 %v7399_v44, %v7403_v21  ;;  %v7419_v41 = vmax.f32 %v7403_v21, %v16936_v37 }
 0x6bb   :  { %9942 = vmatpush3.bf16.msra.mxu1 %v7430_v1  ;;  %v7427_v61 = vpack.c.bf16 %v7416_v13, %v7415_v12  ;;  %v7429_v53 = vpack.c.bf16 %v7420_v56, %v7419_v41 }
 0x6bc   :  { %9943 = vmatprep.subr.bf16.mxu1 %v19494_v48 }
 0x6bf   :  { %9944 = vmatpush3.bf16.msra.mxu1 %v7429_v53 }
 0x6c0   :  { %9945 = vmatprep.subr.bf16.mxu1 %v19494_v48 }
 0x6c3   :  { %9946 = vmatpush3.bf16.msra.mxu1 %v7428_v58 }
 0x6c4   :  { %9947 = vmatprep.subr.bf16.mxu1 %v19494_v48 }
 0x6c7   :  { %9948 = vmatpush3.bf16.msra.mxu1 %v7427_v61 }
 0x6c8   :  { %9949 = vmatprep.subr.bf16.mxu1 %v19494_v48 }
 0x6cb   :  { %9950 = vmatpush3.bf16.msra.mxu1 %v7426_v25 }
 0x6cc   :  { %9951 = vmatprep.subr.bf16.mxu1 %v19494_v48 }
 0x6cf   :  { %9952 = vmatpush3.bf16.msra.mxu1 %v7425_v5 }
 0x6d0   :  { %9953 = vmatprep.subr.bf16.mxu1 %v19494_v48 }
 0x6d3   :  { %9954 = vmatpush3.bf16.msra.mxu1 %v7424_v59 }
 0x6d4   :  { %9955 = vmatprep.subr.bf16.mxu1 %v19494_v48 }
 0x6d7   :  { %9956 = vmatpush3.bf16.msra.mxu1 %v16968_v38 }
 0x6da   :  { %9958 = vmatmul.mubr.bf16.vlgmr.msra.gmra.mxu1 %v7431_v3 }
 0x79a   :  { %v7466_v37 = vpop.f32.mrf.mxu1 }
 0x79b   :  { %v17006_v19 = vpack.c.bf16 %v7466_v37, %v7466_v37 }
 0x79c   :  { %v9959_v14 = vpop.f32.mrf.mxu1 }
 0x79e   :  { %v7469_v49 = vpop.f32.mrf.mxu1 }
 0x7a0   :  { %v9960_v31 = vpop.f32.mrf.mxu1 }
 0x7a1   :  { %10342 = dma.done.wait [#allocation10 + $0x4], 4096 }
 0x7a2   :  { %10343 = vsyncadd [#allocation10 + $0x4], 4294963200  ;;  %v19495_v4 = vld [vmem:[#allocation68_spill] sm:$0xff]  ;;  %v19496_v52 = vld [vmem:[#allocation66_spill] sm:$0xff] }
 0x7a3   :  { %v8932_v24 = vcombine.high %v19496_v52, %v19495_v4  ;;  %v19497_v35 = vld [vmem:[#allocation69_spill] sm:$0xff]  ;;  %v19498_v60 = vld [vmem:[#allocation67_spill] sm:$0xff]  ;;  %v8931_v38 = vcombine.low %v19496_v52, %v19495_v4 }
 0x7a4   :  { %v8934_v36 = vcombine.high %v19498_v60, %v19497_v35  ;;  %v8933_v50 = vcombine.low %v19498_v60, %v19497_v35 }
 0x7a5   :  { %10344 = dma.done.wait [#allocation10 + $0x5], 64 }
 0x7a6   :  { %10345 = vsyncadd [#allocation10 + $0x5], 4294967232  ;;  %v19499_v42 = vld [vmem:[#allocation64_spill] sm:$0xff]  ;;  %v19500_v6 = vld [vmem:[#allocation62_spill] sm:$0xff]  ;;  %7694 = vmatprep.subr.bf16.mxu0 %v8932_v24  ;;  %7735 = vmatprep.subr.bf16.mxu1 %v8934_v36  ;;  %v10360_v0 = vmov 0   ;;  %v7516_v35 = vsub.s32 0, %v19470_v15 }
 0x7a7   :  { %v8928_v43 = vcombine.high %v19500_v6, %v19499_v42  ;;  %v19501_v11 = vld [vmem:[#allocation65_spill] sm:$0xff]  ;;  %v19502_v26 = vld [vmem:[#allocation63_spill] sm:$0xff]  ;;  %7695 = vmatpush1.bf16.msra.mxu0 %v8931_v38  ;;  %7736 = vmatpush1.bf16.msra.mxu1 %v8933_v50  ;;  %v8927_v44 = vcombine.low %v19500_v6, %v19499_v42  ;;  %v19503_v55 = vld [vmem:[#allocation60_spill] sm:$0xff]  ;;  %v7524_v60 = vsub.s32 2, %v19470_v15  ;;  %v7520_v38 = vsub.s32 1, %v19470_v15 }
 0x7a8   :  { %v8930_v2 = vcombine.high %v19502_v26, %v19501_v11  ;;  %v8929_v30 = vcombine.low %v19502_v26, %v19501_v11  ;;  %v19504_v16 = vld [vmem:[#allocation58_spill] sm:$0xff]  ;;  %v19505_v8 = vld [vmem:[#allocation61_spill] sm:$0xff]  ;;  %v19506_v23 = vld [vmem:[#allocation59_spill] sm:$0xff]  ;;  %7726 = vmatprep.mubr.bf16.mxu0 %v10360_v0  ;;  %7767 = vmatprep.mubr.bf16.mxu1 %v10360_v0  ;;  %v7528_v50 = vsub.s32 3, %v19470_v15 }
 0x7a9   :  { %7696 = vmatprep.subr.bf16.mxu0 %v8928_v43  ;;  %v8924_v32 = vcombine.high %v19504_v16, %v19503_v55  ;;  %v8926_v9 = vcombine.high %v19506_v23, %v19505_v8  ;;  %v8923_v47 = vcombine.low %v19504_v16, %v19503_v55  ;;  %v8925_v33 = vcombine.low %v19506_v23, %v19505_v8  ;;  %v19507_v20 = vld [vmem:[#allocation56_spill] sm:$0xff]  ;;  %v19508_v54 = vld [vmem:[#allocation54_spill] sm:$0xff]  ;;  %v19509_v5 = vld [vmem:[#allocation57_spill] sm:$0xff] }
 0x7aa   :  { %7737 = vmatprep.subr.bf16.mxu1 %v8930_v2  ;;  %v8920_v59 = vcombine.high %v19508_v54, %v19507_v20  ;;  %v19510_v57 = vld [vmem:[#allocation55_spill] sm:$0xff]  ;;  %v8919_v62 = vcombine.low %v19508_v54, %v19507_v20  ;;  %v19511_v7 = vld [vmem:[#allocation52_spill] sm:$0xff]  ;;  %v19512_v63 = vld [vmem:[#allocation50_spill] sm:$0xff] }
 0x7ab   :  { %7697 = vmatpush1.bf16.msra.mxu0 %v8927_v44  ;;  %7738 = vmatpush1.bf16.msra.mxu1 %v8929_v30  ;;  %v8922_v40 = vcombine.high %v19510_v57, %v19509_v5  ;;  %v8921_v28 = vcombine.low %v19510_v57, %v19509_v5  ;;  %v8916_v29 = vcombine.high %v19512_v63, %v19511_v7  ;;  %v19513_v22 = vld [vmem:[#allocation53_spill] sm:$0xff]  ;;  %v19514_v34 = vld [vmem:[#allocation51_spill] sm:$0xff]  ;;  %v19515_v27 = vld [vmem:[#allocation48_spill] sm:$0xff] }
 0x7ac   :  { %7698 = vmatprep.subr.bf16.mxu0 %v8924_v32  ;;  %7739 = vmatprep.subr.bf16.mxu1 %v8926_v9  ;;  %v8918_v51 = vcombine.high %v19514_v34, %v19513_v22  ;;  %v8915_v10 = vcombine.low %v19512_v63, %v19511_v7  ;;  %v8917_v45 = vcombine.low %v19514_v34, %v19513_v22  ;;  %v19516_v18 = vld [vmem:[#allocation46_spill] sm:$0xff]  ;;  %v19517_v46 = vld [vmem:[#allocation49_spill] sm:$0xff]  ;;  %v19518_v39 = vld [vmem:[#allocation47_spill] sm:$0xff] }
 0x7ad   :  { %v8912_v17 = vcombine.high %v19516_v18, %v19515_v27  ;;  %v8914_v21 = vcombine.high %v19518_v39, %v19517_v46  ;;  %v8911_v13 = vcombine.low %v19516_v18, %v19515_v27  ;;  %v8913_v56 = vcombine.low %v19518_v39, %v19517_v46  ;;  %v19519_v25 = vld [vmem:[#allocation44_spill] sm:$0xff]  ;;  %v19520_v58 = vld [vmem:[#allocation42_spill] sm:$0xff]  ;;  %v19521_v12 = vld [vmem:[#allocation45_spill] sm:$0xff] }
 0x7ae   :  { %v8908_v1 = vcombine.high %v19520_v58, %v19519_v25  ;;  %v19522_v41 = vld [vmem:[#allocation43_spill] sm:$0xff]  ;;  %v8907_v53 = vcombine.low %v19520_v58, %v19519_v25  ;;  %v19523_v3 = vld [vmem:[#allocation40_spill] sm:$0xff]  ;;  %v19524_v37 = vld [vmem:[#allocation38_spill] sm:$0xff] }
 0x7af   :  { %7699 = vmatpush1.bf16.msra.mxu0 %v8923_v47  ;;  %7740 = vmatpush1.bf16.msra.mxu1 %v8925_v33  ;;  %v8910_v61 = vcombine.high %v19522_v41, %v19521_v12  ;;  %v8909_v48 = vcombine.low %v19522_v41, %v19521_v12  ;;  %v8904_v14 = vcombine.high %v19524_v37, %v19523_v3  ;;  %v19525_v49 = vld [vmem:[#allocation41_spill] sm:$0xff]  ;;  %v19526_v31 = vld [vmem:[#allocation39_spill] sm:$0xff] }
 0x7b0   :  { %7700 = vmatprep.subr.bf16.mxu0 %v8920_v59  ;;  %7741 = vmatprep.subr.bf16.mxu1 %v8922_v40  ;;  %v8906_v4 = vcombine.high %v19526_v31, %v19525_v49  ;;  %v8903_v52 = vcombine.low %v19524_v37, %v19523_v3  ;;  %v8905_v24 = vcombine.low %v19526_v31, %v19525_v49  ;;  %v7512_v36 = vld [vmem:[#allocation7] sm:$0xf] }
 0x7b1   :  { %v7517_v42 = vrot.slane %v7512_v36, %v7516_v35  ;;  %v7525_v6 = vrot.slane %v7512_v36, %v7524_v60  ;;  %v7521_v43 = vrot.slane %v7512_v36, %v7520_v38  ;;  %v7529_v11 = vrot.slane %v7512_v36, %v7528_v50 }
 0x7b3   :  { %7701 = vmatpush1.bf16.msra.mxu0 %v8919_v62  ;;  %7742 = vmatpush1.bf16.msra.mxu1 %v8921_v28 }
 0x7b4   :  { %7702 = vmatprep.subr.bf16.mxu0 %v8916_v29  ;;  %7743 = vmatprep.subr.bf16.mxu1 %v8918_v51 }
 0x7b7   :  { %7703 = vmatpush1.bf16.msra.mxu0 %v8915_v10  ;;  %7744 = vmatpush1.bf16.msra.mxu1 %v8917_v45 }
 0x7b8   :  { %7704 = vmatprep.subr.bf16.mxu0 %v8912_v17  ;;  %7745 = vmatprep.subr.bf16.mxu1 %v8914_v21 }
 0x7bb   :  { %7705 = vmatpush1.bf16.msra.mxu0 %v8911_v13  ;;  %7746 = vmatpush1.bf16.msra.mxu1 %v8913_v56 }
 0x7bc   :  { %7706 = vmatprep.subr.bf16.mxu0 %v8908_v1  ;;  %7747 = vmatprep.subr.bf16.mxu1 %v8910_v61 }
 0x7bf   :  { %7707 = vmatpush1.bf16.msra.mxu0 %v8907_v53  ;;  %7748 = vmatpush1.bf16.msra.mxu1 %v8909_v48 }
 0x7c0   :  { %7708 = vmatprep.subr.bf16.mxu0 %v8904_v14  ;;  %7749 = vmatprep.subr.bf16.mxu1 %v8906_v4 }
 0x7c3   :  { %7709 = vmatpush1.bf16.msra.mxu0 %v8903_v52  ;;  %7750 = vmatpush1.bf16.msra.mxu1 %v8905_v24 }
 0x7c6   :  { %7727 = vmatmul.mubr.bf16.vlgmr.msra.gmra.mxu0 %v17006_v19  ;;  %7768 = vmatmul.mubr.bf16.vlgmr.msra.gmra.mxu1 %v17006_v19 }
 0x886   :  { %v7728_v26 = vpop.f32.mrf.mxu0  ;;  %v7769_v2 = vpop.f32.mrf.mxu1 }
 0x887   :  { %v17078_v44 = vadd.f32 %v7728_v26, %v7517_v42  ;;  %v17080_v30 = vadd.f32 %v7769_v2, %v7525_v6 }
 0x888   :  { %v7730_v19 = vpop.f32.mrf.mxu0  ;;  %v7771_v55 = vpop.f32.mrf.mxu1 }
 0x889   :  { %v7776_v16 = vmax.f32 %v17078_v44, 0.0  ;;  %v7778_v32 = vmax.f32 %v17080_v30, 0.0  ;;  %v7731_v8 = vadd.f32 %v7730_v19, %v7521_v43  ;;  %v7772_v23 = vadd.f32 %v7771_v55, %v7529_v11 }
 0x88a   :  { %v7732_v9 = vpop.f32.mrf.mxu0  ;;  %v7773_v15 = vpop.f32.mrf.mxu1 }
 0x88b   :  { %v7777_v0 = vmax.f32 %v7731_v8, 0.0  ;;  %v7779_v47 = vmax.f32 %v7772_v23, 0.0 }
 0x88c   :  { %v7733_v33 = vpop.f32.mrf.mxu0  ;;  %v7774_v20 = vpop.f32.mrf.mxu1 }
 0x88d   :  { %10346 = dma.done.wait [#allocation10 + $0x6], 4096 }
 0x88e   :  { %10347 = vsyncadd [#allocation10 + $0x6], 4294963200 }
 0x88f   :  { %10348 = dma.done.wait [#allocation10 + $0x7], 16 }
 0x890   :  { %10349 = vsyncadd [#allocation10 + $0x7], 4294967280  ;;  %v7787_v54 = vpack.c.bf16 %v7777_v0, %v7777_v0  ;;  %v7789_v59 = vpack.c.bf16 %v7779_v47, %v7779_v47  ;;  %v10200_v5 = vld [vmem:[#allocation8 + $0x78] sm:$0xff]   ;;  %v10204_v28 = vld [vmem:[#allocation8 + $0x70] sm:$0xff]   ;;  %v7786_v49 = vpack.c.bf16 %v7776_v16, %v7776_v16  ;;  %v7788_v31 = vpack.c.bf16 %v7778_v32, %v7778_v32  ;;  %s10361_s1 = smov [#allocation14]  }
 0x891   :  { %v10201_v57 = vld [vmem:[#allocation8 + $0xf8] sm:$0xff]   ;;  %9801 = vmatprep.subr.bf16.mxu0 %v10200_v5  ;;  %v10205_v7 = vld [vmem:[#allocation8 + $0xf0] sm:$0xff]   ;;  %v10208_v22 = vld [vmem:[#allocation8 + $0x68] sm:$0xff]   ;;  %s8140_s11 = sshll.u32 %s10361_s1, 4  ;;  %s8141_s11 = int_to_ptr.vmem [resolvable:$true] %s8140_s11 }
 0x892   :  { %8085 = vmatprep.mubr.bf16.mxu0 %v7787_v54  ;;  %8125 = vmatprep.mubr.bf16.mxu1 %v7789_v59  ;;  %v10202_v40 = vld [vmem:[#allocation8 + $0x38] sm:$0xff]   ;;  %v10206_v63 = vld [vmem:[#allocation8 + $0x30] sm:$0xff]   ;;  %v10209_v34 = vld [vmem:[#allocation8 + $0xe8] sm:$0xff]   ;;  %s10312_s23 = scalar_lea.vmem %s8141_s11, 32  ;;  %p10317_p7 = scmp.lt.s32.totalorder %s8141_s11, %s8141_s11 }
 0x893   :  { %9823 = vmatprep.subr.bf16.mxu1 %v10201_v57  ;;  %v10203_v62 = vld [vmem:[#allocation8 + $0xb8] sm:$0xff]   ;;  %9802 = vmatpush3.bf16.msra.mxu0 %v10202_v40  ;;  %v10207_v29 = vld [vmem:[#allocation8 + $0xb0] sm:$0xff]   ;;  %v10210_v51 = vld [vmem:[#allocation8 + $0x28] sm:$0xff]   ;;  %p10313_p6 = scmp.ne.s32.totalorder %s8141_s11, %s10312_s23  ;;  %p10318_p8 = scmp.lt.s32.totalorder %s10312_s23, %s10312_s23 }
 0x894   :  { %9824 = vmatpush3.bf16.msra.mxu1 %v10203_v62  ;;  %9803 = vmatprep.subr.bf16.mxu0 %v10204_v28  ;;  %v10211_v10 = vld [vmem:[#allocation8 + $0xa8] sm:$0xff]   ;;  %v10212_v45 = vld [vmem:[#allocation8 + $0x60] sm:$0xff]   ;;  %v10216_v46 = vld [vmem:[#allocation8 + $0x58] sm:$0xff]  }
 0x895   :  { %9825 = vmatprep.subr.bf16.mxu1 %v10205_v7  ;;  %v10213_v27 = vld [vmem:[#allocation8 + $0xe0] sm:$0xff]   ;;  %v10217_v39 = vld [vmem:[#allocation8 + $0xd8] sm:$0xff]   ;;  %v10220_v56 = vld [vmem:[#allocation8 + $0x50] sm:$0xff]   ;;  %p10319_p9 = por %p10318_p8, %p10317_p7 }
 0x896   :  { %v10214_v18 = vld [vmem:[#allocation8 + $0x20] sm:$0xff]   ;;  %v10218_v21 = vld [vmem:[#allocation8 + $0x18] sm:$0xff]   ;;  %v10221_v25 = vld [vmem:[#allocation8 + $0xd0] sm:$0xff]  }
 0x897   :  { %9804 = vmatpush3.bf16.msra.mxu0 %v10206_v63  ;;  %v10215_v17 = vld [vmem:[#allocation8 + $0xa0] sm:$0xff]   ;;  %v10219_v13 = vld [vmem:[#allocation8 + $0x98] sm:$0xff]   ;;  %v10222_v58 = vld [vmem:[#allocation8 + $0x10] sm:$0xff]   ;;  %p10320_p10 = pnand %p10319_p9, %p10313_p6 }
 0x898   :  { %9826 = vmatpush3.bf16.msra.mxu1 %v10207_v29  ;;  %9805 = vmatprep.subr.bf16.mxu0 %v10208_v22  ;;  %v10223_v1 = vld [vmem:[#allocation8 + $0x90] sm:$0xff]   ;;  %v10224_v12 = vld [vmem:[#allocation8 + $0x48] sm:$0xff]   ;;  %v10228_v48 = vld [vmem:[#allocation8 + $0x40] sm:$0xff]  }
 0x899   :  { %9827 = vmatprep.subr.bf16.mxu1 %v10209_v34  ;;  %v10225_v41 = vld [vmem:[#allocation8 + $0xc8] sm:$0xff]   ;;  %v10229_v3 = vld [vmem:[#allocation8 + $0xc0] sm:$0xff]  }
 0x89a   :  { %v10226_v61 = vld [vmem:[#allocation8 + $0x8] sm:$0xff]   ;;  %v10230_v37 = vld [vmem:[#allocation8] sm:$0xff]  }
 0x89b   :  { %9806 = vmatpush3.bf16.msra.mxu0 %v10210_v51  ;;  %v10227_v53 = vld [vmem:[#allocation8 + $0x88] sm:$0xff]   ;;  %v10231_v14 = vld [vmem:[#allocation8 + $0x80] sm:$0xff]  }
 0x89c   :  { %9828 = vmatpush3.bf16.msra.mxu1 %v10211_v10  ;;  %9807 = vmatprep.subr.bf16.mxu0 %v10212_v45  ;;  %v8935_v24 = vld [vmem:[#allocation9] ss:$0 sm:$0xff] }
 0x89d   :  { %9829 = vmatprep.subr.bf16.mxu1 %v10213_v27 }
 0x89f   :  { %9808 = vmatpush3.bf16.msra.mxu0 %v10214_v18 }
 0x8a0   :  { %9830 = vmatpush3.bf16.msra.mxu1 %v10215_v17  ;;  %9809 = vmatprep.subr.bf16.mxu0 %v10216_v46 }
 0x8a1   :  { %9831 = vmatprep.subr.bf16.mxu1 %v10217_v39 }
 0x8a3   :  { %9810 = vmatpush3.bf16.msra.mxu0 %v10218_v21 }
 0x8a4   :  { %9832 = vmatpush3.bf16.msra.mxu1 %v10219_v13  ;;  %9811 = vmatprep.subr.bf16.mxu0 %v10220_v56 }
 0x8a5   :  { %9833 = vmatprep.subr.bf16.mxu1 %v10221_v25 }
 0x8a7   :  { %9812 = vmatpush3.bf16.msra.mxu0 %v10222_v58 }
 0x8a8   :  { %9834 = vmatpush3.bf16.msra.mxu1 %v10223_v1  ;;  %9813 = vmatprep.subr.bf16.mxu0 %v10224_v12 }
 0x8a9   :  { %9835 = vmatprep.subr.bf16.mxu1 %v10225_v41 }
 0x8ab   :  { %9814 = vmatpush3.bf16.msra.mxu0 %v10226_v61 }
 0x8ac   :  { %9836 = vmatpush3.bf16.msra.mxu1 %v10227_v53  ;;  %9815 = vmatprep.subr.bf16.mxu0 %v10228_v48 }
 0x8ad   :  { %9837 = vmatprep.subr.bf16.mxu1 %v10229_v3 }
 0x8af   :  { %9816 = vmatpush3.bf16.msra.mxu0 %v10230_v37 }
 0x8b0   :  { %9838 = vmatpush3.bf16.msra.mxu1 %v10231_v14 }
 0x8b2   :  { %8086 = vmatmul.mubr.bf16.vlgmr.msra.gmra.mxu0 %v7786_v49 }
 0x8b3   :  { %8126 = vmatmul.mubr.bf16.vlgmr.msra.gmra.mxu1 %v7788_v31 }
 0x972   :  { %v9817_v4 = vpop.f32.mrf.mxu0 }
 0x973   :  { %v9839_v52 = vpop.f32.mrf.mxu1 }
 0x974   :  { %v9818_v35 = vpop.f32.mrf.mxu0 }
 0x975   :  { %v9819_v60 = vadd.f32 %v9818_v35, %v9817_v4  ;;  %v9840_v36 = vpop.f32.mrf.mxu1 }
 0x976   :  { %v9820_v38 = vpop.f32.mrf.mxu0  ;;  %v9841_v42 = vadd.f32 %v9840_v36, %v9839_v52 }
 0x977   :  { %v8088_v50 = vadd.f32 %v9819_v60, %v8935_v24  ;;  %v9842_v6 = vpop.f32.mrf.mxu1 }
 0x978   :  { %v9821_v43 = vpop.f32.mrf.mxu0 }
 0x979   :  { %v8128_v11 = vadd.f32 %v9841_v42, %v8088_v50  ;;  %v9843_v26 = vpop.f32.mrf.mxu1 }
 0x97b   :  { %8133 = vst [vmem:[#allocation14] sm:$0x3] %v8128_v11 }
 0x97c   :  { %10323 = shalt.err (!%p10320_p10)
}
 0x97d   :  { %8143 = dma.vmem_to_hbm [thread:$0]  %s8141_s11, 32, %s17105_s12, [#allocation13]  }
 0x97e   :  { %10350 = dma.done.wait [#allocation13], 32  }
 0x97f   :  { %10351 = vsyncadd [#allocation13], 4294967264 }
 0x980   :  { %8147 = vsyncpa [#allocation12], 1 }
 0x981   :  { %8148 = vsyncpa [#allocation13], 1 }
 0x982   :  { %8149 = vsyncmov [#allocation10] }
 0x985   :  { %s8150_s26 = vpop.sfrf %8149 }
 0x986   :  { %p8968_p11 = scmp.ne.s32.totalorder %s8150_s26, 0 }
 0x988   :  { %8154 = shalt.err (%p8968_p11)  }
 0x989   :  { %8156 = vsyncmov [#allocation10 + $0x1] }
 0x98c   :  { %s8157_s27 = vpop.sfrf %8156 }
 0x98d   :  { %p8969_p12 = scmp.ne.s32.totalorder %s8157_s27, 0 }
 0x98f   :  { %8161 = shalt.err (%p8969_p12)  }
 0x990   :  { %8163 = vsyncmov [#allocation10 + $0x2] }
 0x993   :  { %s8164_s6 = vpop.sfrf %8163 }
 0x994   :  { %p8970_p13 = scmp.ne.s32.totalorder %s8164_s6, 0 }
 0x996   :  { %8168 = shalt.err (%p8970_p13)  }
 0x997   :  { %8170 = vsyncmov [#allocation10 + $0x3] }
 0x99a   :  { %s8171_s28 = vpop.sfrf %8170 }
 0x99b   :  { %p8971_p0 = scmp.ne.s32.totalorder %s8171_s28, 0 }
 0x99d   :  { %8175 = shalt.err (%p8971_p0)  }
 0x99e   :  { %8177 = vsyncmov [#allocation10 + $0x4] }
 0x9a1   :  { %s8178_s12 = vpop.sfrf %8177 }
 0x9a2   :  { %p8972_p1 = scmp.ne.s32.totalorder %s8178_s12, 0 }
 0x9a4   :  { %8182 = shalt.err (%p8972_p1)  }
 0x9a5   :  { %8184 = vsyncmov [#allocation10 + $0x5] }
 0x9a8   :  { %s8185_s29 = vpop.sfrf %8184 }
 0x9a9   :  { %p8973_p2 = scmp.ne.s32.totalorder %s8185_s29, 0 }
 0x9ab   :  { %8189 = shalt.err (%p8973_p2)  }
 0x9ac   :  { %8191 = vsyncmov [#allocation10 + $0x6] }
 0x9af   :  { %s8192_s30 = vpop.sfrf %8191 }
 0x9b0   :  { %p8974_p3 = scmp.ne.s32.totalorder %s8192_s30, 0 }
 0x9b2   :  { %8196 = shalt.err (%p8974_p3)  }
 0x9b3   :  { %8198 = vsyncmov [#allocation10 + $0x7] }
 0x9b6   :  { %s8199_s13 = vpop.sfrf %8198 }
 0x9b7   :  { %p8975_p4 = scmp.ne.s32.totalorder %s8199_s13, 0 }
 0x9b9   :  { %8203 = shalt.err (%p8975_p4)  }

</bundles_post_ra>
